<compile_context>
chip_gen: v5e
topology: v5e:2x2
jax: 0.10.0
libtpu: 0.0.40
codegen_flags: <defaults>
</compile_context>

<pallas_src>
import functools

import jax
import jax.numpy as jnp
import numpy as np
from jax.experimental import pallas as pl
from jax.experimental.pallas import tpu as pltpu

_NEG_BIG = -1e30
# "NT" matmul: contract the last (pin/lane) axis of both operands on the MXU.
_NT_DNUMS = (((1,), (1,)), ((), ()))
# HIGHEST keeps the 0/1-mask segment sums at full f32 accuracy.  The matmul is
# tiny (K = PIN_TILE, N = 4) and nowhere near the critical path after the CSR
# restructure; on v5e one can drop to Precision.HIGH (mask is exact in bf16).
_MATMUL_PRECISION = jax.lax.Precision.HIGHEST


def _round_up(v, m):
    return (v + m - 1) // m * m


def _wawl_kernel(pbs_ref, ig_ref, p2n_ref, x_ref, y_ref, o_ref,
                 mxp_s, mxn_s, myp_s, myn_s, den_s, num_s):
    """One (net_tile, pin_block) grid step.

    pbs_ref : (grid_n,) int32  scalar-prefetch pin-block offsets (used in index_maps)
    ig_ref  : (1, 1)    f32    1/gamma in SMEM (runtime value, no recompile per gamma)
    p2n_ref : (1, PT)   int32  pin -> net id (pins sorted by net, padded with -1)
    x_ref   : (1, PT)   f32    pin x coordinates (same ordering)
    y_ref   : (1, PT)   f32    pin y coordinates
    o_ref   : (TN, 2)   f32    per-net (WA_x, WA_y), written on the last pin block
    m*_s    : (TN, 1)   f32    running per-net max of  x, -x, y, -y
    den_s   : (TN, 4)   f32    running denominators   (xp, xn, yp, yn branches)
    num_s   : (TN, 4)   f32    running numerators
    """
    tile_n = den_s.shape[0]
    pt = x_ref.shape[1]
    k = pl.program_id(1)
    n0 = pl.program_id(0) * tile_n            # first net id of this net tile

    @pl.when(k == 0)
    def _init():
        mxp_s[...] = jnp.full_like(mxp_s, _NEG_BIG)
        mxn_s[...] = jnp.full_like(mxn_s, _NEG_BIG)
        myp_s[...] = jnp.full_like(myp_s, _NEG_BIG)
        myn_s[...] = jnp.full_like(myn_s, _NEG_BIG)
        den_s[...] = jnp.zeros_like(den_s)
        num_s[...] = jnp.zeros_like(num_s)

    ig = ig_ref[0, 0]
    x = x_ref[...]                            # (1, PT)
    y = y_ref[...]                            # (1, PT)
    lidx = p2n_ref[...] - n0                  # (1, PT) local net index

    # Membership mask built in-kernel: nets of this tile on sublanes, pins on
    # lanes.  Pins of other tiles / padding (p2n = -1) match no row.
    net_iota = jax.lax.broadcasted_iota(jnp.int32, (tile_n, pt), 0)
    mb = net_iota == lidx                     # (TN, PT) bool
    mb_f = mb.astype(jnp.float32)

    def block_max(row):                       # (1, PT) -> (TN, 1) per-net block max
        return jnp.max(jnp.where(mb, row, _NEG_BIG), axis=1, keepdims=True)

    def scatter(per_net):                     # (TN, 1) -> (1, PT) per-pin value
        return jnp.max(jnp.where(mb, per_net, _NEG_BIG), axis=0, keepdims=True)

    def update(m_ref, row):
        """Online running-max update for one branch; returns (m_old - m_new,
        per-pin scattered running max)."""
        m_old = m_ref[...]
        m_new = jnp.maximum(m_old, block_max(row))
        m_ref[...] = m_new
        return m_old - m_new, scatter(m_new)

    d_xp, mp_xp = update(mxp_s, x)            # branch 0: exp((x - xmax)/g)
    d_xn, mp_xn = update(mxn_s, -x)           # branch 1: exp((xmin - x)/g)
    d_yp, mp_yp = update(myp_s, y)            # branch 2
    d_yn, mp_yn = update(myn_s, -y)           # branch 3

    # Flash-style rescale of the already-accumulated sums (exp(0)=1 when the
    # running max did not change; exp(-big)=0 on the very first contribution).
    lane4 = jax.lax.broadcasted_iota(jnp.int32, (tile_n, 4), 1)
    diff4 = jnp.where(lane4 == 0, d_xp,
                      jnp.where(lane4 == 1, d_xn,
                                jnp.where(lane4 == 2, d_yp, d_yn)))
    alpha = jnp.exp(diff4 * ig)               # (TN, 4)

    # Per-pin exponentials: only the 4 unique rows (x, -x, y, -y).
    row4 = jax.lax.broadcasted_iota(jnp.int32, (4, pt), 0)
    w4 = jnp.where(row4 < 2, x, y)            # numerator coordinate: x, x, y, y
    sgn = jnp.where((row4 & 1) == 0, 1.0, -1.0).astype(jnp.float32)
    c4 = w4 * sgn                             # x, -x, y, -y
    mpin = jnp.where(row4 == 0, mp_xp,
                     jnp.where(row4 == 1, mp_xn,
                               jnp.where(row4 == 2, mp_yp, mp_yn)))
    # Pins belonging to other net tiles scatter back -BIG; clamping keeps their
    # exps finite (=1) and mb_f excludes them from the segment sums anyway.
    e4 = jnp.exp(jnp.minimum((c4 - mpin) * ig, 0.0))      # (4, PT)

    # All per-net segment sums on the MXU ("NT" contraction over the pin axis).
    den_blk = jax.lax.dot_general(mb_f, e4, _NT_DNUMS,
                                  precision=_MATMUL_PRECISION,
                                  preferred_element_type=jnp.float32)   # (TN, 4)
    num_blk = jax.lax.dot_general(mb_f, w4 * e4, _NT_DNUMS,
                                  precision=_MATMUL_PRECISION,
                                  preferred_element_type=jnp.float32)   # (TN, 4)

    den_s[...] = den_s[...] * alpha + den_blk
    num_s[...] = num_s[...] * alpha + num_blk

    @pl.when(k == pl.num_programs(1) - 1)
    def _finalize():
        den = den_s[...]
        den = jnp.where(den > 0.0, den, 1.0)  # empty / padded nets -> wirelength 0
        # Exact divide (not pl.reciprocal approx) keeps the fp64 check tight;
        # it runs once per net tile so it is off the critical path.
        r = num_s[...] / den                  # (TN, 4)
        sx = jnp.where(lane4 == 0, 1.0, jnp.where(lane4 == 1, -1.0, 0.0))
        sy = jnp.where(lane4 == 2, 1.0, jnp.where(lane4 == 3, -1.0, 0.0))
        wl_x = jnp.sum(r * sx, axis=1, keepdims=True)      # (TN, 1)
        wl_y = jnp.sum(r * sy, axis=1, keepdims=True)      # (TN, 1)
        oc = jax.lax.broadcasted_iota(jnp.int32, (tile_n, 2), 1)
        o_ref[...] = jnp.where(oc == 0, wl_x, wl_y)


def _prepare_topology(pin2net_map, num_nets, tile_n, pin_tile):
    """Host-side CSR preprocessing (numpy).  The net topology is fixed across
    placement iterations, so in production this runs once and is cached."""
    p2n = np.asarray(pin2net_map, dtype=np.int32).reshape(-1)
    num_pins = p2n.shape[0]

    order = np.argsort(p2n, kind="stable").astype(np.int32)
    p2n_sorted = p2n[order]

    p_pad = _round_up(max(num_pins, 1), pin_tile)
    num_blocks = p_pad // pin_tile
    n_pad = _round_up(max(num_nets, 1), tile_n)
    grid_n = n_pad // tile_n

    tiles = np.arange(grid_n, dtype=np.int64)
    first_pin = np.searchsorted(p2n_sorted, tiles * tile_n, side="left")
    last_pin = np.searchsorted(p2n_sorted, (tiles + 1) * tile_n, side="left") - 1
    empty = first_pin > last_pin
    first_blk = np.where(empty, 0, first_pin // pin_tile)
    last_blk = np.where(empty, 0, np.maximum(last_pin, 0) // pin_tile)
    kb = max(int(np.max(last_blk - first_blk + 1)), 1) if grid_n else 1
    # Clamp so pbs[g] + kb never runs off the end; coverage of each tile's own
    # pin range is preserved (foreign pins in the window are masked in-kernel).
    pbs = np.clip(first_blk, 0, num_blocks - kb).astype(np.int32)

    p2n_pad = np.full((p_pad,), -1, dtype=np.int32)   # padding pins match no net
    p2n_pad[:num_pins] = p2n_sorted
    return order, p2n_pad.reshape(1, p_pad), pbs, p_pad, n_pad, grid_n, kb


@functools.partial(
    jax.jit,
    static_argnames=("num_pins", "p_pad", "n_pad", "grid_n", "kb",
                     "tile_n", "pin_tile"))
def _wawl_forward(pos, order, p2n_row, pbs, inv_gamma,
                  net_weights, net_weights_x, net_mask, *,
                  num_pins, p_pad, n_pad, grid_n, kb, tile_n, pin_tile):
    # Reorder pin coordinates into the CSR (sorted-by-net) order and pad.
    x = jnp.take(pos[:num_pins].astype(jnp.float32), order)
    y = jnp.take(pos[num_pins:2 * num_pins].astype(jnp.float32), order)
    dp = p_pad - num_pins
    if dp:
        x = jnp.pad(x, (0, dp))
        y = jnp.pad(y, (0, dp))
    x_row = x.reshape(1, p_pad)
    y_row = y.reshape(1, p_pad)

    pin_map = lambda g, k, pbs_ref: (0, pbs_ref[g] + k)   # per-tile pin window
    net_map = lambda g, k, pbs_ref: (g, 0)

    grid_spec = pltpu.PrefetchScalarGridSpec(
        num_scalar_prefetch=1,
        grid=(grid_n, kb),
        in_specs=[
            pl.BlockSpec(memory_space=pltpu.MemorySpace.SMEM),   # inv_gamma (1,1)
            pl.BlockSpec((1, pin_tile), pin_map),                # pin2net (sorted)
            pl.BlockSpec((1, pin_tile), pin_map),                # x (sorted)
            pl.BlockSpec((1, pin_tile), pin_map),                # y (sorted)
        ],
        out_specs=pl.BlockSpec((tile_n, 2), net_map),
        scratch_shapes=[
            pltpu.VMEM((tile_n, 1), jnp.float32),   # running max  x
            pltpu.VMEM((tile_n, 1), jnp.float32),   # running max -x
            pltpu.VMEM((tile_n, 1), jnp.float32),   # running max  y
            pltpu.VMEM((tile_n, 1), jnp.float32),   # running max -y
            pltpu.VMEM((tile_n, 4), jnp.float32),   # denominators
            pltpu.VMEM((tile_n, 4), jnp.float32),   # numerators
        ],
    )

    per_net = pl.pallas_call(
        _wawl_kernel,
        out_shape=jax.ShapeDtypeStruct((n_pad, 2), jnp.float32),
        grid_spec=grid_spec,
        compiler_params=pltpu.CompilerParams(
            dimension_semantics=("parallel", "arbitrary")),   # net tiles on v7x TCs
    )(pbs, inv_gamma, p2n_row, x_row, y_row)

    # Tiny per-net weighting + scalar reduction in plain JAX (N elements).
    num_nets = net_weights.shape[0]
    mask_f = net_mask.astype(jnp.float32)
    wx = net_weights_x.astype(jnp.float32) * mask_f
    wy = net_weights.astype(jnp.float32) * mask_f
    wl = per_net[:num_nets]
    return jnp.sum(wx * wl[:, 0] + wy * wl[:, 1])


def weighted_average_wirelength(pos, pin2net_map, net_weights, net_weights_x,
                                net_mask, gamma, *, tile_n=128, pin_tile=512):
    """Forward WA wirelength.  pos: (2*P,) float32, first half x, second half y.

    tile_n nets x pin_tile pins per grid step; VMEM usage is bounded by the tile
    sizes (independent of total #pins / #nets), so the defaults fit v5e/v6e/v7x.
    """
    assert tile_n % 8 == 0 and pin_tile % 128 == 0
    num_nets = int(net_weights.shape[0])
    num_pins = int(pos.shape[0]) // 2

    order, p2n_row, pbs, p_pad, n_pad, grid_n, kb = _prepare_topology(
        pin2net_map, num_nets, tile_n, pin_tile)
    inv_gamma = jnp.full((1, 1), 1.0 / float(gamma), jnp.float32)

    return _wawl_forward(
        pos, jnp.asarray(order), jnp.asarray(p2n_row), jnp.asarray(pbs),
        inv_gamma, net_weights, net_weights_x, net_mask,
        num_pins=num_pins, p_pad=p_pad, n_pad=n_pad, grid_n=grid_n, kb=kb,
        tile_n=tile_n, pin_tile=pin_tile)
    # TODO(synk): backward pass (gradient w.r.t. pin positions with pin_mask
    # zero-fill) is not implemented; only the module's forward is covered.


def _reference(pos, pin2net_map, net_weights, net_weights_x, net_mask, gamma):
    """Pure numpy reference (net-by-net, float64), for a correctness check."""
    pos = np.asarray(pos, np.float64)
    p2n = np.asarray(pin2net_map)
    nw = np.asarray(net_weights, np.float64)
    nwx = np.asarray(net_weights_x, np.float64)
    msk = np.asarray(net_mask)
    P = pos.shape[0] // 2
    ig = 1.0 / gamma
    total = 0.0
    for n in range(nw.shape[0]):
        if msk[n] == 0:
            continue
        pins = np.where(p2n == n)[0]
        if pins.size == 0:
            continue
        for coords, w in ((pos[:P][pins], nwx[n]), (pos[P:][pins], nw[n])):
            cmax, cmin = coords.max(), coords.min()
            ep = np.exp((coords - cmax) * ig)
            en = np.exp((cmin - coords) * ig)
            wl = (coords * ep).sum() / ep.sum() - (coords * en).sum() / en.sum()
            total += w * wl
    return total


if __name__ == "__main__":
    key = jax.random.PRNGKey(0)
    num_nets = 256          # 2 net tiles of 128
    num_pins = 1024         # 4 pin blocks of 256 -> exercises the online pin loop
    gamma = 4.0
    num_carry_chains = 2
    cc_net_weight = 2.0
    dir_net_weight = True

    k1, k2, k3 = jax.random.split(key, 3)

    # pin positions (x then y), like the torch module's flattened `pos`
    pos = jax.random.uniform(k1, (2 * num_pins,), jnp.float32,
                             minval=0.0, maxval=100.0)

    # pin2net map: guarantee every net has at least one pin
    rand_nets = jax.random.randint(k2, (num_pins - num_nets,), 0, num_nets,
                                   dtype=jnp.int32)
    pin2net_map = jnp.concatenate(
        [jnp.arange(num_nets, dtype=jnp.int32), rand_nets])

    # net weights; mark two nets as carry-chain nets (weight == cc_net_weight)
    net_weights = jax.random.uniform(k3, (num_nets,), jnp.float32,
                                     minval=0.5, maxval=1.5)
    net_weights = net_weights.at[:num_carry_chains].set(cc_net_weight)

    # net_weights_x = net_weights.clone(); carry-chain adjustment from __init__
    net_weights_x = net_weights
    if num_carry_chains > 0 and cc_net_weight > 1.0 and dir_net_weight:
        net_weights_x = jnp.where(net_weights_x == cc_net_weight,
                                  1.5 * cc_net_weight, net_weights_x)

    # net mask: compute all nets except the last one
    net_mask = jnp.ones((num_nets,), jnp.float32).at[-1].set(0.0)

    wl = weighted_average_wirelength(pos, pin2net_map, net_weights,
                                     net_weights_x, net_mask, gamma,
                                     tile_n=128, pin_tile=256)
    wl = jax.block_until_ready(wl)

    ref = _reference(pos, pin2net_map, net_weights, net_weights_x,
                     net_mask, gamma)
    assert np.allclose(float(wl), ref, rtol=5e-4, atol=1e-2), (float(wl), ref)

    print("KERNEL_OK")
</pallas_src>

<mosaic_0001>
module attributes {stable_mosaic.version = 11 : i64} {
  func.func @_wawl_kernel(%arg0: i32, %arg1: i32, %arg2: memref<2xi32, #tpu.memory_space<smem>>, %arg3: memref<1x1xf32, #tpu.memory_space<smem>>, %arg4: memref<1x256xi32, #tpu.memory_space<vmem>>, %arg5: memref<1x256xf32, #tpu.memory_space<vmem>>, %arg6: memref<1x256xf32, #tpu.memory_space<vmem>>, %arg7: memref<128x2xf32, #tpu.memory_space<vmem>>, %arg8: memref<128x1xf32, #tpu.memory_space<vmem>>, %arg9: memref<128x1xf32, #tpu.memory_space<vmem>>, %arg10: memref<128x1xf32, #tpu.memory_space<vmem>>, %arg11: memref<128x1xf32, #tpu.memory_space<vmem>>, %arg12: memref<128x4xf32, #tpu.memory_space<vmem>>, %arg13: memref<128x4xf32, #tpu.memory_space<vmem>>) attributes {dimension_semantics = [#tpu.dimension_semantics<parallel>, #tpu.dimension_semantics<arbitrary>], iteration_bounds = array<i64: 2, 3>, scalar_prefetch = 1 : i64, scratch_operands = 6 : i64, tpu.core_type = #tpu.core_type<tc>, window_params = [{transform_indices = @transform_0, window_bounds = array<i64: 1, 1>}, {transform_indices = @transform_1, window_bounds = array<i64: 1, 256>}, {transform_indices = @transform_2, window_bounds = array<i64: 1, 256>}, {transform_indices = @transform_3, window_bounds = array<i64: 1, 256>}, {transform_indices = @transform_4, window_bounds = array<i64: 128, 2>}]} {
    %c128_i32 = arith.constant 128 : i32
    %0 = arith.muli %arg0, %c128_i32 : i32
    %c0_i32 = arith.constant 0 : i32
    %1 = arith.cmpi eq, %arg1, %c0_i32 : i32
    %2 = arith.extui %1 : i1 to i32
    %c0_i32_0 = arith.constant 0 : i32
    %3 = arith.cmpi ne, %2, %c0_i32_0 : i32
    scf.if %3 {
      %cst_63 = arith.constant -1.000000e+30 : f32
      %157 = vector.broadcast %cst_63 : f32 to vector<128x1xf32>
      %c0_64 = arith.constant 0 : index
      %c0_65 = arith.constant 0 : index
      %158 = vector.load %arg8[%c0_64, %c0_65] : memref<128x1xf32, #tpu.memory_space<vmem>>, vector<128x1xf32>
      tpu.vector_store %arg8[%c0_64, %c0_65], %157 {strides = array<i32>} : memref<128x1xf32, #tpu.memory_space<vmem>>, vector<128x1xf32>,
      %cst_66 = arith.constant -1.000000e+30 : f32
      %159 = vector.broadcast %cst_66 : f32 to vector<128x1xf32>
      %c0_67 = arith.constant 0 : index
      %c0_68 = arith.constant 0 : index
      %160 = vector.load %arg9[%c0_67, %c0_68] : memref<128x1xf32, #tpu.memory_space<vmem>>, vector<128x1xf32>
      tpu.vector_store %arg9[%c0_67, %c0_68], %159 {strides = array<i32>} : memref<128x1xf32, #tpu.memory_space<vmem>>, vector<128x1xf32>,
      %cst_69 = arith.constant -1.000000e+30 : f32
      %161 = vector.broadcast %cst_69 : f32 to vector<128x1xf32>
      %c0_70 = arith.constant 0 : index
      %c0_71 = arith.constant 0 : index
      %162 = vector.load %arg10[%c0_70, %c0_71] : memref<128x1xf32, #tpu.memory_space<vmem>>, vector<128x1xf32>
      tpu.vector_store %arg10[%c0_70, %c0_71], %161 {strides = array<i32>} : memref<128x1xf32, #tpu.memory_space<vmem>>, vector<128x1xf32>,
      %cst_72 = arith.constant -1.000000e+30 : f32
      %163 = vector.broadcast %cst_72 : f32 to vector<128x1xf32>
      %c0_73 = arith.constant 0 : index
      %c0_74 = arith.constant 0 : index
      %164 = vector.load %arg11[%c0_73, %c0_74] : memref<128x1xf32, #tpu.memory_space<vmem>>, vector<128x1xf32>
      tpu.vector_store %arg11[%c0_73, %c0_74], %163 {strides = array<i32>} : memref<128x1xf32, #tpu.memory_space<vmem>>, vector<128x1xf32>,
      %cst_75 = arith.constant 0.000000e+00 : f32
      %165 = vector.broadcast %cst_75 : f32 to vector<128x4xf32>
      %c0_76 = arith.constant 0 : index
      %c0_77 = arith.constant 0 : index
      %166 = vector.load %arg12[%c0_76, %c0_77] : memref<128x4xf32, #tpu.memory_space<vmem>>, vector<128x4xf32>
      tpu.vector_store %arg12[%c0_76, %c0_77], %165 {strides = array<i32>} : memref<128x4xf32, #tpu.memory_space<vmem>>, vector<128x4xf32>,
      %cst_78 = arith.constant 0.000000e+00 : f32
      %167 = vector.broadcast %cst_78 : f32 to vector<128x4xf32>
      %c0_79 = arith.constant 0 : index
      %c0_80 = arith.constant 0 : index
      %168 = vector.load %arg13[%c0_79, %c0_80] : memref<128x4xf32, #tpu.memory_space<vmem>>, vector<128x4xf32>
      tpu.vector_store %arg13[%c0_79, %c0_80], %167 {strides = array<i32>} : memref<128x4xf32, #tpu.memory_space<vmem>>, vector<128x4xf32>,
    } else {
    }
    %c0 = arith.constant 0 : index
    %c0_1 = arith.constant 0 : index
    %4 = memref.load %arg3[%c0, %c0_1] : memref<1x1xf32, #tpu.memory_space<smem>>
    %c0_2 = arith.constant 0 : index
    %c0_3 = arith.constant 0 : index
    %5 = vector.load %arg5[%c0_2, %c0_3] : memref<1x256xf32, #tpu.memory_space<vmem>>, vector<1x256xf32>
    %c0_4 = arith.constant 0 : index
    %c0_5 = arith.constant 0 : index
    %6 = vector.load %arg6[%c0_4, %c0_5] : memref<1x256xf32, #tpu.memory_space<vmem>>, vector<1x256xf32>
    %c0_6 = arith.constant 0 : index
    %c0_7 = arith.constant 0 : index
    %7 = vector.load %arg4[%c0_6, %c0_7] : memref<1x256xi32, #tpu.memory_space<vmem>>, vector<1x256xi32>
    %8 = vector.broadcast %0 : i32 to vector<1x256xi32>
    %9 = arith.subi %7, %8 : vector<1x256xi32>
    %10 = tpu.iota {dimensions = array<i32: 0>} : vector<128x256xi32>
    %11 = vector.broadcast %9 : vector<1x256xi32> to vector<128x256xi32>
    %12 = arith.cmpi eq, %10, %11 : vector<128x256xi32>
    %13 = arith.extui %12 : vector<128x256xi1> to vector<128x256xi32>
    %14 = arith.sitofp %13 : vector<128x256xi32> to vector<128x256xf32>
    %c0_8 = arith.constant 0 : index
    %c0_9 = arith.constant 0 : index
    %15 = vector.load %arg8[%c0_8, %c0_9] : memref<128x1xf32, #tpu.memory_space<vmem>>, vector<128x1xf32>
    %cst = arith.constant -1.000000e+30 : f32
    %16 = vector.shape_cast %5 : vector<1x256xf32> to vector<1x256xf32>
    %17 = vector.broadcast %16 : vector<1x256xf32> to vector<128x256xf32>
    %18 = vector.broadcast %cst : f32 to vector<128x256xf32>
    %19 = arith.select %12, %17, %18 : vector<128x256xi1>, vector<128x256xf32>
    %cst_10 = arith.constant dense<0xFF800000> : vector<128xf32>
    %20 = vector.multi_reduction <maximumf>, %19, %cst_10 [1] : vector<128x256xf32> to vector<128xf32>
    %21 = vector.shape_cast %20 : vector<128xf32> to vector<128x1xf32>
    %22 = arith.maximumf %15, %21 : vector<128x1xf32>
    %c0_11 = arith.constant 0 : index
    %c0_12 = arith.constant 0 : index
    %23 = vector.load %arg8[%c0_11, %c0_12] : memref<128x1xf32, #tpu.memory_space<vmem>>, vector<128x1xf32>
    tpu.vector_store %arg8[%c0_11, %c0_12], %22 {strides = array<i32>} : memref<128x1xf32, #tpu.memory_space<vmem>>, vector<128x1xf32>,
    %24 = arith.subf %15, %22 : vector<128x1xf32>
    %cst_13 = arith.constant -1.000000e+30 : f32
    %25 = vector.shape_cast %22 : vector<128x1xf32> to vector<128x1xf32>
    %26 = vector.broadcast %25 : vector<128x1xf32> to vector<128x256xf32>
    %27 = vector.broadcast %cst_13 : f32 to vector<128x256xf32>
    %28 = arith.select %12, %26, %27 : vector<128x256xi1>, vector<128x256xf32>
    %cst_14 = arith.constant dense<0xFF800000> : vector<256xf32>
    %29 = vector.multi_reduction <maximumf>, %28, %cst_14 [0] : vector<128x256xf32> to vector<256xf32>
    %30 = vector.shape_cast %29 : vector<256xf32> to vector<1x256xf32>
    %cst_15 = arith.constant 0.000000e+00 : f32
    %31 = vector.broadcast %cst_15 : f32 to vector<1x256xf32>
    %32 = arith.subf %31, %5 : vector<1x256xf32>
    %c0_16 = arith.constant 0 : index
    %c0_17 = arith.constant 0 : index
    %33 = vector.load %arg9[%c0_16, %c0_17] : memref<128x1xf32, #tpu.memory_space<vmem>>, vector<128x1xf32>
    %cst_18 = arith.constant -1.000000e+30 : f32
    %34 = vector.shape_cast %32 : vector<1x256xf32> to vector<1x256xf32>
    %35 = vector.broadcast %34 : vector<1x256xf32> to vector<128x256xf32>
    %36 = vector.broadcast %cst_18 : f32 to vector<128x256xf32>
    %37 = arith.select %12, %35, %36 : vector<128x256xi1>, vector<128x256xf32>
    %cst_19 = arith.constant dense<0xFF800000> : vector<128xf32>
    %38 = vector.multi_reduction <maximumf>, %37, %cst_19 [1] : vector<128x256xf32> to vector<128xf32>
    %39 = vector.shape_cast %38 : vector<128xf32> to vector<128x1xf32>
    %40 = arith.maximumf %33, %39 : vector<128x1xf32>
    %c0_20 = arith.constant 0 : index
    %c0_21 = arith.constant 0 : index
    %41 = vector.load %arg9[%c0_20, %c0_21] : memref<128x1xf32, #tpu.memory_space<vmem>>, vector<128x1xf32>
    tpu.vector_store %arg9[%c0_20, %c0_21], %40 {strides = array<i32>} : memref<128x1xf32, #tpu.memory_space<vmem>>, vector<128x1xf32>,
    %42 = arith.subf %33, %40 : vector<128x1xf32>
    %cst_22 = arith.constant -1.000000e+30 : f32
    %43 = vector.shape_cast %40 : vector<128x1xf32> to vector<128x1xf32>
    %44 = vector.broadcast %43 : vector<128x1xf32> to vector<128x256xf32>
    %45 = vector.broadcast %cst_22 : f32 to vector<128x256xf32>
    %46 = arith.select %12, %44, %45 : vector<128x256xi1>, vector<128x256xf32>
    %cst_23 = arith.constant dense<0xFF800000> : vector<256xf32>
    %47 = vector.multi_reduction <maximumf>, %46, %cst_23 [0] : vector<128x256xf32> to vector<256xf32>
    %48 = vector.shape_cast %47 : vector<256xf32> to vector<1x256xf32>
    %c0_24 = arith.constant 0 : index
    %c0_25 = arith.constant 0 : index
    %49 = vector.load %arg10[%c0_24, %c0_25] : memref<128x1xf32, #tpu.memory_space<vmem>>, vector<128x1xf32>
    %cst_26 = arith.constant -1.000000e+30 : f32
    %50 = vector.shape_cast %6 : vector<1x256xf32> to vector<1x256xf32>
    %51 = vector.broadcast %50 : vector<1x256xf32> to vector<128x256xf32>
    %52 = vector.broadcast %cst_26 : f32 to vector<128x256xf32>
    %53 = arith.select %12, %51, %52 : vector<128x256xi1>, vector<128x256xf32>
    %cst_27 = arith.constant dense<0xFF800000> : vector<128xf32>
    %54 = vector.multi_reduction <maximumf>, %53, %cst_27 [1] : vector<128x256xf32> to vector<128xf32>
    %55 = vector.shape_cast %54 : vector<128xf32> to vector<128x1xf32>
    %56 = arith.maximumf %49, %55 : vector<128x1xf32>
    %c0_28 = arith.constant 0 : index
    %c0_29 = arith.constant 0 : index
    %57 = vector.load %arg10[%c0_28, %c0_29] : memref<128x1xf32, #tpu.memory_space<vmem>>, vector<128x1xf32>
    tpu.vector_store %arg10[%c0_28, %c0_29], %56 {strides = array<i32>} : memref<128x1xf32, #tpu.memory_space<vmem>>, vector<128x1xf32>,
    %58 = arith.subf %49, %56 : vector<128x1xf32>
    %cst_30 = arith.constant -1.000000e+30 : f32
    %59 = vector.shape_cast %56 : vector<128x1xf32> to vector<128x1xf32>
    %60 = vector.broadcast %59 : vector<128x1xf32> to vector<128x256xf32>
    %61 = vector.broadcast %cst_30 : f32 to vector<128x256xf32>
    %62 = arith.select %12, %60, %61 : vector<128x256xi1>, vector<128x256xf32>
    %cst_31 = arith.constant dense<0xFF800000> : vector<256xf32>
    %63 = vector.multi_reduction <maximumf>, %62, %cst_31 [0] : vector<128x256xf32> to vector<256xf32>
    %64 = vector.shape_cast %63 : vector<256xf32> to vector<1x256xf32>
    %cst_32 = arith.constant 0.000000e+00 : f32
    %65 = vector.broadcast %cst_32 : f32 to vector<1x256xf32>
    %66 = arith.subf %65, %6 : vector<1x256xf32>
    %c0_33 = arith.constant 0 : index
    %c0_34 = arith.constant 0 : index
    %67 = vector.load %arg11[%c0_33, %c0_34] : memref<128x1xf32, #tpu.memory_space<vmem>>, vector<128x1xf32>
    %cst_35 = arith.constant -1.000000e+30 : f32
    %68 = vector.shape_cast %66 : vector<1x256xf32> to vector<1x256xf32>
    %69 = vector.broadcast %68 : vector<1x256xf32> to vector<128x256xf32>
    %70 = vector.broadcast %cst_35 : f32 to vector<128x256xf32>
    %71 = arith.select %12, %69, %70 : vector<128x256xi1>, vector<128x256xf32>
    %cst_36 = arith.constant dense<0xFF800000> : vector<128xf32>
    %72 = vector.multi_reduction <maximumf>, %71, %cst_36 [1] : vector<128x256xf32> to vector<128xf32>
    %73 = vector.shape_cast %72 : vector<128xf32> to vector<128x1xf32>
    %74 = arith.maximumf %67, %73 : vector<128x1xf32>
    %c0_37 = arith.constant 0 : index
    %c0_38 = arith.constant 0 : index
    %75 = vector.load %arg11[%c0_37, %c0_38] : memref<128x1xf32, #tpu.memory_space<vmem>>, vector<128x1xf32>
    tpu.vector_store %arg11[%c0_37, %c0_38], %74 {strides = array<i32>} : memref<128x1xf32, #tpu.memory_space<vmem>>, vector<128x1xf32>,
    %76 = arith.subf %67, %74 : vector<128x1xf32>
    %cst_39 = arith.constant -1.000000e+30 : f32
    %77 = vector.shape_cast %74 : vector<128x1xf32> to vector<128x1xf32>
    %78 = vector.broadcast %77 : vector<128x1xf32> to vector<128x256xf32>
    %79 = vector.broadcast %cst_39 : f32 to vector<128x256xf32>
    %80 = arith.select %12, %78, %79 : vector<128x256xi1>, vector<128x256xf32>
    %cst_40 = arith.constant dense<0xFF800000> : vector<256xf32>
    %81 = vector.multi_reduction <maximumf>, %80, %cst_40 [0] : vector<128x256xf32> to vector<256xf32>
    %82 = vector.shape_cast %81 : vector<256xf32> to vector<1x256xf32>
    %83 = tpu.iota {dimensions = array<i32: 1>} : vector<128x4xi32>
    %c0_i32_41 = arith.constant 0 : i32
    %84 = vector.broadcast %c0_i32_41 : i32 to vector<128x4xi32>
    %85 = arith.cmpi eq, %83, %84 : vector<128x4xi32>
    %c1_i32 = arith.constant 1 : i32
    %86 = vector.broadcast %c1_i32 : i32 to vector<128x4xi32>
    %87 = arith.cmpi eq, %83, %86 : vector<128x4xi32>
    %c2_i32 = arith.constant 2 : i32
    %88 = vector.broadcast %c2_i32 : i32 to vector<128x4xi32>
    %89 = arith.cmpi eq, %83, %88 : vector<128x4xi32>
    %90 = vector.shape_cast %58 : vector<128x1xf32> to vector<128x1xf32>
    %91 = vector.broadcast %90 : vector<128x1xf32> to vector<128x4xf32>
    %92 = vector.shape_cast %76 : vector<128x1xf32> to vector<128x1xf32>
    %93 = vector.broadcast %92 : vector<128x1xf32> to vector<128x4xf32>
    %94 = arith.select %89, %91, %93 : vector<128x4xi1>, vector<128x4xf32>
    %95 = vector.shape_cast %42 : vector<128x1xf32> to vector<128x1xf32>
    %96 = vector.broadcast %95 : vector<128x1xf32> to vector<128x4xf32>
    %97 = arith.select %87, %96, %94 : vector<128x4xi1>, vector<128x4xf32>
    %98 = vector.shape_cast %24 : vector<128x1xf32> to vector<128x1xf32>
    %99 = vector.broadcast %98 : vector<128x1xf32> to vector<128x4xf32>
    %100 = arith.select %85, %99, %97 : vector<128x4xi1>, vector<128x4xf32>
    %101 = vector.broadcast %4 : f32 to vector<128x4xf32>
    %102 = arith.mulf %100, %101 : vector<128x4xf32>
    %103 = math.exp %102 : vector<128x4xf32>
    %104 = tpu.iota {dimensions = array<i32: 0>} : vector<4x256xi32>
    %c2_i32_42 = arith.constant 2 : i32
    %105 = vector.broadcast %c2_i32_42 : i32 to vector<4x256xi32>
    %106 = arith.cmpi slt, %104, %105 : vector<4x256xi32>
    %107 = vector.shape_cast %5 : vector<1x256xf32> to vector<1x256xf32>
    %108 = vector.broadcast %107 : vector<1x256xf32> to vector<4x256xf32>
    %109 = vector.shape_cast %6 : vector<1x256xf32> to vector<1x256xf32>
    %110 = vector.broadcast %109 : vector<1x256xf32> to vector<4x256xf32>
    %111 = arith.select %106, %108, %110 : vector<4x256xi1>, vector<4x256xf32>
    %c1_i32_43 = arith.constant 1 : i32
    %112 = vector.broadcast %c1_i32_43 : i32 to vector<4x256xi32>
    %113 = arith.andi %104, %112 : vector<4x256xi32>
    %c0_i32_44 = arith.constant 0 : i32
    %114 = vector.broadcast %c0_i32_44 : i32 to vector<4x256xi32>
    %115 = arith.cmpi eq, %113, %114 : vector<4x256xi32>
    %cst_45 = arith.constant 1.000000e+00 : f32
    %cst_46 = arith.constant -1.000000e+00 : f32
    %116 = vector.broadcast %cst_45 : f32 to vector<4x256xf32>
    %117 = vector.broadcast %cst_46 : f32 to vector<4x256xf32>
    %118 = arith.select %115, %116, %117 : vector<4x256xi1>, vector<4x256xf32>
    %119 = arith.mulf %111, %118 : vector<4x256xf32>
    %c0_i32_47 = arith.constant 0 : i32
    %120 = vector.broadcast %c0_i32_47 : i32 to vector<4x256xi32>
    %121 = arith.cmpi eq, %104, %120 : vector<4x256xi32>
    %c1_i32_48 = arith.constant 1 : i32
    %122 = vector.broadcast %c1_i32_48 : i32 to vector<4x256xi32>
    %123 = arith.cmpi eq, %104, %122 : vector<4x256xi32>
    %c2_i32_49 = arith.constant 2 : i32
    %124 = vector.broadcast %c2_i32_49 : i32 to vector<4x256xi32>
    %125 = arith.cmpi eq, %104, %124 : vector<4x256xi32>
    %126 = vector.shape_cast %64 : vector<1x256xf32> to vector<1x256xf32>
    %127 = vector.broadcast %126 : vector<1x256xf32> to vector<4x256xf32>
    %128 = vector.shape_cast %82 : vector<1x256xf32> to vector<1x256xf32>
    %129 = vector.broadcast %128 : vector<1x256xf32> to vector<4x256xf32>
    %130 = arith.select %125, %127, %129 : vector<4x256xi1>, vector<4x256xf32>
    %131 = vector.shape_cast %48 : vector<1x256xf32> to vector<1x256xf32>
    %132 = vector.broadcast %131 : vector<1x256xf32> to vector<4x256xf32>
    %133 = arith.select %123, %132, %130 : vector<4x256xi1>, vector<4x256xf32>
    %134 = vector.shape_cast %30 : vector<1x256xf32> to vector<1x256xf32>
    %135 = vector.broadcast %134 : vector<1x256xf32> to vector<4x256xf32>
    %136 = arith.select %121, %135, %133 : vector<4x256xi1>, vector<4x256xf32>
    %137 = arith.subf %119, %136 : vector<4x256xf32>
    %138 = vector.broadcast %4 : f32 to vector<4x256xf32>
    %139 = arith.mulf %137, %138 : vector<4x256xf32>
    %cst_50 = arith.constant 0.000000e+00 : f32
    %140 = vector.broadcast %cst_50 : f32 to vector<4x256xf32>
    %141 = arith.minimumf %139, %140 : vector<4x256xf32>
    %142 = math.exp %141 : vector<4x256xf32>
    %cst_51 = arith.constant dense<0.000000e+00> : vector<128x4xf32>
    %143 = tpu.matmul %14, %142, %cst_51 {dimension_numbers = #tpu.dot_dimension_numbers<[1], [1], [0], [0], [0, 0, 1, 0], [], []>, precision = #tpu.contract_precision<fp32>} : vector<128x256xf32>, vector<4x256xf32>, vector<128x4xf32> -> vector<128x4xf32>
    %144 = arith.mulf %111, %142 : vector<4x256xf32>
    %cst_52 = arith.constant dense<0.000000e+00> : vector<128x4xf32>
    %145 = tpu.matmul %14, %144, %cst_52 {dimension_numbers = #tpu.dot_dimension_numbers<[1], [1], [0], [0], [0, 0, 1, 0], [], []>, precision = #tpu.contract_precision<fp32>} : vector<128x256xf32>, vector<4x256xf32>, vector<128x4xf32> -> vector<128x4xf32>
    %c0_53 = arith.constant 0 : index
    %c0_54 = arith.constant 0 : index
    %146 = vector.load %arg12[%c0_53, %c0_54] : memref<128x4xf32, #tpu.memory_space<vmem>>, vector<128x4xf32>
    %147 = arith.mulf %146, %103 : vector<128x4xf32>
    %148 = arith.addf %147, %143 : vector<128x4xf32>
    %c0_55 = arith.constant 0 : index
    %c0_56 = arith.constant 0 : index
    %149 = vector.load %arg12[%c0_55, %c0_56] : memref<128x4xf32, #tpu.memory_space<vmem>>, vector<128x4xf32>
    tpu.vector_store %arg12[%c0_55, %c0_56], %148 {strides = array<i32>} : memref<128x4xf32, #tpu.memory_space<vmem>>, vector<128x4xf32>,
    %c0_57 = arith.constant 0 : index
    %c0_58 = arith.constant 0 : index
    %150 = vector.load %arg13[%c0_57, %c0_58] : memref<128x4xf32, #tpu.memory_space<vmem>>, vector<128x4xf32>
    %151 = arith.mulf %150, %103 : vector<128x4xf32>
    %152 = arith.addf %151, %145 : vector<128x4xf32>
    %c0_59 = arith.constant 0 : index
    %c0_60 = arith.constant 0 : index
    %153 = vector.load %arg13[%c0_59, %c0_60] : memref<128x4xf32, #tpu.memory_space<vmem>>, vector<128x4xf32>
    tpu.vector_store %arg13[%c0_59, %c0_60], %152 {strides = array<i32>} : memref<128x4xf32, #tpu.memory_space<vmem>>, vector<128x4xf32>,
    %c2_i32_61 = arith.constant 2 : i32
    %154 = arith.cmpi eq, %arg1, %c2_i32_61 : i32
    %155 = arith.extui %154 : i1 to i32
    %c0_i32_62 = arith.constant 0 : i32
    %156 = arith.cmpi ne, %155, %c0_i32_62 : i32
    scf.if %156 {
      %c0_63 = arith.constant 0 : index
      %c0_64 = arith.constant 0 : index
      %157 = vector.load %arg12[%c0_63, %c0_64] : memref<128x4xf32, #tpu.memory_space<vmem>>, vector<128x4xf32>
      %cst_65 = arith.constant 0.000000e+00 : f32
      %158 = vector.broadcast %cst_65 : f32 to vector<128x4xf32>
      %159 = arith.cmpf ogt, %157, %158 : vector<128x4xf32>
      %cst_66 = arith.constant 1.000000e+00 : f32
      %160 = vector.broadcast %cst_66 : f32 to vector<128x4xf32>
      %161 = arith.select %159, %157, %160 : vector<128x4xi1>, vector<128x4xf32>
      %c0_67 = arith.constant 0 : index
      %c0_68 = arith.constant 0 : index
      %162 = vector.load %arg13[%c0_67, %c0_68] : memref<128x4xf32, #tpu.memory_space<vmem>>, vector<128x4xf32>
      %163 = arith.divf %162, %161 : vector<128x4xf32>
      %c0_i32_69 = arith.constant 0 : i32
      %164 = vector.broadcast %c0_i32_69 : i32 to vector<128x4xi32>
      %165 = arith.cmpi eq, %83, %164 : vector<128x4xi32>
      %c1_i32_70 = arith.constant 1 : i32
      %166 = vector.broadcast %c1_i32_70 : i32 to vector<128x4xi32>
      %167 = arith.cmpi eq, %83, %166 : vector<128x4xi32>
      %cst_71 = arith.constant -1.000000e+00 : f32
      %cst_72 = arith.constant 0.000000e+00 : f32
      %168 = vector.broadcast %cst_71 : f32 to vector<128x4xf32>
      %169 = vector.broadcast %cst_72 : f32 to vector<128x4xf32>
      %170 = arith.select %167, %168, %169 : vector<128x4xi1>, vector<128x4xf32>
      %cst_73 = arith.constant 1.000000e+00 : f32
      %171 = vector.broadcast %cst_73 : f32 to vector<128x4xf32>
      %172 = arith.select %165, %171, %170 : vector<128x4xi1>, vector<128x4xf32>
      %c2_i32_74 = arith.constant 2 : i32
      %173 = vector.broadcast %c2_i32_74 : i32 to vector<128x4xi32>
      %174 = arith.cmpi eq, %83, %173 : vector<128x4xi32>
      %c3_i32 = arith.constant 3 : i32
      %175 = vector.broadcast %c3_i32 : i32 to vector<128x4xi32>
      %176 = arith.cmpi eq, %83, %175 : vector<128x4xi32>
      %cst_75 = arith.constant -1.000000e+00 : f32
      %cst_76 = arith.constant 0.000000e+00 : f32
      %177 = vector.broadcast %cst_75 : f32 to vector<128x4xf32>
      %178 = vector.broadcast %cst_76 : f32 to vector<128x4xf32>
      %179 = arith.select %176, %177, %178 : vector<128x4xi1>, vector<128x4xf32>
      %cst_77 = arith.constant 1.000000e+00 : f32
      %180 = vector.broadcast %cst_77 : f32 to vector<128x4xf32>
      %181 = arith.select %174, %180, %179 : vector<128x4xi1>, vector<128x4xf32>
      %182 = arith.mulf %163, %172 : vector<128x4xf32>
      %cst_78 = arith.constant dense<0.000000e+00> : vector<128xf32>
      %183 = vector.multi_reduction <add>, %182, %cst_78 [1] : vector<128x4xf32> to vector<128xf32>
      %184 = vector.shape_cast %183 : vector<128xf32> to vector<128x1xf32>
      %185 = arith.mulf %163, %181 : vector<128x4xf32>
      %cst_79 = arith.constant dense<0.000000e+00> : vector<128xf32>
      %186 = vector.multi_reduction <add>, %185, %cst_79 [1] : vector<128x4xf32> to vector<128xf32>
      %187 = vector.shape_cast %186 : vector<128xf32> to vector<128x1xf32>
      %188 = tpu.iota {dimensions = array<i32: 1>} : vector<128x2xi32>
      %c0_i32_80 = arith.constant 0 : i32
      %189 = vector.broadcast %c0_i32_80 : i32 to vector<128x2xi32>
      %190 = arith.cmpi eq, %188, %189 : vector<128x2xi32>
      %191 = vector.shape_cast %184 : vector<128x1xf32> to vector<128x1xf32>
      %192 = vector.broadcast %191 : vector<128x1xf32> to vector<128x2xf32>
      %193 = vector.shape_cast %187 : vector<128x1xf32> to vector<128x1xf32>
      %194 = vector.broadcast %193 : vector<128x1xf32> to vector<128x2xf32>
      %195 = arith.select %190, %192, %194 : vector<128x2xi1>, vector<128x2xf32>
      %c0_81 = arith.constant 0 : index
      %c0_82 = arith.constant 0 : index
      %196 = vector.load %arg7[%c0_81, %c0_82] : memref<128x2xf32, #tpu.memory_space<vmem>>, vector<128x2xf32>
      tpu.vector_store %arg7[%c0_81, %c0_82], %195 {strides = array<i32>} : memref<128x2xf32, #tpu.memory_space<vmem>>, vector<128x2xf32>,
    } else {
    }
    return
  }
  func.func @transform_0(%arg0: i32, %arg1: i32, %arg2: memref<2xi32, #tpu.memory_space<smem>>) -> (i32, i32) {
    %c0_i32 = arith.constant 0 : i32
    %c0_i32_0 = arith.constant 0 : i32
    %c0_i32_1 = arith.constant 0 : i32
    return %c0_i32, %c0_i32_0 : i32, i32
  }
  func.func @transform_1(%arg0: i32, %arg1: i32, %arg2: memref<2xi32, #tpu.memory_space<smem>>) -> (i32, i32) {
    %0 = arith.index_cast %arg0 : i32 to index
    %1 = memref.load %arg2[%0] : memref<2xi32, #tpu.memory_space<smem>>
    %2 = arith.addi %1, %arg1 : i32
    %c0_i32 = arith.constant 0 : i32
    %c0_i32_0 = arith.constant 0 : i32
    return %c0_i32, %2 : i32, i32
  }
  func.func @transform_2(%arg0: i32, %arg1: i32, %arg2: memref<2xi32, #tpu.memory_space<smem>>) -> (i32, i32) {
    %0 = arith.index_cast %arg0 : i32 to index
    %1 = memref.load %arg2[%0] : memref<2xi32, #tpu.memory_space<smem>>
    %2 = arith.addi %1, %arg1 : i32
    %c0_i32 = arith.constant 0 : i32
    %c0_i32_0 = arith.constant 0 : i32
    return %c0_i32, %2 : i32, i32
  }
  func.func @transform_3(%arg0: i32, %arg1: i32, %arg2: memref<2xi32, #tpu.memory_space<smem>>) -> (i32, i32) {
    %0 = arith.index_cast %arg0 : i32 to index
    %1 = memref.load %arg2[%0] : memref<2xi32, #tpu.memory_space<smem>>
    %2 = arith.addi %1, %arg1 : i32
    %c0_i32 = arith.constant 0 : i32
    %c0_i32_0 = arith.constant 0 : i32
    return %c0_i32, %2 : i32, i32
  }
  func.func @transform_4(%arg0: i32, %arg1: i32, %arg2: memref<2xi32, #tpu.memory_space<smem>>) -> (i32, i32) {
    %c0_i32 = arith.constant 0 : i32
    %c0_i32_0 = arith.constant 0 : i32
    return %arg0, %c0_i32 : i32, i32
  }
}

</mosaic_0001>

<bundles_post_ra>
// kernel: _wawl_forward.1
= control target key start
LH: loop header
LB: loop body
LE: loop exit
PB: predicated region body
PF: predicated region fallthrough
CT: control target
= control target key end

     0   :  { %s5732_s23 = smov [#allocation9]   ;;  %s10076_s0 = inlined_call_operand.vmem [shape: s32[2], index: 0, kind: input, shape index: {}]   ;;  %s10077_s1 = inlined_call_operand.<no memory space> [shape: f32[1,1], index: 1, kind: input, shape index: {}]   ;;  %s10078_s2 = inlined_call_operand.vmem [shape: s32[1,1024], index: 2, kind: input, shape index: {}]   ;;  %s10079_s3 = inlined_call_operand.vmem [shape: f32[1,1024], index: 3, kind: input, shape index: {}]   ;;  %s10080_s4 = inlined_call_operand.vmem [shape: f32[1,1024], index: 4, kind: input, shape index: {}]   ;;  %s10081_s5 = inlined_call_operand.vmem [shape: f32[256,2], index: 5, kind: output, shape index: {}]  }
   0x1   :  { %s11_s20 = sshll.u32 %s10076_s0, 4  ;;  %15 = sst [smem:[#allocation10]] %s10077_s1  ;;  %s12_s20 = int_to_ptr.vmem [resolvable:$true] %s11_s20 }
   0x2   :  { %14 = dma.vmem_to_smem %s12_s20, 16, %s5732_s23, [#allocation8] }
   0x3   :  { %5710 = dma.done.wait [#allocation8], 16 }
   0x4   :  { %5711 = vsyncadd [#allocation8], 4294967280 }
   0x5   :  { %18 = sfence }
   0x6   :  { %s5776_s24 = smov 0   ;;  %s5778_s25 = smov 0  }
   0x7   :  { %s5780_s26 = smov 0   ;;  %s5782_s27 = smov 0  }
   0x8   :  { %s5784_s28 = smov 0  }
   0x9 LB: > { %s33_s0 = sadd.s32 1, %s5722_s26  ;;  %s36_s1 = sadd.s32 1, %s5726_s27  ;;  %s5730_s28 = sphi %s5784_s28, %s24_s28   ;;  %s5726_s27 = sphi %s5782_s27, %s11465_s27   ;;  %s5722_s26 = sphi %s5780_s26, %s11464_s26   ;;  %s5718_s25 = sphi %s5778_s25, %s11463_s25   ;;  %s5714_s24 = sphi %s5776_s24, %s11462_s24  }
   0xa   : > { %p34_p0 = scmp.ge.s32.totalorder %s33_s0, 3  ;;  %p5324_p1 = scmp.ge.s32.totalorder %s5730_s28, 1 }
   0xb   : > { %p228_p2 = scmp.lt.s32.totalorder %s5730_s28, 7 }
   0xc   : > { %s11467_s0 = smov (%p34_p0, %s33_s0), 0  ;;  %s11469_s1 = smov (!%p34_p0, %s36_s1), %s5726_s27 }
   0xd   : > { %p229_p3 = pnand %p5324_p1, %p228_p2  ;;  %p38_p4 = scmp.ge.s32.totalorder %s11469_s1, 2 }
   0xf   : > { %s11471_s1 = smov (%p38_p4, %s11469_s1), 0  ;;  %232 = sbr.rel (%p229_p3) target bundleno = 1806 (0x70e), region = 36 }
  0x14   : > { %s267_s29 = sld [smem:[#allocation9 + %s5718_s25]]  ;;  %s5328_s30 = sshll.u32 %s5718_s25, 4 }
  0x15   : > { %s276_s6 = sld [smem:[#allocation9 + %s5718_s25]]  ;;  %p295_p5 = scmp.lt.s32.totalorder %s5328_s30, 31 }
  0x16   : > { %s285_s7 = sld [smem:[#allocation9 + %s5718_s25]]  ;;  %s5330_s8 = sshll.u32 %s5718_s25, 7 }
  0x17   : > { %s11473_s30 = smov (!%p295_p5, %s5328_s30), 31  ;;  %p5331_p9 = scmp.ne.s32.totalorder %s5714_s24, 0 }
  0x18   : > { %s5329_s9 = sshll.u32 %s11473_s30, 3 }
  0x19   : > { %s5819_s13 = scalar_lea.vmem %s10081_s5, %s5329_s9 }
  0x1a   : > { %s268_s10 = sadd.s32 %s5714_s24, %s267_s29 }
  0x1b   : > { %s5325_s14 = sshll.u32 %s268_s10, 1  ;;  %s277_s15 = sadd.s32 %s5714_s24, %s276_s6 }
  0x1c   : > { %p270_p6 = scmp.lt.s32.totalorder %s5325_s14, 7  ;;  %s5326_s16 = sshll.u32 %s277_s15, 1 }
  0x1d   : > { %p279_p7 = scmp.lt.s32.totalorder %s5326_s16, 7  ;;  %s286_s17 = sadd.s32 %s5714_s24, %s285_s7 }
  0x1e   : > { %s11475_s14 = smov (!%p270_p6, %s5325_s14), 7  ;;  %s5327_s21 = sshll.u32 %s286_s17, 1 }
  0x1f   : > { %s11477_s16 = smov (!%p279_p7, %s5326_s16), 7  ;;  %s272_s20 = scalar_lea.vmem %s10078_s2, %s11475_s14 }
  0x20   : > { %s281_s29 = scalar_lea.vmem %s10079_s3, %s11477_s16  ;;  %p288_p8 = scmp.lt.s32.totalorder %s5327_s21, 7 }
  0x21   : > { %304 = sbr.rel (%p5331_p9) target bundleno = 135 (0x87), region = 40 }
  0x22   : > { %s11479_s21 = smov (!%p288_p8, %s5327_s21), 7 }
  0x23   : > { %s290_s7 = scalar_lea.vmem %s10080_s4, %s11479_s21 }
  0x26   : > { %vm305_vm0 = vcmask 7168   ;;  %v5733_v0 = vmov -1e+30   ;;  %vm370_vm1 = vcmask 31744   ;;  %v5734_v1 = vmov 0.0  }
  0x27   : > { %306 = vst.msk [vmem:[#allocation2] sm:$0xff] %vm305_vm0, %v5733_v0 }
  0x28   : > { %307 = vst.msk [vmem:[#allocation2 + $0x8] sm:$0xff] %vm305_vm0, %v5733_v0 }
  0x29   : > { %308 = vst.msk [vmem:[#allocation2 + $0x10] sm:$0xff] %vm305_vm0, %v5733_v0 }
  0x2a   : > { %309 = vst.msk [vmem:[#allocation2 + $0x18] sm:$0xff] %vm305_vm0, %v5733_v0 }
  0x2b   : > { %310 = vst.msk [vmem:[#allocation2 + $0x20] sm:$0xff] %vm305_vm0, %v5733_v0 }
  0x2c   : > { %311 = vst.msk [vmem:[#allocation2 + $0x28] sm:$0xff] %vm305_vm0, %v5733_v0 }
  0x2d   : > { %312 = vst.msk [vmem:[#allocation2 + $0x30] sm:$0xff] %vm305_vm0, %v5733_v0 }
  0x2e   : > { %313 = vst.msk [vmem:[#allocation2 + $0x38] sm:$0xff] %vm305_vm0, %v5733_v0 }
  0x2f   : > { %314 = vst.msk [vmem:[#allocation2 + $0x40] sm:$0xff] %vm305_vm0, %v5733_v0 }
  0x30   : > { %315 = vst.msk [vmem:[#allocation2 + $0x48] sm:$0xff] %vm305_vm0, %v5733_v0 }
  0x31   : > { %316 = vst.msk [vmem:[#allocation2 + $0x50] sm:$0xff] %vm305_vm0, %v5733_v0 }
  0x32   : > { %317 = vst.msk [vmem:[#allocation2 + $0x58] sm:$0xff] %vm305_vm0, %v5733_v0 }
  0x33   : > { %318 = vst.msk [vmem:[#allocation2 + $0x60] sm:$0xff] %vm305_vm0, %v5733_v0 }
  0x34   : > { %319 = vst.msk [vmem:[#allocation2 + $0x68] sm:$0xff] %vm305_vm0, %v5733_v0 }
  0x35   : > { %320 = vst.msk [vmem:[#allocation2 + $0x70] sm:$0xff] %vm305_vm0, %v5733_v0 }
  0x36   : > { %321 = vst.msk [vmem:[#allocation2 + $0x78] sm:$0xff] %vm305_vm0, %v5733_v0 }
  0x37   : > { %322 = vst.msk [vmem:[#allocation3] sm:$0xff] %vm305_vm0, %v5733_v0 }
  0x38   : > { %323 = vst.msk [vmem:[#allocation3 + $0x8] sm:$0xff] %vm305_vm0, %v5733_v0 }
  0x39   : > { %324 = vst.msk [vmem:[#allocation3 + $0x10] sm:$0xff] %vm305_vm0, %v5733_v0 }
  0x3a   : > { %325 = vst.msk [vmem:[#allocation3 + $0x18] sm:$0xff] %vm305_vm0, %v5733_v0 }
  0x3b   : > { %326 = vst.msk [vmem:[#allocation3 + $0x20] sm:$0xff] %vm305_vm0, %v5733_v0 }
  0x3c   : > { %327 = vst.msk [vmem:[#allocation3 + $0x28] sm:$0xff] %vm305_vm0, %v5733_v0 }
  0x3d   : > { %328 = vst.msk [vmem:[#allocation3 + $0x30] sm:$0xff] %vm305_vm0, %v5733_v0 }
  0x3e   : > { %329 = vst.msk [vmem:[#allocation3 + $0x38] sm:$0xff] %vm305_vm0, %v5733_v0 }
  0x3f   : > { %330 = vst.msk [vmem:[#allocation3 + $0x40] sm:$0xff] %vm305_vm0, %v5733_v0 }
  0x40   : > { %331 = vst.msk [vmem:[#allocation3 + $0x48] sm:$0xff] %vm305_vm0, %v5733_v0 }
  0x41   : > { %332 = vst.msk [vmem:[#allocation3 + $0x50] sm:$0xff] %vm305_vm0, %v5733_v0 }
  0x42   : > { %333 = vst.msk [vmem:[#allocation3 + $0x58] sm:$0xff] %vm305_vm0, %v5733_v0 }
  0x43   : > { %334 = vst.msk [vmem:[#allocation3 + $0x60] sm:$0xff] %vm305_vm0, %v5733_v0 }
  0x44   : > { %335 = vst.msk [vmem:[#allocation3 + $0x68] sm:$0xff] %vm305_vm0, %v5733_v0 }
  0x45   : > { %336 = vst.msk [vmem:[#allocation3 + $0x70] sm:$0xff] %vm305_vm0, %v5733_v0 }
  0x46   : > { %337 = vst.msk [vmem:[#allocation3 + $0x78] sm:$0xff] %vm305_vm0, %v5733_v0 }
  0x47   : > { %338 = vst.msk [vmem:[#allocation4] sm:$0xff] %vm305_vm0, %v5733_v0 }
  0x48   : > { %339 = vst.msk [vmem:[#allocation4 + $0x8] sm:$0xff] %vm305_vm0, %v5733_v0 }
  0x49   : > { %340 = vst.msk [vmem:[#allocation4 + $0x10] sm:$0xff] %vm305_vm0, %v5733_v0 }
  0x4a   : > { %341 = vst.msk [vmem:[#allocation4 + $0x18] sm:$0xff] %vm305_vm0, %v5733_v0 }
  0x4b   : > { %342 = vst.msk [vmem:[#allocation4 + $0x20] sm:$0xff] %vm305_vm0, %v5733_v0 }
  0x4c   : > { %343 = vst.msk [vmem:[#allocation4 + $0x28] sm:$0xff] %vm305_vm0, %v5733_v0 }
  0x4d   : > { %344 = vst.msk [vmem:[#allocation4 + $0x30] sm:$0xff] %vm305_vm0, %v5733_v0 }
  0x4e   : > { %345 = vst.msk [vmem:[#allocation4 + $0x38] sm:$0xff] %vm305_vm0, %v5733_v0 }
  0x4f   : > { %346 = vst.msk [vmem:[#allocation4 + $0x40] sm:$0xff] %vm305_vm0, %v5733_v0 }
  0x50   : > { %347 = vst.msk [vmem:[#allocation4 + $0x48] sm:$0xff] %vm305_vm0, %v5733_v0 }
  0x51   : > { %348 = vst.msk [vmem:[#allocation4 + $0x50] sm:$0xff] %vm305_vm0, %v5733_v0 }
  0x52   : > { %349 = vst.msk [vmem:[#allocation4 + $0x58] sm:$0xff] %vm305_vm0, %v5733_v0 }
  0x53   : > { %350 = vst.msk [vmem:[#allocation4 + $0x60] sm:$0xff] %vm305_vm0, %v5733_v0 }
  0x54   : > { %351 = vst.msk [vmem:[#allocation4 + $0x68] sm:$0xff] %vm305_vm0, %v5733_v0 }
  0x55   : > { %352 = vst.msk [vmem:[#allocation4 + $0x70] sm:$0xff] %vm305_vm0, %v5733_v0 }
  0x56   : > { %353 = vst.msk [vmem:[#allocation4 + $0x78] sm:$0xff] %vm305_vm0, %v5733_v0 }
  0x57   : > { %354 = vst.msk [vmem:[#allocation5] sm:$0xff] %vm305_vm0, %v5733_v0 }
  0x58   : > { %355 = vst.msk [vmem:[#allocation5 + $0x8] sm:$0xff] %vm305_vm0, %v5733_v0 }
  0x59   : > { %356 = vst.msk [vmem:[#allocation5 + $0x10] sm:$0xff] %vm305_vm0, %v5733_v0 }
  0x5a   : > { %357 = vst.msk [vmem:[#allocation5 + $0x18] sm:$0xff] %vm305_vm0, %v5733_v0 }
  0x5b   : > { %358 = vst.msk [vmem:[#allocation5 + $0x20] sm:$0xff] %vm305_vm0, %v5733_v0 }
  0x5c   : > { %359 = vst.msk [vmem:[#allocation5 + $0x28] sm:$0xff] %vm305_vm0, %v5733_v0 }
  0x5d   : > { %360 = vst.msk [vmem:[#allocation5 + $0x30] sm:$0xff] %vm305_vm0, %v5733_v0 }
  0x5e   : > { %361 = vst.msk [vmem:[#allocation5 + $0x38] sm:$0xff] %vm305_vm0, %v5733_v0 }
  0x5f   : > { %362 = vst.msk [vmem:[#allocation5 + $0x40] sm:$0xff] %vm305_vm0, %v5733_v0 }
  0x60   : > { %363 = vst.msk [vmem:[#allocation5 + $0x48] sm:$0xff] %vm305_vm0, %v5733_v0 }
  0x61   : > { %364 = vst.msk [vmem:[#allocation5 + $0x50] sm:$0xff] %vm305_vm0, %v5733_v0 }
  0x62   : > { %365 = vst.msk [vmem:[#allocation5 + $0x58] sm:$0xff] %vm305_vm0, %v5733_v0 }
  0x63   : > { %366 = vst.msk [vmem:[#allocation5 + $0x60] sm:$0xff] %vm305_vm0, %v5733_v0 }
  0x64   : > { %367 = vst.msk [vmem:[#allocation5 + $0x68] sm:$0xff] %vm305_vm0, %v5733_v0 }
  0x65   : > { %368 = vst.msk [vmem:[#allocation5 + $0x70] sm:$0xff] %vm305_vm0, %v5733_v0 }
  0x66   : > { %369 = vst.msk [vmem:[#allocation5 + $0x78] sm:$0xff] %vm305_vm0, %v5733_v0 }
  0x67   : > { %371 = vst.msk [vmem:[#allocation6] sm:$0xff] %vm370_vm1, %v5734_v1 }
  0x68   : > { %372 = vst.msk [vmem:[#allocation6 + $0x8] sm:$0xff] %vm370_vm1, %v5734_v1 }
  0x69   : > { %373 = vst.msk [vmem:[#allocation6 + $0x10] sm:$0xff] %vm370_vm1, %v5734_v1 }
  0x6a   : > { %374 = vst.msk [vmem:[#allocation6 + $0x18] sm:$0xff] %vm370_vm1, %v5734_v1 }
  0x6b   : > { %375 = vst.msk [vmem:[#allocation6 + $0x20] sm:$0xff] %vm370_vm1, %v5734_v1 }
  0x6c   : > { %376 = vst.msk [vmem:[#allocation6 + $0x28] sm:$0xff] %vm370_vm1, %v5734_v1 }
  0x6d   : > { %377 = vst.msk [vmem:[#allocation6 + $0x30] sm:$0xff] %vm370_vm1, %v5734_v1 }
  0x6e   : > { %378 = vst.msk [vmem:[#allocation6 + $0x38] sm:$0xff] %vm370_vm1, %v5734_v1 }
  0x6f   : > { %379 = vst.msk [vmem:[#allocation6 + $0x40] sm:$0xff] %vm370_vm1, %v5734_v1 }
  0x70   : > { %380 = vst.msk [vmem:[#allocation6 + $0x48] sm:$0xff] %vm370_vm1, %v5734_v1 }
  0x71   : > { %381 = vst.msk [vmem:[#allocation6 + $0x50] sm:$0xff] %vm370_vm1, %v5734_v1 }
  0x72   : > { %382 = vst.msk [vmem:[#allocation6 + $0x58] sm:$0xff] %vm370_vm1, %v5734_v1 }
  0x73   : > { %383 = vst.msk [vmem:[#allocation6 + $0x60] sm:$0xff] %vm370_vm1, %v5734_v1 }
  0x74   : > { %384 = vst.msk [vmem:[#allocation6 + $0x68] sm:$0xff] %vm370_vm1, %v5734_v1 }
  0x75   : > { %385 = vst.msk [vmem:[#allocation6 + $0x70] sm:$0xff] %vm370_vm1, %v5734_v1 }
  0x76   : > { %386 = vst.msk [vmem:[#allocation6 + $0x78] sm:$0xff] %vm370_vm1, %v5734_v1 }
  0x77   : > { %387 = vst.msk [vmem:[#allocation7] sm:$0xff] %vm370_vm1, %v5734_v1 }
  0x78   : > { %388 = vst.msk [vmem:[#allocation7 + $0x8] sm:$0xff] %vm370_vm1, %v5734_v1 }
  0x79   : > { %389 = vst.msk [vmem:[#allocation7 + $0x10] sm:$0xff] %vm370_vm1, %v5734_v1 }
  0x7a   : > { %390 = vst.msk [vmem:[#allocation7 + $0x18] sm:$0xff] %vm370_vm1, %v5734_v1 }
  0x7b   : > { %391 = vst.msk [vmem:[#allocation7 + $0x20] sm:$0xff] %vm370_vm1, %v5734_v1 }
  0x7c   : > { %392 = vst.msk [vmem:[#allocation7 + $0x28] sm:$0xff] %vm370_vm1, %v5734_v1 }
  0x7d   : > { %393 = vst.msk [vmem:[#allocation7 + $0x30] sm:$0xff] %vm370_vm1, %v5734_v1 }
  0x7e   : > { %394 = vst.msk [vmem:[#allocation7 + $0x38] sm:$0xff] %vm370_vm1, %v5734_v1 }
  0x7f   : > { %395 = vst.msk [vmem:[#allocation7 + $0x40] sm:$0xff] %vm370_vm1, %v5734_v1 }
  0x80   : > { %396 = vst.msk [vmem:[#allocation7 + $0x48] sm:$0xff] %vm370_vm1, %v5734_v1 }
  0x81   : > { %397 = vst.msk [vmem:[#allocation7 + $0x50] sm:$0xff] %vm370_vm1, %v5734_v1 }
  0x82   : > { %398 = vst.msk [vmem:[#allocation7 + $0x58] sm:$0xff] %vm370_vm1, %v5734_v1 }
  0x83   : > { %399 = vst.msk [vmem:[#allocation7 + $0x60] sm:$0xff] %vm370_vm1, %v5734_v1 }
  0x84   : > { %400 = vst.msk [vmem:[#allocation7 + $0x68] sm:$0xff] %vm370_vm1, %v5734_v1 }
  0x85   : > { %401 = vst.msk [vmem:[#allocation7 + $0x70] sm:$0xff] %vm370_vm1, %v5734_v1 }
  0x86   : > { %402 = vst.msk [vmem:[#allocation7 + $0x78] sm:$0xff] %vm370_vm1, %v5734_v1 }
  0x87 PF: > { %v405_v2 = vld [vmem:[%s290_s7] sm:$0x3]  ;;  %v407_v4 = vstv %s5330_s8  ;;  %v10108_v5 = vlaneseq  ;;  %v10538_v17 = vmov 0  ;;  %v10541_v18 = vmov 0  ;;  %s403_s14 = sld [smem:[#allocation10]]  ;;  %p5556_p10 = scmp.ne.s32.totalorder %s5714_s24, 2 }
  0x88   : > { %v406_v3 = vld [vmem:[%s272_s20] sm:$0x3]  ;;  %v1435_v7 = vsub.f32 0.0, %v405_v2  ;;  %v6017_v9 = vperm.slane %v405_v2, 0  ;;  %v6019_v10 = vperm.slane %v405_v2, 1  ;;  %v10544_v24 = vmov 0 }
  0x89   : > { %v408_v6 = vsub.s32 %v406_v3, %v407_v4  ;;  %v6015_v8 = vshrl.u32 %v10108_v5, 7  ;;  %v404_v20 = vld [vmem:[%s281_s29] sm:$0x3]  ;;  %v10547_v27 = vmov 0  ;;  %v10550_v31 = vmov 0 }
  0x8a   : > { %10536 = vst [vmem:[#allocation13_spill] sm:$0xff] %v6017_v9  ;;  %v6025_v13 = vperm.slane %v1435_v7, 0  ;;  %v6027_v14 = vperm.slane %v1435_v7, 1  ;;  %v10553_v32 = vmov 0  ;;  %v828_v34 = vsub.f32 0.0, %v404_v20 }
  0x8b   : > { %10535 = vst [vmem:[#allocation12_spill] sm:$0xff] %v6015_v8  ;;  %v6021_v11 = vperm.slane %v408_v6, 0  ;;  %v6023_v12 = vperm.slane %v408_v6, 1  ;;  %v412_v15 = vadd.s32 16, %v6015_v8  ;;  %v411_v16 = vadd.s32 8, %v6015_v8 }
  0x8c   : > { %10537 = vst [vmem:[#allocation14_spill] sm:$0xff] %v6019_v10  ;;  %v413_v19 = vadd.s32 24, %v6015_v8  ;;  %v10556_v37 = vmov 0  ;;  %v10559_v38 = vmov 0  ;;  %v6115_v45 = vperm.slane %v828_v34, 0 }
  0x8d   : > { %vm6033_vm2 = vcmp.eq.s32.totalorder %v6015_v8, %v6021_v11  ;;  %vm6039_vm3 = vcmp.eq.s32.totalorder %v6015_v8, %v6023_v12  ;;  %vm6059_vm4 = vcmp.eq.s32.totalorder %v412_v15, %v6021_v11  ;;  %vm6067_vm5 = vcmp.eq.s32.totalorder %v412_v15, %v6023_v12 }
  0x8e   : > { %v10539_v17 = vsel %vm6033_vm2, 4294967295, %v10538_v17  ;;  %v10542_v18 = vsel %vm6039_vm3, 4294967295, %v10541_v18  ;;  %v1457_v21 = vsel %vm6033_vm2, %v6025_v13, -1e+30  ;;  %v1458_v22 = vsel %vm6039_vm3, %v6027_v14, -1e+30 }
  0x8f   : > { %10540 = vst [vmem:[#allocation15_spill] sm:$0xff] %v10539_v17  ;;  %v1153_v23 = vsel %vm6033_vm2, %v6017_v9, -1e+30  ;;  %v10545_v24 = vsel %vm6059_vm4, 4294967295, %v10544_v24  ;;  %v1489_v25 = vmax.f32 %v1457_v21, %v1458_v22  ;;  %v1154_v26 = vsel %vm6039_vm3, %v6019_v10, -1e+30 }
  0x90   : > { %10543 = vst [vmem:[#allocation16_spill] sm:$0xff] %v10542_v18  ;;  %v10548_v27 = vsel %vm6067_vm5, 4294967295, %v10547_v27  ;;  %v1157_v28 = vsel %vm6059_vm4, %v6017_v9, -1e+30  ;;  %v1185_v29 = vmax.f32 %v1153_v23, %v1154_v26  ;;  %v1158_v30 = vsel %vm6067_vm5, %v6019_v10, -1e+30 }
  0x91   : > { %10546 = vst [vmem:[#allocation17_spill] sm:$0xff] %v10545_v24  ;;  %vm6078_vm6 = vcmp.eq.s32.totalorder %v411_v16, %v6021_v11  ;;  %vm6083_vm7 = vcmp.eq.s32.totalorder %v411_v16, %v6023_v12  ;;  %1490 = vmax.xlane.f32.xlu2 %v1489_v25  ;;  %v1191_v33 = vmax.f32 %v1157_v28, %v1158_v30  ;;  %v6117_v46 = vperm.slane %v828_v34, 1 }
  0x92   : > { %10549 = vst [vmem:[#allocation18_spill] sm:$0xff] %v10548_v27  ;;  %v10551_v31 = vsel %vm6078_vm6, 4294967295, %v10550_v31  ;;  %v10554_v32 = vsel %vm6083_vm7, 4294967295, %v10553_v32  ;;  %1186 = vmax.xlane.f32.xlu0 %v1185_v29  ;;  %v1459_v35 = vsel %vm6078_vm6, %v6025_v13, -1e+30  ;;  %vm6094_vm8 = vcmp.eq.s32.totalorder %v413_v19, %v6021_v11 }
  0x93   : > { %10552 = vst [vmem:[#allocation19_spill] sm:$0xff] %v10551_v31  ;;  %v1460_v36 = vsel %vm6083_vm7, %v6027_v14, -1e+30  ;;  %v10557_v37 = vsel %vm6094_vm8, 4294967295, %v10556_v37  ;;  %vm6099_vm9 = vcmp.eq.s32.totalorder %v413_v19, %v6023_v12  ;;  %1192 = vmax.xlane.f32.xlu1 %v1191_v33  ;;  %v1155_v39 = vsel %vm6078_vm6, %v6017_v9, -1e+30 }
  0x94   : > { %10555 = vst [vmem:[#allocation20_spill] sm:$0xff] %v10554_v32  ;;  %v10560_v38 = vsel %vm6099_vm9, 4294967295, %v10559_v38  ;;  %v1156_v40 = vsel %vm6083_vm7, %v6019_v10, -1e+30  ;;  %v1159_v41 = vsel %vm6094_vm8, %v6017_v9, -1e+30  ;;  %v1492_v43 = vmax.f32 %v1459_v35, %v1460_v36 }
  0x95   : > { %10558 = vst [vmem:[#allocation21_spill] sm:$0xff] %v10557_v37  ;;  %v1160_v42 = vsel %vm6099_vm9, %v6019_v10, -1e+30  ;;  %v1188_v44 = vmax.f32 %v1155_v39, %v1156_v40  ;;  %v850_v48 = vsel %vm6033_vm2, %v6115_v45, -1e+30  ;;  %v6155_v0 = vperm.slane %v404_v20, 0 }
  0x96   : > { %10561 = vst [vmem:[#allocation22_spill] sm:$0xff] %v10560_v38  ;;  %v1194_v47 = vmax.f32 %v1159_v41, %v1160_v42  ;;  %v851_v49 = vsel %vm6039_vm3, %v6117_v46, -1e+30  ;;  %v1461_v50 = vsel %vm6059_vm4, %v6025_v13, -1e+30  ;;  %v6157_v1 = vperm.slane %v404_v20, 1 }
  0x97   : > { %v1462_v51 = vsel %vm6067_vm5, %v6027_v14, -1e+30  ;;  %v1463_v52 = vsel %vm6094_vm8, %v6025_v13, -1e+30  ;;  %v1464_v53 = vsel %vm6099_vm9, %v6027_v14, -1e+30  ;;  %v882_v54 = vmax.f32 %v850_v48, %v851_v49 }
  0x98   : > { %v1495_v55 = vmax.f32 %v1461_v50, %v1462_v51  ;;  %v1498_v56 = vmax.f32 %v1463_v52, %v1464_v53  ;;  %v856_v57 = vsel %vm6094_vm8, %v6115_v45, -1e+30  ;;  %v857_v58 = vsel %vm6099_vm9, %v6117_v46, -1e+30  ;;  %10562 = vst [vmem:[#allocation23_spill] sm:$0xff] %v6155_v0 }
  0x99   : > { %1493 = vmax.xlane.f32.xlu2 %v1492_v43  ;;  %v852_v59 = vsel %vm6078_vm6, %v6115_v45, -1e+30  ;;  %v853_v60 = vsel %vm6083_vm7, %v6117_v46, -1e+30  ;;  %v854_v61 = vsel %vm6059_vm4, %v6115_v45, -1e+30  ;;  %v891_v63 = vmax.f32 %v856_v57, %v857_v58 }
  0x9a   : > { %1189 = vmax.xlane.f32.xlu0 %v1188_v44  ;;  %v855_v62 = vsel %vm6067_vm5, %v6117_v46, -1e+30  ;;  %10563 = vst [vmem:[#allocation24_spill] sm:$0xff] %v6157_v1  ;;  %v885_v2 = vmax.f32 %v852_v59, %v853_v60  ;;  %v549_v4 = vsel %vm6059_vm4, %v6155_v0, -1e+30  ;;  %v415_v16 = vadd.s32 40, %v6015_v8 }
  0x9b   : > { %1195 = vmax.xlane.f32.xlu1 %v1194_v47  ;;  %v888_v3 = vmax.f32 %v854_v61, %v855_v62  ;;  %v550_v6 = vsel %vm6067_vm5, %v6157_v1, -1e+30  ;;  %v545_v7 = vsel %vm6033_vm2, %v6155_v0, -1e+30  ;;  %v546_v15 = vsel %vm6039_vm3, %v6157_v1, -1e+30 }
  0x9c   : > { %v547_v19 = vsel %vm6078_vm6, %v6155_v0, -1e+30  ;;  %v548_v20 = vsel %vm6083_vm7, %v6157_v1, -1e+30  ;;  %v583_v21 = vmax.f32 %v549_v4, %v550_v6  ;;  %v414_v22 = vadd.s32 32, %v6015_v8 }
  0x9d   : > { %v577_v23 = vmax.f32 %v545_v7, %v546_v15  ;;  %v580_v25 = vmax.f32 %v547_v19, %v548_v20  ;;  %vm6180_vm10 = vcmp.eq.s32.totalorder %v415_v16, %v6021_v11  ;;  %v10564_v26 = vmov 0 }
  0x9e   : > { %v10565_v26 = vsel %vm6180_vm10, 4294967295, %v10564_v26  ;;  %vm6185_vm11 = vcmp.eq.s32.totalorder %v415_v16, %v6023_v12  ;;  %v10567_v28 = vmov 0  ;;  %vm6190_vm12 = vcmp.eq.s32.totalorder %v414_v22, %v6021_v11 }
  0x9f   : > { %10566 = vst [vmem:[#allocation25_spill] sm:$0xff] %v10565_v26  ;;  %v10568_v28 = vsel %vm6185_vm11, 4294967295, %v10567_v28  ;;  %v10570_v29 = vmov 0  ;;  %vm6195_vm13 = vcmp.eq.s32.totalorder %v414_v22, %v6023_v12  ;;  %v10573_v30 = vmov 0 }
  0xa0   : > { %10569 = vst [vmem:[#allocation26_spill] sm:$0xff] %v10568_v28  ;;  %v10571_v29 = vsel %vm6190_vm12, 4294967295, %v10570_v29  ;;  %v10574_v30 = vsel %vm6195_vm13, 4294967295, %v10573_v30  ;;  %v1163_v33 = vsel %vm6180_vm10, %v6017_v9, -1e+30  ;;  %v416_v59 = vadd.s32 48, %v6015_v8 }
  0xa1   : > { %883 = vmax.xlane.f32.xlu2 %v882_v54  ;;  %10572 = vst [vmem:[#allocation27_spill] sm:$0xff] %v10571_v29  ;;  %v1164_v34 = vsel %vm6185_vm11, %v6019_v10, -1e+30  ;;  %v551_v35 = vsel %vm6094_vm8, %v6155_v0, -1e+30  ;;  %v10576_v4 = vmov 0 }
  0xa2   : > { %1496 = vmax.xlane.f32.xlu0 %v1495_v55  ;;  %10575 = vst [vmem:[#allocation28_spill] sm:$0xff] %v10574_v30  ;;  %v552_v36 = vsel %vm6099_vm9, %v6157_v1, -1e+30  ;;  %v1161_v39 = vsel %vm6190_vm12, %v6017_v9, -1e+30  ;;  %v1200_v41 = vmax.f32 %v1163_v33, %v1164_v34  ;;  %vm6256_vm14 = vcmp.eq.s32.totalorder %v416_v59, %v6021_v11 }
  0xa3   : > { %1499 = vmax.xlane.f32.xlu1 %v1498_v56  ;;  %v1162_v40 = vsel %vm6195_vm13, %v6019_v10, -1e+30  ;;  %v586_v42 = vmax.f32 %v551_v35, %v552_v36  ;;  %v858_v44 = vsel %vm6190_vm12, %v6115_v45, -1e+30  ;;  %v859_v47 = vsel %vm6195_vm13, %v6117_v46, -1e+30 }
  0xa4   : > { %v1197_v43 = vmax.f32 %v1161_v39, %v1162_v40  ;;  %v1465_v48 = vsel %vm6190_vm12, %v6025_v13, -1e+30  ;;  %v1466_v49 = vsel %vm6195_vm13, %v6027_v14, -1e+30  ;;  %v1467_v50 = vsel %vm6180_vm10, %v6025_v13, -1e+30 }
  0xa5   : > { %v1468_v51 = vsel %vm6185_vm11, %v6027_v14, -1e+30  ;;  %v894_v52 = vmax.f32 %v858_v44, %v859_v47  ;;  %v1501_v53 = vmax.f32 %v1465_v48, %v1466_v49  ;;  %v555_v55 = vsel %vm6180_vm10, %v6155_v0, -1e+30 }
  0xa6   : > { %v1504_v54 = vmax.f32 %v1467_v50, %v1468_v51  ;;  %v556_v56 = vsel %vm6185_vm11, %v6157_v1, -1e+30  ;;  %v860_v57 = vsel %vm6180_vm10, %v6115_v45, -1e+30  ;;  %v861_v58 = vsel %vm6185_vm11, %v6117_v46, -1e+30 }
  0xa7   : > { %v553_v60 = vsel %vm6190_vm12, %v6155_v0, -1e+30  ;;  %v554_v61 = vsel %vm6195_vm13, %v6157_v1, -1e+30  ;;  %v592_v62 = vmax.f32 %v555_v55, %v556_v56  ;;  %v10577_v4 = vsel %vm6256_vm14, 4294967295, %v10576_v4 }
  0xa8   : > { %10578 = vst [vmem:[#allocation29_spill] sm:$0xff] %v10577_v4  ;;  %vm6261_vm15 = vcmp.eq.s32.totalorder %v416_v59, %v6023_v12  ;;  %v10579_v6 = vmov 0  ;;  %v10582_v7 = vmov 0  ;;  %v10585_v15 = vmov 0 }
  0xa9   : > { %892 = vmax.xlane.f32.xlu2 %v891_v63  ;;  %v417_v63 = vadd.s32 56, %v6015_v8  ;;  %v10580_v6 = vsel %vm6261_vm15, 4294967295, %v10579_v6  ;;  %v1469_v16 = vsel %vm6256_vm14, %v6025_v13, -1e+30  ;;  %v1470_v19 = vsel %vm6261_vm15, %v6027_v14, -1e+30 }
  0xaa   : > { %886 = vmax.xlane.f32.xlu0 %v885_v2  ;;  %v897_v2 = vmax.f32 %v860_v57, %v861_v58  ;;  %10581 = vst [vmem:[#allocation30_spill] sm:$0xff] %v10580_v6  ;;  %v1165_v20 = vsel %vm6256_vm14, %v6017_v9, -1e+30  ;;  %v10588_v49 = vmov 0  ;;  %v10591_v50 = vmov 0 }
  0xab   : > { %889 = vmax.xlane.f32.xlu1 %v888_v3  ;;  %v589_v3 = vmax.f32 %v553_v60, %v554_v61  ;;  %vm6266_vm0 = vcmp.eq.s32.totalorder %v417_v63, %v6021_v11  ;;  %vm6271_vm1 = vcmp.eq.s32.totalorder %v417_v63, %v6023_v12  ;;  %v419_v55 = vadd.s32 72, %v6015_v8 }
  0xac   : > { %v10583_v7 = vsel %vm6266_vm0, 4294967295, %v10582_v7  ;;  %v10586_v15 = vsel %vm6271_vm1, 4294967295, %v10585_v15  ;;  %v1167_v22 = vsel %vm6266_vm0, %v6017_v9, -1e+30  ;;  %v864_v35 = vsel %vm6266_vm0, %v6115_v45, -1e+30 }
  0xad   : > { %10584 = vst [vmem:[#allocation31_spill] sm:$0xff] %v10583_v7  ;;  %v865_v36 = vsel %vm6271_vm1, %v6117_v46, -1e+30  ;;  %v1471_v39 = vsel %vm6266_vm0, %v6025_v13, -1e+30  ;;  %vm6342_vm13 = vcmp.eq.s32.totalorder %v419_v55, %v6021_v11  ;;  %v10594_v61 = vmov 0 }
  0xae   : > { %10587 = vst [vmem:[#allocation32_spill] sm:$0xff] %v10586_v15  ;;  %v1472_v40 = vsel %vm6271_vm1, %v6027_v14, -1e+30  ;;  %v903_v44 = vmax.f32 %v864_v35, %v865_v36  ;;  %v559_v56 = vsel %vm6266_vm0, %v6155_v0, -1e+30  ;;  %v10595_v61 = vsel %vm6342_vm13, 4294967295, %v10594_v61 }
  0xaf   : > { %v1510_v47 = vmax.f32 %v1471_v39, %v1472_v40  ;;  %v560_v57 = vsel %vm6271_vm1, %v6157_v1, -1e+30  ;;  %10596 = vst [vmem:[#allocation35_spill] sm:$0xff] %v10595_v61  ;;  %v1475_v63 = vsel %vm6342_vm13, %v6025_v13, -1e+30  ;;  %v421_v36 = vadd.s32 88, %v6015_v8 }
  0xb0   : > { %v598_v60 = vmax.f32 %v559_v56, %v560_v57  ;;  %v868_v39 = vsel %vm6342_vm13, %v6115_v45, -1e+30 }
  0xb1   : > { %584 = vmax.xlane.f32.xlu2 %v583_v21  ;;  %v1166_v21 = vsel %vm6261_vm15, %v6019_v10, -1e+30 }
  0xb2   : > { %578 = vmax.xlane.f32.xlu0 %v577_v23  ;;  %v1168_v23 = vsel %vm6271_vm1, %v6019_v10, -1e+30  ;;  %v1203_v33 = vmax.f32 %v1165_v20, %v1166_v21 }
  0xb3   : > { %581 = vmax.xlane.f32.xlu1 %v580_v25  ;;  %v1507_v25 = vmax.f32 %v1469_v16, %v1470_v19  ;;  %v1206_v34 = vmax.f32 %v1167_v22, %v1168_v23 }
  0xb9   : > { %1201 = vmax.xlane.f32.xlu2 %v1200_v41  ;;  %v418_v41 = vadd.s32 64, %v6015_v8 }
  0xba   : > { %587 = vmax.xlane.f32.xlu0 %v586_v42  ;;  %v862_v42 = vsel %vm6256_vm14, %v6115_v45, -1e+30 }
  0xbb   : > { %1198 = vmax.xlane.f32.xlu1 %v1197_v43  ;;  %v863_v43 = vsel %vm6261_vm15, %v6117_v46, -1e+30  ;;  %vm6313_vm11 = vcmp.eq.s32.totalorder %v418_v41, %v6021_v11  ;;  %vm6318_vm10 = vcmp.eq.s32.totalorder %v418_v41, %v6023_v12 }
  0xbc   : > { %v900_v48 = vmax.f32 %v862_v42, %v863_v43  ;;  %v10589_v49 = vsel %vm6313_vm11, 4294967295, %v10588_v49  ;;  %v10592_v50 = vsel %vm6318_vm10, 4294967295, %v10591_v50  ;;  %v1169_v51 = vsel %vm6313_vm11, %v6017_v9, -1e+30 }
  0xbd   : > { %10590 = vst [vmem:[#allocation33_spill] sm:$0xff] %v10589_v49  ;;  %v1473_v19 = vsel %vm6313_vm11, %v6025_v13, -1e+30  ;;  %v1474_v20 = vsel %vm6318_vm10, %v6027_v14, -1e+30  ;;  %v420_v42 = vadd.s32 80, %v6015_v8 }
  0xbe   : > { %10593 = vst [vmem:[#allocation34_spill] sm:$0xff] %v10592_v50  ;;  %v1513_v23 = vmax.f32 %v1473_v19, %v1474_v20  ;;  %v867_v35 = vsel %vm6318_vm10, %v6117_v46, -1e+30  ;;  %v10634_v50 = vmov 0 }
  0xbf   : > { %vm6400_vm1 = vcmp.eq.s32.totalorder %v420_v42, %v6021_v11  ;;  %vm6405_vm0 = vcmp.eq.s32.totalorder %v420_v42, %v6023_v12 }
  0xc0   : > { %v1173_v57 = vsel %vm6400_vm1, %v6017_v9, -1e+30  ;;  %v1478_v19 = vsel %vm6405_vm0, %v6027_v14, -1e+30 }
  0xc1   : > { %895 = vmax.xlane.f32.xlu2 %v894_v52  ;;  %v1170_v52 = vsel %vm6318_vm10, %v6019_v10, -1e+30 }
  0xc2   : > { %1502 = vmax.xlane.f32.xlu0 %v1501_v53  ;;  %v557_v53 = vsel %vm6256_vm14, %v6155_v0, -1e+30  ;;  %v1209_v58 = vmax.f32 %v1169_v51, %v1170_v52  ;;  %v10606_v51 = vmov 0  ;;  %v10609_v52 = vmov 0 }
  0xc3   : > { %1505 = vmax.xlane.f32.xlu1 %v1504_v54  ;;  %v558_v54 = vsel %vm6261_vm15, %v6157_v1, -1e+30  ;;  %vm6347_vm15 = vcmp.eq.s32.totalorder %v419_v55, %v6023_v12  ;;  %v10607_v51 = vsel %vm6400_vm1, 4294967295, %v10606_v51  ;;  %v10610_v52 = vsel %vm6405_vm0, 4294967295, %v10609_v52 }
  0xc4   : > { %v595_v59 = vmax.f32 %v557_v53, %v558_v54  ;;  %v1172_v16 = vsel %vm6347_vm15, %v6019_v10, -1e+30  ;;  %v869_v40 = vsel %vm6347_vm15, %v6117_v46, -1e+30  ;;  %10608 = vst [vmem:[#allocation39_spill] sm:$0xff] %v10607_v51 }
  0xc5   : > { %10611 = vst [vmem:[#allocation40_spill] sm:$0xff] %v10610_v52  ;;  %v563_v55 = vsel %vm6342_vm13, %v6155_v0, -1e+30  ;;  %v564_v56 = vsel %vm6347_vm15, %v6157_v1, -1e+30 }
  0xc9   : > { %593 = vmax.xlane.f32.xlu2 %v592_v62  ;;  %v10597_v62 = vmov 0 }
  0xca   : > { %898 = vmax.xlane.f32.xlu0 %v897_v2  ;;  %v10598_v62 = vsel %vm6347_vm15, 4294967295, %v10597_v62  ;;  %v1476_v2 = vsel %vm6347_vm15, %v6027_v14, -1e+30 }
  0xcb   : > { %590 = vmax.xlane.f32.xlu1 %v589_v3  ;;  %10599 = vst [vmem:[#allocation36_spill] sm:$0xff] %v10598_v62  ;;  %v1171_v3 = vsel %vm6342_vm13, %v6017_v9, -1e+30  ;;  %v1516_v21 = vmax.f32 %v1475_v63, %v1476_v2  ;;  %v870_v2 = vsel %vm6400_vm1, %v6115_v45, -1e+30 }
  0xcc   : > { %v1212_v22 = vmax.f32 %v1171_v3, %v1172_v16  ;;  %v871_v3 = vsel %vm6405_vm0, %v6117_v46, -1e+30  ;;  %v1477_v16 = vsel %vm6400_vm1, %v6025_v13, -1e+30 }
  0xd1   : > { %1508 = vmax.xlane.f32.xlu2 %v1507_v25  ;;  %v561_v25 = vsel %vm6313_vm11, %v6155_v0, -1e+30 }
  0xd2   : > { %1204 = vmax.xlane.f32.xlu0 %v1203_v33  ;;  %v562_v33 = vsel %vm6318_vm10, %v6157_v1, -1e+30  ;;  %vm6395_vm10 = vcmp.eq.s32.totalorder %v421_v36, %v6023_v12 }
  0xd3   : > { %1207 = vmax.xlane.f32.xlu1 %v1206_v34  ;;  %v866_v34 = vsel %vm6313_vm11, %v6115_v45, -1e+30  ;;  %v601_v41 = vmax.f32 %v561_v25, %v562_v33  ;;  %vm6390_vm11 = vcmp.eq.s32.totalorder %v421_v36, %v6021_v11  ;;  %v1176_v54 = vsel %vm6395_vm10, %v6019_v10, -1e+30  ;;  %v6445_v33 = vld [vmem:[#allocation5] sm:$0xff] }
  0xd4   : > { %v906_v43 = vmax.f32 %v866_v34, %v867_v35  ;;  %v1175_v53 = vsel %vm6390_vm11, %v6017_v9, -1e+30  ;;  %v1479_v20 = vsel %vm6390_vm11, %v6025_v13, -1e+30  ;;  %10612 = vst [vmem:[#allocation41_spill] sm:$0xff] %v6445_v33 }
  0xd5   : > { %v567_v34 = vsel %vm6390_vm11, %v6155_v0, -1e+30  ;;  %v568_v35 = vsel %vm6395_vm10, %v6157_v1, -1e+30  ;;  %v872_v36 = vsel %vm6390_vm11, %v6115_v45, -1e+30 }
  0xd9   : > { %904 = vmax.xlane.f32.xlu2 %v903_v44  ;;  %v909_v44 = vmax.f32 %v868_v39, %v869_v40  ;;  %v873_v39 = vsel %vm6395_vm10, %v6117_v46, -1e+30  ;;  %v6459_v40 = vld [vmem:[#allocation4] sm:$0xff] }
  0xda   : > { %1511 = vmax.xlane.f32.xlu0 %v1510_v47  ;;  %v10600_v47 = vmov 0 }
  0xdb   : > { %901 = vmax.xlane.f32.xlu1 %v900_v48  ;;  %v10601_v47 = vsel %vm6390_vm11, 4294967295, %v10600_v47  ;;  %v10603_v48 = vmov 0 }
  0xdc   : > { %10602 = vst [vmem:[#allocation37_spill] sm:$0xff] %v10601_v47  ;;  %v10604_v48 = vsel %vm6395_vm10, 4294967295, %v10603_v48 }
  0xdd   : > { %10605 = vst [vmem:[#allocation38_spill] sm:$0xff] %v10604_v48 }
  0xe1   : > { %1210 = vmax.xlane.f32.xlu2 %v1209_v58  ;;  %v1174_v58 = vsel %vm6405_vm0, %v6019_v10, -1e+30 }
  0xe2   : > { %596 = vmax.xlane.f32.xlu0 %v595_v59  ;;  %v1218_v59 = vmax.f32 %v1175_v53, %v1176_v54  ;;  %v1215_v63 = vmax.f32 %v1173_v57, %v1174_v58  ;;  %v566_v53 = vsel %vm6405_vm0, %v6157_v1, -1e+30  ;;  %v423_v57 = vadd.s32 104, %v6015_v8 }
  0xe3   : > { %599 = vmax.xlane.f32.xlu1 %v598_v60  ;;  %v604_v60 = vmax.f32 %v563_v55, %v564_v56  ;;  %v610_v55 = vmax.f32 %v567_v34, %v568_v35  ;;  %v6520_v35 = vld [vmem:[#allocation4 + $0x8] sm:$0xff] }
  0xe4   : > { %vm6502_vm15 = vcmp.eq.s32.totalorder %v423_v57, %v6023_v12 }
  0xe9   : > { %1517 = vmax.xlane.f32.xlu2 %v1516_v21  ;;  %v1480_v21 = vsel %vm6395_vm10, %v6027_v14, -1e+30  ;;  %vm641_vm10 = vcmask 7168  }
  0xea   : > { %1213 = vmax.xlane.f32.xlu0 %v1212_v22  ;;  %v912_v22 = vmax.f32 %v870_v2, %v871_v3  ;;  %v1522_v25 = vmax.f32 %v1479_v20, %v1480_v21  ;;  %v10614_v3 = vmov 0  ;;  %v10623_v20 = vmov 0  ;;  %v6506_v21 = vld [vmem:[#allocation5 + $0x8] sm:$0xff] }
  0xeb   : > { %1514 = vmax.xlane.f32.xlu1 %v1513_v23  ;;  %v1519_v23 = vmax.f32 %v1477_v16, %v1478_v19  ;;  %v10617_v16 = vmov 0  ;;  %v10620_v19 = vmov 0  ;;  %v10624_v20 = vsel %vm6502_vm15, 4294967295, %v10623_v20  ;;  %10626 = vst [vmem:[#allocation47_spill] sm:$0xff] %v6506_v21 }
  0xec   : > { %10625 = vst [vmem:[#allocation46_spill] sm:$0xff] %v10624_v20  ;;  %v10646_v20 = vmov 0 }
  0xf1   : > { %602 = vmax.xlane.f32.xlu2 %v601_v41  ;;  %v422_v41 = vadd.s32 96, %v6015_v8 }
  0xf2   : > { %907 = vmax.xlane.f32.xlu0 %v906_v43  ;;  %v6462_v43 = vld [vmem:[#allocation4 + $0x10] sm:$0xff] }
  0xf3   : > { %910 = vmax.xlane.f32.xlu1 %v909_v44  ;;  %v565_v44 = vsel %vm6400_vm1, %v6155_v0, -1e+30  ;;  %vm6483_vm11 = vcmp.eq.s32.totalorder %v422_v41, %v6021_v11  ;;  %vm6488_vm0 = vcmp.eq.s32.totalorder %v422_v41, %v6023_v12  ;;  %vm6497_vm1 = vcmp.eq.s32.totalorder %v423_v57, %v6021_v11 }
  0xf4   : > { %v607_v2 = vmax.f32 %v565_v44, %v566_v53  ;;  %v10615_v3 = vsel %vm6483_vm11, 4294967295, %v10614_v3  ;;  %v10618_v16 = vsel %vm6488_vm0, 4294967295, %v10617_v16  ;;  %v10621_v19 = vsel %vm6497_vm1, 4294967295, %v10620_v19 }
  0xf5   : > { %10616 = vst [vmem:[#allocation43_spill] sm:$0xff] %v10615_v3  ;;  %v1178_v34 = vsel %vm6488_vm0, %v6019_v10, -1e+30  ;;  %v1179_v41 = vsel %vm6497_vm1, %v6017_v9, -1e+30 }
  0xf6   : > { %10619 = vst [vmem:[#allocation44_spill] sm:$0xff] %v10618_v16  ;;  %v874_v5 = vsel %vm6483_vm11, %v6115_v45, -1e+30 }
  0xf7   : > { %10622 = vst [vmem:[#allocation45_spill] sm:$0xff] %v10621_v19 }
  0xf9   : > { %1219 = vmax.xlane.f32.xlu2 %v1218_v59  ;;  %v915_v59 = vmax.f32 %v872_v36, %v873_v39  ;;  %v6522_v39 = vld [vmem:[#allocation4 + $0x18] sm:$0xff] }
  0xfa   : > { %605 = vmax.xlane.f32.xlu0 %v604_v60 }
  0xfb   : > { %1216 = vmax.xlane.f32.xlu1 %v1215_v63 }
 0x101   : > { %913 = vmax.xlane.f32.xlu2 %v912_v22  ;;  %v1481_v22 = vsel %vm6483_vm11, %v6025_v13, -1e+30 }
 0x102   : > { %1520 = vmax.xlane.f32.xlu0 %v1519_v23  ;;  %v1482_v23 = vsel %vm6488_vm0, %v6027_v14, -1e+30 }
 0x103   : > { %1523 = vmax.xlane.f32.xlu1 %v1522_v25  ;;  %v1177_v25 = vsel %vm6483_vm11, %v6017_v9, -1e+30  ;;  %v1525_v53 = vmax.f32 %v1481_v22, %v1482_v23  ;;  %v6549_v23 = vld [vmem:[#allocation3] sm:$0xff] }
 0x104   : > { %v1491_v42 = vpop.xlane.xlu2 %1490  ;;  %v1221_v57 = vmax.f32 %v1177_v25, %v1178_v34  ;;  %10628 = vst [vmem:[#allocation49_spill] sm:$0xff] %v6549_v23  ;;  %v876_v25 = vsel %vm6497_vm1, %v6115_v45, -1e+30  ;;  %v877_v34 = vsel %vm6502_vm15, %v6117_v46, -1e+30 }
 0x105   : > { %v6471_v54 = vmax.f32 %v6445_v33, %v1491_v42  ;;  %v1187_v56 = vpop.xlane.xlu0 %1186  ;;  %v1180_v42 = vsel %vm6502_vm15, %v6019_v10, -1e+30 }
 0x106   : > { %v1193_v58 = vpop.xlane.xlu1 %1192  ;;  %v6475_v60 = vmax.f32 %v6459_v40, %v1187_v56 }
 0x107   : > { %10613 = vst [vmem:[#allocation42_spill] sm:$0xff] %v6471_v54  ;;  %v6480_v63 = vmax.f32 %v6462_v43, %v1193_v58 }
 0x108   : > { %1553 = vst.msk [vmem:[#allocation5] sm:$0xff] %vm641_vm10, %v6471_v54 }
 0x109   : > { %1249 = vst.msk [vmem:[#allocation4] sm:$0xff] %vm641_vm10, %v6475_v60  ;;  %611 = vmax.xlane.f32.xlu2 %v610_v55 }
 0x10a   : > { %1251 = vst.msk [vmem:[#allocation4 + $0x10] sm:$0xff] %vm641_vm10, %v6480_v63  ;;  %916 = vmax.xlane.f32.xlu0 %v915_v59 }
 0x10b   : > { %608 = vmax.xlane.f32.xlu1 %v607_v2  ;;  %v1224_v2 = vmax.f32 %v1179_v41, %v1180_v42  ;;  %v1483_v41 = vsel %vm6497_vm1, %v6025_v13, -1e+30  ;;  %v1484_v42 = vsel %vm6502_vm15, %v6027_v14, -1e+30 }
 0x10c   : > { %v1494_v36 = vpop.xlane.xlu2 %1493  ;;  %v1528_v52 = vmax.f32 %v1483_v41, %v1484_v42  ;;  %v425_v41 = vadd.s32 120, %v6015_v8 }
 0x10d   : > { %v6531_v44 = vmax.f32 %v6506_v21, %v1494_v36  ;;  %v1190_v55 = vpop.xlane.xlu0 %1189  ;;  %v921_v36 = vmax.f32 %v876_v25, %v877_v34  ;;  %v10637_v25 = vmov 0  ;;  %v569_v34 = vsel %vm6483_vm11, %v6155_v0, -1e+30 }
 0x10e   : > { %v1196_v56 = vpop.xlane.xlu1 %1195  ;;  %v6534_v58 = vmax.f32 %v6520_v35, %v1190_v55  ;;  %v424_v55 = vadd.s32 112, %v6015_v8 }
 0x10f   : > { %10627 = vst [vmem:[#allocation48_spill] sm:$0xff] %v6531_v44  ;;  %v6539_v59 = vmax.f32 %v6522_v39, %v1196_v56 }
 0x110   : > { %1554 = vst.msk [vmem:[#allocation5 + $0x8] sm:$0xff] %vm641_vm10, %v6531_v44  ;;  %vm6586_vm13 = vcmp.eq.s32.totalorder %v424_v55, %v6021_v11  ;;  %vm6591_vm14 = vcmp.eq.s32.totalorder %v424_v55, %v6023_v12  ;;  %v6616_v55 = vld [vmem:[#allocation3 + $0x10] sm:$0xff] }
 0x111   : > { %1250 = vst.msk [vmem:[#allocation4 + $0x8] sm:$0xff] %vm641_vm10, %v6534_v58  ;;  %1526 = vmax.xlane.f32.xlu2 %v1525_v53  ;;  %v6563_v53 = vld [vmem:[#allocation5 + $0x10] sm:$0xff]  ;;  %v10635_v50 = vsel %vm6586_vm13, 4294967295, %v10634_v50  ;;  %v10638_v25 = vsel %vm6591_vm14, 4294967295, %v10637_v25 }
 0x112   : > { %1252 = vst.msk [vmem:[#allocation4 + $0x18] sm:$0xff] %vm641_vm10, %v6539_v59  ;;  %1222 = vmax.xlane.f32.xlu0 %v1221_v57  ;;  %v6566_v57 = vld [vmem:[#allocation5 + $0x18] sm:$0xff] }
 0x113   : > { %1225 = vmax.xlane.f32.xlu1 %v1224_v2  ;;  %10629 = vst [vmem:[#allocation50_spill] sm:$0xff] %v6563_v53  ;;  %v875_v2 = vsel %vm6488_vm0, %v6117_v46, -1e+30 }
 0x114   : > { %v884_v56 = vpop.xlane.xlu2 %883  ;;  %10630 = vst [vmem:[#allocation51_spill] sm:$0xff] %v6566_v57  ;;  %v918_v21 = vmax.f32 %v874_v5, %v875_v2  ;;  %v1181_v5 = vsel %vm6586_vm13, %v6017_v9, -1e+30 }
 0x115   : > { %v6575_v22 = vmax.f32 %v6549_v23, %v884_v56  ;;  %v1497_v48 = vpop.xlane.xlu0 %1496  ;;  %10636 = vst [vmem:[#allocation55_spill] sm:$0xff] %v10635_v50  ;;  %v571_v56 = vsel %vm6497_vm1, %v6155_v0, -1e+30  ;;  %vm6636_vm1 = vcmp.eq.s32.totalorder %v425_v41, %v6021_v11  ;;  %v6651_v11 = vld [vmem:[#allocation2 + $0x10] sm:$0xff] }
 0x116   : > { %v1500_v47 = vpop.xlane.xlu1 %1499  ;;  %v6578_v51 = vmax.f32 %v6563_v53, %v1497_v48  ;;  %10639 = vst [vmem:[#allocation56_spill] sm:$0xff] %v10638_v25  ;;  %v1182_v48 = vsel %vm6591_vm14, %v6019_v10, -1e+30  ;;  %v10647_v20 = vsel %vm6636_vm1, 4294967295, %v10646_v20 }
 0x117   : > { %10631 = vst [vmem:[#allocation52_spill] sm:$0xff] %v6575_v22  ;;  %v6583_v33 = vmax.f32 %v6566_v57, %v1500_v47  ;;  %v6599_v47 = vld [vmem:[#allocation3 + $0x18] sm:$0xff]  ;;  %v1227_v16 = vmax.f32 %v1181_v5, %v1182_v48  ;;  %v10649_v5 = vmov 0  ;;  %v1183_v48 = vsel %vm6636_vm1, %v6017_v9, -1e+30 }
 0x118   : > { %10632 = vst [vmem:[#allocation53_spill] sm:$0xff] %v6578_v51 }
 0x119   : > { %946 = vst.msk [vmem:[#allocation3] sm:$0xff] %vm641_vm10, %v6575_v22  ;;  %922 = vmax.xlane.f32.xlu2 %v921_v36  ;;  %v570_v36 = vsel %vm6488_vm0, %v6157_v1, -1e+30 }
 0x11a   : > { %10633 = vst [vmem:[#allocation54_spill] sm:$0xff] %v6583_v33  ;;  %1529 = vmax.xlane.f32.xlu0 %v1528_v52  ;;  %v6613_v52 = vld [vmem:[#allocation3 + $0x8] sm:$0xff]  ;;  %v613_v57 = vmax.f32 %v569_v34, %v570_v36 }
 0x11b   : > { %1555 = vst.msk [vmem:[#allocation5 + $0x10] sm:$0xff] %vm641_vm10, %v6578_v51  ;;  %919 = vmax.xlane.f32.xlu1 %v918_v21  ;;  %v572_v21 = vsel %vm6502_vm15, %v6157_v1, -1e+30  ;;  %vm6641_vm15 = vcmp.eq.s32.totalorder %v425_v41, %v6023_v12  ;;  %v1487_v12 = vsel %vm6636_vm1, %v6025_v13, -1e+30  ;;  %v6667_v36 = vld [vmem:[#allocation2 + $0x8] sm:$0xff] }
 0x11c   : > { %1556 = vst.msk [vmem:[#allocation5 + $0x18] sm:$0xff] %vm641_vm10, %v6583_v33  ;;  %v893_v42 = vpop.xlane.xlu2 %892  ;;  %v616_v53 = vmax.f32 %v571_v56, %v572_v21  ;;  %v10650_v5 = vsel %vm6641_vm15, 4294967295, %v10649_v5  ;;  %v1485_v41 = vsel %vm6586_vm13, %v6025_v13, -1e+30 }
 0x11d   : > { %10640 = vst [vmem:[#allocation57_spill] sm:$0xff] %v6599_v47  ;;  %v6625_v2 = vmax.f32 %v6599_v47, %v893_v42  ;;  %v887_v3 = vpop.xlane.xlu0 %886 }
 0x11e   : > { %10641 = vst [vmem:[#allocation58_spill] sm:$0xff] %v6613_v52  ;;  %v890_v23 = vpop.xlane.xlu1 %889  ;;  %v6628_v8 = vmax.f32 %v6613_v52, %v887_v3 }
 0x11f   : > { %10642 = vst [vmem:[#allocation59_spill] sm:$0xff] %v6616_v55  ;;  %v6633_v19 = vmax.f32 %v6616_v55, %v890_v23  ;;  %v1488_v23 = vsel %vm6641_vm15, %v6027_v14, -1e+30 }
 0x120   : > { %10643 = vst [vmem:[#allocation60_spill] sm:$0xff] %v6625_v2  ;;  %v1534_v56 = vmax.f32 %v1487_v12, %v1488_v23  ;;  %v5735_v12 = vmov 0   ;;  %v6692_v23 = vld [vmem:[#allocation4 + $0x28] sm:$0xff] }
 0x121   : > { %10644 = vst [vmem:[#allocation61_spill] sm:$0xff] %v6628_v8  ;;  %1228 = vmax.xlane.f32.xlu2 %v1227_v16  ;;  %v1184_v16 = vsel %vm6641_vm15, %v6019_v10, -1e+30  ;;  %5607 = vset.pattern.permute.xlu1 %v5735_v12 }
 0x122   : > { %949 = vst.msk [vmem:[#allocation3 + $0x18] sm:$0xff] %vm641_vm10, %v6625_v2  ;;  %614 = vmax.xlane.f32.xlu0 %v613_v57  ;;  %v6665_v57 = vld [vmem:[#allocation2] sm:$0xff]  ;;  %v1230_v10 = vmax.f32 %v1183_v48, %v1184_v16  ;;  %v574_v48 = vsel %vm6591_vm14, %v6157_v1, -1e+30  ;;  %5608 = vset.pattern.permute.xlu2 %v5735_v12  ;;  %v878_v16 = vsel %vm6586_vm13, %v6115_v45, -1e+30 }
 0x123   : > { %10645 = vst [vmem:[#allocation62_spill] sm:$0xff] %v6633_v19  ;;  %617 = vmax.xlane.f32.xlu1 %v616_v53  ;;  %v1486_v53 = vsel %vm6591_vm14, %v6027_v14, -1e+30  ;;  %5609 = vset.pattern.permute.xlu0 %v5735_v12 }
 0x124   : > { %10648 = vst [vmem:[#allocation63_spill] sm:$0xff] %v10647_v20  ;;  %v585_v34 = vpop.xlane.xlu2 %584  ;;  %v1531_v13 = vmax.f32 %v1485_v41, %v1486_v53  ;;  %v6708_v53 = vld [vmem:[#allocation4 + $0x20] sm:$0xff] }
 0x125   : > { %10651 = vst [vmem:[#allocation64_spill] sm:$0xff] %v10650_v5  ;;  %v6676_v42 = vmax.f32 %v6651_v11, %v585_v34  ;;  %v579_v21 = vpop.xlane.xlu0 %578  ;;  %v6706_v34 = vld [vmem:[#allocation2 + $0x18] sm:$0xff] }
 0x126   : > { %947 = vst.msk [vmem:[#allocation3 + $0x8] sm:$0xff] %vm641_vm10, %v6628_v8  ;;  %v582_v3 = vpop.xlane.xlu1 %581  ;;  %v6679_v9 = vmax.f32 %v6665_v57, %v579_v21  ;;  %v881_v21 = vsel %vm6641_vm15, %v6117_v46, -1e+30  ;;  %v6789_v5 = vld [vmem:[#allocation4 + $0x38] sm:$0xff] }
 0x127   : > { %948 = vst.msk [vmem:[#allocation3 + $0x10] sm:$0xff] %vm641_vm10, %v6633_v19  ;;  %v6684_v52 = vmax.f32 %v6667_v36, %v582_v3  ;;  %v573_v3 = vsel %vm6586_vm13, %v6155_v0, -1e+30  ;;  %v10821_v18 = vld [vmem:[#allocation60_spill] sm:$0xff] }
 0x128   : > { %10652 = vst [vmem:[#allocation65_spill] sm:$0xff] %v6651_v11  ;;  %v619_v14 = vmax.f32 %v573_v3, %v574_v48  ;;  %v576_v3 = vsel %vm6641_vm15, %v6157_v1, -1e+30  ;;  %v6741_v48 = vld [vmem:[#allocation5 + $0x20] sm:$0xff] }
 0x129   : > { %10653 = vst [vmem:[#allocation66_spill] sm:$0xff] %v6665_v57  ;;  %1535 = vmax.xlane.f32.xlu2 %v1534_v56  ;;  %v880_v56 = vsel %vm6636_vm1, %v6115_v45, -1e+30 }
 0x12a   : > { %10654 = vst [vmem:[#allocation67_spill] sm:$0xff] %v6667_v36  ;;  %1231 = vmax.xlane.f32.xlu0 %v1230_v10  ;;  %v879_v10 = vsel %vm6591_vm14, %v6117_v46, -1e+30  ;;  %v927_v45 = vmax.f32 %v880_v56, %v881_v21 }
 0x12b   : > { %10655 = vst [vmem:[#allocation68_spill] sm:$0xff] %v6676_v42  ;;  %1532 = vmax.xlane.f32.xlu1 %v1531_v13  ;;  %v924_v25 = vmax.f32 %v878_v16, %v879_v10  ;;  %v6743_v10 = vld [vmem:[#allocation5 + $0x28] sm:$0xff] }
 0x12c   : > { %10656 = vst [vmem:[#allocation69_spill] sm:$0xff] %v6679_v9  ;;  %v1202_v41 = vpop.xlane.xlu2 %1201 }
 0x12d   : > { %644 = vst.msk [vmem:[#allocation2 + $0x10] sm:$0xff] %vm641_vm10, %v6676_v42  ;;  %v6717_v13 = vmax.f32 %v6692_v23, %v1202_v41  ;;  %v588_v36 = vpop.xlane.xlu0 %587 }
 0x12e   : > { %10657 = vst [vmem:[#allocation70_spill] sm:$0xff] %v6684_v52  ;;  %v1199_v57 = vpop.xlane.xlu1 %1198  ;;  %v6720_v12 = vmax.f32 %v6706_v34, %v588_v36  ;;  %v6733_v36 = vld [vmem:[#allocation3 + $0x20] sm:$0xff] }
 0x12f   : > { %642 = vst.msk [vmem:[#allocation2] sm:$0xff] %vm641_vm10, %v6679_v9  ;;  %v6725_v50 = vmax.f32 %v6708_v53, %v1199_v57  ;;  %v575_v57 = vsel %vm6636_vm1, %v6155_v0, -1e+30 }
 0x130   : > { %643 = vst.msk [vmem:[#allocation2 + $0x8] sm:$0xff] %vm641_vm10, %v6684_v52  ;;  %v622_v56 = vmax.f32 %v575_v57, %v576_v3  ;;  %v6762_v57 = vld [vmem:[#allocation2 + $0x28] sm:$0xff] }
 0x131   : > { %10658 = vst [vmem:[#allocation71_spill] sm:$0xff] %v6706_v34  ;;  %620 = vmax.xlane.f32.xlu2 %v619_v14  ;;  %v6764_v3 = vld [vmem:[#allocation3 + $0x28] sm:$0xff] }
 0x132   : > { %10659 = vst [vmem:[#allocation72_spill] sm:$0xff] %v6708_v53  ;;  %925 = vmax.xlane.f32.xlu0 %v924_v25 }
 0x133   : > { %10660 = vst [vmem:[#allocation73_spill] sm:$0xff] %v6720_v12  ;;  %928 = vmax.xlane.f32.xlu1 %v927_v45 }
 0x134   : > { %1254 = vst.msk [vmem:[#allocation4 + $0x28] sm:$0xff] %vm641_vm10, %v6717_v13  ;;  %v896_v16 = vpop.xlane.xlu2 %895 }
 0x135   : > { %645 = vst.msk [vmem:[#allocation2 + $0x18] sm:$0xff] %vm641_vm10, %v6720_v12  ;;  %v6746_v41 = vmax.f32 %v6733_v36, %v896_v16  ;;  %v1503_v25 = vpop.xlane.xlu0 %1502 }
 0x136   : > { %1253 = vst.msk [vmem:[#allocation4 + $0x20] sm:$0xff] %vm641_vm10, %v6725_v50  ;;  %v1506_v14 = vpop.xlane.xlu1 %1505  ;;  %v6749_v21 = vmax.f32 %v6741_v48, %v1503_v25  ;;  %v6766_v25 = vld [vmem:[#allocation2 + $0x20] sm:$0xff] }
 0x137   : > { %10661 = vst [vmem:[#allocation74_spill] sm:$0xff] %v6733_v36  ;;  %v6754_v45 = vmax.f32 %v6743_v10, %v1506_v14 }
 0x138   : > { %10662 = vst [vmem:[#allocation75_spill] sm:$0xff] %v6741_v48 }
 0x139   : > { %10663 = vst [vmem:[#allocation76_spill] sm:$0xff] %v6743_v10 }
 0x13a   : > { %10664 = vst [vmem:[#allocation77_spill] sm:$0xff] %v6746_v41  ;;  %623 = vmax.xlane.f32.xlu0 %v622_v56 }
 0x13b   : > { %10665 = vst [vmem:[#allocation78_spill] sm:$0xff] %v6749_v21 }
 0x13c   : > { %950 = vst.msk [vmem:[#allocation3 + $0x20] sm:$0xff] %vm641_vm10, %v6746_v41  ;;  %v594_v16 = vpop.xlane.xlu2 %593 }
 0x13d   : > { %10666 = vst [vmem:[#allocation79_spill] sm:$0xff] %v6754_v45  ;;  %v6769_v14 = vmax.f32 %v6762_v57, %v594_v16  ;;  %v899_v34 = vpop.xlane.xlu0 %898  ;;  %v6785_v16 = vld [vmem:[#allocation5 + $0x30] sm:$0xff] }
 0x13e   : > { %1557 = vst.msk [vmem:[#allocation5 + $0x20] sm:$0xff] %vm641_vm10, %v6749_v21  ;;  %v591_v1 = vpop.xlane.xlu1 %590  ;;  %v6772_v0 = vmax.f32 %v6764_v3, %v899_v34 }
 0x13f   : > { %1558 = vst.msk [vmem:[#allocation5 + $0x28] sm:$0xff] %vm641_vm10, %v6754_v45  ;;  %v6777_v56 = vmax.f32 %v6766_v25, %v591_v1 }
 0x140   : > { %10667 = vst [vmem:[#allocation80_spill] sm:$0xff] %v6762_v57  ;;  %v6787_v57 = vld [vmem:[#allocation4 + $0x30] sm:$0xff] }
 0x141   : > { %10668 = vst [vmem:[#allocation81_spill] sm:$0xff] %v6764_v3 }
 0x142   : > { %10669 = vst [vmem:[#allocation82_spill] sm:$0xff] %v6766_v25 }
 0x143   : > { %10670 = vst [vmem:[#allocation83_spill] sm:$0xff] %v6769_v14 }
 0x144   : > { %10671 = vst [vmem:[#allocation84_spill] sm:$0xff] %v6772_v0  ;;  %v1509_v34 = vpop.xlane.xlu2 %1508 }
 0x145   : > { %647 = vst.msk [vmem:[#allocation2 + $0x28] sm:$0xff] %vm641_vm10, %v6769_v14  ;;  %v6792_v20 = vmax.f32 %v6785_v16, %v1509_v34  ;;  %v1205_v1 = vpop.xlane.xlu0 %1204  ;;  %v6809_v34 = vld [vmem:[#allocation3 + $0x38] sm:$0xff] }
 0x146   : > { %10672 = vst [vmem:[#allocation85_spill] sm:$0xff] %v6777_v56  ;;  %v1208_v25 = vpop.xlane.xlu1 %1207  ;;  %v6795_v36 = vmax.f32 %v6787_v57, %v1205_v1  ;;  %v6811_v1 = vld [vmem:[#allocation5 + $0x38] sm:$0xff] }
 0x147   : > { %951 = vst.msk [vmem:[#allocation3 + $0x28] sm:$0xff] %vm641_vm10, %v6772_v0  ;;  %v6800_v46 = vmax.f32 %v6789_v5, %v1208_v25  ;;  %v6814_v25 = vld [vmem:[#allocation3 + $0x30] sm:$0xff] }
 0x148   : > { %646 = vst.msk [vmem:[#allocation2 + $0x20] sm:$0xff] %vm641_vm10, %v6777_v56 }
 0x149   : > { %10673 = vst [vmem:[#allocation86_spill] sm:$0xff] %v6785_v16  ;;  %1288 = vperm.xlu2 %5608, %v6534_v58  }
 0x14a   : > { %10674 = vst [vmem:[#allocation87_spill] sm:$0xff] %v6787_v57 }
 0x14b   : > { %10675 = vst [vmem:[#allocation88_spill] sm:$0xff] %v6789_v5 }
 0x14c   : > { %10676 = vst [vmem:[#allocation89_spill] sm:$0xff] %v6792_v20  ;;  %1283 = vperm.xlu1 %5607, %v6475_v60   ;;  %v905_v11 = vpop.xlane.xlu2 %904 }
 0x14d   : > { %10677 = vst [vmem:[#allocation90_spill] sm:$0xff] %v6795_v36  ;;  %v6817_v55 = vmax.f32 %v6809_v34, %v905_v11  ;;  %v1512_v47 = vpop.xlane.xlu0 %1511 }
 0x14e   : > { %1559 = vst.msk [vmem:[#allocation5 + $0x30] sm:$0xff] %vm641_vm10, %v6792_v20  ;;  %v902_v16 = vpop.xlane.xlu1 %901  ;;  %1293 = vperm.xlu0 %5609, %v6480_v63   ;;  %v6821_v3 = vmax.f32 %v6811_v1, %v1512_v47  ;;  %v6837_v47 = vld [vmem:[#allocation2 + $0x30] sm:$0xff] }
 0x14f   : > { %10678 = vst [vmem:[#allocation91_spill] sm:$0xff] %v6800_v46  ;;  %v6826_v10 = vmax.f32 %v6814_v25, %v902_v16  ;;  %v6840_v16 = vld [vmem:[#allocation2 + $0x38] sm:$0xff] }
 0x150   : > { %1255 = vst.msk [vmem:[#allocation4 + $0x30] sm:$0xff] %vm641_vm10, %v6795_v36 }
 0x151   : > { %1256 = vst.msk [vmem:[#allocation4 + $0x38] sm:$0xff] %vm641_vm10, %v6800_v46  ;;  %1298 = vperm.xlu2 %5608, %v6539_v59  }
 0x152   : > { %10679 = vst [vmem:[#allocation92_spill] sm:$0xff] %v6809_v34  ;;  %v6835_v34 = vld [vmem:[#allocation4 + $0x40] sm:$0xff] }
 0x153   : > { %10680 = vst [vmem:[#allocation93_spill] sm:$0xff] %v6811_v1 }
 0x154   : > { %10681 = vst [vmem:[#allocation94_spill] sm:$0xff] %v6814_v25  ;;  %1587 = vperm.xlu1 %5607, %v6471_v54   ;;  %v1211_v48 = vpop.xlane.xlu2 %1210 }
 0x155   : > { %10682 = vst [vmem:[#allocation95_spill] sm:$0xff] %v6817_v55  ;;  %v6843_v25 = vmax.f32 %v6835_v34, %v1211_v48  ;;  %v597_v49 = vpop.xlane.xlu0 %596 }
 0x156   : > { %10683 = vst [vmem:[#allocation96_spill] sm:$0xff] %v6821_v3  ;;  %v600_v5 = vpop.xlane.xlu1 %599  ;;  %985 = vperm.xlu0 %5609, %v6628_v8   ;;  %v6847_v11 = vmax.f32 %v6837_v47, %v597_v49  ;;  %v6861_v8 = vld [vmem:[#allocation5 + $0x48] sm:$0xff] }
 0x157   : > { %953 = vst.msk [vmem:[#allocation3 + $0x38] sm:$0xff] %vm641_vm10, %v6817_v55  ;;  %v6852_v1 = vmax.f32 %v6840_v16, %v600_v5  ;;  %v6863_v49 = vld [vmem:[#allocation4 + $0x48] sm:$0xff]  ;;  %v6866_v5 = vld [vmem:[#allocation5 + $0x40] sm:$0xff] }
 0x158   : > { %10684 = vst [vmem:[#allocation97_spill] sm:$0xff] %v6826_v10 }
 0x159   : > { %1560 = vst.msk [vmem:[#allocation5 + $0x38] sm:$0xff] %vm641_vm10, %v6821_v3  ;;  %1592 = vperm.xlu2 %5608, %v6531_v44  }
 0x15a   : > { %952 = vst.msk [vmem:[#allocation3 + $0x30] sm:$0xff] %vm641_vm10, %v6826_v10 }
 0x15b   : > { %10685 = vst [vmem:[#allocation98_spill] sm:$0xff] %v6837_v47 }
 0x15c   : > { %10686 = vst [vmem:[#allocation99_spill] sm:$0xff] %v6840_v16  ;;  %1597 = vperm.xlu1 %5607, %v6578_v51   ;;  %v1518_v54 = vpop.xlane.xlu2 %1517 }
 0x15d   : > { %10687 = vst [vmem:[#allocation100_spill] sm:$0xff] %v6847_v11  ;;  %v6869_v16 = vmax.f32 %v6861_v8, %v1518_v54  ;;  %v1214_v57 = vpop.xlane.xlu0 %1213 }
 0x15e   : > { %1257 = vst.msk [vmem:[#allocation4 + $0x40] sm:$0xff] %vm641_vm10, %v6843_v25  ;;  %v1515_v62 = vpop.xlane.xlu1 %1514  ;;  %676 = vperm.xlu0 %5609, %v6679_v9   ;;  %v6873_v48 = vmax.f32 %v6863_v49, %v1214_v57  ;;  %v6887_v9 = vld [vmem:[#allocation2 + $0x40] sm:$0xff] }
 0x15f   : > { %10688 = vst [vmem:[#allocation101_spill] sm:$0xff] %v6852_v1  ;;  %v6878_v47 = vmax.f32 %v6866_v5, %v1515_v62  ;;  %v6889_v57 = vld [vmem:[#allocation3 + $0x40] sm:$0xff]  ;;  %v6892_v62 = vld [vmem:[#allocation3 + $0x48] sm:$0xff] }
 0x160   : > { %648 = vst.msk [vmem:[#allocation2 + $0x30] sm:$0xff] %vm641_vm10, %v6847_v11  ;;  %v10831_v37 = vld [vmem:[#allocation97_spill] sm:$0xff] }
 0x161   : > { %649 = vst.msk [vmem:[#allocation2 + $0x38] sm:$0xff] %vm641_vm10, %v6852_v1  ;;  %1602 = vperm.xlu2 %5608, %v6583_v33  }
 0x162   : > { %10689 = vst [vmem:[#allocation102_spill] sm:$0xff] %v6861_v8 }
 0x163   : > { %10690 = vst [vmem:[#allocation103_spill] sm:$0xff] %v6863_v49 }
 0x164   : > { %10691 = vst [vmem:[#allocation104_spill] sm:$0xff] %v6866_v5  ;;  %980 = vperm.xlu1 %5607, %v6575_v22   ;;  %v603_v8 = vpop.xlane.xlu2 %602 }
 0x165   : > { %10692 = vst [vmem:[#allocation105_spill] sm:$0xff] %v6869_v16  ;;  %v6895_v5 = vmax.f32 %v6887_v9, %v603_v8  ;;  %v908_v51 = vpop.xlane.xlu0 %907 }
 0x166   : > { %10693 = vst [vmem:[#allocation106_spill] sm:$0xff] %v6873_v48  ;;  %v911_v44 = vpop.xlane.xlu1 %910  ;;  %691 = vperm.xlu0 %5609, %v6720_v12   ;;  %v6899_v54 = vmax.f32 %v6889_v57, %v908_v51  ;;  %v6913_v12 = vld [vmem:[#allocation4 + $0x58] sm:$0xff]  ;;  %v6915_v51 = vld [vmem:[#allocation2 + $0x48] sm:$0xff] }
 0x167   : > { %1562 = vst.msk [vmem:[#allocation5 + $0x48] sm:$0xff] %vm641_vm10, %v6869_v16  ;;  %v6904_v33 = vmax.f32 %v6892_v62, %v911_v44  ;;  %v6918_v44 = vld [vmem:[#allocation4 + $0x50] sm:$0xff] }
 0x168   : > { %10694 = vst [vmem:[#allocation107_spill] sm:$0xff] %v6878_v47 }
 0x169   : > { %1258 = vst.msk [vmem:[#allocation4 + $0x48] sm:$0xff] %vm641_vm10, %v6873_v48  ;;  %990 = vperm.xlu2 %5608, %v6633_v19   ;;  %v6939_v19 = vld [vmem:[#allocation3 + $0x50] sm:$0xff] }
 0x16a   : > { %1561 = vst.msk [vmem:[#allocation5 + $0x40] sm:$0xff] %vm641_vm10, %v6878_v47 }
 0x16b   : > { %10695 = vst [vmem:[#allocation108_spill] sm:$0xff] %v6887_v9 }
 0x16c   : > { %10696 = vst [vmem:[#allocation109_spill] sm:$0xff] %v6889_v57  ;;  %995 = vperm.xlu1 %5607, %v6625_v2   ;;  %v1220_v9 = vpop.xlane.xlu2 %1219 }
 0x16d   : > { %10697 = vst [vmem:[#allocation110_spill] sm:$0xff] %v6892_v62  ;;  %v6921_v62 = vmax.f32 %v6913_v12, %v1220_v9  ;;  %v606_v22 = vpop.xlane.xlu0 %605 }
 0x16e   : > { %10698 = vst [vmem:[#allocation111_spill] sm:$0xff] %v6895_v5  ;;  %v1217_v49 = vpop.xlane.xlu1 %1216  ;;  %1607 = vperm.xlu0 %5609, %v6749_v21   ;;  %v6925_v8 = vmax.f32 %v6915_v51, %v606_v22  ;;  %v6941_v22 = vld [vmem:[#allocation5 + $0x50] sm:$0xff] }
 0x16f   : > { %10699 = vst [vmem:[#allocation112_spill] sm:$0xff] %v6899_v54  ;;  %v6930_v57 = vmax.f32 %v6918_v44, %v1217_v49  ;;  %v6944_v49 = vld [vmem:[#allocation5 + $0x58] sm:$0xff] }
 0x170   : > { %650 = vst.msk [vmem:[#allocation2 + $0x40] sm:$0xff] %vm641_vm10, %v6895_v5 }
 0x171   : > { %10700 = vst [vmem:[#allocation113_spill] sm:$0xff] %v6904_v33  ;;  %681 = vperm.xlu2 %5608, %v6684_v52   ;;  %v6965_v52 = vld [vmem:[#allocation2 + $0x58] sm:$0xff] }
 0x172   : > { %954 = vst.msk [vmem:[#allocation3 + $0x40] sm:$0xff] %vm641_vm10, %v6899_v54 }
 0x173   : > { %955 = vst.msk [vmem:[#allocation3 + $0x48] sm:$0xff] %vm641_vm10, %v6904_v33 }
 0x174   : > { %10701 = vst [vmem:[#allocation114_spill] sm:$0xff] %v6913_v12  ;;  %686 = vperm.xlu1 %5607, %v6676_v42   ;;  %v914_v2 = vpop.xlane.xlu2 %913 }
 0x175   : > { %10702 = vst [vmem:[#allocation115_spill] sm:$0xff] %v6915_v51  ;;  %v6947_v21 = vmax.f32 %v6939_v19, %v914_v2 }
 0x176   : > { %10703 = vst [vmem:[#allocation116_spill] sm:$0xff] %v6918_v44  ;;  %v1521_v44 = vpop.xlane.xlu0 %1520  ;;  %v1524_v61 = vpop.xlane.xlu1 %1523  ;;  %1005 = vperm.xlu0 %5609, %v6772_v0  }
 0x177   : > { %10704 = vst [vmem:[#allocation117_spill] sm:$0xff] %v6921_v62  ;;  %v6951_v9 = vmax.f32 %v6941_v22, %v1521_v44  ;;  %v6956_v51 = vmax.f32 %v6944_v49, %v1524_v61  ;;  %v6967_v44 = vld [vmem:[#allocation3 + $0x58] sm:$0xff]  ;;  %v6970_v61 = vld [vmem:[#allocation2 + $0x50] sm:$0xff] }
 0x178   : > { %10705 = vst [vmem:[#allocation118_spill] sm:$0xff] %v6925_v8 }
 0x179   : > { %1260 = vst.msk [vmem:[#allocation4 + $0x58] sm:$0xff] %vm641_vm10, %v6921_v62  ;;  %1303 = vperm.xlu2 %5608, %v6725_v50  }
 0x17a   : > { %10706 = vst [vmem:[#allocation119_spill] sm:$0xff] %v6930_v57 }
 0x17b   : > { %651 = vst.msk [vmem:[#allocation2 + $0x48] sm:$0xff] %vm641_vm10, %v6925_v8 }
 0x17c   : > { %1259 = vst.msk [vmem:[#allocation4 + $0x50] sm:$0xff] %vm641_vm10, %v6930_v57  ;;  %1308 = vperm.xlu1 %5607, %v6717_v13   ;;  %v612_v0 = vpop.xlane.xlu2 %611 }
 0x17d   : > { %10707 = vst [vmem:[#allocation120_spill] sm:$0xff] %v6939_v19  ;;  %v6973_v19 = vmax.f32 %v6965_v52, %v612_v0 }
 0x17e   : > { %10708 = vst [vmem:[#allocation121_spill] sm:$0xff] %v6941_v22  ;;  %v917_v42 = vpop.xlane.xlu0 %916  ;;  %1313 = vperm.xlu0 %5609, %v6795_v36  }
 0x17f   : > { %10709 = vst [vmem:[#allocation122_spill] sm:$0xff] %v6944_v49  ;;  %v609_v49 = vpop.xlane.xlu1 %608  ;;  %v6977_v2 = vmax.f32 %v6967_v44, %v917_v42  ;;  %v6993_v42 = vld [vmem:[#allocation4 + $0x60] sm:$0xff] }
 0x180   : > { %10710 = vst [vmem:[#allocation123_spill] sm:$0xff] %v6947_v21  ;;  %v6982_v22 = vmax.f32 %v6970_v61, %v609_v49  ;;  %v6996_v49 = vld [vmem:[#allocation4 + $0x68] sm:$0xff] }
 0x181   : > { %10711 = vst [vmem:[#allocation124_spill] sm:$0xff] %v6951_v9  ;;  %1612 = vperm.xlu2 %5608, %v6754_v45  }
 0x182   : > { %956 = vst.msk [vmem:[#allocation3 + $0x50] sm:$0xff] %vm641_vm10, %v6947_v21 }
 0x183   : > { %10712 = vst [vmem:[#allocation125_spill] sm:$0xff] %v6956_v51 }
 0x184   : > { %1563 = vst.msk [vmem:[#allocation5 + $0x50] sm:$0xff] %vm641_vm10, %v6951_v9  ;;  %1000 = vperm.xlu1 %5607, %v6746_v41   ;;  %v1527_v36 = vpop.xlane.xlu2 %1526  ;;  %v7017_v41 = vld [vmem:[#allocation3 + $0x68] sm:$0xff] }
 0x185   : > { %1564 = vst.msk [vmem:[#allocation5 + $0x58] sm:$0xff] %vm641_vm10, %v6956_v51 }
 0x186   : > { %10713 = vst [vmem:[#allocation126_spill] sm:$0xff] %v6965_v52  ;;  %v6991_v52 = vld [vmem:[#allocation5 + $0x60] sm:$0xff]  ;;  %v1223_v12 = vpop.xlane.xlu0 %1222  ;;  %1622 = vperm.xlu0 %5609, %v6821_v3  }
 0x187   : > { %10714 = vst [vmem:[#allocation127_spill] sm:$0xff] %v6967_v44  ;;  %v1226_v53 = vpop.xlane.xlu1 %1225  ;;  %v7003_v0 = vmax.f32 %v6993_v42, %v1223_v12  ;;  %v7019_v12 = vld [vmem:[#allocation5 + $0x68] sm:$0xff] }
 0x188   : > { %10715 = vst [vmem:[#allocation128_spill] sm:$0xff] %v6970_v61  ;;  %v6999_v61 = vmax.f32 %v6991_v52, %v1527_v36  ;;  %v7008_v44 = vmax.f32 %v6996_v49, %v1226_v53  ;;  %v7022_v53 = vld [vmem:[#allocation3 + $0x60] sm:$0xff] }
 0x189   : > { %10716 = vst [vmem:[#allocation129_spill] sm:$0xff] %v6973_v19  ;;  %696 = vperm.xlu2 %5608, %v6777_v56  }
 0x18a   : > { %10717 = vst [vmem:[#allocation130_spill] sm:$0xff] %v6977_v2 }
 0x18b   : > { %653 = vst.msk [vmem:[#allocation2 + $0x58] sm:$0xff] %vm641_vm10, %v6973_v19 }
 0x18c   : > { %10718 = vst [vmem:[#allocation131_spill] sm:$0xff] %v6982_v22  ;;  %701 = vperm.xlu1 %5607, %v6769_v14  }
 0x18d   : > { %957 = vst.msk [vmem:[#allocation3 + $0x58] sm:$0xff] %vm641_vm10, %v6977_v2 }
 0x18e   : > { %652 = vst.msk [vmem:[#allocation2 + $0x50] sm:$0xff] %vm641_vm10, %v6982_v22  ;;  %v1530_v3 = vpop.xlane.xlu0 %1529  ;;  %706 = vperm.xlu0 %5609, %v6847_v11   ;;  %v7043_v11 = vld [vmem:[#allocation4 + $0x70] sm:$0xff] }
 0x18f   : > { %10719 = vst [vmem:[#allocation132_spill] sm:$0xff] %v6991_v52  ;;  %v923_v52 = vpop.xlane.xlu2 %922  ;;  %v7029_v36 = vmax.f32 %v7019_v12, %v1530_v3  ;;  %v7045_v3 = vld [vmem:[#allocation2 + $0x60] sm:$0xff] }
 0x190   : > { %10720 = vst [vmem:[#allocation133_spill] sm:$0xff] %v6993_v42  ;;  %v7025_v45 = vmax.f32 %v7017_v41, %v923_v52 }
 0x191   : > { %10721 = vst [vmem:[#allocation134_spill] sm:$0xff] %v6996_v49  ;;  %v920_v49 = vpop.xlane.xlu1 %919  ;;  %1318 = vperm.xlu2 %5608, %v6800_v46  }
 0x192   : > { %10722 = vst [vmem:[#allocation135_spill] sm:$0xff] %v6999_v61  ;;  %v7034_v56 = vmax.f32 %v7022_v53, %v920_v49  ;;  %v7048_v49 = vld [vmem:[#allocation2 + $0x68] sm:$0xff] }
 0x193   : > { %10723 = vst [vmem:[#allocation136_spill] sm:$0xff] %v7003_v0 }
 0x194   : > { %1565 = vst.msk [vmem:[#allocation5 + $0x60] sm:$0xff] %vm641_vm10, %v6999_v61  ;;  %1617 = vperm.xlu1 %5607, %v6792_v20   ;;  %v7069_v20 = vld [vmem:[#allocation5 + $0x78] sm:$0xff] }
 0x195   : > { %10724 = vst [vmem:[#allocation137_spill] sm:$0xff] %v7008_v44 }
 0x196   : > { %1261 = vst.msk [vmem:[#allocation4 + $0x60] sm:$0xff] %vm641_vm10, %v7003_v0  ;;  %1328 = vperm.xlu0 %5609, %v6873_v48  }
 0x197   : > { %1262 = vst.msk [vmem:[#allocation4 + $0x68] sm:$0xff] %vm641_vm10, %v7008_v44  ;;  %v1229_v14 = vpop.xlane.xlu2 %1228 }
 0x198   : > { %10725 = vst [vmem:[#allocation138_spill] sm:$0xff] %v7017_v41  ;;  %v7051_v41 = vmax.f32 %v7043_v11, %v1229_v14 }
 0x199   : > { %10726 = vst [vmem:[#allocation139_spill] sm:$0xff] %v7019_v12  ;;  %v618_v42 = vpop.xlane.xlu1 %617  ;;  %1010 = vperm.xlu2 %5608, %v6826_v10  }
 0x19a   : > { %10727 = vst [vmem:[#allocation140_spill] sm:$0xff] %v7022_v53  ;;  %v615_v53 = vpop.xlane.xlu0 %614  ;;  %v7060_v12 = vmax.f32 %v7048_v49, %v618_v42  ;;  %v7074_v42 = vld [vmem:[#allocation5 + $0x70] sm:$0xff] }
 0x19b   : > { %10728 = vst [vmem:[#allocation141_spill] sm:$0xff] %v7025_v45  ;;  %v7055_v52 = vmax.f32 %v7045_v3, %v615_v53  ;;  %v7071_v53 = vld [vmem:[#allocation4 + $0x78] sm:$0xff] }
 0x19c   : > { %10729 = vst [vmem:[#allocation142_spill] sm:$0xff] %v7029_v36  ;;  %1015 = vperm.xlu1 %5607, %v6817_v55  }
 0x19d   : > { %959 = vst.msk [vmem:[#allocation3 + $0x68] sm:$0xff] %vm641_vm10, %v7025_v45 }
 0x19e   : > { %1566 = vst.msk [vmem:[#allocation5 + $0x68] sm:$0xff] %vm641_vm10, %v7029_v36  ;;  %1020 = vperm.xlu0 %5609, %v6899_v54   ;;  %v7095_v54 = vld [vmem:[#allocation2 + $0x70] sm:$0xff] }
 0x19f   : > { %958 = vst.msk [vmem:[#allocation3 + $0x60] sm:$0xff] %vm641_vm10, %v7034_v56  ;;  %v1536_v48 = vpop.xlane.xlu2 %1535 }
 0x1a0   : > { %10730 = vst [vmem:[#allocation143_spill] sm:$0xff] %v7043_v11 }
 0x1a1   : > { %10731 = vst [vmem:[#allocation144_spill] sm:$0xff] %v7045_v3  ;;  %v1533_v46 = vpop.xlane.xlu1 %1532  ;;  %711 = vperm.xlu2 %5608, %v6852_v1   ;;  %v10837_v17 = vld [vmem:[#allocation140_spill] sm:$0xff] }
 0x1a2   : > { %10732 = vst [vmem:[#allocation145_spill] sm:$0xff] %v7048_v49  ;;  %v7077_v49 = vmax.f32 %v7069_v20, %v1536_v48  ;;  %v1232_v11 = vpop.xlane.xlu0 %1231  ;;  %v7086_v3 = vmax.f32 %v7074_v42, %v1533_v46  ;;  %v7100_v46 = vld [vmem:[#allocation3 + $0x78] sm:$0xff] }
 0x1a3   : > { %10733 = vst [vmem:[#allocation146_spill] sm:$0xff] %v7055_v52  ;;  %v7081_v14 = vmax.f32 %v7071_v53, %v1232_v11  ;;  %v7097_v11 = vld [vmem:[#allocation3 + $0x70] sm:$0xff] }
 0x1a4   : > { %1263 = vst.msk [vmem:[#allocation4 + $0x70] sm:$0xff] %vm641_vm10, %v7051_v41  ;;  %1323 = vperm.xlu1 %5607, %v6843_v25  }
 0x1a5   : > { %10734 = vst [vmem:[#allocation147_spill] sm:$0xff] %v7060_v12 }
 0x1a6   : > { %654 = vst.msk [vmem:[#allocation2 + $0x60] sm:$0xff] %vm641_vm10, %v7055_v52  ;;  %721 = vperm.xlu0 %5609, %v6925_v8   ;;  %v7121_v8 = vld [vmem:[#allocation2 + $0x78] sm:$0xff] }
 0x1a7   : > { %655 = vst.msk [vmem:[#allocation2 + $0x68] sm:$0xff] %vm641_vm10, %v7060_v12 }
 0x1a8   : > { %10735 = vst [vmem:[#allocation148_spill] sm:$0xff] %v7069_v20  ;;  %v621_v20 = vpop.xlane.xlu2 %620 }
 0x1a9   : > { %10736 = vst [vmem:[#allocation149_spill] sm:$0xff] %v7071_v53  ;;  %v929_v55 = vpop.xlane.xlu1 %928  ;;  %1627 = vperm.xlu2 %5608, %v6878_v47  }
 0x1aa   : > { %10737 = vst [vmem:[#allocation150_spill] sm:$0xff] %v7074_v42  ;;  %v7103_v42 = vmax.f32 %v7095_v54, %v621_v20  ;;  %v926_v10 = vpop.xlane.xlu0 %925  ;;  %v7112_v1 = vmax.f32 %v7100_v46, %v929_v55 }
 0x1ab   : > { %10738 = vst [vmem:[#allocation151_spill] sm:$0xff] %v7081_v14  ;;  %v7107_v48 = vmax.f32 %v7097_v11, %v926_v10 }
 0x1ac   : > { %1568 = vst.msk [vmem:[#allocation5 + $0x78] sm:$0xff] %vm641_vm10, %v7077_v49  ;;  %1632 = vperm.xlu1 %5607, %v6869_v16  }
 0x1ad   : > { %1264 = vst.msk [vmem:[#allocation4 + $0x78] sm:$0xff] %vm641_vm10, %v7081_v14 }
 0x1ae   : > { %1567 = vst.msk [vmem:[#allocation5 + $0x70] sm:$0xff] %vm641_vm10, %v7086_v3  ;;  %1637 = vperm.xlu0 %5609, %v6951_v9  }
 0x1af   : > { %10739 = vst [vmem:[#allocation152_spill] sm:$0xff] %v7095_v54 }
 0x1b0   : > { %10740 = vst [vmem:[#allocation153_spill] sm:$0xff] %v7097_v11  ;;  %v1289_v10 = vpop.permute.xlu2 %1288 }
 0x1b1   : > { %10741 = vst [vmem:[#allocation154_spill] sm:$0xff] %v7100_v46  ;;  %1025 = vperm.xlu2 %5608, %v6904_v33   ;;  %v1363_v11 = vsel %vm6078_vm6, %v1289_v10, -1e+30  ;;  %v1364_v16 = vsel %vm6083_vm7, %v1289_v10, -1e+30 }
 0x1b2   : > { %10742 = vst [vmem:[#allocation155_spill] sm:$0xff] %v7103_v42  ;;  %v624_v54 = vpop.xlane.xlu0 %623 }
 0x1b3   : > { %10743 = vst [vmem:[#allocation156_spill] sm:$0xff] %v7107_v48  ;;  %v7126_v55 = vmax.f32 %v7121_v8, %v624_v54 }
 0x1b4   : > { %656 = vst.msk [vmem:[#allocation2 + $0x70] sm:$0xff] %vm641_vm10, %v7103_v42  ;;  %716 = vperm.xlu1 %5607, %v6895_v5  }
 0x1b5   : > { %10744 = vst [vmem:[#allocation157_spill] sm:$0xff] %v7112_v1 }
 0x1b6   : > { %960 = vst.msk [vmem:[#allocation3 + $0x70] sm:$0xff] %vm641_vm10, %v7107_v48  ;;  %1035 = vperm.xlu0 %5609, %v6977_v2  }
 0x1b7   : > { %961 = vst.msk [vmem:[#allocation3 + $0x78] sm:$0xff] %vm641_vm10, %v7112_v1 }
 0x1b8   : > { %10745 = vst [vmem:[#allocation158_spill] sm:$0xff] %v7121_v8  ;;  %v1299_v46 = vpop.permute.xlu2 %1298 }
 0x1b9   : > { %10746 = vst [vmem:[#allocation159_spill] sm:$0xff] %v7126_v55  ;;  %v1367_v54 = vsel %vm6094_vm8, %v1299_v46, -1e+30  ;;  %v1368_v47 = vsel %vm6099_vm9, %v1299_v46, -1e+30  ;;  %1333 = vperm.xlu2 %5608, %v6930_v57  }
 0x1ba   : > { %657 = vst.msk [vmem:[#allocation2 + $0x78] sm:$0xff] %vm641_vm10, %v7126_v55  ;;  %v7142_v9 = vmax.f32 %v1363_v11, %v1367_v54  ;;  %v7144_v20 = vmax.f32 %v1364_v16, %v1368_v47  ;;  %vm10747_vm10 = vnez %v10574_v30  ;;  %v10814_v30 = vld [vmem:[#allocation52_spill] sm:$0xff] }
 0x1bc   : > { %1338 = vperm.xlu1 %5607, %v6921_v62  }
 0x1be   : > { %v1284_v5 = vpop.permute.xlu1 %1283  ;;  %1343 = vperm.xlu0 %5609, %v7003_v0  }
 0x1bf   : > { %v1361_v10 = vsel %vm6033_vm2, %v1284_v5, -1e+30  ;;  %v1362_v11 = vsel %vm6039_vm3, %v1284_v5, -1e+30 }
 0x1c0   : > { %v1593_v8 = vpop.permute.xlu2 %1592  ;;  %v1294_v33 = vpop.permute.xlu0 %1293 }
 0x1c1   : > { %v1365_v47 = vsel %vm6059_vm4, %v1294_v33, -1e+30  ;;  %v1366_v16 = vsel %vm6067_vm5, %v1294_v33, -1e+30  ;;  %1642 = vperm.xlu2 %5608, %v6956_v51   ;;  %v1667_v2 = vsel %vm6078_vm6, %v1593_v8, -1e+30 }
 0x1c2   : > { %v1393_v46 = vmax.f32 %v1361_v10, %v1365_v47  ;;  %v1414_v54 = vmax.f32 %v1362_v11, %v1366_v16  ;;  %v1668_v0 = vsel %vm6083_vm7, %v1593_v8, -1e+30 }
 0x1c4   : > { %1030 = vperm.xlu1 %5607, %v6947_v21  }
 0x1c6   : > { %v1588_v51 = vpop.permute.xlu1 %1587  ;;  %1652 = vperm.xlu0 %5609, %v7029_v36  }
 0x1c7   : > { %v1665_v8 = vsel %vm6033_vm2, %v1588_v51, -1e+30 }
 0x1c8   : > { %v1603_v53 = vpop.permute.xlu2 %1602  ;;  %v986_v10 = vpop.permute.xlu0 %985 }
 0x1c9   : > { %v1671_v5 = vsel %vm6094_vm8, %v1603_v53, -1e+30  ;;  %v1672_v57 = vsel %vm6099_vm9, %v1603_v53, -1e+30  ;;  %726 = vperm.xlu2 %5608, %v6982_v22   ;;  %v1666_v53 = vsel %vm6039_vm3, %v1588_v51, -1e+30 }
 0x1ca   : > { %v1698_v33 = vmax.f32 %v1667_v2, %v1671_v5  ;;  %v1719_v62 = vmax.f32 %v1668_v0, %v1672_v57 }
 0x1cc   : > { %731 = vperm.xlu1 %5607, %v6973_v19  }
 0x1ce   : > { %v1598_v47 = vpop.permute.xlu1 %1597  ;;  %736 = vperm.xlu0 %5609, %v7055_v52  }
 0x1cf   : > { %v1669_v57 = vsel %vm6059_vm4, %v1598_v47, -1e+30  ;;  %v1670_v2 = vsel %vm6067_vm5, %v1598_v47, -1e+30 }
 0x1d0   : > { %v991_v11 = vpop.permute.xlu2 %990  ;;  %v1697_v0 = vmax.f32 %v1665_v8, %v1669_v57  ;;  %v1718_v16 = vmax.f32 %v1666_v53, %v1670_v2  ;;  %v677_v5 = vpop.permute.xlu0 %676 }
 0x1d1   : > { %1348 = vperm.xlu2 %5608, %v7008_v44   ;;  %v1062_v52 = vsel %vm6059_vm4, %v991_v11, -1e+30  ;;  %v1063_v51 = vsel %vm6067_vm5, %v991_v11, -1e+30 }
 0x1d4   : > { %1647 = vperm.xlu1 %5607, %v6999_v61  }
 0x1d6   : > { %v981_v19 = vpop.permute.xlu1 %980  ;;  %1358 = vperm.xlu0 %5609, %v7081_v14  }
 0x1d7   : > { %v1058_v47 = vsel %vm6033_vm2, %v981_v19, -1e+30  ;;  %v1059_v8 = vsel %vm6039_vm3, %v981_v19, -1e+30 }
 0x1d8   : > { %v682_v22 = vpop.permute.xlu2 %681  ;;  %v7193_v57 = vmax.f32 %v1058_v47, %v1062_v52  ;;  %v7195_v2 = vmax.f32 %v1059_v8, %v1063_v51  ;;  %v692_v21 = vpop.permute.xlu0 %691  ;;  %v1060_v47 = vsel %vm6078_vm6, %v986_v10, -1e+30 }
 0x1d9   : > { %v756_v53 = vsel %vm6078_vm6, %v682_v22, -1e+30  ;;  %v757_v61 = vsel %vm6083_vm7, %v682_v22, -1e+30  ;;  %v760_v11 = vsel %vm6094_vm8, %v692_v21, -1e+30  ;;  %1040 = vperm.xlu2 %5608, %v7034_v56  }
 0x1da   : > { %v761_v36 = vsel %vm6099_vm9, %v692_v21, -1e+30  ;;  %v7204_v19 = vmax.f32 %v756_v53, %v760_v11 }
 0x1db   : > { %v7206_v14 = vmax.f32 %v757_v61, %v761_v36  ;;  %v1061_v61 = vsel %vm6083_vm7, %v986_v10, -1e+30  ;;  %vm10749_vm7 = vnez %v10568_v28 }
 0x1dc   : > { %1045 = vperm.xlu1 %5607, %v7025_v45  }
 0x1de   : > { %v996_v44 = vpop.permute.xlu1 %995  ;;  %1050 = vperm.xlu0 %5609, %v7107_v48   ;;  %v10839_v48 = vld [vmem:[#allocation148_spill] sm:$0xff] }
 0x1df   : > { %v1064_v36 = vsel %vm6094_vm8, %v996_v44, -1e+30  ;;  %v1065_v53 = vsel %vm6099_vm9, %v996_v44, -1e+30  ;;  %vm10748_vm9 = vnez %v10565_v26  ;;  %vm10752_vm8 = vnez %v10583_v7  ;;  %v10823_v7 = vld [vmem:[#allocation62_spill] sm:$0xff] }
 0x1e0   : > { %v1304_v52 = vpop.permute.xlu2 %1303  ;;  %v1091_v11 = vmax.f32 %v1060_v47, %v1064_v36  ;;  %v1112_v45 = vmax.f32 %v1061_v61, %v1065_v53  ;;  %v754_v47 = vsel %vm6033_vm2, %v677_v5, -1e+30 }
 0x1e1   : > { %v1369_v51 = vsel %vm6190_vm12, %v1304_v52, -1e+30  ;;  %v1370_v22 = vsel %vm10747_vm10, %v1304_v52, -1e+30  ;;  %v1608_v52 = vpop.permute.xlu0 %1607  ;;  %741 = vperm.xlu2 %5608, %v7060_v12   ;;  %v10838_v12 = vld [vmem:[#allocation150_spill] sm:$0xff] }
 0x1e2   : > { %v1395_v8 = vmax.f32 %v1393_v46, %v1369_v51  ;;  %v1416_v21 = vmax.f32 %v1414_v54, %v1370_v22  ;;  %v1673_v31 = vsel %vm6190_vm12, %v1608_v52, -1e+30  ;;  %v1674_v46 = vsel %vm10747_vm10, %v1608_v52, -1e+30 }
 0x1e3   : > { %v7227_v54 = vmax.f32 %v1697_v0, %v1673_v31  ;;  %v7229_v10 = vmax.f32 %v1718_v16, %v1674_v46  ;;  %v755_v31 = vsel %vm6039_vm3, %v677_v5, -1e+30  ;;  %vm10751_vm3 = vnez %v10580_v6 }
 0x1e4   : > { %1353 = vperm.xlu1 %5607, %v7051_v41  }
 0x1e6   : > { %v687_v53 = vpop.permute.xlu1 %686  ;;  %751 = vperm.xlu0 %5609, %v7126_v55   ;;  %v10827_v55 = vld [vmem:[#allocation77_spill] sm:$0xff] }
 0x1e7   : > { %v758_v0 = vsel %vm6059_vm4, %v687_v53, -1e+30  ;;  %v759_v16 = vsel %vm6067_vm5, %v687_v53, -1e+30  ;;  %vm10750_vm5 = vnez %v10577_v4  ;;  %vm10753_vm4 = vnez %v10586_v15  ;;  %v10808_v15 = vld [vmem:[#allocation142_spill] sm:$0xff] }
 0x1e8   : > { %v1613_v51 = vpop.permute.xlu2 %1612  ;;  %v786_v52 = vmax.f32 %v754_v47, %v758_v0  ;;  %v807_v46 = vmax.f32 %v755_v31, %v759_v16  ;;  %v1583_v4 = vsub.f32 %v10838_v12, %v7086_v3  ;;  %v10842_v12 = vld [vmem:[#allocation40_spill] sm:$0xff] }
 0x1e9   : > { %v1675_v44 = vsel %vm10748_vm9, %v1613_v51, -1e+30  ;;  %v1676_v22 = vsel %vm10749_vm7, %v1613_v51, -1e+30  ;;  %v1006_v51 = vpop.permute.xlu0 %1005  ;;  %1657 = vperm.xlu2 %5608, %v7086_v3  }
 0x1ea   : > { %v1700_v61 = vmax.f32 %v1698_v33, %v1675_v44  ;;  %v1721_v36 = vmax.f32 %v1719_v62, %v1676_v22  ;;  %v1068_v38 = vsel %vm10748_vm9, %v1006_v51, -1e+30  ;;  %v1069_v62 = vsel %vm10749_vm7, %v1006_v51, -1e+30 }
 0x1eb   : > { %v7250_v33 = vmax.f32 %v1091_v11, %v1068_v38  ;;  %v7252_v5 = vmax.f32 %v1112_v45, %v1069_v62  ;;  %v1267_v22 = vsub.f32 %v6462_v43, %v6480_v63 }
 0x1ec   : > { %1662 = vperm.xlu1 %5607, %v7077_v49  }
 0x1ee   : > { %v1309_v16 = vpop.permute.xlu1 %1308  ;;  %1756 = vperm.xlu0 %5609, %v1267_v22  }
 0x1ef   : > { %v1371_v38 = vsel %vm10748_vm9, %v1309_v16, -1e+30  ;;  %v1372_v45 = vsel %vm10749_vm7, %v1309_v16, -1e+30 }
 0x1f0   : > { %v697_v44 = vpop.permute.xlu2 %696  ;;  %v1396_v11 = vmax.f32 %v7142_v9, %v1371_v38  ;;  %v1417_v43 = vmax.f32 %v7144_v20, %v1372_v45  ;;  %v1270_v9 = vsub.f32 %v6692_v23, %v6717_v13  ;;  %v1265_v38 = vsub.f32 %v6459_v40, %v6475_v60 }
 0x1f1   : > { %v762_v47 = vsel %vm6190_vm12, %v697_v44, -1e+30  ;;  %v763_v53 = vsel %vm10747_vm10, %v697_v44, -1e+30  ;;  %v1314_v63 = vpop.permute.xlu0 %1313  ;;  %1055 = vperm.xlu2 %5608, %v7112_v1   ;;  %v1273_v60 = vsub.f32 %v6835_v34, %v6843_v25 }
 0x1f2   : > { %v788_v31 = vmax.f32 %v786_v52, %v762_v47  ;;  %v809_v0 = vmax.f32 %v807_v46, %v763_v53  ;;  %v1373_v51 = vsel %vm10750_vm5, %v1314_v63, -1e+30  ;;  %v1374_v52 = vsel %vm10751_vm3, %v1314_v63, -1e+30 }
 0x1f3   : > { %v7272_v46 = vmax.f32 %v1395_v8, %v1373_v51  ;;  %v7274_v62 = vmax.f32 %v1416_v21, %v1374_v52  ;;  %v10754_v52 = vsub.f32 %v6520_v35, %v6534_v58 }
 0x1f4   : > { %746 = vperm.xlu1 %5607, %v7103_v42   ;;  %v10833_v42 = vld [vmem:[#allocation113_spill] sm:$0xff] }
 0x1f6   : > { %v1001_v16 = vpop.permute.xlu1 %1000  ;;  %1771 = vperm.xlu0 %5609, %v1270_v9  }
 0x1f7   : > { %v1066_v8 = vsel %vm6190_vm12, %v1001_v16, -1e+30  ;;  %v1067_v21 = vsel %vm10747_vm10, %v1001_v16, -1e+30  ;;  %v10755_v16 = vsub.f32 %v6522_v39, %v6539_v59 }
 0x1f8   : > { %v1319_v44 = vpop.permute.xlu2 %1318  ;;  %v1092_v23 = vmax.f32 %v7193_v57, %v1066_v8  ;;  %v1113_v13 = vmax.f32 %v7195_v2, %v1067_v21 }
 0x1f9   : > { %v1375_v20 = vsel %vm10752_vm8, %v1319_v44, -1e+30  ;;  %v1376_v22 = vsel %vm10753_vm4, %v1319_v44, -1e+30  ;;  %v1623_v45 = vpop.permute.xlu0 %1622  ;;  %1746 = vperm.xlu2 %5608, %v1265_v38   ;;  %v10756_v38 = vld [vmem:[#allocation72_spill] sm:$0xff] }
 0x1fa   : > { %v1398_v47 = vmax.f32 %v1396_v11, %v1375_v20  ;;  %v1419_v53 = vmax.f32 %v1417_v43, %v1376_v22  ;;  %v1679_v11 = vsel %vm10752_vm8, %v1623_v45, -1e+30  ;;  %v1680_v43 = vsel %vm10753_vm4, %v1623_v45, -1e+30 }
 0x1fb   : > { %v7295_v63 = vmax.f32 %v1700_v61, %v1679_v11  ;;  %v7297_v51 = vmax.f32 %v1721_v36, %v1680_v43 }
 0x1fc   : > { %1751 = vperm.xlu1 %5607, %v10754_v52  }
 0x1fe   : > { %v702_v61 = vpop.permute.xlu1 %701  ;;  %1786 = vperm.xlu0 %5609, %v1273_v60  }
 0x1ff   : > { %v764_v36 = vsel %vm10748_vm9, %v702_v61, -1e+30  ;;  %v765_v35 = vsel %vm10749_vm7, %v702_v61, -1e+30  ;;  %v10761_v61 = vld [vmem:[#allocation36_spill] sm:$0xff] }
 0x200   : > { %v1011_v40 = vpop.permute.xlu2 %1010  ;;  %v789_v58 = vmax.f32 %v7204_v19, %v764_v36  ;;  %v810_v34 = vmax.f32 %v7206_v14, %v765_v35  ;;  %v1269_v19 = vsub.f32 %v10756_v38, %v6725_v50  ;;  %vm10762_vm10 = vnez %v10761_v61  ;;  %v10763_v35 = vld [vmem:[#allocation87_spill] sm:$0xff] }
 0x201   : > { %v1070_v57 = vsel %vm10750_vm5, %v1011_v40, -1e+30  ;;  %v1071_v2 = vsel %vm10751_vm3, %v1011_v40, -1e+30  ;;  %v707_v25 = vpop.permute.xlu0 %706  ;;  %1761 = vperm.xlu2 %5608, %v10755_v16   ;;  %v10767_v16 = vld [vmem:[#allocation88_spill] sm:$0xff]  ;;  %v10768_v38 = vld [vmem:[#allocation143_spill] sm:$0xff] }
 0x202   : > { %v1094_v44 = vmax.f32 %v1092_v23, %v1070_v57  ;;  %v1115_v9 = vmax.f32 %v1113_v13, %v1071_v2  ;;  %v766_v20 = vsel %vm10750_vm5, %v707_v25, -1e+30  ;;  %v767_v22 = vsel %vm10751_vm3, %v707_v25, -1e+30  ;;  %v10757_v23 = vld [vmem:[#allocation117_spill] sm:$0xff]  ;;  %v10758_v13 = vld [vmem:[#allocation114_spill] sm:$0xff] }
 0x203   : > { %v7321_v8 = vmax.f32 %v788_v31, %v766_v20  ;;  %v7323_v21 = vmax.f32 %v809_v0, %v767_v22  ;;  %v1276_v45 = vsub.f32 %v10758_v13, %v10757_v23  ;;  %v10759_v57 = vld [vmem:[#allocation35_spill] sm:$0xff]  ;;  %v10771_v13 = vld [vmem:[#allocation34_spill] sm:$0xff] }
 0x204   : > { %1766 = vperm.xlu1 %5607, %v1269_v19   ;;  %vm10760_vm7 = vnez %v10759_v57  ;;  %v10766_v22 = vld [vmem:[#allocation91_spill] sm:$0xff]  ;;  %v1279_v19 = vsub.f32 %v10768_v38, %v7051_v41 }
 0x206   : > { %v1618_v31 = vpop.permute.xlu1 %1617  ;;  %1801 = vperm.xlu0 %5609, %v1276_v45  }
 0x207   : > { %v1677_v50 = vsel %vm10750_vm5, %v1618_v31, -1e+30  ;;  %v1678_v0 = vsel %vm10751_vm3, %v1618_v31, -1e+30  ;;  %vm10772_vm5 = vnez %v10771_v13 }
 0x208   : > { %v712_v14 = vpop.permute.xlu2 %711  ;;  %v1701_v52 = vmax.f32 %v7227_v54, %v1677_v50  ;;  %v1722_v40 = vmax.f32 %v7229_v10, %v1678_v0  ;;  %v1272_v54 = vsub.f32 %v10767_v16, %v10766_v22  ;;  %v10778_v16 = vld [vmem:[#allocation48_spill] sm:$0xff] }
 0x209   : > { %v768_v11 = vsel %vm10752_vm8, %v712_v14, -1e+30  ;;  %v769_v43 = vsel %vm10753_vm4, %v712_v14, -1e+30  ;;  %v1329_v60 = vpop.permute.xlu0 %1328  ;;  %v10769_v14 = vld [vmem:[#allocation33_spill] sm:$0xff] }
 0x20a   : > { %v7333_v39 = vmax.f32 %v789_v58, %v768_v11  ;;  %v7335_v59 = vmax.f32 %v810_v34, %v769_v43  ;;  %v1379_v2 = vsel %vm10760_vm7, %v1329_v60, -1e+30  ;;  %v1380_v36 = vsel %vm10762_vm10, %v1329_v60, -1e+30  ;;  %v10764_v58 = vld [vmem:[#allocation90_spill] sm:$0xff]  ;;  %v10773_v60 = vld [vmem:[#allocation103_spill] sm:$0xff] }
 0x20b   : > { %v10765_v34 = vsub.f32 %v10763_v35, %v10764_v58  ;;  %v7350_v25 = vmax.f32 %v1398_v47, %v1379_v2  ;;  %v7352_v20 = vmax.f32 %v1419_v53, %v1380_v36  ;;  %vm10770_vm3 = vnez %v10769_v14  ;;  %v10774_v2 = vld [vmem:[#allocation106_spill] sm:$0xff] }
 0x20c   : > { %1781 = vperm.xlu1 %5607, %v1272_v54   ;;  %v10775_v36 = vsub.f32 %v10773_v60, %v10774_v2  ;;  %v10779_v54 = vld [vmem:[#allocation47_spill] sm:$0xff] }
 0x20d   : > { %1776 = vperm.xlu2 %5608, %v10765_v34   ;;  %v10777_v34 = vld [vmem:[#allocation116_spill] sm:$0xff] }
 0x20e   : > { %v1016_v53 = vpop.permute.xlu1 %1015  ;;  %1816 = vperm.xlu0 %5609, %v1279_v19  }
 0x20f   : > { %v1072_v43 = vsel %vm10752_vm8, %v1016_v53, -1e+30  ;;  %v1073_v31 = vsel %vm10753_vm4, %v1016_v53, -1e+30  ;;  %v10780_v53 = vld [vmem:[#allocation133_spill] sm:$0xff]  ;;  %vm10843_vm8 = vnez %v10842_v12 }
 0x210   : > { %v1628_v10 = vpop.permute.xlu2 %1627  ;;  %v7371_v41 = vmax.f32 %v7250_v33, %v1072_v43  ;;  %v7374_v50 = vmax.f32 %v7252_v5, %v1073_v31  ;;  %v10776_v33 = vld [vmem:[#allocation119_spill] sm:$0xff]  ;;  %v10781_v43 = vld [vmem:[#allocation136_spill] sm:$0xff] }
 0x211   : > { %v1681_v23 = vsel %vm10770_vm3, %v1628_v10, -1e+30  ;;  %v1682_v45 = vsel %vm10772_vm5, %v1628_v10, -1e+30  ;;  %v1021_v0 = vpop.permute.xlu0 %1020  ;;  %v1275_v22 = vsub.f32 %v10777_v34, %v10776_v33  ;;  %v1570_v10 = vsub.f32 %v10779_v54, %v10778_v16  ;;  %v10786_v33 = vld [vmem:[#allocation78_spill] sm:$0xff] }
 0x212   : > { %v7362_v11 = vmax.f32 %v1701_v52, %v1681_v23  ;;  %v7364_v47 = vmax.f32 %v1722_v40, %v1682_v45  ;;  %v1074_v52 = vsel %vm10770_vm3, %v1021_v0, -1e+30  ;;  %v1075_v40 = vsel %vm10772_vm5, %v1021_v0, -1e+30  ;;  %v10783_v0 = vld [vmem:[#allocation137_spill] sm:$0xff] }
 0x213   : > { %v7383_v35 = vmax.f32 %v1094_v44, %v1074_v52  ;;  %v7385_v58 = vmax.f32 %v1115_v9, %v1075_v40  ;;  %v10782_v31 = vsub.f32 %v10780_v53, %v10781_v43  ;;  %v10784_v52 = vld [vmem:[#allocation134_spill] sm:$0xff]  ;;  %v10792_v53 = vld [vmem:[#allocation41_spill] sm:$0xff] }
 0x214   : > { %1796 = vperm.xlu1 %5607, %v1275_v22   ;;  %v1278_v40 = vsub.f32 %v10784_v52, %v10783_v0  ;;  %v10793_v52 = vld [vmem:[#allocation93_spill] sm:$0xff] }
 0x215   : > { %1791 = vperm.xlu2 %5608, %v10775_v36   ;;  %v10785_v36 = vld [vmem:[#allocation75_spill] sm:$0xff] }
 0x216   : > { %v1324_v38 = vpop.permute.xlu1 %1323  ;;  %1831 = vperm.xlu0 %5609, %v1570_v10   ;;  %v10788_v10 = vld [vmem:[#allocation149_spill] sm:$0xff] }
 0x217   : > { %v1377_v19 = vsel %vm10770_vm3, %v1324_v38, -1e+30  ;;  %v1378_v44 = vsel %vm10772_vm5, %v1324_v38, -1e+30  ;;  %v10789_v38 = vld [vmem:[#allocation151_spill] sm:$0xff] }
 0x218   : > { %v7389_v5 = vpop.permute.xlu2 %1025  ;;  %v7398_v9 = vmax.f32 %v7272_v46, %v1377_v19  ;;  %v7401_v23 = vmax.f32 %v7274_v62, %v1378_v44  ;;  %v10787_v46 = vsub.f32 %v10785_v36, %v10786_v33  ;;  %v10790_v19 = vsub.f32 %v10788_v10, %v10789_v38  ;;  %v10791_v44 = vld [vmem:[#allocation42_spill] sm:$0xff] }
 0x219   : > { %v7403_v45 = vpop.permute.xlu0 %721  ;;  %v1569_v43 = vsub.f32 %v10792_v53, %v10791_v44  ;;  %v10801_v44 = vld [vmem:[#allocation124_spill] sm:$0xff]  ;;  %v1076_v26 = vsel %vm10760_vm7, %v7389_v5, -1e+30 }
 0x21a   : > { %v1097_v24 = vmax.f32 %v7371_v41, %v1076_v26 }
 0x21c   : > { %1811 = vperm.xlu1 %5607, %v1278_v40  }
 0x21d   : > { %1806 = vperm.xlu2 %5608, %v10782_v31  }
 0x21e   : > { %v1633_v2 = vpop.permute.xlu1 %1632  ;;  %1846 = vperm.xlu0 %5609, %v10787_v46   ;;  %v10798_v46 = vld [vmem:[#allocation54_spill] sm:$0xff] }
 0x21f   : > { %v1683_v62 = vsel %vm10760_vm7, %v1633_v2, -1e+30  ;;  %v1684_v34 = vsel %vm10762_vm10, %v1633_v2, -1e+30  ;;  %v10797_v2 = vld [vmem:[#allocation50_spill] sm:$0xff] }
 0x220   : > { %v7410_v60 = vpop.permute.xlu2 %1333  ;;  %v7420_v22 = vmax.f32 %v7295_v63, %v1683_v62  ;;  %v7423_v16 = vmax.f32 %v7297_v51, %v1684_v34  ;;  %v10794_v63 = vld [vmem:[#allocation96_spill] sm:$0xff]  ;;  %v10796_v51 = vld [vmem:[#allocation53_spill] sm:$0xff]  ;;  %v10799_v62 = vld [vmem:[#allocation51_spill] sm:$0xff] }
 0x221   : > { %v7425_v54 = vpop.permute.xlu0 %1637  ;;  %v10795_v40 = vsub.f32 %v10793_v52, %v10794_v63  ;;  %v1571_v36 = vsub.f32 %v10797_v2, %v10796_v51  ;;  %v1572_v34 = vsub.f32 %v10799_v62, %v10798_v46  ;;  %v10804_v52 = vld [vmem:[#allocation76_spill] sm:$0xff]  ;;  %v10805_v51 = vld [vmem:[#allocation89_spill] sm:$0xff]  ;;  %v10806_v2 = vld [vmem:[#allocation86_spill] sm:$0xff]  ;;  %v1382_v3 = vsel %vm10843_vm8, %v7410_v60, -1e+30 }
 0x224   : > { %1826 = vperm.xlu1 %5607, %v1569_v43   ;;  %v10803_v43 = vld [vmem:[#allocation79_spill] sm:$0xff] }
 0x225   : > { %1821 = vperm.xlu2 %5608, %v10790_v19   ;;  %v10800_v19 = vld [vmem:[#allocation121_spill] sm:$0xff]  ;;  %v1574_v63 = vsub.f32 %v10804_v52, %v10803_v43  ;;  %v10813_v52 = vld [vmem:[#allocation102_spill] sm:$0xff] }
 0x226   : > { %v7434_v0 = vpop.permute.xlu1 %716  ;;  %1861 = vperm.xlu0 %5609, %v10795_v40   ;;  %v10802_v53 = vsub.f32 %v10800_v19, %v10801_v44  ;;  %v10810_v19 = vld [vmem:[#allocation107_spill] sm:$0xff]  ;;  %v10811_v44 = vld [vmem:[#allocation104_spill] sm:$0xff]  ;;  %v10812_v43 = vld [vmem:[#allocation105_spill] sm:$0xff] }
 0x228   : > { %v7432_v31 = vpop.permute.xlu2 %1642 }
 0x229   : > { %v7441_v33 = vpop.permute.xlu0 %1035 }
 0x22c   : > { %1841 = vperm.xlu1 %5607, %v1572_v34   ;;  %v10807_v34 = vld [vmem:[#allocation139_spill] sm:$0xff] }
 0x22d   : > { %1836 = vperm.xlu2 %5608, %v1571_v36   ;;  %v1575_v36 = vsub.f32 %v10806_v2, %v10805_v51  ;;  %v10809_v6 = vsub.f32 %v10807_v34, %v10808_v15  ;;  %v10815_v51 = vld [vmem:[#allocation49_spill] sm:$0xff] }
 0x22e   : > { %v7447_v38 = vpop.permute.xlu1 %1338  ;;  %1876 = vperm.xlu0 %5609, %v10802_v53   ;;  %v1577_v53 = vsub.f32 %v10811_v44, %v10810_v19  ;;  %v962_v2 = vsub.f32 %v10815_v51, %v10814_v30  ;;  %v10816_v15 = vld [vmem:[#allocation125_spill] sm:$0xff]  ;;  %v10819_v19 = vld [vmem:[#allocation135_spill] sm:$0xff]  ;;  %v10820_v44 = vld [vmem:[#allocation132_spill] sm:$0xff] }
 0x22f   : > { %v10824_v30 = vld [vmem:[#allocation59_spill] sm:$0xff] }
 0x230   : > { %v7445_v10 = vpop.permute.xlu2 %726 }
 0x231   : > { %v7454_v40 = vpop.permute.xlu0 %1343 }
 0x234   : > { %1856 = vperm.xlu1 %5607, %v1575_v36  }
 0x235   : > { %1851 = vperm.xlu2 %5608, %v1574_v63   ;;  %v1578_v63 = vsub.f32 %v10813_v52, %v10812_v43  ;;  %v10822_v43 = vld [vmem:[#allocation57_spill] sm:$0xff] }
 0x236   : > { %v7460_v62 = vpop.permute.xlu1 %1030  ;;  %1891 = vperm.xlu0 %5609, %v10809_v6   ;;  %v10817_v6 = vld [vmem:[#allocation122_spill] sm:$0xff]  ;;  %v965_v52 = vsub.f32 %v10822_v43, %v10821_v18  ;;  %v1584_v43 = vsub.f32 %v10839_v48, %v7077_v49  ;;  %v1686_v49 = vsel %vm10843_vm8, %v7425_v54, -1e+30  ;;  %v10845_v48 = vld [vmem:[#allocation37_spill] sm:$0xff] }
 0x237   : > { %v1580_v34 = vsub.f32 %v10817_v6, %v10816_v15  ;;  %v10828_v15 = vld [vmem:[#allocation74_spill] sm:$0xff] }
 0x238   : > { %v7458_v46 = vpop.permute.xlu2 %1348  ;;  %v10834_v18 = vld [vmem:[#allocation110_spill] sm:$0xff] }
 0x239   : > { %v7467_v28 = vpop.permute.xlu0 %1652 }
 0x23c   : > { %1871 = vperm.xlu1 %5607, %v1578_v63  }
 0x23d   : > { %1866 = vperm.xlu2 %5608, %v1577_v53   ;;  %v1581_v53 = vsub.f32 %v10820_v44, %v10819_v19  ;;  %v10832_v19 = vld [vmem:[#allocation94_spill] sm:$0xff] }
 0x23e   : > { %v7475_v27 = vpop.permute.xlu1 %731  ;;  %1922 = vperm.xlu0 %5609, %v962_v2   ;;  %v968_v44 = vsub.f32 %v10832_v19, %v10831_v37  ;;  %v1077_v37 = vsel %vm10762_vm10, %v7389_v5, -1e+30  ;;  %v772_v19 = vsel %vm10760_vm7, %v7403_v45, -1e+30 }
 0x240   : > { %v7473_v36 = vpop.permute.xlu2 %1040 }
 0x241   : > { %v7479_v32 = vpop.permute.xlu0 %736 }
 0x242   : > { %10818 = vst [vmem:[#allocation72_spill] sm:$0xff] %v7479_v32  ;;  %v7543_v32 = vmax.f32 %v7333_v39, %v772_v19  ;;  %v7560_v39 = vmax.f32 %v7364_v47, %v1686_v49  ;;  %v771_v47 = vsel %vm10772_vm5, %v7434_v0, -1e+30  ;;  %v1386_v19 = vsel %vm6488_vm0, %v7454_v40, -1e+30 }
 0x244   : > { %1886 = vperm.xlu1 %5607, %v1581_v53   ;;  %v773_v53 = vsel %vm10762_vm10, %v7403_v45, -1e+30  ;;  %vm10846_vm10 = vnez %v10845_v48  ;;  %v10847_v45 = vld [vmem:[#allocation38_spill] sm:$0xff] }
 0x245   : > { %1881 = vperm.xlu2 %5608, %v1580_v34   ;;  %v1687_v63 = vsel %vm10846_vm10, %v7432_v31, -1e+30  ;;  %v7546_v29 = vmax.f32 %v7335_v59, %v773_v53  ;;  %vm10848_vm7 = vnez %v10847_v45  ;;  %v1385_v53 = vsel %vm6483_vm11, %v7454_v40, -1e+30 }
 0x246   : > { %v7506_v6 = vpop.permute.xlu1 %1647  ;;  %1937 = vperm.xlu0 %5609, %v965_v52   ;;  %v10840_v52 = vld [vmem:[#allocation39_spill] sm:$0xff]  ;;  %v1688_v26 = vsel %vm10848_vm7, %v7432_v31, -1e+30  ;;  %v7563_v59 = vmax.f32 %v7420_v22, %v1687_v63  ;;  %v1383_v22 = vsel %vm10846_vm10, %v7447_v38, -1e+30 }
 0x247   : > { %vm10841_vm4 = vnez %v10840_v52  ;;  %v1384_v31 = vsel %vm10848_vm7, %v7447_v38, -1e+30  ;;  %v775_v38 = vsel %vm10843_vm8, %v7445_v10, -1e+30 }
 0x248   : > { %v7487_v51 = vpop.permute.xlu2 %741  ;;  %v1381_v2 = vsel %vm10841_vm4, %v7410_v60, -1e+30  ;;  %v1685_v5 = vsel %vm10841_vm4, %v7425_v54, -1e+30  ;;  %v1118_v60 = vmax.f32 %v7374_v50, %v1077_v37  ;;  %v1422_v54 = vmax.f32 %v7401_v23, %v1382_v3  ;;  %v10850_v37 = vld [vmem:[#allocation44_spill] sm:$0xff] }
 0x249   : > { %v7530_v57 = vpop.permute.xlu0 %1358  ;;  %v1401_v41 = vmax.f32 %v7398_v9, %v1381_v2  ;;  %v7554_v1 = vmax.f32 %v7362_v11, %v1685_v5  ;;  %v770_v50 = vsel %vm10770_vm3, %v7434_v0, -1e+30  ;;  %v1081_v9 = vsel %vm10848_vm7, %v7441_v33, -1e+30 }
 0x24a   : > { %v7574_v23 = vmax.f32 %v7423_v16, %v1688_v26  ;;  %v1078_v16 = vsel %vm10841_vm4, %v7460_v62, -1e+30  ;;  %v1079_v0 = vsel %vm10843_vm8, %v7460_v62, -1e+30  ;;  %v1402_v3 = vmax.f32 %v7350_v25, %v1383_v22  ;;  %v10851_v26 = vld [vmem:[#allocation45_spill] sm:$0xff] }
 0x24b   : > { %v1423_v5 = vmax.f32 %v7352_v20, %v1384_v31  ;;  %v1082_v62 = vsel %vm6483_vm11, %v7473_v36, -1e+30  ;;  %v1098_v49 = vmax.f32 %v7383_v35, %v1078_v16  ;;  %vm10852_vm8 = vnez %v10851_v26  ;;  %v10855_v20 = vld [vmem:[#allocation58_spill] sm:$0xff] }
 0x24c   : > { %1901 = vperm.xlu1 %5607, %v1584_v43   ;;  %v1120_v43 = vmax.f32 %v1118_v60, %v1081_v9  ;;  %v1119_v60 = vmax.f32 %v7385_v58, %v1079_v0  ;;  %v10856_v9 = vld [vmem:[#allocation61_spill] sm:$0xff]  ;;  %v1403_v31 = vmax.f32 %v1401_v41, %v1385_v53  ;;  %v1424_v12 = vmax.f32 %v1422_v54, %v1386_v19  ;;  %v10858_v0 = vld [vmem:[#allocation55_spill] sm:$0xff]  ;;  %v10861_v54 = vld [vmem:[#allocation64_spill] sm:$0xff] }
 0x24d   : > { %1896 = vperm.xlu2 %5608, %v1583_v4   ;;  %v1080_v4 = vsel %vm10846_vm10, %v7441_v33, -1e+30  ;;  %v774_v33 = vsel %vm10841_vm4, %v7445_v10, -1e+30  ;;  %v1083_v10 = vsel %vm6488_vm0, %v7473_v36, -1e+30  ;;  %v10857_v22 = vsub.f32 %v10855_v20, %v10856_v9 }
 0x24e   : > { %v1099_v63 = vmax.f32 %v1097_v24, %v1080_v4  ;;  %v1046_v2 = vpop.permute.xlu1 %1045  ;;  %1952 = vperm.xlu0 %5609, %v968_v44   ;;  %v10853_v4 = vld [vmem:[#allocation46_spill] sm:$0xff]  ;;  %v1387_v36 = vsel %vm10852_vm8, %v7458_v46, -1e+30  ;;  %v1100_v58 = vmax.f32 %v1098_v49, %v1082_v62  ;;  %v1121_v16 = vmax.f32 %v1119_v60, %v1083_v10 }
 0x24f   : > { %v1084_v40 = vsel %vm10852_vm8, %v1046_v2, -1e+30  ;;  %vm10854_vm5 = vnez %v10853_v4  ;;  %v1391_v41 = vsel %vm6636_vm1, %v7530_v57, -1e+30  ;;  %v1392_v53 = vsel %vm6641_vm15, %v7530_v57, -1e+30 }
 0x250   : > { %v7571_v11 = vpop.permute.xlu2 %1657  ;;  %v1085_v25 = vsel %vm10854_vm5, %v1046_v2, -1e+30  ;;  %v1388_v35 = vsel %vm10854_vm5, %v7458_v46, -1e+30  ;;  %v10859_v2 = vld [vmem:[#allocation56_spill] sm:$0xff]  ;;  %v1101_v19 = vmax.f32 %v1099_v63, %v1084_v40  ;;  %v10862_v46 = vsub.f32 %v10824_v30, %v10823_v7 }
 0x251   : > { %v1051_v44 = vpop.permute.xlu0 %1050  ;;  %v1122_v9 = vmax.f32 %v1120_v43, %v1085_v25  ;;  %v1404_v10 = vmax.f32 %v1402_v3, %v1387_v36  ;;  %v1425_v49 = vmax.f32 %v1423_v5, %v1388_v35  ;;  %v10863_v63 = vsub.f32 %v10834_v18, %v10833_v42 }
 0x252   : > { %v1086_v13 = vsel %vm6586_vm13, %v1051_v44, -1e+30  ;;  %v1087_v52 = vsel %vm6591_vm14, %v1051_v44, -1e+30  ;;  %v792_v36 = vmax.f32 %v7321_v8, %v770_v50  ;;  %v813_v35 = vmax.f32 %v7323_v21, %v771_v47 }
 0x253   : > { %v1123_v14 = vmax.f32 %v1121_v16, %v1087_v52  ;;  %v1406_v7 = vmax.f32 %v1404_v10, %v1391_v41  ;;  %v1427_v30 = vmax.f32 %v1425_v49, %v1392_v53  ;;  %v1691_v42 = vsel %vm10852_vm8, %v7467_v28, -1e+30  ;;  %v10865_v16 = vld [vmem:[#allocation81_spill] sm:$0xff]  ;;  %v10866_v41 = vld [vmem:[#allocation84_spill] sm:$0xff] }
 0x254   : > { %1932 = vperm.xlu1 %5607, %v10862_v46   ;;  %v1692_v18 = vsel %vm10854_vm5, %v7467_v28, -1e+30  ;;  %v777_v8 = vsel %vm10848_vm7, %v7475_v27, -1e+30  ;;  %v815_v50 = vmax.f32 %v813_v35, %v775_v38  ;;  %v1689_v28 = vsel %vm6483_vm11, %v7506_v6, -1e+30 }
 0x255   : > { %1927 = vperm.xlu2 %5608, %v10857_v22   ;;  %v1102_v22 = vmax.f32 %v1100_v58, %v1086_v13  ;;  %v10867_v53 = vsub.f32 %v10865_v16, %v10866_v41  ;;  %v1729_v38 = vmax.f32 %v7574_v23, %v1692_v18  ;;  %v1694_v46 = vsel %vm6591_vm14, %v7571_v11, -1e+30 }
 0x256   : > { %v1354_v57 = vpop.permute.xlu1 %1353  ;;  %1967 = vperm.xlu0 %5609, %v10863_v63   ;;  %v1707_v23 = vmax.f32 %v7554_v1, %v1689_v28 }
 0x257   : > { %v1389_v43 = vsel %vm6586_vm13, %v1354_v57, -1e+30  ;;  %v1390_v3 = vsel %vm6591_vm14, %v1354_v57, -1e+30 }
 0x258   : > { %v1056_v62 = vpop.permute.xlu2 %1055  ;;  %v1405_v25 = vmax.f32 %v1403_v31, %v1389_v43  ;;  %v1426_v13 = vmax.f32 %v1424_v12, %v1390_v3  ;;  %v794_v12 = vmax.f32 %v792_v36, %v774_v33  ;;  %v1708_v33 = vmax.f32 %v7563_v59, %v1691_v42  ;;  %v10872_v3 = vld [vmem:[#allocation72_spill] sm:$0xff] }
 0x259   : > { %v1088_v44 = vsel %vm6636_vm1, %v1056_v62, -1e+30  ;;  %v1089_v60 = vsel %vm6641_vm15, %v1056_v62, -1e+30  ;;  %v7650_v52 = vpop.permute.xlu0 %751  ;;  %v10868_v59 = vsub.f32 %v10837_v17, %v7034_v56 }
 0x25a   : > { %v1103_v61 = vmax.f32 %v1101_v19, %v1088_v44  ;;  %v1124_v34 = vmax.f32 %v1122_v9, %v1089_v60  ;;  %v1407_v21 = vmax.f32 %v1405_v25, %v1406_v7  ;;  %v816_v9 = vmax.f32 %v7546_v29, %v777_v8  ;;  %v10869_v7 = vld [vmem:[#allocation92_spill] sm:$0xff] }
 0x25b   : > { %v781_v60 = vsel %vm10854_vm5, %v7487_v51, -1e+30  ;;  %v778_v25 = vsel %vm6483_vm11, %v10872_v3, -1e+30  ;;  %v785_v36 = vsel %vm6641_vm15, %v7650_v52, -1e+30 }
 0x25c   : > { %v1104_v5 = vmax.f32 %v1102_v22, %v1103_v61  ;;  %v1125_v40 = vmax.f32 %v1123_v14, %v1124_v34  ;;  %v10864_v61 = vsub.f32 %v10828_v15, %v10827_v55  ;;  %v776_v14 = vsel %vm10846_vm10, %v7475_v27, -1e+30  ;;  %1947 = vperm.xlu1 %5607, %v10867_v53  }
 0x25d   : > { %v1428_v34 = vmax.f32 %v1426_v13, %v1427_v30  ;;  %v1690_v55 = vsel %vm6488_vm0, %v7506_v6, -1e+30  ;;  %v1408_v31 = vrot.slane %v1407_v21, 4  ;;  %v795_v19 = vmax.f32 %v7543_v32, %v776_v14  ;;  %v10870_v30 = vld [vmem:[#allocation95_spill] sm:$0xff] }
 0x25e   : > { %1942 = vperm.xlu2 %5608, %v10864_v61   ;;  %v1105_v15 = vrot.slane %v1104_v5, 4  ;;  %v1126_v47 = vrot.slane %v1125_v40, 4  ;;  %v1693_v6 = vsel %vm6586_vm13, %v7571_v11, -1e+30  ;;  %v1663_v49 = vpop.permute.xlu1 %1662  ;;  %1982 = vperm.xlu0 %5609, %v10868_v59   ;;  %v1728_v32 = vmax.f32 %v7560_v39, %v1690_v55 }
 0x25f   : > { %v1429_v58 = vrot.slane %v1428_v34, 4  ;;  %v1409_v62 = vmax.f32 %v1407_v21, %v1408_v31  ;;  %v1695_v29 = vsel %vm6636_vm1, %v1663_v49, -1e+30  ;;  %v1696_v44 = vsel %vm6641_vm15, %v1663_v49, -1e+30  ;;  %v10873_v21 = vld [vmem:[#allocation109_spill] sm:$0xff] }
 0x260   : > { %v7678_v27 = vpop.permute.xlu2 %1746  ;;  %v780_v11 = vsel %vm10852_vm8, %v7487_v51, -1e+30  ;;  %v1106_v17 = vmax.f32 %v1104_v5, %v1105_v15  ;;  %v1127_v56 = vmax.f32 %v1125_v40, %v1126_v47  ;;  %v1709_v1 = vmax.f32 %v1707_v23, %v1693_v6 }
 0x261   : > { %v1430_v10 = vmax.f32 %v1428_v34, %v1429_v58  ;;  %v7705_v22 = vpop.permute.xlu0 %1756  ;;  %v1730_v39 = vmax.f32 %v1728_v32, %v1694_v46  ;;  %v1710_v57 = vmax.f32 %v1708_v33, %v1695_v29  ;;  %v1731_v63 = vmax.f32 %v1729_v38, %v1696_v44  ;;  %v10874_v34 = vld [vmem:[#allocation112_spill] sm:$0xff]  ;;  %v10876_v38 = vld [vmem:[#allocation154_spill] sm:$0xff]  ;;  %v10879_v32 = vld [vmem:[#allocation141_spill] sm:$0xff] }
 0x262   : > { %v10871_v43 = vsub.f32 %v10869_v7, %v10870_v30  ;;  %v779_v51 = vsel %vm6488_vm0, %v10872_v3, -1e+30  ;;  %v1410_v5 = vrot.slane %v1409_v62, 2  ;;  %v784_v13 = vsel %vm6636_vm1, %v7650_v52, -1e+30  ;;  %v10880_v29 = vld [vmem:[#allocation138_spill] sm:$0xff] }
 0x263   : > { %v1431_v40 = vrot.slane %v1430_v10, 2  ;;  %v1711_v35 = vmax.f32 %v1709_v1, %v1710_v57  ;;  %v1732_v42 = vmax.f32 %v1730_v39, %v1731_v63  ;;  %v797_v18 = vmax.f32 %v795_v19, %v780_v11  ;;  %v10877_v19 = vld [vmem:[#allocation157_spill] sm:$0xff]  ;;  %v10881_v1 = vld [vmem:[#allocation12_spill] sm:$0xff]  ;;  %v10883_v63 = vld [vmem:[#allocation123_spill] sm:$0xff] }
 0x264   : > { %v818_v61 = vmax.f32 %v816_v9, %v781_v60  ;;  %v1107_v14 = vrot.slane %v1106_v17, 2  ;;  %v1128_v8 = vrot.slane %v1127_v56, 2  ;;  %v10875_v28 = vsub.f32 %v10873_v21, %v10874_v34  ;;  %v10882_v57 = vld [vmem:[#allocation120_spill] sm:$0xff]  ;;  %v10889_v21 = vld [vmem:[#allocation23_spill] sm:$0xff] }
 0x265   : > { %v796_v15 = vmax.f32 %v794_v12, %v778_v25  ;;  %v817_v47 = vmax.f32 %v815_v50, %v779_v51  ;;  %v1712_v31 = vrot.slane %v1711_v35, 4  ;;  %v1733_v58 = vrot.slane %v1732_v42, 4 }
 0x266   : > { %1957 = vperm.xlu2 %5608, %v10871_v43   ;;  %1962 = vperm.xlu1 %5607, %v10875_v28   ;;  %v1411_v16 = vmax.f32 %v1409_v62, %v1410_v5  ;;  %v1432_v41 = vmax.f32 %v1430_v10, %v1431_v40  ;;  %v799_v53 = vmax.f32 %v797_v18, %v784_v13  ;;  %v747_v33 = vpop.permute.xlu1 %746  ;;  %v2164_v39 = vand.u32 1, %v10881_v1  ;;  %v10908_v28 = vld [vmem:[#allocation66_spill] sm:$0xff] }
 0x267   : > { %v820_v52 = vmax.f32 %v818_v61, %v785_v36  ;;  %v10878_v9 = vsub.f32 %v10876_v38, %v10877_v19  ;;  %v1713_v6 = vmax.f32 %v1711_v35, %v1712_v31  ;;  %v1734_v46 = vmax.f32 %v1732_v42, %v1733_v58  ;;  %v10885_v36 = vld [vmem:[#allocation127_spill] sm:$0xff]  ;;  %v10886_v35 = vld [vmem:[#allocation130_spill] sm:$0xff]  ;;  %v10892_v58 = vld [vmem:[#allocation65_spill] sm:$0xff] }
 0x268   : > { %v7725_v55 = vpop.permute.xlu2 %1761  ;;  %v782_v49 = vsel %vm6586_vm13, %v747_v33, -1e+30  ;;  %v783_v12 = vsel %vm6591_vm14, %v747_v33, -1e+30  ;;  %v1108_v50 = vmax.f32 %v1106_v17, %v1107_v14  ;;  %v1129_v59 = vmax.f32 %v1127_v56, %v1128_v8  ;;  %v10888_v8 = vld [vmem:[#allocation13_spill] sm:$0xff] }
 0x269   : > { %1997 = vperm.xlu0 %5609, %v10878_v9   ;;  %v798_v23 = vmax.f32 %v796_v15, %v782_v49  ;;  %v819_v62 = vmax.f32 %v817_v47, %v783_v12  ;;  %v7734_v10 = vpop.permute.xlu0 %1771  ;;  %v975_v44 = vsub.f32 %v10880_v29, %v10879_v32  ;;  %v1714_v11 = vrot.slane %v1713_v6, 2  ;;  %v10897_v29 = vld [vmem:[#allocation14_spill] sm:$0xff] }
 0x26a   : > { %v1735_v60 = vrot.slane %v1734_v46, 2  ;;  %v10884_v7 = vsub.f32 %v10882_v57, %v10883_v63  ;;  %vm10346_vm14 = vcmp.lt.s32.totalorder %v10881_v1, 2  ;;  %v1412_v30 = vrot.slane %v1411_v16, 1  ;;  %v10902_v63 = vld [vmem:[#allocation83_spill] sm:$0xff] }
 0x26b   : > { %v800_v17 = vmax.f32 %v798_v23, %v799_v53  ;;  %v821_v56 = vmax.f32 %v819_v62, %v820_v52  ;;  %v1433_v43 = vrot.slane %v1432_v41, 1  ;;  %v1715_v3 = vmax.f32 %v1713_v6, %v1714_v11  ;;  %v10893_v53 = vld [vmem:[#allocation68_spill] sm:$0xff] }
 0x26c   : > { %v1736_v25 = vmax.f32 %v1734_v46, %v1735_v60  ;;  %v1109_v51 = vrot.slane %v1108_v50, 1  ;;  %v1130_v5 = vrot.slane %v1129_v59, 1  ;;  %v10887_v42 = vsub.f32 %v10885_v36, %v10886_v35  ;;  %v10898_v11 = vld [vmem:[#allocation24_spill] sm:$0xff] }
 0x26d   : > { %v801_v40 = vrot.slane %v800_v17, 4  ;;  %v822_v13 = vrot.slane %v821_v56, 4  ;;  %v1716_v61 = vrot.slane %v1715_v3, 1  ;;  %v7753_v34 = vsel %vm10346_vm14, %v10889_v21, %v10888_v8 }
 0x26e   : > { %1972 = vperm.xlu2 %5608, %v10884_v7   ;;  %1977 = vperm.xlu1 %5607, %v10887_v42   ;;  %v1737_v14 = vrot.slane %v1736_v25, 1  ;;  %vm7755_vm15 = vcmp.eq.s32.totalorder %v2164_v39, 0  ;;  %v7760_v31 = vpop.permute.xlu1 %1751  ;;  %v10894_v52 = vsub.f32 %v10892_v58, %v10893_v53  ;;  %v1413_v33 = vmax.f32 %v1411_v16, %v1412_v30  ;;  %v10903_v7 = vld [vmem:[#allocation80_spill] sm:$0xff] }
 0x26f   : > { %v802_v15 = vmax.f32 %v800_v17, %v801_v40  ;;  %v823_v47 = vmax.f32 %v821_v56, %v822_v13  ;;  %v1434_v38 = vmax.f32 %v1432_v41, %v1433_v43  ;;  %v1717_v19 = vmax.f32 %v1715_v3, %v1716_v61  ;;  %v10904_v43 = vld [vmem:[#allocation153_spill] sm:$0xff]  ;;  %v10905_v3 = vld [vmem:[#allocation156_spill] sm:$0xff] }
 0x270   : > { %v7747_v18 = vpop.permute.xlu2 %1776  ;;  %v1738_v9 = vmax.f32 %v1736_v25, %v1737_v14  ;;  %v1110_v6 = vmax.f32 %v1108_v50, %v1109_v51  ;;  %v1131_v46 = vmax.f32 %v1129_v59, %v1130_v5  ;;  %vm10895_vm5 = vcmp.eq.s32.totalorder %v10881_v1, 2 }
 0x271   : > { %2028 = vperm.xlu0 %5609, %v10894_v52   ;;  %v803_v49 = vrot.slane %v802_v15, 2  ;;  %v824_v12 = vrot.slane %v823_v47, 2  ;;  %v7765_v23 = vpop.permute.xlu0 %1786  ;;  %v2172_v62 = vsel %vm10895_vm5, %v1413_v33, %v1717_v19  ;;  %vm10896_vm14 = vmmov %vm10895_vm5  ;;  %vm10899_vm0 = vcmp.lt.s32.totalorder %v10881_v1, 2  ;;  %v10912_v52 = vld [vmem:[#allocation70_spill] sm:$0xff]  ;;  %v10913_v33 = vld [vmem:[#allocation67_spill] sm:$0xff] }
 0x272   : > { %v2173_v32 = vsel %vm10896_vm14, %v1434_v38, %v1738_v9  ;;  %v7775_v16 = vsel %vm10899_vm0, %v10898_v11, %v10897_v29  ;;  %v5736_v41 = vmov -1.0   ;;  %vm10900_vm7 = vcmp.eq.s32.totalorder %v10881_v1, 1 }
 0x273   : > { %v2166_v50 = vsel %vm7755_vm15, 1.0, %v5736_v41  ;;  %v804_v59 = vmax.f32 %v802_v15, %v803_v49  ;;  %v825_v60 = vmax.f32 %v823_v47, %v824_v12  ;;  %v2174_v39 = vsel %vm10900_vm7, %v1110_v6, %v2172_v62  ;;  %vm10901_vm5 = vmmov %vm10900_vm7  ;;  %v10909_v15 = vld [vmem:[#allocation69_spill] sm:$0xff]  ;;  %v10914_v6 = vld [vmem:[#allocation111_spill] sm:$0xff] }
 0x274   : > { %v2175_v57 = vsel %vm10901_vm5, %v1131_v46, %v2173_v32  ;;  %v663_v17 = vsub.f32 %v10903_v7, %v10902_v63  ;;  %v10906_v25 = vsub.f32 %v10904_v43, %v10905_v3  ;;  %v2168_v5 = vmul.f32 %v2166_v50, %v7775_v16  ;;  %v10915_v46 = vld [vmem:[#allocation108_spill] sm:$0xff]  ;;  %v10921_v7 = vld [vmem:[#allocation85_spill] sm:$0xff] }
 0x275   : > { %v805_v56 = vrot.slane %v804_v59, 1  ;;  %v826_v30 = vrot.slane %v825_v60, 1  ;;  %vm2169_vm7 = vcmp.eq.s32.totalorder %v10881_v1, 0  ;;  %v7795_v35 = vstv %s403_s14 }
 0x276   : > { %1987 = vperm.xlu2 %5608, %v975_v44   ;;  %1992 = vperm.xlu1 %5607, %v10906_v25   ;;  %v2167_v44 = vmul.f32 %v2166_v50, %v7753_v34  ;;  %v7793_v36 = vpop.permute.xlu1 %1766  ;;  %10907 = vst [vmem:[#allocation117_spill] sm:$0xff] %v7795_v35  ;;  %v10910_v47 = vsub.f32 %v10908_v28, %v10909_v15  ;;  %v10353_v58 = vmov 0.0  }
 0x277   : > { %v806_v40 = vmax.f32 %v804_v59, %v805_v56  ;;  %v827_v13 = vmax.f32 %v825_v60, %v826_v30  ;;  %v5332_v53 = vsel %vm6033_vm2, 1.0, %v10353_v58  ;;  %v659_v38 = vsub.f32 %v10913_v33, %v10912_v52 }
 0x278   : > { %v7788_v51 = vpop.permute.xlu2 %1791  ;;  %v666_v49 = vsub.f32 %v10915_v46, %v10914_v6  ;;  %v7813_v62 = vsub.f32 %v5332_v53, %v5332_v53  ;;  %v10923_v30 = vlaneseq  ;;  %v5334_v25 = vsel %vm6078_vm6, 1.0, %v10353_v58 }
 0x279   : > { %2043 = vperm.xlu0 %5609, %v663_v17   ;;  %v2176_v42 = vsel %vm2169_vm7, %v806_v40, %v2174_v39  ;;  %v2177_v61 = vsel %vm2169_vm7, %v827_v13, %v2175_v57  ;;  %v7797_v14 = vpop.permute.xlu0 %1801  ;;  %v10918_v39 = vld [vmem:[#allocation71_spill] sm:$0xff]  ;;  %v10919_v57 = vld [vmem:[#allocation73_spill] sm:$0xff]  ;;  %v10922_v17 = vld [vmem:[#allocation82_spill] sm:$0xff] }
 0x27a   : > { %v2178_v8 = vsub.f32 %v2167_v44, %v2176_v42  ;;  %v2179_v21 = vsub.f32 %v2168_v5, %v2177_v61  ;;  %10916 = vst [vmem:[#allocation114_spill] sm:$0xff] %v7813_v62  ;;  %v7820_v60 = vand.u32 4294901760, %v7813_v62  ;;  %v10920_v63 = vsub.f32 %v10918_v39, %v10919_v57  ;;  %v10926_v44 = vld [vmem:[#allocation129_spill] sm:$0xff]  ;;  %v10927_v5 = vld [vmem:[#allocation126_spill] sm:$0xff]  ;;  %v10939_v57 = vld [vmem:[#allocation155_spill] sm:$0xff] }
 0x27b   : > { %v662_v56 = vsub.f32 %v10922_v17, %v10921_v7  ;;  %v7828_v43 = vand.u32 127, %v10923_v30  ;;  %v669_v40 = vsub.f32 %v10927_v5, %v10926_v44  ;;  %v7839_v61 = vsub.f32 %v5334_v25, %v5334_v25 }
 0x27c   : > { %v2180_v19 = vmul.f32 %v2178_v8, %v7795_v35  ;;  %v2181_v9 = vmul.f32 %v2179_v21, %v7795_v35  ;;  %10917 = vst [vmem:[#allocation87_spill] sm:$0xff] %v7820_v60  ;;  %v2208_v42 = vsub.f32 %v7813_v62, %v7820_v60 }
 0x27d   : > { %10924 = vst [vmem:[#allocation90_spill] sm:$0xff] %v7828_v43  ;;  %vm10385_vm14 = vcmp.eq.s32.totalorder %v7828_v43, 2  ;;  %v7858_v46 = vand.u32 4294901760, %v7839_v61 }
 0x27e   : > { %2018 = vperm.xlu2 %5608, %v10910_v47   ;;  %2023 = vperm.xlu1 %5607, %v659_v38   ;;  %v2182_v32 = vmin.f32 %v2180_v19, 0.0  ;;  %v2183_v29 = vmin.f32 %v2181_v9, 0.0  ;;  %v7815_v11 = vpop.permute.xlu1 %1781  ;;  %10928 = vst [vmem:[#allocation91_spill] sm:$0xff] %v7839_v61  ;;  %v7844_v53 = vand.u32 4294901760, %v2208_v42  ;;  %v10931_v38 = vld [vmem:[#allocation98_spill] sm:$0xff]  ;;  %v10932_v19 = vld [vmem:[#allocation100_spill] sm:$0xff] }
 0x27f   : > { %v10933_v9 = vsub.f32 %v10931_v38, %v10932_v19  ;;  %10934 = vst [vmem:[#allocation103_spill] sm:$0xff] %v7858_v46  ;;  %v2216_v25 = vsub.f32 %v7839_v61, %v7858_v46  ;;  %v10945_v38 = vld [vmem:[#allocation118_spill] sm:$0xff] }
 0x280   : > { %v7811_v12 = vpop.permute.xlu2 %1806  ;;  %v2184_v41 = vmul.f32 1.442695, %v2182_v32  ;;  %v2186_v50 = vmul.f32 1.442695, %v2183_v29  ;;  %10929 = vst [vmem:[#allocation88_spill] sm:$0xff] %v7844_v53  ;;  %v10935_v32 = vld [vmem:[#allocation101_spill] sm:$0xff] }
 0x281   : > { %2058 = vperm.xlu0 %5609, %v666_v49   ;;  %v7817_v59 = vpop.permute.xlu0 %1816  ;;  %v10936_v29 = vld [vmem:[#allocation99_spill] sm:$0xff] }
 0x282   : > { %5610 = vpow2.f32 %v2184_v41 }
 0x283   : > { %5612 = vpow2.f32 %v2186_v50 }
 0x286   : > { %2033 = vperm.xlu2 %5608, %v10920_v63   ;;  %2038 = vperm.xlu1 %5607, %v662_v56   ;;  %v7841_v8 = vpop.permute.xlu1 %1796  ;;  %v10940_v63 = vld [vmem:[#allocation152_spill] sm:$0xff] }
 0x287   : > { %v672_v7 = vsub.f32 %v10940_v63, %v10939_v57 }
 0x288   : > { %v7835_v13 = vpop.permute.xlu2 %1821  ;;  %v5611_v21 = vpop.eup %5610 }
 0x289   : > { %2073 = vperm.xlu0 %5609, %v669_v40   ;;  %v5613_v28 = vpop.eup %5612  ;;  %v1832_v15 = vpop.permute.xlu0 %1831  ;;  %v2203_v47 = vand.u32 4294901760, %v5611_v21  ;;  %v7847_v52 = vmul.f32 %v5611_v21, %v7753_v34  ;;  %v665_v34 = vsub.f32 %v10936_v29, %v10935_v32  ;;  %v7892_v32 = vand.u32 4294901760, %v2216_v25 }
 0x28a   : > { %v7852_v33 = vsel %vm10385_vm14, %v7760_v31, %v1832_v15  ;;  %v2814_v6 = vand.u32 4294901760, %v5613_v28  ;;  %v7861_v49 = vmul.f32 %v5613_v28, %v7775_v16  ;;  %v10937_v31 = vld [vmem:[#allocation17_spill] sm:$0xff]  ;;  %v10944_v15 = vld [vmem:[#allocation115_spill] sm:$0xff] }
 0x28b   : > { %10930 = vst [vmem:[#allocation143_spill] sm:$0xff] %v7852_v33  ;;  %2204 = vmatpush.xpose.msra.mxu0 %v2203_v47  ;;  %2535 = vmatpush.xpose.msra.mxu3 %v2203_v47  ;;  %v2350_v41 = vsub.f32 %v5611_v21, %v2203_v47  ;;  %vm10938_vm15 = vnez %v10937_v31  ;;  %v10946_v19 = vsub.f32 %v10944_v15, %v10945_v38  ;;  %v10961_v15 = vld [vmem:[#allocation147_spill] sm:$0xff] }
 0x28c   : > { %v5336_v50 = vsel %vm10938_vm15, 1.0, %v10353_v58  ;;  %v2961_v39 = vsub.f32 %v5613_v28, %v2814_v6  ;;  %10947 = vst [vmem:[#allocation48_spill] sm:$0xff] %v7892_v32 }
 0x28d   : > { %2437 = vmatpush.xpose.msra.mxu2 %v2350_v41  ;;  %v2351_v56 = vand.u32 4294901760, %v2350_v41  ;;  %v7879_v44 = vsub.f32 %v5336_v50, %v5336_v50 }
 0x28e   : > { %2048 = vperm.xlu2 %5608, %v10933_v9   ;;  %2053 = vperm.xlu1 %5607, %v665_v34   ;;  %v2962_v30 = vand.u32 4294901760, %v2961_v39  ;;  %v7881_v5 = vpop.permute.xlu1 %1811  ;;  %v10949_v34 = vld [vmem:[#allocation131_spill] sm:$0xff] }
 0x28f   : > { %2210 = vmatmul.f32.vlgmr.msra.gmra.mxu0 %v7844_v53  ;;  %2539 = vmatmul.f32.vlgmr.msra.gmra.mxu3 %v7820_v60  ;;  %10942 = vst [vmem:[#allocation119_spill] sm:$0xff] %v7879_v44  ;;  %v2352_v40 = vsub.f32 %v2350_v41, %v2351_v56  ;;  %v7895_v29 = vand.u32 4294901760, %v7879_v44  ;;  %v10950_v41 = vld [vmem:[#allocation128_spill] sm:$0xff] }
 0x290   : > { %v1837_v17 = vpop.permute.xlu2 %1836  ;;  %2651 = vmatpush.xpose.msrb.mxu0 %v2351_v56  ;;  %2440 = vmatmul.f32.vlgmr.msra.gmra.mxu2 %v7813_v62  ;;  %v668_v50 = vsub.f32 %v10950_v41, %v10949_v34 }
 0x291   : > { %v7873_v16 = vsel %vm10385_vm14, %v7705_v22, %v1837_v17  ;;  %2815 = vmatpush.xpose.msrb.mxu2 %v2814_v6  ;;  %2088 = vperm.xlu0 %5609, %v672_v7   ;;  %v2963_v22 = vsub.f32 %v2961_v39, %v2962_v30  ;;  %v1847_v42 = vpop.permute.xlu0 %1846  ;;  %v2353_v21 = vand.u32 4294901760, %v2352_v40  ;;  %10948 = vst [vmem:[#allocation47_spill] sm:$0xff] %v7895_v29  ;;  %v10350_v7 = vmov 1.0   ;;  %v10956_v40 = vld [vmem:[#allocation144_spill] sm:$0xff] }
 0x292   : > { %10941 = vst [vmem:[#allocation106_spill] sm:$0xff] %v7873_v16  ;;  %v7887_v28 = vsel %vm10385_vm14, %v7793_v36, %v1847_v42  ;;  %v2224_v17 = vsub.f32 %v7879_v44, %v7895_v29 }
 0x293   : > { %10943 = vst [vmem:[#allocation116_spill] sm:$0xff] %v7887_v28  ;;  %v2964_v9 = vand.u32 4294901760, %v2963_v22  ;;  %2354 = vmatpush.xpose.msra.mxu1 %v2353_v21  ;;  %v10957_v22 = vld [vmem:[#allocation146_spill] sm:$0xff] }
 0x294   : > { %3048 = vmatpush.xpose.msra.mxu0 %v2961_v39  ;;  %v10951_v39 = vld [vmem:[#allocation21_spill] sm:$0xff]  ;;  %v10958_v42 = vsub.f32 %v10956_v40, %v10957_v22  ;;  %v7930_v21 = vand.u32 4294901760, %v2224_v17 }
 0x295   : > { %3262 = vmatpush.xpose.msra.mxu2 %v2962_v30  ;;  %vm10952_vm0 = vnez %v10951_v39  ;;  %2965 = vmatpush.xpose.msrb.mxu3 %v2964_v9  ;;  %v5340_v9 = vsel %vm6190_vm12, 1.0, %v10353_v58 }
 0x296   : > { %2063 = vperm.xlu2 %5608, %v10946_v19   ;;  %v5338_v57 = vsel %vm10952_vm0, 1.0, %v10353_v58  ;;  %2068 = vperm.xlu1 %5607, %v668_v50   ;;  %10959 = vst [vmem:[#allocation134_spill] sm:$0xff] %v7930_v21  ;;  %v10963_v19 = vld [vmem:[#allocation27_spill] sm:$0xff]  ;;  %v7951_v50 = vsub.f32 %v5340_v9, %v5340_v9 }
 0x297   : > { %2733 = vmatpush.xpose.msrb.mxu1 %v2203_v47  ;;  %2218 = vmatmul.f32.gmra.mxu0 %v7892_v32  ;;  %v7913_v56 = vsub.f32 %v5338_v57, %v5338_v57  ;;  %v1827_v47 = vpop.permute.xlu1 %1826 }
 0x298   : > { %v1852_v36 = vpop.permute.xlu2 %1851  ;;  %5364 = vmatmul.msk.f32.vlgmr.msra.gmra.mxu1 %vm6033_vm2, %v10350_v7  ;;  %2545 = vmatmul.f32.gmra.mxu3 %v7858_v46  ;;  %10964 = vst [vmem:[#allocation78_spill] sm:$0xff] %v7951_v50 }
 0x299   : > { %3344 = vmatpush.xpose.msra.mxu3 %v2814_v6  ;;  %v7905_v63 = vsel %vm10385_vm14, %v7734_v10, %v1852_v36  ;;  %10954 = vst [vmem:[#allocation136_spill] sm:$0xff] %v7913_v56  ;;  %v7919_v10 = vsel %vm10385_vm14, %v7678_v27, %v1827_v47  ;;  %2445 = vmatmul.f32.gmra.mxu2 %v7839_v61  ;;  %v1862_v30 = vpop.permute.xlu0 %1861  ;;  %v10962_v27 = vld [vmem:[#allocation145_spill] sm:$0xff]  ;;  %v10966_v47 = vld [vmem:[#allocation158_spill] sm:$0xff] }
 0x29a   : > { %10953 = vst [vmem:[#allocation133_spill] sm:$0xff] %v7905_v63  ;;  %v7925_v25 = vsel %vm10385_vm14, %v7815_v11, %v1862_v30  ;;  %v671_v38 = vsub.f32 %v10962_v27, %v10961_v15  ;;  %v10967_v30 = vld [vmem:[#allocation159_spill] sm:$0xff]  ;;  %v5342_v15 = vsel %vm10748_vm9, 1.0, %v10353_v58  ;;  %v10990_v63 = vmov 0.0  }
 0x29b   : > { %3146 = vmatpush.xpose.msra.mxu1 %v2814_v6  ;;  %10955 = vst [vmem:[#allocation137_spill] sm:$0xff] %v7919_v10  ;;  %v7933_v6 = vand.u32 4294901760, %v7913_v56  ;;  %v10968_v40 = vsub.f32 %v10966_v47, %v10967_v30  ;;  %v7987_v9 = vsub.f32 %v5342_v15, %v5342_v15  ;;  %v10976_v30 = vld [vmem:[#allocation29_spill] sm:$0xff] }
 0x29c   : > { %vm10977_vm5 = vnez %v10976_v30 }
 0x29d   : > { %10960 = vst [vmem:[#allocation75_spill] sm:$0xff] %v7933_v6  ;;  %v2232_v41 = vsub.f32 %v7913_v56, %v7933_v6  ;;  %v8004_v47 = vand.u32 4294901760, %v7987_v9 }
 0x29e   : > { %2078 = vperm.xlu2 %5608, %v10958_v42   ;;  %2083 = vperm.xlu1 %5607, %v671_v38   ;;  %v7971_v42 = vand.u32 4294901760, %v7951_v50  ;;  %10972 = vst [vmem:[#allocation41_spill] sm:$0xff] %v7987_v9 }
 0x29f   : > { %2226 = vmatmul.f32.gmra.mxu0 %v7930_v21  ;;  %v1842_v57 = vpop.permute.xlu1 %1841  ;;  %v7968_v22 = vand.u32 4294901760, %v2232_v41  ;;  %10975 = vst [vmem:[#allocation53_spill] sm:$0xff] %v8004_v47 }
 0x2a0   : > { %v1867_v34 = vpop.permute.xlu2 %1866  ;;  %5365 = vmatmul.msk.f32.gmra.mxu1 %vm6078_vm6, %v10350_v7  ;;  %2551 = vmatmul.f32.gmra.mxu3 %v7895_v29  ;;  %v7957_v36 = vsel %vm10385_vm14, %v7725_v55, %v1842_v57  ;;  %10970 = vst [vmem:[#allocation42_spill] sm:$0xff] %v7971_v42  ;;  %v10971_v55 = vld [vmem:[#allocation25_spill] sm:$0xff] }
 0x2a1   : > { %v7943_v11 = vsel %vm10385_vm14, %v7765_v23, %v1867_v34  ;;  %10965 = vst [vmem:[#allocation149_spill] sm:$0xff] %v7957_v36  ;;  %2450 = vmatmul.f32.gmra.mxu2 %v7879_v44  ;;  %v1877_v23 = vpop.permute.xlu0 %1876 }
 0x2a2   : > { %v7963_v17 = vsel %vm10385_vm14, %v7841_v8, %v1877_v23  ;;  %10969 = vst [vmem:[#allocation151_spill] sm:$0xff] %v7968_v22  ;;  %v2240_v8 = vsub.f32 %v7951_v50, %v7971_v42 }
 0x2a4   : > { %v8001_v23 = vand.u32 4294901760, %v2240_v8 }
 0x2a6   : > { %2093 = vperm.xlu2 %5608, %v10968_v40   ;;  %10974 = vst [vmem:[#allocation96_spill] sm:$0xff] %v8001_v23  ;;  %v5344_v40 = vsel %vm10977_vm5, 1.0, %v10353_v58 }
 0x2a7   : > { %2234 = vmatmul.f32.gmra.mxu0 %v7968_v22  ;;  %v1857_v34 = vpop.permute.xlu1 %1856 }
 0x2a8   : > { %v1882_v27 = vpop.permute.xlu2 %1881  ;;  %5366 = vmatmul.msk.f32.gmra.mxu1 %vm10938_vm15, %v10350_v7  ;;  %2557 = vmatmul.f32.gmra.mxu3 %v7933_v6  ;;  %v7993_v41 = vsel %vm10385_vm14, %v7747_v18, %v1857_v34 }
 0x2a9   : > { %v7979_v38 = vsel %vm10385_vm14, %v7797_v14, %v1882_v27  ;;  %10973 = vst [vmem:[#allocation93_spill] sm:$0xff] %v7993_v41  ;;  %2455 = vmatmul.f32.gmra.mxu2 %v7913_v56  ;;  %v1892_v14 = vpop.permute.xlu0 %1891  ;;  %v8020_v27 = vsub.f32 %v5344_v40, %v5344_v40 }
 0x2aa   : > { %v7999_v57 = vsel %vm10385_vm14, %v7881_v5, %v1892_v14  ;;  %v2248_v5 = vsub.f32 %v7987_v9, %v8004_v47 }
 0x2ab   : > { %10978 = vst [vmem:[#allocation50_spill] sm:$0xff] %v8020_v27 }
 0x2ac   : > { %v8029_v14 = vand.u32 4294901760, %v2248_v5 }
 0x2ae   : > { %10980 = vst [vmem:[#allocation51_spill] sm:$0xff] %v8029_v14 }
 0x2af   : > { %2242 = vmatmul.f32.gmra.mxu0 %v8001_v23  ;;  %v1872_v8 = vpop.permute.xlu1 %1871 }
 0x2b0   : > { %v1897_v15 = vpop.permute.xlu2 %1896  ;;  %5367 = vmatmul.msk.f32.gmra.mxu1 %vm10952_vm0, %v10350_v7  ;;  %2563 = vmatmul.f32.gmra.mxu3 %v7971_v42  ;;  %v1913_v34 = vsel %vm10385_vm14, %v7788_v51, %v1872_v8  ;;  %v10982_v7 = vld [vmem:[#allocation31_spill] sm:$0xff]  ;;  %v10985_v42 = vmov 1.0  }
 0x2b1   : > { %v8012_v18 = vsel %vm10385_vm14, %v7817_v59, %v1897_v15  ;;  %2460 = vmatmul.f32.gmra.mxu2 %v7951_v50  ;;  %v8027_v59 = vpop.permute.xlu0 %1922  ;;  %v8032_v15 = vand.u32 4294901760, %v8020_v27  ;;  %vm10983_vm7 = vnez %v10982_v7 }
 0x2b2   : > { %10979 = vst [vmem:[#allocation54_spill] sm:$0xff] %v8027_v59  ;;  %v5346_v40 = vsel %vm10983_vm7, 1.0, %v10353_v58 }
 0x2b3   : > { %10981 = vst [vmem:[#allocation121_spill] sm:$0xff] %v8032_v15  ;;  %v2256_v51 = vsub.f32 %v8020_v27, %v8032_v15  ;;  %v8045_v5 = vsub.f32 %v5346_v40, %v5346_v40  ;;  %v5348_v40 = vsel %vm10770_vm3, 1.0, %v10990_v63 }
 0x2b5   : > { %10986 = vst [vmem:[#allocation79_spill] sm:$0xff] %v8045_v5  ;;  %v8057_v23 = vand.u32 4294901760, %v8045_v5 }
 0x2b7   : > { %2250 = vmatmul.f32.gmra.mxu0 %v8029_v14  ;;  %v1887_v8 = vpop.permute.xlu1 %1886  ;;  %v8054_v14 = vand.u32 4294901760, %v2256_v51  ;;  %10989 = vst [vmem:[#allocation86_spill] sm:$0xff] %v8057_v23  ;;  %v8070_v51 = vsub.f32 %v5348_v40, %v5348_v40 }
 0x2b8   : > { %v8037_v41 = vpop.permute.xlu2 %1927  ;;  %5368 = vmatmul.msk.f32.gmra.mxu1 %vm6190_vm12, %v10985_v42  ;;  %2569 = vmatmul.f32.gmra.mxu3 %v8004_v47  ;;  %v1916_v58 = vsel %vm10385_vm14, %v7811_v12, %v1887_v8  ;;  %v2264_v12 = vsub.f32 %v8045_v5, %v8057_v23  ;;  %vm10392_vm12 = vcmp.eq.s32.totalorder %v7828_v43, 1 }
 0x2b9   : > { %10984 = vst [vmem:[#allocation124_spill] sm:$0xff] %v8037_v41  ;;  %2465 = vmatmul.f32.gmra.mxu2 %v7987_v9  ;;  %v8052_v50 = vpop.permute.xlu0 %1937  ;;  %v8082_v22 = vand.u32 4294901760, %v8070_v51 }
 0x2ba   : > { %10987 = vst [vmem:[#allocation76_spill] sm:$0xff] %v8052_v50 }
 0x2bb   : > { %10988 = vst [vmem:[#allocation89_spill] sm:$0xff] %v8054_v14 }
 0x2bc   : > { %10993 = vst [vmem:[#allocation142_spill] sm:$0xff] %v8070_v51 }
 0x2bd   : > { %10996 = vst [vmem:[#allocation105_spill] sm:$0xff] %v8082_v22 }
 0x2bf   : > { %2258 = vmatmul.f32.gmra.mxu0 %v8054_v14  ;;  %v1902_v8 = vpop.permute.xlu1 %1901  ;;  %v8079_v14 = vand.u32 4294901760, %v2264_v12  ;;  %v2272_v12 = vsub.f32 %v8070_v51, %v8082_v22 }
 0x2c0   : > { %v8062_v6 = vpop.permute.xlu2 %1942  ;;  %5369 = vmatmul.msk.f32.gmra.mxu1 %vm10748_vm9, %v10985_v42  ;;  %2575 = vmatmul.f32.gmra.mxu3 %v8032_v15  ;;  %v1919_v9 = vsel %vm10385_vm14, %v7835_v13, %v1902_v8  ;;  %vm10401_vm14 = vcmp.eq.s32.totalorder %v7828_v43, 0 }
 0x2c1   : > { %10992 = vst [vmem:[#allocation139_spill] sm:$0xff] %v8062_v6  ;;  %2470 = vmatmul.f32.gmra.mxu2 %v8020_v27  ;;  %v8077_v47 = vpop.permute.xlu0 %1952  ;;  %v10997_v6 = vld [vmem:[#allocation35_spill] sm:$0xff] }
 0x2c2   : > { %10994 = vst [vmem:[#allocation107_spill] sm:$0xff] %v8077_v47  ;;  %vm10998_vm9 = vnez %v10997_v6 }
 0x2c3   : > { %10995 = vst [vmem:[#allocation104_spill] sm:$0xff] %v8079_v14  ;;  %v5350_v40 = vsel %vm10998_vm9, 1.0, %v10990_v63 }
 0x2c4   : > { %v8099_v8 = vsub.f32 %v5350_v40, %v5350_v40  ;;  %v5352_v40 = vsel %vm10841_vm4, 1.0, %v10990_v63 }
 0x2c6   : > { %11000 = vst [vmem:[#allocation52_spill] sm:$0xff] %v8099_v8 }
 0x2c7   : > { %2266 = vmatmul.f32.gmra.mxu0 %v8079_v14  ;;  %v8102_v27 = vpop.permute.xlu1 %1932  ;;  %v8112_v14 = vand.u32 4294901760, %v8099_v8 }
 0x2c8   : > { %v1958_v15 = vpop.permute.xlu2 %1957  ;;  %5370 = vmatmul.msk.f32.gmra.mxu1 %vm10977_vm5, %v10985_v42  ;;  %2581 = vmatmul.f32.gmra.mxu3 %v8057_v23  ;;  %11001 = vst [vmem:[#allocation49_spill] sm:$0xff] %v8102_v27 }
 0x2c9   : > { %v8091_v13 = vsel %vm10392_vm12, %v1958_v15, %v7925_v25  ;;  %2475 = vmatmul.f32.gmra.mxu2 %v8045_v5  ;;  %v1968_v47 = vpop.permute.xlu0 %1967  ;;  %v8109_v15 = vand.u32 4294901760, %v2272_v12  ;;  %11003 = vst [vmem:[#allocation122_spill] sm:$0xff] %v8112_v14 }
 0x2ca   : > { %10999 = vst [vmem:[#allocation102_spill] sm:$0xff] %v8091_v13  ;;  %v8107_v25 = vsel %vm10392_vm12, %v1968_v47, %v1913_v34  ;;  %v2280_v47 = vsub.f32 %v8099_v8, %v8112_v14  ;;  %v8128_v34 = vsub.f32 %v5352_v40, %v5352_v40  ;;  %v5354_v40 = vsel %vm10846_vm10, 1.0, %v10990_v63 }
 0x2cb   : > { %11002 = vst [vmem:[#allocation125_spill] sm:$0xff] %v8109_v15 }
 0x2cc   : > { %11005 = vst [vmem:[#allocation135_spill] sm:$0xff] %v8128_v34 }
 0x2cf   : > { %2274 = vmatmul.f32.gmra.mxu0 %v8109_v15  ;;  %v8131_v12 = vpop.permute.xlu1 %1947  ;;  %v8141_v15 = vand.u32 4294901760, %v8128_v34 }
 0x2d0   : > { %v1973_v28 = vpop.permute.xlu2 %1972  ;;  %5371 = vmatmul.msk.f32.gmra.mxu1 %vm10983_vm7, %v10985_v42  ;;  %2587 = vmatmul.f32.gmra.mxu3 %v8082_v22  ;;  %11006 = vst [vmem:[#allocation132_spill] sm:$0xff] %v8131_v12 }
 0x2d1   : > { %v8120_v23 = vsel %vm10392_vm12, %v1973_v28, %v7963_v17  ;;  %2480 = vmatmul.f32.gmra.mxu2 %v8070_v51  ;;  %v1983_v5 = vpop.permute.xlu0 %1982  ;;  %v8138_v17 = vand.u32 4294901760, %v2280_v47  ;;  %11008 = vst [vmem:[#allocation57_spill] sm:$0xff] %v8141_v15 }
 0x2d2   : > { %v8136_v28 = vsel %vm10392_vm12, %v1983_v5, %v1916_v58  ;;  %v2288_v58 = vsub.f32 %v8128_v34, %v8141_v15  ;;  %v8157_v5 = vsub.f32 %v5354_v40, %v5354_v40  ;;  %v5356_v40 = vsel %vm6483_vm11, 1.0, %v10990_v63 }
 0x2d3   : > { %11007 = vst [vmem:[#allocation60_spill] sm:$0xff] %v8138_v17 }
 0x2d4   : > { %11009 = vst [vmem:[#allocation62_spill] sm:$0xff] %v8157_v5  ;;  %v8171_v12 = vand.u32 4294901760, %v8157_v5 }
 0x2d6   : > { %11011 = vst [vmem:[#allocation77_spill] sm:$0xff] %v8171_v12 }
 0x2d7   : > { %2282 = vmatmul.f32.gmra.mxu0 %v8138_v17  ;;  %v8168_v17 = vand.u32 4294901760, %v2288_v58 }
 0x2d8   : > { %v1988_v44 = vpop.permute.xlu2 %1987  ;;  %5372 = vmatmul.msk.f32.gmra.mxu1 %vm10770_vm3, %v10985_v42  ;;  %2593 = vmatmul.f32.gmra.mxu3 %v8112_v14  ;;  %v1963_v47 = vpop.permute.xlu1 %1962 }
 0x2d9   : > { %v8149_v22 = vsel %vm10392_vm12, %v1988_v44, %v7999_v57  ;;  %v2008_v51 = vsel %vm10392_vm12, %v1963_v47, %v7943_v11  ;;  %2485 = vmatmul.f32.gmra.mxu2 %v8099_v8  ;;  %11010 = vst [vmem:[#allocation59_spill] sm:$0xff] %v8168_v17  ;;  %v2296_v11 = vsub.f32 %v8157_v5, %v8171_v12 }
 0x2db   : > { %v1998_v44 = vpop.permute.xlu0 %1997 }
 0x2dc   : > { %v8166_v57 = vsel %vm10392_vm12, %v1998_v44, %v1919_v9  ;;  %v8184_v9 = vsub.f32 %v5356_v40, %v5356_v40  ;;  %v5358_v40 = vsel %vm10852_vm8, 1.0, %v10990_v63 }
 0x2de   : > { %11013 = vst [vmem:[#allocation97_spill] sm:$0xff] %v8184_v9  ;;  %v8196_v8 = vand.u32 4294901760, %v8184_v9 }
 0x2df   : > { %2290 = vmatmul.f32.gmra.mxu0 %v8168_v17  ;;  %v8193_v17 = vand.u32 4294901760, %v2296_v11  ;;  %v8209_v11 = vsub.f32 %v5358_v40, %v5358_v40  ;;  %v5360_v40 = vsel %vm6586_vm13, 1.0, %v10990_v63 }
 0x2e0   : > { %v8176_v14 = vpop.permute.xlu2 %2018  ;;  %5373 = vmatmul.msk.f32.gmra.mxu1 %vm10998_vm9, %v10985_v42  ;;  %2599 = vmatmul.f32.gmra.mxu3 %v8141_v15  ;;  %v1978_v58 = vpop.permute.xlu1 %1977  ;;  %11016 = vst [vmem:[#allocation110_spill] sm:$0xff] %v8196_v8 }
 0x2e1   : > { %11012 = vst [vmem:[#allocation74_spill] sm:$0xff] %v8176_v14  ;;  %v2011_v47 = vsel %vm10392_vm12, %v1978_v58, %v7979_v38  ;;  %2490 = vmatmul.f32.gmra.mxu2 %v8128_v34  ;;  %v2304_v38 = vsub.f32 %v8184_v9, %v8196_v8  ;;  %v8221_v21 = vand.u32 4294901760, %v8209_v11 }
 0x2e2   : > { %11015 = vst [vmem:[#allocation113_spill] sm:$0xff] %v8193_v17 }
 0x2e3   : > { %v8191_v44 = vpop.permute.xlu0 %2028  ;;  %11018 = vst [vmem:[#allocation150_spill] sm:$0xff] %v8209_v11 }
 0x2e4   : > { %11014 = vst [vmem:[#allocation94_spill] sm:$0xff] %v8191_v44 }
 0x2e5   : > { %11021 = vst [vmem:[#allocation44_spill] sm:$0xff] %v8221_v21 }
 0x2e7   : > { %2298 = vmatmul.f32.gmra.mxu0 %v8193_v17  ;;  %v8218_v17 = vand.u32 4294901760, %v2304_v38  ;;  %v8234_v38 = vsub.f32 %v5360_v40, %v5360_v40  ;;  %v5362_v40 = vsel %vm6636_vm1, 1.0, %v10990_v63 }
 0x2e8   : > { %v8201_v29 = vpop.permute.xlu2 %2033  ;;  %5374 = vmatmul.msk.f32.gmra.mxu1 %vm10841_vm4, %v10985_v42  ;;  %2605 = vmatmul.f32.gmra.mxu3 %v8171_v12  ;;  %v1993_v58 = vpop.permute.xlu1 %1992 }
 0x2e9   : > { %11017 = vst [vmem:[#allocation140_spill] sm:$0xff] %v8201_v29  ;;  %v2014_v34 = vsel %vm10392_vm12, %v1993_v58, %v8012_v18  ;;  %2495 = vmatmul.f32.gmra.mxu2 %v8157_v5  ;;  %v2312_v18 = vsub.f32 %v8209_v11, %v8221_v21 }
 0x2ea   : > { %11020 = vst [vmem:[#allocation38_spill] sm:$0xff] %v8218_v17 }
 0x2eb   : > { %v8216_v15 = vpop.permute.xlu0 %2043  ;;  %11023 = vst [vmem:[#allocation61_spill] sm:$0xff] %v8234_v38  ;;  %v8245_v12 = vand.u32 4294901760, %v2312_v18 }
 0x2ec   : > { %11019 = vst [vmem:[#allocation148_spill] sm:$0xff] %v8216_v15 }
 0x2ed   : > { %11026 = vst [vmem:[#allocation63_spill] sm:$0xff] %v8245_v12 }
 0x2ef   : > { %2306 = vmatmul.f32.gmra.mxu0 %v8218_v17 }
 0x2f0   : > { %v8226_v29 = vpop.permute.xlu2 %2048  ;;  %5375 = vmatmul.msk.f32.gmra.mxu1 %vm10846_vm10, %v10985_v42  ;;  %2611 = vmatmul.f32.gmra.mxu3 %v8196_v8  ;;  %v8237_v58 = vpop.permute.xlu1 %2023 }
 0x2f1   : > { %11022 = vst [vmem:[#allocation58_spill] sm:$0xff] %v8226_v29  ;;  %2500 = vmatmul.f32.gmra.mxu2 %v8184_v9  ;;  %v8248_v29 = vand.u32 4294901760, %v8234_v38 }
 0x2f2   : > { %11024 = vst [vmem:[#allocation55_spill] sm:$0xff] %v8237_v58 }
 0x2f3   : > { %v2059_v5 = vpop.permute.xlu0 %2058  ;;  %11027 = vst [vmem:[#allocation64_spill] sm:$0xff] %v8248_v29 }
 0x2f4   : > { %v8243_v17 = vsel %vm10401_vm14, %v2059_v5, %v2008_v51  ;;  %v2320_v51 = vsub.f32 %v8234_v38, %v8248_v29  ;;  %v8264_v5 = vsub.f32 %v5362_v40, %v5362_v40  ;;  %v11034_v40 = vld [vmem:[#allocation16_spill] sm:$0xff] }
 0x2f5   : > { %11025 = vst [vmem:[#allocation56_spill] sm:$0xff] %v8243_v17  ;;  %vm11035_vm12 = vnez %v11034_v40 }
 0x2f6   : > { %11029 = vst [vmem:[#allocation84_spill] sm:$0xff] %v8264_v5  ;;  %v5333_v15 = vsel %vm11035_vm12, 1.0, %v10990_v63 }
 0x2f7   : > { %2314 = vmatmul.f32.gmra.mxu0 %v8245_v12  ;;  %v8277_v12 = vand.u32 4294901760, %v8264_v5 }
 0x2f8   : > { %v2064_v8 = vpop.permute.xlu2 %2063  ;;  %5376 = vmatmul.msk.f32.gmra.mxu1 %vm6483_vm11, %v10985_v42  ;;  %2617 = vmatmul.f32.gmra.mxu3 %v8221_v21  ;;  %v8267_v18 = vpop.permute.xlu1 %2038 }
 0x2f9   : > { %v8256_v9 = vsel %vm10401_vm14, %v2064_v8, %v8107_v25  ;;  %11030 = vst [vmem:[#allocation92_spill] sm:$0xff] %v8267_v18  ;;  %2505 = vmatmul.f32.gmra.mxu2 %v8209_v11  ;;  %v8274_v25 = vand.u32 4294901760, %v2320_v51  ;;  %v8297_v51 = vsub.f32 %v5333_v15, %v5333_v15 }
 0x2fa   : > { %11028 = vst [vmem:[#allocation81_spill] sm:$0xff] %v8256_v9 }
 0x2fb   : > { %v2074_v17 = vpop.permute.xlu0 %2073  ;;  %11032 = vst [vmem:[#allocation72_spill] sm:$0xff] %v8274_v25 }
 0x2fc   : > { %v8272_v8 = vsel %vm10401_vm14, %v2074_v17, %v2011_v47  ;;  %11033 = vst [vmem:[#allocation109_spill] sm:$0xff] %v8277_v12  ;;  %v2328_v17 = vsub.f32 %v8264_v5, %v8277_v12 }
 0x2fd   : > { %11031 = vst [vmem:[#allocation95_spill] sm:$0xff] %v8272_v8  ;;  %v8309_v8 = vand.u32 4294901760, %v7847_v52 }
 0x2fe   : > { %11038 = vst [vmem:[#allocation157_spill] sm:$0xff] %v8297_v51 }
 0x2ff   : > { %2322 = vmatmul.f32.gmra.mxu0 %v8274_v25  ;;  %v8306_v25 = vand.u32 4294901760, %v8297_v51 }
 0x300   : > { %v2079_v9 = vpop.permute.xlu2 %2078  ;;  %5377 = vmatmul.msk.f32.gmra.mxu1 %vm10852_vm8, %v10985_v42  ;;  %2623 = vmatmul.f32.gmra.mxu3 %v8248_v29  ;;  %v8294_v47 = vpop.permute.xlu1 %2053  ;;  %v11041_v29 = vld [vmem:[#allocation20_spill] sm:$0xff] }
 0x301   : > { %v8285_v21 = vsel %vm10401_vm14, %v2079_v9, %v8136_v28  ;;  %11037 = vst [vmem:[#allocation154_spill] sm:$0xff] %v8294_v47  ;;  %2510 = vmatmul.f32.gmra.mxu2 %v8234_v38  ;;  %v8303_v9 = vand.u32 4294901760, %v2328_v17  ;;  %vm11042_vm8 = vnez %v11041_v29  ;;  %v8336_v17 = vsub.f32 %v7847_v52, %v8309_v8 }
 0x302   : > { %11036 = vst [vmem:[#allocation112_spill] sm:$0xff] %v8285_v21  ;;  %v5335_v38 = vsel %vm11042_vm8, 1.0, %v10990_v63 }
 0x303   : > { %v2089_v11 = vpop.permute.xlu0 %2088  ;;  %11040 = vst [vmem:[#allocation138_spill] sm:$0xff] %v8303_v9 }
 0x304   : > { %v8301_v28 = vsel %vm10401_vm14, %v2089_v11, %v2014_v34 }
 0x305   : > { %11039 = vst [vmem:[#allocation141_spill] sm:$0xff] %v8301_v28  ;;  %v11050_v28 = vand.u32 4294901760, %v8336_v17 }
 0x307   : > { %2330 = vmatmul.f32.gmra.mxu0 %v8303_v9 }
 0x308   : > { %v2094_v21 = vpop.permute.xlu2 %2093  ;;  %5378 = vmatmul.msk.f32.gmra.mxu1 %vm6586_vm13, %v10985_v42  ;;  %2629 = vmatmul.f32.gmra.mxu3 %v8277_v12  ;;  %v2069_v34 = vpop.permute.xlu1 %2068  ;;  %vm11048_vm13 = vcmp.eq.s32.totalorder %v7828_v43, 0 }
 0x309   : > { %v8317_v15 = vsel %vm10401_vm14, %v2094_v21, %v8166_v57  ;;  %v8327_v11 = vsel %vm10401_vm14, %v2069_v34, %v8120_v23  ;;  %2515 = vmatmul.f32.gmra.mxu2 %v8264_v5  ;;  %v2819_v21 = vsub.f32 %v8297_v51, %v8306_v25  ;;  %v8332_v57 = vsub.f32 %v5335_v38, %v5335_v38  ;;  %v11046_v34 = vld [vmem:[#allocation18_spill] sm:$0xff] }
 0x30a   : > { %11043 = vst [vmem:[#allocation12_spill] sm:$0xff] %v8317_v15  ;;  %vm11047_vm14 = vnez %v11046_v34 }
 0x30b   : > { %11044 = vst [vmem:[#allocation120_spill] sm:$0xff] %v8327_v11  ;;  %v8338_v15 = vand.u32 4294901760, %v2819_v21  ;;  %v8341_v12 = vand.u32 4294901760, %v8332_v57  ;;  %v5337_v5 = vsel %vm11047_vm14, 1.0, %v10990_v63  ;;  %v3576_v11 = vsub.f32 %v8336_v17, %v11050_v28 }
 0x30c   : > { %v2211_v9 = vpop.f32.mrf.mxu0  ;;  %v8366_v23 = vsub.f32 %v5337_v5, %v5337_v5  ;;  %v11052_v5 = vld [vmem:[#allocation22_spill] sm:$0xff] }
 0x30d   : > { %11045 = vst [vmem:[#allocation123_spill] sm:$0xff] %v8338_v15  ;;  %v2827_v21 = vsub.f32 %v8332_v57, %v8341_v12 }
 0x30f   : > { %5380 = vmatmul.msk.f32.vlgmr.msrb.gmra.mxu0 %vm6033_vm2, %v10985_v42 }
 0x310   : > { %5379 = vmatmul.msk.f32.gmra.mxu1 %vm6636_vm1, %v10985_v42  ;;  %5412 = vmatmul.msk.f32.vlgmr.msrb.gmra.mxu3 %vm11035_vm12, %v10985_v42  ;;  %v2084_v52 = vpop.permute.xlu1 %2083 }
 0x311   : > { %3428 = vmatpush.xpose.msrb.mxu0 %v8309_v8  ;;  %3759 = vmatpush.xpose.msrb.mxu3 %v8309_v8  ;;  %v8361_v38 = vsel %vm11048_vm13, %v2084_v52, %v8149_v22  ;;  %v8372_v22 = vand.u32 4294901760, %v2827_v21  ;;  %v8375_v52 = vand.u32 4294901760, %v8366_v23  ;;  %vm11053_vm13 = vnez %v11052_v5 }
 0x312   : > { %11049 = vst [vmem:[#allocation127_spill] sm:$0xff] %v8361_v38  ;;  %2821 = vmatmul.f32.vlgmr.msrb.gmra.mxu2 %v8338_v15  ;;  %v2540_v47 = vpop.f32.mrf.mxu3  ;;  %v3577_v15 = vand.u32 4294901760, %v3576_v11  ;;  %v5339_v38 = vsel %vm11053_vm13, 1.0, %v10990_v63 }
 0x313   : > { %3661 = vmatpush.xpose.msrb.mxu2 %v8336_v17  ;;  %v2441_v61 = vpop.f32.mrf.mxu2  ;;  %11051 = vst [vmem:[#allocation130_spill] sm:$0xff] %v8372_v22 }
 0x314   : > { %v2219_v18 = vpop.f32.mrf.mxu0 }
 0x315   : > { %v2357_v50 = vpop.f32.mrf.mxu1 }
 0x316   : > { %v2358_v36 = vadd.f32 %v2357_v50, %v2211_v9 }
 0x317   : > { %5381 = vmatmul.msk.f32.gmra.mxu0 %vm6078_vm6, %v10985_v42 }
 0x318   : > { %v2442_v46 = vadd.f32 %v2441_v61, %v2358_v36  ;;  %5396 = vmatmul.msk.f32.vlgmr.msrb.gmra.mxu1 %vm6033_vm2, %v10985_v42  ;;  %5413 = vmatmul.msk.f32.gmra.mxu3 %vm11042_vm8, %v10985_v42  ;;  %v2835_v61 = vsub.f32 %v8366_v23, %v8375_v52  ;;  %v8394_v36 = vsub.f32 %v5339_v38, %v5339_v38 }
 0x319   : > { %3578 = vmatpush.xpose.msrb.mxu1 %v3577_v15 }
 0x31a   : > { %v8389_v50 = vadd.f32 %v2540_v47, %v2442_v46  ;;  %2829 = vmatmul.f32.gmra.mxu2 %v8372_v22  ;;  %v8396_v32 = vand.u32 4294901760, %v2835_v61  ;;  %v8399_v44 = vand.u32 4294901760, %v8394_v36  ;;  %v11056_v46 = vld [vmem:[#allocation28_spill] sm:$0xff] }
 0x31b   : > { %v2546_v28 = vpop.f32.mrf.mxu3  ;;  %vm11057_vm2 = vnez %v11056_v46 }
 0x31c   : > { %v2227_v9 = vpop.f32.mrf.mxu0  ;;  %v2446_v1 = vpop.f32.mrf.mxu2  ;;  %11054 = vst [vmem:[#allocation13_spill] sm:$0xff] %v8396_v32  ;;  %v5341_v47 = vsel %vm11057_vm2, 1.0, %v10990_v63  ;;  %v2843_v38 = vsub.f32 %v8394_v36, %v8399_v44 }
 0x31d   : > { %v2361_v11 = vpop.f32.mrf.mxu1  ;;  %11055 = vst [vmem:[#allocation23_spill] sm:$0xff] %v8399_v44 }
 0x31e   : > { %v2362_v21 = vadd.f32 %v2361_v11, %v2219_v18  ;;  %v8420_v3 = vand.u32 4294901760, %v2843_v38 }
 0x31f   : > { %5382 = vmatmul.msk.f32.gmra.mxu0 %vm10938_vm15, %v10985_v42 }
 0x320   : > { %v2447_v15 = vadd.f32 %v2446_v1, %v2362_v21  ;;  %5397 = vmatmul.msk.f32.gmra.mxu1 %vm6078_vm6, %v10985_v42  ;;  %5414 = vmatmul.msk.f32.gmra.mxu3 %vm11047_vm14, %v10985_v42  ;;  %v8418_v1 = vsub.f32 %v5341_v47, %v5341_v47  ;;  %11058 = vst [vmem:[#allocation65_spill] sm:$0xff] %v8420_v3 }
 0x322   : > { %v8413_v18 = vadd.f32 %v2546_v28, %v2447_v15  ;;  %2837 = vmatmul.f32.gmra.mxu2 %v8396_v32  ;;  %v8423_v16 = vand.u32 4294901760, %v8418_v1  ;;  %v11060_v28 = vld [vmem:[#allocation26_spill] sm:$0xff] }
 0x323   : > { %v2552_v61 = vpop.f32.mrf.mxu3  ;;  %vm11061_vm6 = vnez %v11060_v28 }
 0x324   : > { %v2235_v11 = vpop.f32.mrf.mxu0  ;;  %v2451_v27 = vpop.f32.mrf.mxu2  ;;  %11059 = vst [vmem:[#allocation68_spill] sm:$0xff] %v8423_v16  ;;  %v5343_v15 = vsel %vm11061_vm6, 1.0, %v10990_v63  ;;  %v2851_v47 = vsub.f32 %v8418_v1, %v8423_v16 }
 0x325   : > { %v2365_v21 = vpop.f32.mrf.mxu1 }
 0x326   : > { %v2366_v22 = vadd.f32 %v2365_v21, %v2227_v9  ;;  %v8444_v31 = vand.u32 4294901760, %v2851_v47 }
 0x327   : > { %5383 = vmatmul.msk.f32.gmra.mxu0 %vm10952_vm0, %v10985_v42 }
 0x328   : > { %v2452_v32 = vadd.f32 %v2451_v27, %v2366_v22  ;;  %5398 = vmatmul.msk.f32.gmra.mxu1 %vm10938_vm15, %v10985_v42  ;;  %5415 = vmatmul.msk.f32.gmra.mxu3 %vm11053_vm13, %v10985_v42  ;;  %v8442_v27 = vsub.f32 %v5343_v15, %v5343_v15  ;;  %11063 = vst [vmem:[#allocation24_spill] sm:$0xff] %v8444_v31  ;;  %vm11067_vm13 = vnez %v10963_v19 }
 0x32a   : > { %v8437_v9 = vadd.f32 %v2552_v61, %v2452_v32  ;;  %2845 = vmatmul.f32.gmra.mxu2 %v8420_v3  ;;  %11062 = vst [vmem:[#allocation14_spill] sm:$0xff] %v8442_v27  ;;  %v8447_v53 = vand.u32 4294901760, %v8442_v27  ;;  %v11065_v32 = vld [vmem:[#allocation30_spill] sm:$0xff] }
 0x32b   : > { %v2558_v22 = vpop.f32.mrf.mxu3  ;;  %vm11066_vm15 = vnez %v11065_v32 }
 0x32c   : > { %v2243_v38 = vpop.f32.mrf.mxu0  ;;  %v2456_v60 = vpop.f32.mrf.mxu2  ;;  %11064 = vst [vmem:[#allocation83_spill] sm:$0xff] %v8447_v53  ;;  %v5345_v61 = vsel %vm11066_vm15, 1.0, %v10990_v63  ;;  %v2859_v15 = vsub.f32 %v8442_v27, %v8447_v53 }
 0x32d   : > { %v2369_v21 = vpop.f32.mrf.mxu1 }
 0x32e   : > { %v2370_v62 = vadd.f32 %v2369_v21, %v2235_v11  ;;  %v8468_v39 = vand.u32 4294901760, %v2859_v15 }
 0x32f   : > { %5384 = vmatmul.msk.f32.gmra.mxu0 %vm11067_vm13, %v10985_v42 }
 0x330   : > { %v2457_v3 = vadd.f32 %v2456_v60, %v2370_v62  ;;  %5399 = vmatmul.msk.f32.gmra.mxu1 %vm10952_vm0, %v10985_v42  ;;  %5416 = vmatmul.msk.f32.gmra.mxu3 %vm11057_vm2, %v10985_v42  ;;  %v8466_v62 = vsub.f32 %v5345_v61, %v5345_v61  ;;  %11069 = vst [vmem:[#allocation153_spill] sm:$0xff] %v8468_v39  ;;  %vm11073_vm2 = vnez %v10971_v55 }
 0x332   : > { %v8461_v11 = vadd.f32 %v2558_v22, %v2457_v3  ;;  %2853 = vmatmul.f32.gmra.mxu2 %v8444_v31  ;;  %11068 = vst [vmem:[#allocation80_spill] sm:$0xff] %v8466_v62  ;;  %v8471_v33 = vand.u32 4294901760, %v8466_v62  ;;  %v11071_v3 = vld [vmem:[#allocation32_spill] sm:$0xff] }
 0x333   : > { %v2564_v60 = vpop.f32.mrf.mxu3  ;;  %vm11072_vm0 = vnez %v11071_v3 }
 0x334   : > { %v2251_v47 = vpop.f32.mrf.mxu0  ;;  %v2461_v41 = vpop.f32.mrf.mxu2  ;;  %11070 = vst [vmem:[#allocation156_spill] sm:$0xff] %v8471_v33  ;;  %v5347_v22 = vsel %vm11072_vm0, 1.0, %v10990_v63  ;;  %v2867_v61 = vsub.f32 %v8466_v62, %v8471_v33 }
 0x335   : > { %v2373_v21 = vpop.f32.mrf.mxu1 }
 0x336   : > { %v2374_v58 = vadd.f32 %v2373_v21, %v2243_v38  ;;  %v8492_v19 = vand.u32 4294901760, %v2867_v61 }
 0x337   : > { %5385 = vmatmul.msk.f32.gmra.mxu0 %vm11073_vm2, %v10985_v42 }
 0x338   : > { %v2462_v31 = vadd.f32 %v2461_v41, %v2374_v58  ;;  %5400 = vmatmul.msk.f32.gmra.mxu1 %vm11067_vm13, %v10985_v42  ;;  %5417 = vmatmul.msk.f32.gmra.mxu3 %vm11061_vm6, %v10985_v42  ;;  %v8490_v41 = vsub.f32 %v5347_v22, %v5347_v22  ;;  %11075 = vst [vmem:[#allocation69_spill] sm:$0xff] %v8492_v19 }
 0x33a   : > { %v8485_v38 = vadd.f32 %v2564_v60, %v2462_v31  ;;  %2861 = vmatmul.f32.gmra.mxu2 %v8468_v39  ;;  %11074 = vst [vmem:[#allocation66_spill] sm:$0xff] %v8490_v41  ;;  %v8495_v43 = vand.u32 4294901760, %v8490_v41  ;;  %v11077_v31 = vld [vmem:[#allocation34_spill] sm:$0xff] }
 0x33b   : > { %v2570_v58 = vpop.f32.mrf.mxu3  ;;  %vm11078_vm13 = vnez %v11077_v31 }
 0x33c   : > { %v2259_v15 = vpop.f32.mrf.mxu0  ;;  %v2466_v14 = vpop.f32.mrf.mxu2  ;;  %11076 = vst [vmem:[#allocation70_spill] sm:$0xff] %v8495_v43  ;;  %v5349_v60 = vsel %vm11078_vm13, 1.0, %v10990_v63  ;;  %v2875_v22 = vsub.f32 %v8490_v41, %v8495_v43 }
 0x33d   : > { %v2377_v21 = vpop.f32.mrf.mxu1 }
 0x33e   : > { %v2378_v35 = vadd.f32 %v2377_v21, %v2251_v47  ;;  %v8516_v55 = vand.u32 4294901760, %v2875_v22 }
 0x33f   : > { %5386 = vmatmul.msk.f32.gmra.mxu0 %vm10977_vm5, %v10985_v42 }
 0x340   : > { %v2467_v39 = vadd.f32 %v2466_v14, %v2378_v35  ;;  %5401 = vmatmul.msk.f32.gmra.mxu1 %vm11073_vm2, %v10985_v42  ;;  %5418 = vmatmul.msk.f32.gmra.mxu3 %vm11066_vm15, %v10985_v42  ;;  %v8514_v35 = vsub.f32 %v5349_v60, %v5349_v60  ;;  %11080 = vst [vmem:[#allocation111_spill] sm:$0xff] %v8516_v55 }
 0x342   : > { %v8509_v47 = vadd.f32 %v2570_v58, %v2467_v39  ;;  %2869 = vmatmul.f32.gmra.mxu2 %v8492_v19  ;;  %11079 = vst [vmem:[#allocation67_spill] sm:$0xff] %v8514_v35  ;;  %v8519_v33 = vand.u32 4294901760, %v8514_v35  ;;  %v11082_v39 = vld [vmem:[#allocation36_spill] sm:$0xff] }
 0x343   : > { %v2576_v14 = vpop.f32.mrf.mxu3  ;;  %vm11083_vm2 = vnez %v11082_v39 }
 0x344   : > { %v2267_v61 = vpop.f32.mrf.mxu0  ;;  %v2471_v10 = vpop.f32.mrf.mxu2  ;;  %11081 = vst [vmem:[#allocation108_spill] sm:$0xff] %v8519_v33  ;;  %v5351_v58 = vsel %vm11083_vm2, 1.0, %v10990_v63  ;;  %v2883_v60 = vsub.f32 %v8514_v35, %v8519_v33 }
 0x345   : > { %v2381_v21 = vpop.f32.mrf.mxu1 }
 0x346   : > { %v2382_v59 = vadd.f32 %v2381_v21, %v2259_v15  ;;  %v8540_v30 = vand.u32 4294901760, %v2883_v60 }
 0x347   : > { %5387 = vmatmul.msk.f32.gmra.mxu0 %vm10983_vm7, %v10985_v42 }
 0x348   : > { %v2472_v19 = vadd.f32 %v2471_v10, %v2382_v59  ;;  %5402 = vmatmul.msk.f32.gmra.mxu1 %vm10977_vm5, %v10985_v42  ;;  %5419 = vmatmul.msk.f32.gmra.mxu3 %vm11072_vm0, %v10985_v42  ;;  %v8538_v10 = vsub.f32 %v5351_v58, %v5351_v58  ;;  %11085 = vst [vmem:[#allocation73_spill] sm:$0xff] %v8540_v30 }
 0x34a   : > { %v8533_v15 = vadd.f32 %v2576_v14, %v2472_v19  ;;  %2877 = vmatmul.f32.gmra.mxu2 %v8516_v55  ;;  %11084 = vst [vmem:[#allocation71_spill] sm:$0xff] %v8538_v10  ;;  %v8543_v32 = vand.u32 4294901760, %v8538_v10  ;;  %v11087_v19 = vld [vmem:[#allocation40_spill] sm:$0xff] }
 0x34b   : > { %v2582_v59 = vpop.f32.mrf.mxu3  ;;  %vm11088_vm5 = vnez %v11087_v19 }
 0x34c   : > { %v2275_v22 = vpop.f32.mrf.mxu0  ;;  %v2476_v41 = vpop.f32.mrf.mxu2  ;;  %11086 = vst [vmem:[#allocation85_spill] sm:$0xff] %v8543_v32  ;;  %v5353_v14 = vsel %vm11088_vm5, 1.0, %v10990_v63  ;;  %v2891_v58 = vsub.f32 %v8538_v10, %v8543_v32 }
 0x34d   : > { %v2385_v21 = vpop.f32.mrf.mxu1 }
 0x34e   : > { %v2386_v43 = vadd.f32 %v2385_v21, %v2267_v61  ;;  %v8564_v7 = vand.u32 4294901760, %v2891_v58 }
 0x34f   : > { %5388 = vmatmul.msk.f32.gmra.mxu0 %vm10770_vm3, %v10985_v42 }
 0x350   : > { %v2477_v55 = vadd.f32 %v2476_v41, %v2386_v43  ;;  %5403 = vmatmul.msk.f32.gmra.mxu1 %vm10983_vm7, %v10985_v42  ;;  %5420 = vmatmul.msk.f32.gmra.mxu3 %vm11078_vm13, %v10985_v42  ;;  %v8562_v43 = vsub.f32 %v5353_v14, %v5353_v14  ;;  %11090 = vst [vmem:[#allocation129_spill] sm:$0xff] %v8564_v7  ;;  %vm11092_vm7 = vnez %v10847_v45 }
 0x352   : > { %v8557_v61 = vadd.f32 %v2582_v59, %v2477_v55  ;;  %2885 = vmatmul.f32.gmra.mxu2 %v8540_v30  ;;  %11089 = vst [vmem:[#allocation82_spill] sm:$0xff] %v8562_v43  ;;  %v8567_v3 = vand.u32 4294901760, %v8562_v43  ;;  %v5355_v55 = vsel %vm11092_vm7, 1.0, %v10990_v63 }
 0x353   : > { %v2588_v41 = vpop.f32.mrf.mxu3 }
 0x354   : > { %v2283_v60 = vpop.f32.mrf.mxu0  ;;  %v2481_v35 = vpop.f32.mrf.mxu2  ;;  %11091 = vst [vmem:[#allocation126_spill] sm:$0xff] %v8567_v3  ;;  %v2899_v14 = vsub.f32 %v8562_v43, %v8567_v3 }
 0x355   : > { %v2389_v21 = vpop.f32.mrf.mxu1 }
 0x356   : > { %v2390_v33 = vadd.f32 %v2389_v21, %v2275_v22  ;;  %v8588_v56 = vand.u32 4294901760, %v2899_v14 }
 0x357   : > { %5389 = vmatmul.msk.f32.gmra.mxu0 %vm10998_vm9, %v10985_v42 }
 0x358   : > { %v2482_v59 = vadd.f32 %v2481_v35, %v2390_v33  ;;  %5404 = vmatmul.msk.f32.gmra.mxu1 %vm10770_vm3, %v10985_v42  ;;  %5421 = vmatmul.msk.f32.gmra.mxu3 %vm11083_vm2, %v10985_v42  ;;  %v8586_v33 = vsub.f32 %v5355_v55, %v5355_v55  ;;  %11094 = vst [vmem:[#allocation100_spill] sm:$0xff] %v8588_v56  ;;  %vm11096_vm3 = vnez %v10850_v37 }
 0x35a   : > { %v8581_v22 = vadd.f32 %v2588_v41, %v2482_v59  ;;  %2893 = vmatmul.f32.gmra.mxu2 %v8564_v7  ;;  %11093 = vst [vmem:[#allocation98_spill] sm:$0xff] %v8586_v33  ;;  %v8591_v10 = vand.u32 4294901760, %v8586_v33  ;;  %v5357_v41 = vsel %vm11096_vm3, 1.0, %v10990_v63 }
 0x35b   : > { %v2594_v35 = vpop.f32.mrf.mxu3 }
 0x35c   : > { %v2291_v58 = vpop.f32.mrf.mxu0  ;;  %v2486_v32 = vpop.f32.mrf.mxu2  ;;  %11095 = vst [vmem:[#allocation101_spill] sm:$0xff] %v8591_v10  ;;  %v2907_v55 = vsub.f32 %v8586_v33, %v8591_v10 }
 0x35d   : > { %v2393_v21 = vpop.f32.mrf.mxu1 }
 0x35e   : > { %v2394_v30 = vadd.f32 %v2393_v21, %v2283_v60  ;;  %v8612_v6 = vand.u32 4294901760, %v2907_v55 }
 0x35f   : > { %5390 = vmatmul.msk.f32.gmra.mxu0 %vm10841_vm4, %v10985_v42 }
 0x360   : > { %v2487_v59 = vadd.f32 %v2486_v32, %v2394_v30  ;;  %5405 = vmatmul.msk.f32.gmra.mxu1 %vm10998_vm9, %v10985_v42  ;;  %5422 = vmatmul.msk.f32.gmra.mxu3 %vm11088_vm5, %v10985_v42  ;;  %v8610_v30 = vsub.f32 %v5357_v41, %v5357_v41  ;;  %11098 = vst [vmem:[#allocation155_spill] sm:$0xff] %v8612_v6  ;;  %vm11100_vm9 = vnez %v10853_v4 }
 0x362   : > { %v8605_v60 = vadd.f32 %v2594_v35, %v2487_v59  ;;  %2901 = vmatmul.f32.gmra.mxu2 %v8588_v56  ;;  %11097 = vst [vmem:[#allocation99_spill] sm:$0xff] %v8610_v30  ;;  %v8615_v43 = vand.u32 4294901760, %v8610_v30  ;;  %v5359_v35 = vsel %vm11100_vm9, 1.0, %v10990_v63 }
 0x363   : > { %v2600_v32 = vpop.f32.mrf.mxu3 }
 0x364   : > { %v2299_v14 = vpop.f32.mrf.mxu0  ;;  %v2491_v3 = vpop.f32.mrf.mxu2  ;;  %11099 = vst [vmem:[#allocation152_spill] sm:$0xff] %v8615_v43  ;;  %v2915_v41 = vsub.f32 %v8610_v30, %v8615_v43 }
 0x365   : > { %v2397_v21 = vpop.f32.mrf.mxu1 }
 0x366   : > { %v2398_v7 = vadd.f32 %v2397_v21, %v2291_v58  ;;  %v8636_v13 = vand.u32 4294901760, %v2915_v41 }
 0x367   : > { %5391 = vmatmul.msk.f32.gmra.mxu0 %vm10846_vm10, %v10985_v42 }
 0x368   : > { %v2492_v59 = vadd.f32 %v2491_v3, %v2398_v7  ;;  %5406 = vmatmul.msk.f32.gmra.mxu1 %vm10841_vm4, %v10985_v42  ;;  %5423 = vmatmul.msk.f32.gmra.mxu3 %vm11092_vm7, %v10985_v42  ;;  %v8634_v7 = vsub.f32 %v5359_v35, %v5359_v35  ;;  %11102 = vst [vmem:[#allocation118_spill] sm:$0xff] %v8636_v13  ;;  %vm11104_vm4 = vnez %v10859_v2 }
 0x36a   : > { %v8629_v58 = vadd.f32 %v2600_v32, %v2492_v59  ;;  %2909 = vmatmul.f32.gmra.mxu2 %v8612_v6  ;;  %11101 = vst [vmem:[#allocation115_spill] sm:$0xff] %v8634_v7  ;;  %v8639_v33 = vand.u32 4294901760, %v8634_v7  ;;  %v5361_v32 = vsel %vm11104_vm4, 1.0, %v10990_v63 }
 0x36b   : > { %v2606_v3 = vpop.f32.mrf.mxu3 }
 0x36c   : > { %v2307_v55 = vpop.f32.mrf.mxu0  ;;  %v2496_v10 = vpop.f32.mrf.mxu2  ;;  %11103 = vst [vmem:[#allocation131_spill] sm:$0xff] %v8639_v33  ;;  %v2923_v35 = vsub.f32 %v8634_v7, %v8639_v33 }
 0x36d   : > { %v2401_v21 = vpop.f32.mrf.mxu1 }
 0x36e   : > { %v2402_v56 = vadd.f32 %v2401_v21, %v2299_v14  ;;  %v8660_v48 = vand.u32 4294901760, %v2923_v35 }
 0x36f   : > { %5392 = vmatmul.msk.f32.gmra.mxu0 %vm6483_vm11, %v10985_v42 }
 0x370   : > { %v2497_v59 = vadd.f32 %v2496_v10, %v2402_v56  ;;  %5407 = vmatmul.msk.f32.gmra.mxu1 %vm10846_vm10, %v10985_v42  ;;  %5424 = vmatmul.msk.f32.gmra.mxu3 %vm11096_vm3, %v10985_v42  ;;  %v8658_v56 = vsub.f32 %v5361_v32, %v5361_v32  ;;  %11106 = vst [vmem:[#allocation144_spill] sm:$0xff] %v8660_v48  ;;  %vm11108_vm10 = vnez %v10861_v54 }
 0x371   : > { %vm11109_vm3 = vnez %v10851_v26 }
 0x372   : > { %v8653_v14 = vadd.f32 %v2606_v3, %v2497_v59  ;;  %2917 = vmatmul.f32.gmra.mxu2 %v8636_v13  ;;  %11105 = vst [vmem:[#allocation128_spill] sm:$0xff] %v8658_v56  ;;  %v8663_v30 = vand.u32 4294901760, %v8658_v56  ;;  %v5363_v3 = vsel %vm11108_vm10, 1.0, %v10990_v63 }
 0x373   : > { %v2612_v10 = vpop.f32.mrf.mxu3 }
 0x374   : > { %v2315_v41 = vpop.f32.mrf.mxu0  ;;  %v2501_v43 = vpop.f32.mrf.mxu2  ;;  %11107 = vst [vmem:[#allocation146_spill] sm:$0xff] %v8663_v30  ;;  %v2931_v63 = vsub.f32 %v8658_v56, %v8663_v30 }
 0x375   : > { %v2405_v21 = vpop.f32.mrf.mxu1 }
 0x376   : > { %v2406_v6 = vadd.f32 %v2405_v21, %v2307_v55  ;;  %v8684_v24 = vand.u32 4294901760, %v2931_v63 }
 0x377   : > { %5393 = vmatmul.msk.f32.gmra.mxu0 %vm11109_vm3, %v10985_v42 }
 0x378   : > { %v2502_v59 = vadd.f32 %v2501_v43, %v2406_v6  ;;  %5408 = vmatmul.msk.f32.gmra.mxu1 %vm6483_vm11, %v10985_v42  ;;  %5425 = vmatmul.msk.f32.gmra.mxu3 %vm11100_vm9, %v10985_v42  ;;  %v8682_v6 = vsub.f32 %v5363_v3, %v5363_v3  ;;  %11111 = vst [vmem:[#allocation145_spill] sm:$0xff] %v8684_v24  ;;  %vm11113_vm11 = vnez %v10858_v0  ;;  %v11305_v0 = vld [vmem:[#allocation157_spill] sm:$0xff] }
 0x37a   : > { %v8677_v55 = vadd.f32 %v2612_v10, %v2502_v59  ;;  %2925 = vmatmul.f32.gmra.mxu2 %v8660_v48  ;;  %11110 = vst [vmem:[#allocation147_spill] sm:$0xff] %v8682_v6  ;;  %v8687_v33 = vand.u32 4294901760, %v8682_v6  ;;  %v8696_v10 = vand.u32 4294901760, %v7861_v49 }
 0x37b   : > { %v2618_v43 = vpop.f32.mrf.mxu3 }
 0x37c   : > { %v2323_v32 = vpop.f32.mrf.mxu0  ;;  %v2506_v13 = vpop.f32.mrf.mxu2  ;;  %11112 = vst [vmem:[#allocation158_spill] sm:$0xff] %v8687_v33  ;;  %v8708_v59 = vsub.f32 %v7861_v49, %v8696_v10 }
 0x37d   : > { %v2409_v35 = vpop.f32.mrf.mxu1 }
 0x37e   : > { %v2410_v21 = vadd.f32 %v2409_v35, %v2315_v41 }
 0x37f   : > { %5394 = vmatmul.msk.f32.gmra.mxu0 %vm11113_vm11, %v10985_v42 }
 0x380   : > { %v2507_v4 = vadd.f32 %v2506_v13, %v2410_v21  ;;  %5409 = vmatmul.msk.f32.gmra.mxu1 %vm11109_vm3, %v10985_v42  ;;  %5426 = vmatmul.msk.f32.gmra.mxu3 %vm11104_vm4, %v10985_v42  ;;  %v2939_v13 = vsub.f32 %v8682_v6, %v8687_v33 }
 0x382   : > { %v8701_v41 = vadd.f32 %v2618_v43, %v2507_v4  ;;  %2933 = vmatmul.f32.gmra.mxu2 %v8684_v24  ;;  %v8710_v26 = vand.u32 4294901760, %v2939_v13  ;;  %v10497_v4 = vand.u32 4294901760, %v8708_v59 }
 0x383   : > { %v2624_v3 = vpop.f32.mrf.mxu3 }
 0x384   : > { %v2331_v63 = vpop.f32.mrf.mxu0  ;;  %v2511_v48 = vpop.f32.mrf.mxu2  ;;  %11114 = vst [vmem:[#allocation159_spill] sm:$0xff] %v8710_v26 }
 0x385   : > { %v2413_v35 = vpop.f32.mrf.mxu1 }
 0x386   : > { %v2414_v21 = vadd.f32 %v2413_v35, %v2323_v32 }
 0x387   : > { %5395 = vmatmul.msk.f32.gmra.mxu0 %vm6636_vm1, %v10985_v42 }
 0x388   : > { %v2512_v30 = vadd.f32 %v2511_v48, %v2414_v21  ;;  %5410 = vmatmul.msk.f32.gmra.mxu1 %vm11113_vm11, %v10985_v42  ;;  %5427 = vmatmul.msk.f32.gmra.mxu3 %vm11108_vm10, %v10985_v42  ;;  %v4187_v48 = vsub.f32 %v8708_v59, %v10497_v4 }
 0x38a   : > { %v8722_v49 = vadd.f32 %v2624_v3, %v2512_v30  ;;  %2941 = vmatmul.f32.gmra.mxu2 %v8710_v26  ;;  %v4188_v30 = vand.u32 4294901760, %v4187_v48  ;;  %v11115_v3 = vand.u32 4294901760, %v8336_v17 }
 0x38b   : > { %v2630_v43 = vpop.f32.mrf.mxu3 }
 0x38c   : > { %v2654_v13 = vpop.f32.mrf.mxu0  ;;  %v2516_v21 = vpop.f32.mrf.mxu2 }
 0x38d   : > { %v2417_v32 = vpop.f32.mrf.mxu1 }
 0x38e   : > { %v2418_v35 = vadd.f32 %v2417_v32, %v2331_v63  ;;  %v2655_v63 = vadd.f32 %v2654_v13, %v8389_v50 }
 0x38f   : > { %3051 = vmatmul.f32.vlgmr.msra.gmra.mxu0 %v8297_v51 }
 0x390   : > { %v2517_v24 = vadd.f32 %v2516_v21, %v2418_v35  ;;  %5411 = vmatmul.msk.f32.gmra.mxu1 %vm6636_vm1, %v10985_v42  ;;  %5444 = vmatmul.msk.f32.vlgmr.msra.gmra.mxu3 %vm11035_vm12, %v10985_v42 }
 0x391   : > { %3875 = vmatpush.xpose.msra.mxu0 %v11115_v3  ;;  %4189 = vmatpush.xpose.msra.mxu3 %v4188_v30 }
 0x392   : > { %v8737_v4 = vadd.f32 %v2630_v43, %v2517_v24  ;;  %5428 = vmatmul.msk.f32.vlgmr.msra.gmra.mxu2 %vm11035_vm12, %v10985_v42 }
 0x393   : > { %4039 = vmatpush.xpose.msra.mxu2 %v8696_v10  ;;  %v2968_v32 = vpop.f32.mrf.mxu3 }
 0x394   : > { %v2658_v48 = vpop.f32.mrf.mxu0 }
 0x395   : > { %v2736_v35 = vpop.f32.mrf.mxu1  ;;  %v2822_v51 = vpop.f32.mrf.mxu2  ;;  %v2659_v17 = vadd.f32 %v2658_v48, %v8413_v18 }
 0x396   : > { %v2737_v21 = vadd.f32 %v2736_v35, %v2655_v63 }
 0x397   : > { %3056 = vmatmul.f32.gmra.mxu0 %v8332_v57 }
 0x398   : > { %v2823_v26 = vadd.f32 %v2822_v51, %v2737_v21  ;;  %3150 = vmatmul.f32.vlgmr.msra.gmra.mxu1 %v8306_v25  ;;  %5445 = vmatmul.msk.f32.gmra.mxu3 %vm11042_vm8, %v10985_v42 }
 0x399   : > { %3957 = vmatpush.xpose.msra.mxu1 %v8309_v8 }
 0x39a   : > { %v8750_v24 = vadd.f32 %v2968_v32, %v2823_v26  ;;  %5429 = vmatmul.msk.f32.gmra.mxu2 %vm11042_vm8, %v10985_v42  ;;  %vm11116_vm8 = vnez %v11052_v5 }
 0x39b   : > { %v2972_v50 = vpop.f32.mrf.mxu3 }
 0x39c   : > { %v2662_v51 = vpop.f32.mrf.mxu0 }
 0x39d   : > { %v2740_v43 = vpop.f32.mrf.mxu1  ;;  %v2830_v30 = vpop.f32.mrf.mxu2  ;;  %v2663_v8 = vadd.f32 %v2662_v51, %v8437_v9 }
 0x39e   : > { %v2741_v13 = vadd.f32 %v2740_v43, %v2659_v17 }
 0x39f   : > { %3061 = vmatmul.f32.gmra.mxu0 %v8366_v23 }
 0x3a0   : > { %v2831_v3 = vadd.f32 %v2830_v30, %v2741_v13  ;;  %3156 = vmatmul.f32.gmra.mxu1 %v8341_v12  ;;  %5446 = vmatmul.msk.f32.gmra.mxu3 %vm11047_vm14, %v10985_v42 }
 0x3a2   : > { %v8761_v26 = vadd.f32 %v2972_v50, %v2831_v3  ;;  %5430 = vmatmul.msk.f32.gmra.mxu2 %vm11047_vm14, %v10985_v42  ;;  %vm11117_vm14 = vnez %v11056_v46 }
 0x3a3   : > { %v2976_v18 = vpop.f32.mrf.mxu3 }
 0x3a4   : > { %v2666_v63 = vpop.f32.mrf.mxu0 }
 0x3a5   : > { %v2744_v32 = vpop.f32.mrf.mxu1  ;;  %v2838_v35 = vpop.f32.mrf.mxu2  ;;  %v2667_v9 = vadd.f32 %v2666_v63, %v8461_v11 }
 0x3a6   : > { %v2745_v48 = vadd.f32 %v2744_v32, %v2663_v8 }
 0x3a7   : > { %3066 = vmatmul.f32.gmra.mxu0 %v8394_v36 }
 0x3a8   : > { %v2839_v21 = vadd.f32 %v2838_v35, %v2745_v48  ;;  %3162 = vmatmul.f32.gmra.mxu1 %v8375_v52  ;;  %5447 = vmatmul.msk.f32.gmra.mxu3 %vm11116_vm8, %v10985_v42 }
 0x3aa   : > { %v8772_v17 = vadd.f32 %v2976_v18, %v2839_v21  ;;  %5431 = vmatmul.msk.f32.gmra.mxu2 %vm11116_vm8, %v10985_v42 }
 0x3ab   : > { %v2980_v50 = vpop.f32.mrf.mxu3 }
 0x3ac   : > { %v2670_v51 = vpop.f32.mrf.mxu0 }
 0x3ad   : > { %v2748_v43 = vpop.f32.mrf.mxu1  ;;  %v2846_v30 = vpop.f32.mrf.mxu2  ;;  %v2671_v11 = vadd.f32 %v2670_v51, %v8485_v38 }
 0x3ae   : > { %v2749_v13 = vadd.f32 %v2748_v43, %v2667_v9 }
 0x3af   : > { %3071 = vmatmul.f32.gmra.mxu0 %v8418_v1 }
 0x3b0   : > { %v2847_v3 = vadd.f32 %v2846_v30, %v2749_v13  ;;  %3168 = vmatmul.f32.gmra.mxu1 %v8399_v44  ;;  %5448 = vmatmul.msk.f32.gmra.mxu3 %vm11117_vm14, %v10985_v42  ;;  %v11163_v44 = vld [vmem:[#allocation140_spill] sm:$0xff] }
 0x3b2   : > { %v8783_v8 = vadd.f32 %v2980_v50, %v2847_v3  ;;  %5432 = vmatmul.msk.f32.gmra.mxu2 %vm11117_vm14, %v10985_v42 }
 0x3b3   : > { %v2984_v18 = vpop.f32.mrf.mxu3 }
 0x3b4   : > { %v2674_v63 = vpop.f32.mrf.mxu0 }
 0x3b5   : > { %v2752_v32 = vpop.f32.mrf.mxu1  ;;  %v2854_v35 = vpop.f32.mrf.mxu2  ;;  %v2675_v38 = vadd.f32 %v2674_v63, %v8509_v47 }
 0x3b6   : > { %v2753_v48 = vadd.f32 %v2752_v32, %v2671_v11  ;;  %v11118_v11 = vld [vmem:[#allocation30_spill] sm:$0xff] }
 0x3b7   : > { %3076 = vmatmul.f32.gmra.mxu0 %v8442_v27  ;;  %v11147_v27 = vld [vmem:[#allocation88_spill] sm:$0xff] }
 0x3b8   : > { %v2855_v21 = vadd.f32 %v2854_v35, %v2753_v48  ;;  %3174 = vmatmul.f32.gmra.mxu1 %v8423_v16  ;;  %5449 = vmatmul.msk.f32.gmra.mxu3 %vm11061_vm6, %v10985_v42 }
 0x3ba   : > { %v8794_v9 = vadd.f32 %v2984_v18, %v2855_v21  ;;  %5433 = vmatmul.msk.f32.gmra.mxu2 %vm11061_vm6, %v10985_v42 }
 0x3bb   : > { %v2988_v50 = vpop.f32.mrf.mxu3 }
 0x3bc   : > { %v2678_v51 = vpop.f32.mrf.mxu0 }
 0x3bd   : > { %v2756_v43 = vpop.f32.mrf.mxu1  ;;  %v2862_v30 = vpop.f32.mrf.mxu2  ;;  %v2679_v47 = vadd.f32 %v2678_v51, %v8533_v15 }
 0x3be   : > { %v2757_v13 = vadd.f32 %v2756_v43, %v2675_v38  ;;  %v11119_v43 = vld [vmem:[#allocation66_spill] sm:$0xff] }
 0x3bf   : > { %3081 = vmatmul.f32.gmra.mxu0 %v8466_v62  ;;  %v11142_v62 = vld [vmem:[#allocation146_spill] sm:$0xff] }
 0x3c0   : > { %v2863_v3 = vadd.f32 %v2862_v30, %v2757_v13  ;;  %3180 = vmatmul.f32.gmra.mxu1 %v8447_v53  ;;  %5450 = vmatmul.msk.f32.gmra.mxu3 %vm11066_vm15, %v10985_v42  ;;  %v11120_v13 = vld [vmem:[#allocation156_spill] sm:$0xff] }
 0x3c1   : > { %v11121_v30 = vld [vmem:[#allocation32_spill] sm:$0xff] }
 0x3c2   : > { %v8805_v18 = vadd.f32 %v2988_v50, %v2863_v3  ;;  %5434 = vmatmul.msk.f32.gmra.mxu2 %vm11066_vm15, %v10985_v42 }
 0x3c3   : > { %v2992_v63 = vpop.f32.mrf.mxu3 }
 0x3c4   : > { %v2682_v32 = vpop.f32.mrf.mxu0 }
 0x3c5   : > { %v2760_v48 = vpop.f32.mrf.mxu1  ;;  %v2870_v21 = vpop.f32.mrf.mxu2  ;;  %v2683_v15 = vadd.f32 %v2682_v32, %v8557_v61 }
 0x3c6   : > { %v2761_v35 = vadd.f32 %v2760_v48, %v2679_v47 }
 0x3c7   : > { %3086 = vmatmul.f32.gmra.mxu0 %v11119_v43  ;;  %v11122_v43 = vld [vmem:[#allocation67_spill] sm:$0xff] }
 0x3c8   : > { %v2871_v38 = vadd.f32 %v2870_v21, %v2761_v35  ;;  %3186 = vmatmul.f32.gmra.mxu1 %v11120_v13  ;;  %5451 = vmatmul.msk.f32.gmra.mxu3 %vm11072_vm0, %v10985_v42  ;;  %v11123_v13 = vld [vmem:[#allocation70_spill] sm:$0xff] }
 0x3ca   : > { %v8816_v50 = vadd.f32 %v2992_v63, %v2871_v38  ;;  %5435 = vmatmul.msk.f32.gmra.mxu2 %vm11072_vm0, %v10985_v42 }
 0x3cb   : > { %v2996_v51 = vpop.f32.mrf.mxu3 }
 0x3cc   : > { %v2686_v3 = vpop.f32.mrf.mxu0 }
 0x3cd   : > { %v2764_v47 = vpop.f32.mrf.mxu1  ;;  %v2878_v35 = vpop.f32.mrf.mxu2  ;;  %v2687_v61 = vadd.f32 %v2686_v3, %v8581_v22 }
 0x3ce   : > { %v2765_v48 = vadd.f32 %v2764_v47, %v2683_v15 }
 0x3cf   : > { %3091 = vmatmul.f32.gmra.mxu0 %v11122_v43  ;;  %v11124_v43 = vld [vmem:[#allocation71_spill] sm:$0xff] }
 0x3d0   : > { %v2879_v21 = vadd.f32 %v2878_v35, %v2765_v48  ;;  %3192 = vmatmul.f32.gmra.mxu1 %v11123_v13  ;;  %5452 = vmatmul.msk.f32.gmra.mxu3 %vm11078_vm13, %v10985_v42  ;;  %v11125_v13 = vld [vmem:[#allocation108_spill] sm:$0xff] }
 0x3d2   : > { %v8827_v63 = vadd.f32 %v2996_v51, %v2879_v21  ;;  %5436 = vmatmul.msk.f32.gmra.mxu2 %vm11078_vm13, %v10985_v42  ;;  %vm11198_vm13 = vcmask 31744  }
 0x3d3   : > { %v3000_v32 = vpop.f32.mrf.mxu3 }
 0x3d4   : > { %v2690_v38 = vpop.f32.mrf.mxu0 }
 0x3d5   : > { %v2768_v15 = vpop.f32.mrf.mxu1  ;;  %v2886_v48 = vpop.f32.mrf.mxu2  ;;  %v2691_v22 = vadd.f32 %v2690_v38, %v8605_v60 }
 0x3d6   : > { %v2769_v47 = vadd.f32 %v2768_v15, %v2687_v61 }
 0x3d7   : > { %3096 = vmatmul.f32.gmra.mxu0 %v11124_v43  ;;  %v11126_v43 = vld [vmem:[#allocation82_spill] sm:$0xff] }
 0x3d8   : > { %v2887_v35 = vadd.f32 %v2886_v48, %v2769_v47  ;;  %3198 = vmatmul.f32.gmra.mxu1 %v11125_v13  ;;  %5453 = vmatmul.msk.f32.gmra.mxu3 %vm11083_vm2, %v10985_v42  ;;  %v11127_v13 = vld [vmem:[#allocation85_spill] sm:$0xff] }
 0x3da   : > { %v8838_v51 = vadd.f32 %v3000_v32, %v2887_v35  ;;  %5437 = vmatmul.msk.f32.gmra.mxu2 %vm11083_vm2, %v10985_v42  ;;  %vm11187_vm2 = vcmask 31744  }
 0x3db   : > { %v3004_v3 = vpop.f32.mrf.mxu3 }
 0x3dc   : > { %v2694_v21 = vpop.f32.mrf.mxu0 }
 0x3dd   : > { %v2772_v61 = vpop.f32.mrf.mxu1  ;;  %v2894_v47 = vpop.f32.mrf.mxu2  ;;  %v2695_v60 = vadd.f32 %v2694_v21, %v8629_v58 }
 0x3de   : > { %v2773_v15 = vadd.f32 %v2772_v61, %v2691_v22 }
 0x3df   : > { %3101 = vmatmul.f32.gmra.mxu0 %v11126_v43  ;;  %v11128_v43 = vld [vmem:[#allocation98_spill] sm:$0xff] }
 0x3e0   : > { %v2895_v48 = vadd.f32 %v2894_v47, %v2773_v15  ;;  %3204 = vmatmul.f32.gmra.mxu1 %v11127_v13  ;;  %5454 = vmatmul.msk.f32.gmra.mxu3 %vm11088_vm5, %v10985_v42  ;;  %v11129_v13 = vld [vmem:[#allocation126_spill] sm:$0xff] }
 0x3e2   : > { %v8849_v32 = vadd.f32 %v3004_v3, %v2895_v48  ;;  %5438 = vmatmul.msk.f32.gmra.mxu2 %vm11088_vm5, %v10985_v42  ;;  %vm11132_vm5 = vnez %v10850_v37 }
 0x3e3   : > { %v3008_v38 = vpop.f32.mrf.mxu3 }
 0x3e4   : > { %v2698_v35 = vpop.f32.mrf.mxu0 }
 0x3e5   : > { %v2776_v22 = vpop.f32.mrf.mxu1  ;;  %v2902_v15 = vpop.f32.mrf.mxu2  ;;  %v2699_v58 = vadd.f32 %v2698_v35, %v8653_v14 }
 0x3e6   : > { %v2777_v61 = vadd.f32 %v2776_v22, %v2695_v60 }
 0x3e7   : > { %3106 = vmatmul.f32.gmra.mxu0 %v11128_v43  ;;  %v11130_v43 = vld [vmem:[#allocation99_spill] sm:$0xff] }
 0x3e8   : > { %v2903_v47 = vadd.f32 %v2902_v15, %v2777_v61  ;;  %3210 = vmatmul.f32.gmra.mxu1 %v11129_v13  ;;  %5455 = vmatmul.msk.f32.gmra.mxu3 %vm11092_vm7, %v10985_v42  ;;  %v11131_v13 = vld [vmem:[#allocation101_spill] sm:$0xff] }
 0x3ea   : > { %v8860_v3 = vadd.f32 %v3008_v38, %v2903_v47  ;;  %5439 = vmatmul.msk.f32.gmra.mxu2 %vm11092_vm7, %v10985_v42  ;;  %vm11176_vm7 = vcmask 31744  }
 0x3eb   : > { %v3012_v21 = vpop.f32.mrf.mxu3 }
 0x3ec   : > { %v2702_v48 = vpop.f32.mrf.mxu0 }
 0x3ed   : > { %v2780_v60 = vpop.f32.mrf.mxu1  ;;  %v2910_v61 = vpop.f32.mrf.mxu2  ;;  %v2703_v14 = vadd.f32 %v2702_v48, %v8677_v55 }
 0x3ee   : > { %v2781_v22 = vadd.f32 %v2780_v60, %v2699_v58 }
 0x3ef   : > { %3111 = vmatmul.f32.gmra.mxu0 %v11130_v43  ;;  %v11134_v43 = vld [vmem:[#allocation46_spill] sm:$0xff] }
 0x3f0   : > { %v2911_v15 = vadd.f32 %v2910_v61, %v2781_v22  ;;  %3216 = vmatmul.f32.gmra.mxu1 %v11131_v13  ;;  %5456 = vmatmul.msk.f32.gmra.mxu3 %vm11132_vm5, %v10985_v42  ;;  %v11133_v13 = vld [vmem:[#allocation152_spill] sm:$0xff] }
 0x3f2   : > { %v8871_v38 = vadd.f32 %v3012_v21, %v2911_v15  ;;  %5440 = vmatmul.msk.f32.gmra.mxu2 %vm11132_vm5, %v10985_v42 }
 0x3f3   : > { %v3016_v35 = vpop.f32.mrf.mxu3 }
 0x3f4   : > { %v2706_v47 = vpop.f32.mrf.mxu0 }
 0x3f5   : > { %v2784_v58 = vpop.f32.mrf.mxu1  ;;  %v2918_v22 = vpop.f32.mrf.mxu2  ;;  %v2707_v55 = vadd.f32 %v2706_v47, %v8701_v41 }
 0x3f6   : > { %v2785_v60 = vadd.f32 %v2784_v58, %v2703_v14 }
 0x3f7   : > { %3116 = vmatmul.f32.gmra.mxu0 %v8634_v7 }
 0x3f8   : > { %v2919_v61 = vadd.f32 %v2918_v22, %v2785_v60  ;;  %3222 = vmatmul.f32.gmra.mxu1 %v11133_v13  ;;  %5457 = vmatmul.msk.f32.gmra.mxu3 %vm11100_vm9, %v10985_v42  ;;  %v11135_v13 = vld [vmem:[#allocation131_spill] sm:$0xff] }
 0x3fa   : > { %v8882_v21 = vadd.f32 %v3016_v35, %v2919_v61  ;;  %5441 = vmatmul.msk.f32.gmra.mxu2 %vm11100_vm9, %v10985_v42  ;;  %v11136_v61 = vld [vmem:[#allocation137_spill] sm:$0xff] }
 0x3fb   : > { %v3020_v48 = vpop.f32.mrf.mxu3 }
 0x3fc   : > { %v2710_v15 = vpop.f32.mrf.mxu0 }
 0x3fd   : > { %v2788_v14 = vpop.f32.mrf.mxu1  ;;  %v2926_v60 = vpop.f32.mrf.mxu2  ;;  %v2711_v41 = vadd.f32 %v2710_v15, %v8722_v49  ;;  %v11143_v49 = vld [vmem:[#allocation117_spill] sm:$0xff] }
 0x3fe   : > { %v2789_v58 = vadd.f32 %v2788_v14, %v2707_v55  ;;  %v11137_v55 = vld [vmem:[#allocation54_spill] sm:$0xff] }
 0x3ff   : > { %3121 = vmatmul.f32.gmra.mxu0 %v8658_v56  ;;  %v11138_v14 = vld [vmem:[#allocation90_spill] sm:$0xff] }
 0x400   : > { %v2927_v22 = vadd.f32 %v2926_v60, %v2789_v58  ;;  %3228 = vmatmul.f32.gmra.mxu1 %v11135_v13  ;;  %5458 = vmatmul.msk.f32.gmra.mxu3 %vm11104_vm4, %v10985_v42  ;;  %vm11139_vm9 = vcmp.eq.s32.totalorder %v11138_v14, 1  ;;  %v11140_v56 = vld [vmem:[#allocation74_spill] sm:$0xff]  ;;  %vm11141_vm5 = vcmp.eq.s32.totalorder %v11138_v14, 0 }
 0x401   : > { %v2000_v58 = vsel %vm11139_vm9, %v11137_v55, %v11136_v61  ;;  %v11145_v55 = vld [vmem:[#allocation124_spill] sm:$0xff] }
 0x402   : > { %v8893_v35 = vadd.f32 %v3020_v48, %v2927_v22  ;;  %5442 = vmatmul.msk.f32.gmra.mxu2 %vm11104_vm4, %v10985_v42  ;;  %v2096_v7 = vsel %vm11141_vm5, %v11140_v56, %v2000_v58  ;;  %vm11164_vm4 = vcmp.eq.s32.totalorder %v11138_v14, 0 }
 0x403   : > { %v3024_v47 = vpop.f32.mrf.mxu3  ;;  %v2113_v15 = vmul.f32 %v11143_v49, %v2096_v7 }
 0x404   : > { %v2714_v60 = vpop.f32.mrf.mxu0 }
 0x405   : > { %v2792_v13 = vpop.f32.mrf.mxu1  ;;  %v2934_v22 = vpop.f32.mrf.mxu2  ;;  %v2715_v56 = vadd.f32 %v2714_v60, %v8737_v4  ;;  %v11148_v60 = vld [vmem:[#allocation87_spill] sm:$0xff] }
 0x406   : > { %v2793_v48 = vadd.f32 %v2792_v13, %v2711_v41  ;;  %v11144_v41 = vld [vmem:[#allocation143_spill] sm:$0xff] }
 0x407   : > { %3126 = vmatmul.f32.gmra.mxu0 %v8682_v6  ;;  %v2001_v58 = vsel %vm11139_vm9, %v11145_v55, %v11144_v41  ;;  %v11149_v41 = vld [vmem:[#allocation114_spill] sm:$0xff]  ;;  %v11152_v55 = vld [vmem:[#allocation49_spill] sm:$0xff] }
 0x408   : > { %v2935_v53 = vadd.f32 %v2934_v22, %v2793_v48  ;;  %3234 = vmatmul.f32.gmra.mxu1 %v11142_v62  ;;  %5459 = vmatmul.msk.f32.gmra.mxu3 %vm11108_vm10, %v10985_v42  ;;  %v2129_v48 = vmul.f32 1.442695, %v2113_v15  ;;  %v11146_v62 = vld [vmem:[#allocation55_spill] sm:$0xff] }
 0x40a   : > { %v8912_v61 = vadd.f32 %v3024_v47, %v2935_v53  ;;  %5443 = vmatmul.msk.f32.gmra.mxu2 %vm11108_vm10, %v10985_v42  ;;  %v2097_v53 = vsel %vm11141_vm5, %v11146_v62, %v2001_v58  ;;  %5614 = vpow2.f32 %v2129_v48  ;;  %v11150_v62 = vand.u32 4294901760, %v8708_v59 }
 0x40b   : > { %v3028_v13 = vpop.f32.mrf.mxu3  ;;  %v2114_v4 = vmul.f32 %v11143_v49, %v2097_v53 }
 0x40c   : > { %v3052_v22 = vpop.f32.mrf.mxu0 }
 0x40d   : > { %v2796_v7 = vpop.f32.mrf.mxu1  ;;  %v2942_v6 = vpop.f32.mrf.mxu2  ;;  %v2131_v48 = vmul.f32 1.442695, %v2114_v4 }
 0x40e   : > { %v2797_v47 = vadd.f32 %v2796_v7, %v2715_v56 }
 0x40f   : > { %3434 = vmatmul.f32.vlgmr.msrb.gmra.mxu0 %v11147_v27  ;;  %v11151_v27 = vld [vmem:[#allocation106_spill] sm:$0xff]  ;;  %5616 = vpow2.f32 %v2131_v48 }
 0x410   : > { %v2943_v16 = vadd.f32 %v2942_v6, %v2797_v47  ;;  %3240 = vmatmul.f32.gmra.mxu1 %v8687_v33  ;;  %3763 = vmatmul.f32.vlgmr.msrb.gmra.mxu3 %v11148_v60  ;;  %v3053_v6 = vadd.f32 %v3052_v22, %v8750_v24  ;;  %v2002_v58 = vsel %vm11139_vm9, %v11152_v55, %v11151_v27  ;;  %v11153_v47 = vld [vmem:[#allocation94_spill] sm:$0xff]  ;;  %v11155_v24 = vld [vmem:[#allocation48_spill] sm:$0xff]  ;;  %v11156_v22 = vld [vmem:[#allocation15_spill] sm:$0xff]  ;;  %vm10517_vm9 = vcmask 31744  }
 0x411   : > { %4272 = vmatpush.xpose.msrb.mxu0 %v8708_v59  ;;  %4568 = vmatpush.xpose.msrb.mxu3 %v8696_v10  ;;  %v4634_v59 = vld [vmem:[#allocation6] sm:$0xff]  ;;  %vm11157_vm10 = vnez %v11156_v22  ;;  %v11158_v27 = vld [vmem:[#allocation103_spill] sm:$0xff] }
 0x412   : > { %v8931_v15 = vadd.f32 %v3028_v13, %v2943_v16  ;;  %3664 = vmatmul.f32.vlgmr.msrb.gmra.mxu2 %v11149_v41  ;;  %v2098_v16 = vsel %vm11141_vm5, %v11153_v47, %v2002_v58  ;;  %v8944_v41 = vpop.eup %5614  ;;  %v11159_v58 = vld [vmem:[#allocation91_spill] sm:$0xff]  ;;  %vm11162_vm5 = vcmp.eq.s32.totalorder %v11138_v14, 1 }
 0x413   : > { %4486 = vmatpush.xpose.msrb.mxu2 %v11150_v62  ;;  %v3347_v56 = vpop.f32.mrf.mxu3  ;;  %11154 = vst [vmem:[#allocation16_spill] sm:$0xff] %v8944_v41  ;;  %v2115_v4 = vmul.f32 %v11143_v49, %v2098_v16 }
 0x414   : > { %v3057_v7 = vpop.f32.mrf.mxu0 }
 0x415   : > { %v3151_v53 = vpop.f32.mrf.mxu1  ;;  %v3265_v60 = vpop.f32.mrf.mxu2  ;;  %v2133_v48 = vmul.f32 1.442695, %v2115_v4 }
 0x416   : > { %v3152_v13 = vadd.f32 %v3151_v53, %v3053_v6  ;;  %v4650_v6 = vmul.f32 %v8944_v41, %v4634_v59  ;;  %v3058_v53 = vadd.f32 %v3057_v7, %v8761_v26  ;;  %v4635_v26 = vld [vmem:[#allocation6 + $0x8] sm:$0xff] }
 0x417   : > { %3442 = vmatmul.f32.gmra.mxu0 %v11155_v24  ;;  %v11161_v24 = vld [vmem:[#allocation76_spill] sm:$0xff]  ;;  %5618 = vpow2.f32 %v2133_v48 }
 0x418   : > { %v3266_v62 = vadd.f32 %v3265_v60, %v3152_v13  ;;  %5460 = vmatmul.msk.f32.vlgmr.msrb.gmra.mxu1 %vm11157_vm10, %v10985_v42  ;;  %3769 = vmatmul.f32.gmra.mxu3 %v11158_v27  ;;  %v11160_v60 = vld [vmem:[#allocation149_spill] sm:$0xff]  ;;  %v8964_v27 = vpop.eup %5616 }
 0x419   : > { %4370 = vmatpush.xpose.msrb.mxu1 %v8696_v10  ;;  %v2003_v16 = vsel %vm11162_vm5, %v11161_v24, %v11160_v60  ;;  %11165 = vst [vmem:[#allocation20_spill] sm:$0xff] %v8964_v27 }
 0x41a   : > { %v3348_v55 = vadd.f32 %v3347_v56, %v3266_v62  ;;  %3669 = vmatmul.f32.gmra.mxu2 %v11159_v58  ;;  %v2099_v56 = vsel %vm11164_vm4, %v11163_v44, %v2003_v16  ;;  %v11169_v58 = vld [vmem:[#allocation47_spill] sm:$0xff]  ;;  %vm11173_vm4 = vcmp.eq.s32.totalorder %v11138_v14, 1 }
 0x41b   : > { %v3351_v13 = vpop.f32.mrf.mxu3  ;;  %v2116_v4 = vmul.f32 %v11143_v49, %v2099_v56  ;;  %v11174_v56 = vld [vmem:[#allocation92_spill] sm:$0xff] }
 0x41c   : > { %v4666_v47 = vadd.f32 %v4650_v6, %v3348_v55  ;;  %v3062_v33 = vpop.f32.mrf.mxu0  ;;  %v11166_v55 = vld [vmem:[#allocation134_spill] sm:$0xff]  ;;  %v11167_v6 = vld [vmem:[#allocation19_spill] sm:$0xff] }
 0x41d   : > { %v3157_v10 = vpop.f32.mrf.mxu1  ;;  %v3269_v62 = vpop.f32.mrf.mxu2  ;;  %vm11168_vm5 = vnez %v11167_v6  ;;  %v3063_v60 = vadd.f32 %v3062_v33, %v8772_v17  ;;  %v4636_v33 = vld [vmem:[#allocation6 + $0x10] sm:$0xff] }
 0x41e   : > { %4683 = vst.msk [vmem:[#allocation6] sm:$0xff] %vm10517_vm9, %v4666_v47  ;;  %v3158_v59 = vadd.f32 %v3157_v10, %v3058_v53  ;;  %v4651_v47 = vmul.f32 %v8964_v27, %v4635_v26  ;;  %v11170_v53 = vld [vmem:[#allocation119_spill] sm:$0xff]  ;;  %v11171_v10 = vld [vmem:[#allocation116_spill] sm:$0xff]  ;;  %vm11175_vm9 = vcmp.eq.s32.totalorder %v11138_v14, 0 }
 0x41f   : > { %3450 = vmatmul.f32.gmra.mxu0 %v11166_v55  ;;  %v2135_v55 = vmul.f32 1.442695, %v2116_v4 }
 0x420   : > { %v3270_v7 = vadd.f32 %v3269_v62, %v3158_v59  ;;  %5461 = vmatmul.msk.f32.gmra.mxu1 %vm11168_vm5, %v10985_v42  ;;  %3775 = vmatmul.f32.gmra.mxu3 %v11169_v58  ;;  %v11172_v59 = vld [vmem:[#allocation139_spill] sm:$0xff]  ;;  %v8983_v58 = vpop.eup %5618 }
 0x421   : > { %v2004_v62 = vsel %vm11173_vm4, %v11172_v59, %v11171_v10  ;;  %11177 = vst [vmem:[#allocation18_spill] sm:$0xff] %v8983_v58  ;;  %5620 = vpow2.f32 %v2135_v55 }
 0x422   : > { %v3352_v44 = vadd.f32 %v3351_v13, %v3270_v7  ;;  %3674 = vmatmul.f32.gmra.mxu2 %v11170_v53  ;;  %v2100_v13 = vsel %vm11175_vm9, %v11174_v56, %v2004_v62  ;;  %v11181_v53 = vld [vmem:[#allocation75_spill] sm:$0xff]  ;;  %v11183_v56 = vld [vmem:[#allocation133_spill] sm:$0xff] }
 0x423   : > { %v3355_v16 = vpop.f32.mrf.mxu3  ;;  %v2117_v4 = vmul.f32 %v11143_v49, %v2100_v13  ;;  %v11186_v13 = vld [vmem:[#allocation148_spill] sm:$0xff] }
 0x424   : > { %v4667_v24 = vadd.f32 %v4651_v47, %v3352_v44  ;;  %v3067_v48 = vpop.f32.mrf.mxu0  ;;  %v11178_v44 = vld [vmem:[#allocation151_spill] sm:$0xff]  ;;  %v11179_v47 = vld [vmem:[#allocation17_spill] sm:$0xff] }
 0x425   : > { %v3163_v41 = vpop.f32.mrf.mxu1  ;;  %v3273_v7 = vpop.f32.mrf.mxu2  ;;  %vm11180_vm4 = vnez %v11179_v47 }
 0x426   : > { %4684 = vst.msk [vmem:[#allocation6 + $0x8] sm:$0xff] %vm11176_vm7, %v4667_v24  ;;  %v3164_v26 = vadd.f32 %v3163_v41, %v3063_v60  ;;  %v4652_v24 = vmul.f32 %v8983_v58, %v4636_v33  ;;  %v11182_v41 = vld [vmem:[#allocation136_spill] sm:$0xff]  ;;  %v3068_v60 = vadd.f32 %v3067_v48, %v8783_v8  ;;  %vm11185_vm7 = vcmp.eq.s32.totalorder %v11138_v14, 1  ;;  %v4637_v8 = vld [vmem:[#allocation6 + $0x18] sm:$0xff] }
 0x427   : > { %3458 = vmatmul.f32.gmra.mxu0 %v11178_v44  ;;  %v2137_v44 = vmul.f32 1.442695, %v2117_v4 }
 0x428   : > { %v3274_v17 = vadd.f32 %v3273_v7, %v3164_v26  ;;  %5462 = vmatmul.msk.f32.gmra.mxu1 %vm11180_vm4, %v10985_v42  ;;  %3781 = vmatmul.f32.gmra.mxu3 %v11181_v53  ;;  %v11184_v26 = vld [vmem:[#allocation132_spill] sm:$0xff]  ;;  %v9002_v53 = vpop.eup %5620 }
 0x429   : > { %v2005_v7 = vsel %vm11185_vm7, %v11184_v26, %v11183_v56  ;;  %11188 = vst [vmem:[#allocation22_spill] sm:$0xff] %v9002_v53  ;;  %5622 = vpow2.f32 %v2137_v44  ;;  %v11197_v44 = vld [vmem:[#allocation58_spill] sm:$0xff] }
 0x42a   : > { %v3356_v10 = vadd.f32 %v3355_v16, %v3274_v17  ;;  %3679 = vmatmul.f32.gmra.mxu2 %v11182_v41  ;;  %v2101_v16 = vsel %vm11175_vm9, %v11186_v13, %v2005_v7  ;;  %v11192_v41 = vld [vmem:[#allocation42_spill] sm:$0xff]  ;;  %v11194_v13 = vld [vmem:[#allocation93_spill] sm:$0xff] }
 0x42b   : > { %v3359_v62 = vpop.f32.mrf.mxu3  ;;  %v2118_v4 = vmul.f32 %v11143_v49, %v2101_v16 }
 0x42c   : > { %v4668_v59 = vadd.f32 %v4652_v24, %v3356_v10  ;;  %v3072_v55 = vpop.f32.mrf.mxu0  ;;  %v11189_v10 = vld [vmem:[#allocation96_spill] sm:$0xff]  ;;  %v11190_v24 = vld [vmem:[#allocation21_spill] sm:$0xff] }
 0x42d   : > { %v3169_v27 = vpop.f32.mrf.mxu1  ;;  %v3277_v17 = vpop.f32.mrf.mxu2  ;;  %vm11191_vm7 = vnez %v11190_v24 }
 0x42e   : > { %4685 = vst.msk [vmem:[#allocation6 + $0x10] sm:$0xff] %vm11187_vm2, %v4668_v59  ;;  %v3170_v33 = vadd.f32 %v3169_v27, %v3068_v60  ;;  %v4653_v59 = vmul.f32 %v9002_v53, %v4637_v8  ;;  %v11193_v27 = vld [vmem:[#allocation78_spill] sm:$0xff]  ;;  %v3073_v60 = vadd.f32 %v3072_v55, %v8794_v9  ;;  %vm11196_vm2 = vcmp.eq.s32.totalorder %v11138_v14, 1  ;;  %v4638_v9 = vld [vmem:[#allocation6 + $0x20] sm:$0xff] }
 0x42f   : > { %3466 = vmatmul.f32.gmra.mxu0 %v11189_v10  ;;  %v2139_v10 = vmul.f32 1.442695, %v2118_v4  ;;  %v11205_v53 = vld [vmem:[#allocation154_spill] sm:$0xff] }
 0x430   : > { %v3278_v48 = vadd.f32 %v3277_v17, %v3170_v33  ;;  %5463 = vmatmul.msk.f32.gmra.mxu1 %vm11191_vm7, %v10985_v42  ;;  %3787 = vmatmul.f32.gmra.mxu3 %v11192_v41  ;;  %v11195_v33 = vld [vmem:[#allocation107_spill] sm:$0xff]  ;;  %v9021_v41 = vpop.eup %5622 }
 0x431   : > { %v2006_v17 = vsel %vm11196_vm2, %v11195_v33, %v11194_v13  ;;  %5624 = vpow2.f32 %v2139_v10 }
 0x432   : > { %v3360_v56 = vadd.f32 %v3359_v62, %v3278_v48  ;;  %3684 = vmatmul.f32.gmra.mxu2 %v11193_v27  ;;  %v2102_v62 = vsel %vm11175_vm9, %v11197_v44, %v2006_v17  ;;  %v11202_v27 = vld [vmem:[#allocation53_spill] sm:$0xff] }
 0x433   : > { %v3363_v7 = vpop.f32.mrf.mxu3  ;;  %v2119_v4 = vmul.f32 %v11143_v49, %v2102_v62 }
 0x434   : > { %v4669_v26 = vadd.f32 %v4653_v59, %v3360_v56  ;;  %v3077_v58 = vpop.f32.mrf.mxu0  ;;  %v11199_v56 = vld [vmem:[#allocation51_spill] sm:$0xff] }
 0x435   : > { %v3175_v16 = vpop.f32.mrf.mxu1  ;;  %v3281_v48 = vpop.f32.mrf.mxu2  ;;  %v11200_v59 = vld [vmem:[#allocation27_spill] sm:$0xff]  ;;  %v3078_v33 = vadd.f32 %v3077_v58, %v8805_v18  ;;  %v2141_v44 = vmul.f32 1.442695, %v2119_v4  ;;  %v11210_v18 = vld [vmem:[#allocation25_spill] sm:$0xff] }
 0x436   : > { %4686 = vst.msk [vmem:[#allocation6 + $0x18] sm:$0xff] %vm11198_vm13, %v4669_v26  ;;  %v3176_v8 = vadd.f32 %v3175_v16, %v3073_v60  ;;  %vm11201_vm2 = vnez %v11200_v59  ;;  %v4654_v26 = vmul.f32 %v9021_v41, %v4638_v9  ;;  %v11203_v60 = vld [vmem:[#allocation41_spill] sm:$0xff]  ;;  %vm11206_vm13 = vmmov %vm11175_vm9  ;;  %vm11207_vm9 = vcmask 31744  }
 0x437   : > { %3474 = vmatmul.f32.gmra.mxu0 %v11199_v56  ;;  %v11204_v56 = vld [vmem:[#allocation102_spill] sm:$0xff]  ;;  %v4639_v9 = vld [vmem:[#allocation6 + $0x28] sm:$0xff]  ;;  %vm11211_vm0 = vnez %v11210_v18  ;;  %5626 = vpow2.f32 %v2141_v44 }
 0x438   : > { %v3282_v55 = vadd.f32 %v3281_v48, %v3176_v8  ;;  %5464 = vmatmul.msk.f32.gmra.mxu1 %vm11201_vm2, %v10985_v42  ;;  %3793 = vmatmul.f32.gmra.mxu3 %v11202_v27  ;;  %v2103_v10 = vsel %vm11206_vm13, %v11205_v53, %v11204_v56  ;;  %v11212_v4 = vld [vmem:[#allocation121_spill] sm:$0xff]  ;;  %vm11214_vm13 = vmmov %vm11207_vm9 }
 0x439   : > { %v2120_v58 = vmul.f32 %v11143_v49, %v2103_v10  ;;  %v4640_v10 = vld [vmem:[#allocation6 + $0x30] sm:$0xff] }
 0x43a   : > { %v3364_v13 = vadd.f32 %v3363_v7, %v3282_v55  ;;  %3689 = vmatmul.f32.gmra.mxu2 %v11203_v60  ;;  %v9037_v55 = vpop.eup %5624  ;;  %v11209_v60 = vld [vmem:[#allocation89_spill] sm:$0xff] }
 0x43b   : > { %v3367_v16 = vpop.f32.mrf.mxu3  ;;  %11208 = vst [vmem:[#allocation28_spill] sm:$0xff] %v9037_v55  ;;  %v4655_v53 = vmul.f32 %v9037_v55, %v4639_v9  ;;  %v11217_v9 = vld [vmem:[#allocation29_spill] sm:$0xff] }
 0x43c   : > { %v4670_v17 = vadd.f32 %v4654_v26, %v3364_v13  ;;  %v3082_v8 = vpop.f32.mrf.mxu0  ;;  %v11213_v13 = vld [vmem:[#allocation50_spill] sm:$0xff] }
 0x43d   : > { %v3181_v48 = vpop.f32.mrf.mxu1  ;;  %v3285_v7 = vpop.f32.mrf.mxu2  ;;  %v3083_v26 = vadd.f32 %v3082_v8, %v8816_v50  ;;  %v11219_v50 = vld [vmem:[#allocation56_spill] sm:$0xff] }
 0x43e   : > { %4687 = vst.msk [vmem:[#allocation6 + $0x20] sm:$0xff] %vm11207_vm9, %v4670_v17  ;;  %v3182_v62 = vadd.f32 %v3181_v48, %v3078_v33  ;;  %v2143_v48 = vmul.f32 1.442695, %v2120_v58  ;;  %vm11218_vm9 = vnez %v11217_v9  ;;  %v2121_v8 = vmul.f32 %v11143_v49, %v11219_v50 }
 0x43f   : > { %3482 = vmatmul.f32.gmra.mxu0 %v11209_v60  ;;  %v9049_v60 = vpop.eup %5626 }
 0x440   : > { %v3286_v27 = vadd.f32 %v3285_v7, %v3182_v62  ;;  %5465 = vmatmul.msk.f32.gmra.mxu1 %vm11211_vm0, %v10985_v42  ;;  %3799 = vmatmul.f32.gmra.mxu3 %v11212_v4  ;;  %11215 = vst [vmem:[#allocation26_spill] sm:$0xff] %v9049_v60  ;;  %5628 = vpow2.f32 %v2143_v48  ;;  %v4641_v48 = vld [vmem:[#allocation6 + $0x38] sm:$0xff] }
 0x442   : > { %v3368_v14 = vadd.f32 %v3367_v16, %v3286_v27  ;;  %3694 = vmatmul.f32.gmra.mxu2 %v11213_v13  ;;  %v11216_v16 = vld [vmem:[#allocation104_spill] sm:$0xff]  ;;  %v11220_v27 = vld [vmem:[#allocation86_spill] sm:$0xff] }
 0x443   : > { %v3371_v17 = vpop.f32.mrf.mxu3 }
 0x444   : > { %v4671_v33 = vadd.f32 %v4655_v53, %v3368_v14  ;;  %v3087_v56 = vpop.f32.mrf.mxu0  ;;  %v4656_v14 = vmul.f32 %v9049_v60, %v4640_v10  ;;  %v11221_v53 = vld [vmem:[#allocation79_spill] sm:$0xff] }
 0x445   : > { %v3187_v62 = vpop.f32.mrf.mxu1  ;;  %v3289_v44 = vpop.f32.mrf.mxu2  ;;  %v3088_v13 = vadd.f32 %v3087_v56, %v8827_v63  ;;  %v11224_v10 = vld [vmem:[#allocation31_spill] sm:$0xff]  ;;  %v11226_v63 = vld [vmem:[#allocation81_spill] sm:$0xff] }
 0x446   : > { %4688 = vst.msk [vmem:[#allocation6 + $0x28] sm:$0xff] %vm11214_vm13, %v4671_v33  ;;  %v3188_v7 = vadd.f32 %v3187_v62, %v3083_v26  ;;  %v2145_v62 = vmul.f32 1.442695, %v2121_v8  ;;  %v9062_v50 = vpop.eup %5628  ;;  %vm11225_vm15 = vnez %v11224_v10  ;;  %v2122_v56 = vmul.f32 %v11143_v49, %v11226_v63  ;;  %v4642_v63 = vld [vmem:[#allocation6 + $0x40] sm:$0xff] }
 0x447   : > { %3490 = vmatmul.f32.gmra.mxu0 %v11216_v16  ;;  %11222 = vst [vmem:[#allocation34_spill] sm:$0xff] %v9062_v50 }
 0x448   : > { %v3290_v4 = vadd.f32 %v3289_v44, %v3188_v7  ;;  %5466 = vmatmul.msk.f32.gmra.mxu1 %vm11218_vm9, %v10985_v42  ;;  %3805 = vmatmul.f32.gmra.mxu3 %v11220_v27  ;;  %5630 = vpow2.f32 %v2145_v62 }
 0x44a   : > { %v3372_v58 = vadd.f32 %v3371_v17, %v3290_v4  ;;  %3699 = vmatmul.f32.gmra.mxu2 %v11221_v53  ;;  %v11223_v17 = vld [vmem:[#allocation125_spill] sm:$0xff] }
 0x44b   : > { %v3375_v33 = vpop.f32.mrf.mxu3  ;;  %v11227_v4 = vld [vmem:[#allocation105_spill] sm:$0xff] }
 0x44c   : > { %v4672_v26 = vadd.f32 %v4656_v14, %v3372_v58  ;;  %v3092_v7 = vpop.f32.mrf.mxu0  ;;  %v4657_v58 = vmul.f32 %v9062_v50, %v4641_v48  ;;  %v11228_v14 = vld [vmem:[#allocation142_spill] sm:$0xff]  ;;  %v11231_v48 = vld [vmem:[#allocation33_spill] sm:$0xff] }
 0x44d   : > { %v3193_v44 = vpop.f32.mrf.mxu1  ;;  %v3293_v55 = vpop.f32.mrf.mxu2  ;;  %v3093_v53 = vadd.f32 %v3092_v7, %v8838_v51  ;;  %v11233_v51 = vld [vmem:[#allocation120_spill] sm:$0xff] }
 0x44e   : > { %4689 = vst.msk [vmem:[#allocation6 + $0x30] sm:$0xff] %vm11214_vm13, %v4672_v26  ;;  %v3194_v16 = vadd.f32 %v3193_v44, %v3088_v13  ;;  %v2147_v26 = vmul.f32 1.442695, %v2122_v56  ;;  %v9075_v60 = vpop.eup %5630  ;;  %v2123_v7 = vmul.f32 %v11143_v49, %v11233_v51  ;;  %v4643_v51 = vld [vmem:[#allocation6 + $0x48] sm:$0xff] }
 0x44f   : > { %3498 = vmatmul.f32.gmra.mxu0 %v11223_v17  ;;  %11229 = vst [vmem:[#allocation36_spill] sm:$0xff] %v9075_v60 }
 0x450   : > { %v3294_v27 = vadd.f32 %v3293_v55, %v3194_v16  ;;  %5467 = vmatmul.msk.f32.gmra.mxu1 %vm11225_vm15, %v10985_v42  ;;  %3811 = vmatmul.f32.gmra.mxu3 %v11227_v4  ;;  %vm11232_vm15 = vnez %v11231_v48  ;;  %5632 = vpow2.f32 %v2147_v26 }
 0x452   : > { %v3376_v8 = vadd.f32 %v3375_v33, %v3294_v27  ;;  %3704 = vmatmul.f32.gmra.mxu2 %v11228_v14  ;;  %v11230_v33 = vld [vmem:[#allocation60_spill] sm:$0xff]  ;;  %v11234_v27 = vld [vmem:[#allocation122_spill] sm:$0xff] }
 0x453   : > { %v3379_v13 = vpop.f32.mrf.mxu3 }
 0x454   : > { %v4673_v55 = vadd.f32 %v4657_v58, %v3376_v8  ;;  %v3097_v44 = vpop.f32.mrf.mxu0  ;;  %v4658_v8 = vmul.f32 %v9075_v60, %v4642_v63  ;;  %v11235_v58 = vld [vmem:[#allocation52_spill] sm:$0xff]  ;;  %v11238_v63 = vld [vmem:[#allocation35_spill] sm:$0xff] }
 0x455   : > { %v3199_v16 = vpop.f32.mrf.mxu1  ;;  %v3297_v17 = vpop.f32.mrf.mxu2  ;;  %v3098_v14 = vadd.f32 %v3097_v44, %v8849_v32  ;;  %v11240_v32 = vld [vmem:[#allocation95_spill] sm:$0xff] }
 0x456   : > { %4690 = vst.msk [vmem:[#allocation6 + $0x38] sm:$0xff] %vm11214_vm13, %v4673_v55  ;;  %v3200_v62 = vadd.f32 %v3199_v16, %v3093_v53  ;;  %v2149_v16 = vmul.f32 1.442695, %v2123_v7  ;;  %v9088_v50 = vpop.eup %5632  ;;  %v2124_v44 = vmul.f32 %v11143_v49, %v11240_v32 }
 0x457   : > { %3506 = vmatmul.f32.gmra.mxu0 %v11230_v33  ;;  %11236 = vst [vmem:[#allocation40_spill] sm:$0xff] %v9088_v50 }
 0x458   : > { %v3298_v4 = vadd.f32 %v3297_v17, %v3200_v62  ;;  %5468 = vmatmul.msk.f32.gmra.mxu1 %vm11232_vm15, %v10985_v42  ;;  %3817 = vmatmul.f32.gmra.mxu3 %v11234_v27  ;;  %vm11239_vm15 = vnez %v11238_v63  ;;  %5634 = vpow2.f32 %v2149_v16  ;;  %v4644_v16 = vld [vmem:[#allocation6 + $0x50] sm:$0xff] }
 0x45a   : > { %v3380_v56 = vadd.f32 %v3379_v13, %v3298_v4  ;;  %3709 = vmatmul.f32.gmra.mxu2 %v11235_v58  ;;  %v11237_v13 = vld [vmem:[#allocation59_spill] sm:$0xff]  ;;  %v11241_v4 = vld [vmem:[#allocation57_spill] sm:$0xff] }
 0x45b   : > { %v3383_v55 = vpop.f32.mrf.mxu3 }
 0x45c   : > { %v4674_v53 = vadd.f32 %v4658_v8, %v3380_v56  ;;  %v3102_v62 = vpop.f32.mrf.mxu0  ;;  %v4659_v56 = vmul.f32 %v9088_v50, %v4643_v51  ;;  %v11242_v8 = vld [vmem:[#allocation135_spill] sm:$0xff] }
 0x45d   : > { %v3205_v17 = vpop.f32.mrf.mxu1  ;;  %v3301_v33 = vpop.f32.mrf.mxu2  ;;  %v3103_v58 = vadd.f32 %v3102_v62, %v8860_v3  ;;  %v11245_v51 = vld [vmem:[#allocation39_spill] sm:$0xff]  ;;  %v11247_v3 = vld [vmem:[#allocation112_spill] sm:$0xff] }
 0x45e   : > { %4691 = vst.msk [vmem:[#allocation6 + $0x40] sm:$0xff] %vm11214_vm13, %v4674_v53  ;;  %v3206_v26 = vadd.f32 %v3205_v17, %v3098_v14  ;;  %v2151_v17 = vmul.f32 1.442695, %v2124_v44  ;;  %v9101_v32 = vpop.eup %5634  ;;  %v2125_v62 = vmul.f32 %v11143_v49, %v11247_v3  ;;  %v4645_v3 = vld [vmem:[#allocation6 + $0x58] sm:$0xff] }
 0x45f   : > { %3514 = vmatmul.f32.gmra.mxu0 %v11237_v13  ;;  %11243 = vst [vmem:[#allocation30_spill] sm:$0xff] %v9101_v32 }
 0x460   : > { %v3302_v27 = vadd.f32 %v3301_v33, %v3206_v26  ;;  %5469 = vmatmul.msk.f32.gmra.mxu1 %vm11239_vm15, %v10985_v42  ;;  %3823 = vmatmul.f32.gmra.mxu3 %v11241_v4  ;;  %vm11246_vm15 = vnez %v11245_v51  ;;  %5636 = vpow2.f32 %v2151_v17 }
 0x462   : > { %v3384_v7 = vadd.f32 %v3383_v55, %v3302_v27  ;;  %3714 = vmatmul.f32.gmra.mxu2 %v11242_v8  ;;  %v11244_v55 = vld [vmem:[#allocation113_spill] sm:$0xff] }
 0x463   : > { %v3387_v53 = vpop.f32.mrf.mxu3  ;;  %v11248_v27 = vld [vmem:[#allocation77_spill] sm:$0xff] }
 0x464   : > { %v4675_v14 = vadd.f32 %v4659_v56, %v3384_v7  ;;  %v3107_v26 = vpop.f32.mrf.mxu0  ;;  %v4660_v7 = vmul.f32 %v9101_v32, %v4644_v16  ;;  %v11249_v56 = vld [vmem:[#allocation62_spill] sm:$0xff]  ;;  %v11252_v16 = vld [vmem:[#allocation37_spill] sm:$0xff] }
 0x465   : > { %v3211_v33 = vpop.f32.mrf.mxu1  ;;  %v3305_v60 = vpop.f32.mrf.mxu2  ;;  %v3108_v8 = vadd.f32 %v3107_v26, %v8871_v38  ;;  %v11254_v38 = vld [vmem:[#allocation127_spill] sm:$0xff] }
 0x466   : > { %4692 = vst.msk [vmem:[#allocation6 + $0x48] sm:$0xff] %vm11214_vm13, %v4675_v14  ;;  %v3212_v13 = vadd.f32 %v3211_v33, %v3103_v58  ;;  %v2153_v14 = vmul.f32 1.442695, %v2125_v62  ;;  %v9114_v50 = vpop.eup %5636  ;;  %v2126_v26 = vmul.f32 %v11143_v49, %v11254_v38  ;;  %v4646_v38 = vld [vmem:[#allocation6 + $0x60] sm:$0xff] }
 0x467   : > { %3522 = vmatmul.f32.gmra.mxu0 %v11244_v55  ;;  %11250 = vst [vmem:[#allocation32_spill] sm:$0xff] %v9114_v50 }
 0x468   : > { %v3306_v4 = vadd.f32 %v3305_v60, %v3212_v13  ;;  %5470 = vmatmul.msk.f32.gmra.mxu1 %vm11246_vm15, %v10985_v42  ;;  %3829 = vmatmul.f32.gmra.mxu3 %v11248_v27  ;;  %vm11253_vm15 = vnez %v11252_v16  ;;  %5638 = vpow2.f32 %v2153_v14 }
 0x46a   : > { %v3388_v44 = vadd.f32 %v3387_v53, %v3306_v4  ;;  %3719 = vmatmul.f32.gmra.mxu2 %v11249_v56  ;;  %v11251_v53 = vld [vmem:[#allocation38_spill] sm:$0xff] }
 0x46b   : > { %v3391_v58 = vpop.f32.mrf.mxu3  ;;  %v11255_v4 = vld [vmem:[#allocation110_spill] sm:$0xff] }
 0x46c   : > { %v4676_v60 = vadd.f32 %v4660_v7, %v3388_v44  ;;  %v3112_v33 = vpop.f32.mrf.mxu0  ;;  %v4661_v44 = vmul.f32 %v9114_v50, %v4645_v3  ;;  %v11256_v7 = vld [vmem:[#allocation97_spill] sm:$0xff]  ;;  %v11259_v3 = vld [vmem:[#allocation43_spill] sm:$0xff] }
 0x46d   : > { %v3217_v13 = vpop.f32.mrf.mxu1  ;;  %v3309_v55 = vpop.f32.mrf.mxu2  ;;  %v3113_v56 = vadd.f32 %v3112_v33, %v8882_v21  ;;  %v11261_v21 = vld [vmem:[#allocation141_spill] sm:$0xff] }
 0x46e   : > { %4693 = vst.msk [vmem:[#allocation6 + $0x50] sm:$0xff] %vm11214_vm13, %v4676_v60  ;;  %v3218_v17 = vadd.f32 %v3217_v13, %v3108_v8  ;;  %v2155_v13 = vmul.f32 1.442695, %v2126_v26  ;;  %v9127_v32 = vpop.eup %5638  ;;  %v2127_v33 = vmul.f32 %v11143_v49, %v11261_v21 }
 0x46f   : > { %3530 = vmatmul.f32.gmra.mxu0 %v11251_v53  ;;  %11257 = vst [vmem:[#allocation46_spill] sm:$0xff] %v9127_v32 }
 0x470   : > { %v3310_v27 = vadd.f32 %v3309_v55, %v3218_v17  ;;  %5471 = vmatmul.msk.f32.gmra.mxu1 %vm11253_vm15, %v10985_v42  ;;  %3835 = vmatmul.f32.gmra.mxu3 %v11255_v4  ;;  %vm11260_vm15 = vnez %v11259_v3  ;;  %5640 = vpow2.f32 %v2155_v13  ;;  %v4647_v13 = vld [vmem:[#allocation6 + $0x68] sm:$0xff] }
 0x472   : > { %v3392_v62 = vadd.f32 %v3391_v58, %v3310_v27  ;;  %3724 = vmatmul.f32.gmra.mxu2 %v11256_v7  ;;  %v11258_v58 = vld [vmem:[#allocation63_spill] sm:$0xff]  ;;  %v11262_v27 = vld [vmem:[#allocation44_spill] sm:$0xff] }
 0x473   : > { %v3395_v60 = vpop.f32.mrf.mxu3 }
 0x474   : > { %v4677_v8 = vadd.f32 %v4661_v44, %v3392_v62  ;;  %v3117_v17 = vpop.f32.mrf.mxu0  ;;  %v4662_v62 = vmul.f32 %v9127_v32, %v4646_v38  ;;  %v11263_v44 = vld [vmem:[#allocation150_spill] sm:$0xff] }
 0x475   : > { %v3223_v55 = vpop.f32.mrf.mxu1  ;;  %v3313_v53 = vpop.f32.mrf.mxu2  ;;  %v3118_v7 = vadd.f32 %v3117_v17, %v8893_v35  ;;  %v11266_v35 = vld [vmem:[#allocation12_spill] sm:$0xff] }
 0x476   : > { %4694 = vst.msk [vmem:[#allocation6 + $0x58] sm:$0xff] %vm11214_vm13, %v4677_v8  ;;  %v3224_v14 = vadd.f32 %v3223_v55, %v3113_v56  ;;  %v2157_v55 = vmul.f32 1.442695, %v2127_v33  ;;  %v9140_v21 = vpop.eup %5640  ;;  %v2128_v17 = vmul.f32 %v11143_v49, %v11266_v35  ;;  %v4648_v49 = vld [vmem:[#allocation6 + $0x70] sm:$0xff] }
 0x477   : > { %3538 = vmatmul.f32.gmra.mxu0 %v11258_v58 }
 0x478   : > { %v3314_v4 = vadd.f32 %v3313_v53, %v3224_v14  ;;  %5472 = vmatmul.msk.f32.gmra.mxu1 %vm11260_vm15, %v10985_v42  ;;  %3841 = vmatmul.f32.gmra.mxu3 %v11262_v27  ;;  %5642 = vpow2.f32 %v2157_v55 }
 0x47a   : > { %v3396_v26 = vadd.f32 %v3395_v60, %v3314_v4  ;;  %3729 = vmatmul.f32.gmra.mxu2 %v11263_v44  ;;  %v11264_v60 = vld [vmem:[#allocation72_spill] sm:$0xff] }
 0x47b   : > { %v3399_v8 = vpop.f32.mrf.mxu3  ;;  %v11267_v4 = vld [vmem:[#allocation64_spill] sm:$0xff] }
 0x47c   : > { %v4678_v56 = vadd.f32 %v4662_v62, %v3396_v26  ;;  %v3122_v14 = vpop.f32.mrf.mxu0  ;;  %v4663_v26 = vmul.f32 %v9140_v21, %v4647_v13  ;;  %v11268_v62 = vld [vmem:[#allocation61_spill] sm:$0xff] }
 0x47d   : > { %v3229_v53 = vpop.f32.mrf.mxu1  ;;  %v3317_v50 = vpop.f32.mrf.mxu2  ;;  %v3123_v44 = vadd.f32 %v3122_v14, %v8912_v61  ;;  %v11270_v61 = vld [vmem:[#allocation109_spill] sm:$0xff] }
 0x47e   : > { %4695 = vst.msk [vmem:[#allocation6 + $0x60] sm:$0xff] %vm11214_vm13, %v4678_v56  ;;  %v3230_v58 = vadd.f32 %v3229_v53, %v3118_v7  ;;  %v2159_v56 = vmul.f32 1.442695, %v2128_v17  ;;  %v9153_v32 = vpop.eup %5642 }
 0x47f   : > { %3546 = vmatmul.f32.gmra.mxu0 %v11264_v60  ;;  %v4664_v13 = vmul.f32 %v9153_v32, %v4648_v49 }
 0x480   : > { %v3318_v27 = vadd.f32 %v3317_v50, %v3230_v58  ;;  %5473 = vmatmul.msk.f32.gmra.mxu1 %vm11109_vm3, %v10985_v42  ;;  %3847 = vmatmul.f32.gmra.mxu3 %v11267_v4  ;;  %5644 = vpow2.f32 %v2159_v56  ;;  %v4649_v56 = vld [vmem:[#allocation6 + $0x78] sm:$0xff] }
 0x482   : > { %v3400_v33 = vadd.f32 %v3399_v8, %v3318_v27  ;;  %3734 = vmatmul.f32.gmra.mxu2 %v11268_v62  ;;  %v11269_v8 = vld [vmem:[#allocation138_spill] sm:$0xff]  ;;  %v11271_v27 = vld [vmem:[#allocation84_spill] sm:$0xff] }
 0x483   : > { %v3403_v7 = vpop.f32.mrf.mxu3 }
 0x484   : > { %v4679_v50 = vadd.f32 %v4663_v26, %v3400_v33  ;;  %v3127_v53 = vpop.f32.mrf.mxu0 }
 0x485   : > { %v3235_v58 = vpop.f32.mrf.mxu1  ;;  %v3321_v60 = vpop.f32.mrf.mxu2  ;;  %v3128_v17 = vadd.f32 %v3127_v53, %v8931_v15  ;;  %v11272_v53 = vld [vmem:[#allocation123_spill] sm:$0xff] }
 0x486   : > { %4696 = vst.msk [vmem:[#allocation6 + $0x68] sm:$0xff] %vm11214_vm13, %v4679_v50  ;;  %v3236_v55 = vadd.f32 %v3235_v58, %v3123_v44  ;;  %v9164_v58 = vpop.eup %5644 }
 0x487   : > { %3554 = vmatmul.f32.gmra.mxu0 %v11269_v8 }
 0x488   : > { %v3322_v35 = vadd.f32 %v3321_v60, %v3236_v55  ;;  %5474 = vmatmul.msk.f32.gmra.mxu1 %vm11113_vm11, %v10985_v42  ;;  %3853 = vmatmul.f32.gmra.mxu3 %v11270_v61 }
 0x48a   : > { %v3404_v14 = vadd.f32 %v3403_v7, %v3322_v35  ;;  %3739 = vmatmul.f32.gmra.mxu2 %v11271_v27  ;;  %v4665_v7 = vmul.f32 %v9164_v58, %v4649_v56  ;;  %v11276_v56 = vld [vmem:[#allocation13_spill] sm:$0xff] }
 0x48b   : > { %v3407_v33 = vpop.f32.mrf.mxu3 }
 0x48c   : > { %v4680_v4 = vadd.f32 %v4664_v13, %v3404_v14  ;;  %v3435_v62 = vpop.f32.mrf.mxu0 }
 0x48d   : > { %v3241_v26 = vpop.f32.mrf.mxu1  ;;  %v3325_v50 = vpop.f32.mrf.mxu2 }
 0x48e   : > { %4697 = vst.msk [vmem:[#allocation6 + $0x70] sm:$0xff] %vm11214_vm13, %v4680_v4  ;;  %v3242_v44 = vadd.f32 %v3241_v26, %v3128_v17  ;;  %v11274_v17 = vld [vmem:[#allocation130_spill] sm:$0xff] }
 0x48f   : > { %5476 = vmatmul.msk.f32.vlgmr.msra.gmra.mxu0 %vm11157_vm10, %v10985_v42 }
 0x490   : > { %v3326_v55 = vadd.f32 %v3325_v50, %v3242_v44  ;;  %5475 = vmatmul.msk.f32.gmra.mxu1 %vm6636_vm1, %v10985_v42  ;;  %5508 = vmatmul.msk.f32.vlgmr.msra.gmra.mxu3 %vm11035_vm12, %v10985_v42  ;;  %vm11273_vm12 = vnez %v11041_v29 }
 0x492   : > { %v3408_v15 = vadd.f32 %v3407_v33, %v3326_v55  ;;  %4045 = vmatmul.f32.vlgmr.msra.gmra.mxu2 %v11272_v53 }
 0x493   : > { %v3764_v49 = vpop.f32.mrf.mxu3 }
 0x494   : > { %v4681_v60 = vadd.f32 %v4665_v7, %v3408_v15  ;;  %v3443_v35 = vpop.f32.mrf.mxu0 }
 0x495   : > { %v3581_v8 = vpop.f32.mrf.mxu1  ;;  %v3665_v14 = vpop.f32.mrf.mxu2 }
 0x496   : > { %4698 = vst.msk [vmem:[#allocation6 + $0x78] sm:$0xff] %vm11214_vm13, %v4681_v60  ;;  %v3582_v61 = vadd.f32 %v3581_v8, %v3435_v62  ;;  %vm11289_vm13 = vnez %v11082_v39 }
 0x497   : > { %5477 = vmatmul.msk.f32.gmra.mxu0 %vm11168_vm5, %v10985_v42 }
 0x498   : > { %v3666_v13 = vadd.f32 %v3665_v14, %v3582_v61  ;;  %5492 = vmatmul.msk.f32.vlgmr.msra.gmra.mxu1 %vm11157_vm10, %v10985_v42  ;;  %5509 = vmatmul.msk.f32.gmra.mxu3 %vm11273_vm12, %v10985_v42  ;;  %vm11275_vm10 = vnez %v11046_v34 }
 0x49a   : > { %v9187_v27 = vadd.f32 %v3764_v49, %v3666_v13  ;;  %4053 = vmatmul.f32.gmra.mxu2 %v11274_v17 }
 0x49b   : > { %v3770_v4 = vpop.f32.mrf.mxu3 }
 0x49c   : > { %v3451_v33 = vpop.f32.mrf.mxu0 }
 0x49d   : > { %v3585_v26 = vpop.f32.mrf.mxu1  ;;  %v3670_v44 = vpop.f32.mrf.mxu2 }
 0x49e   : > { %v3586_v62 = vadd.f32 %v3585_v26, %v3443_v35  ;;  %v11277_v35 = vld [vmem:[#allocation65_spill] sm:$0xff] }
 0x49f   : > { %5478 = vmatmul.msk.f32.gmra.mxu0 %vm11180_vm4, %v10985_v42 }
 0x4a0   : > { %v3671_v50 = vadd.f32 %v3670_v44, %v3586_v62  ;;  %5493 = vmatmul.msk.f32.gmra.mxu1 %vm11168_vm5, %v10985_v42  ;;  %5510 = vmatmul.msk.f32.gmra.mxu3 %vm11275_vm10, %v10985_v42  ;;  %vm11280_vm5 = vnez %v11118_v11 }
 0x4a2   : > { %v9199_v22 = vadd.f32 %v3770_v4, %v3671_v50  ;;  %4061 = vmatmul.f32.gmra.mxu2 %v11276_v56 }
 0x4a3   : > { %v3776_v55 = vpop.f32.mrf.mxu3 }
 0x4a4   : > { %v3459_v15 = vpop.f32.mrf.mxu0 }
 0x4a5   : > { %v3589_v7 = vpop.f32.mrf.mxu1  ;;  %v3675_v60 = vpop.f32.mrf.mxu2 }
 0x4a6   : > { %v3590_v53 = vadd.f32 %v3589_v7, %v3451_v33  ;;  %v11278_v33 = vld [vmem:[#allocation24_spill] sm:$0xff] }
 0x4a7   : > { %5479 = vmatmul.msk.f32.gmra.mxu0 %vm11191_vm7, %v10985_v42 }
 0x4a8   : > { %v3676_v49 = vadd.f32 %v3675_v60, %v3590_v53  ;;  %5494 = vmatmul.msk.f32.gmra.mxu1 %vm11180_vm4, %v10985_v42  ;;  %5511 = vmatmul.msk.f32.gmra.mxu3 %vm11116_vm8, %v10985_v42  ;;  %vm11282_vm4 = vnez %v11224_v10 }
 0x4aa   : > { %v9211_v6 = vadd.f32 %v3776_v55, %v3676_v49  ;;  %4069 = vmatmul.f32.gmra.mxu2 %v11277_v35 }
 0x4ab   : > { %v3782_v8 = vpop.f32.mrf.mxu3 }
 0x4ac   : > { %v3467_v61 = vpop.f32.mrf.mxu0 }
 0x4ad   : > { %v3593_v14 = vpop.f32.mrf.mxu1  ;;  %v3680_v17 = vpop.f32.mrf.mxu2 }
 0x4ae   : > { %v3594_v13 = vadd.f32 %v3593_v14, %v3459_v15  ;;  %v11279_v15 = vld [vmem:[#allocation153_spill] sm:$0xff] }
 0x4af   : > { %5480 = vmatmul.msk.f32.gmra.mxu0 %vm11201_vm2, %v10985_v42 }
 0x4b0   : > { %v3681_v4 = vadd.f32 %v3680_v17, %v3594_v13  ;;  %5495 = vmatmul.msk.f32.gmra.mxu1 %vm11191_vm7, %v10985_v42  ;;  %5512 = vmatmul.msk.f32.gmra.mxu3 %vm11117_vm14, %v10985_v42  ;;  %vm11285_vm7 = vnez %v11231_v48 }
 0x4b2   : > { %v9223_v47 = vadd.f32 %v3782_v8, %v3681_v4  ;;  %4077 = vmatmul.f32.gmra.mxu2 %v11278_v33 }
 0x4b3   : > { %v3788_v26 = vpop.f32.mrf.mxu3 }
 0x4b4   : > { %v3475_v62 = vpop.f32.mrf.mxu0 }
 0x4b5   : > { %v3597_v44 = vpop.f32.mrf.mxu1  ;;  %v3685_v56 = vpop.f32.mrf.mxu2 }
 0x4b6   : > { %v3598_v50 = vadd.f32 %v3597_v44, %v3467_v61  ;;  %v11281_v61 = vld [vmem:[#allocation69_spill] sm:$0xff] }
 0x4b7   : > { %5481 = vmatmul.msk.f32.gmra.mxu0 %vm11211_vm0, %v10985_v42 }
 0x4b8   : > { %v3686_v55 = vadd.f32 %v3685_v56, %v3598_v50  ;;  %5496 = vmatmul.msk.f32.gmra.mxu1 %vm11201_vm2, %v10985_v42  ;;  %5513 = vmatmul.msk.f32.gmra.mxu3 %vm11061_vm6, %v10985_v42  ;;  %vm11286_vm2 = vnez %v11077_v31 }
 0x4ba   : > { %v9235_v24 = vadd.f32 %v3788_v26, %v3686_v55  ;;  %4085 = vmatmul.f32.gmra.mxu2 %v11279_v15 }
 0x4bb   : > { %v3794_v7 = vpop.f32.mrf.mxu3 }
 0x4bc   : > { %v3483_v53 = vpop.f32.mrf.mxu0 }
 0x4bd   : > { %v3601_v60 = vpop.f32.mrf.mxu1  ;;  %v3690_v35 = vpop.f32.mrf.mxu2 }
 0x4be   : > { %v3602_v49 = vadd.f32 %v3601_v60, %v3475_v62  ;;  %v11284_v62 = vld [vmem:[#allocation111_spill] sm:$0xff] }
 0x4bf   : > { %5482 = vmatmul.msk.f32.gmra.mxu0 %vm11218_vm9, %v10985_v42 }
 0x4c0   : > { %v3691_v8 = vadd.f32 %v3690_v35, %v3602_v49  ;;  %5497 = vmatmul.msk.f32.gmra.mxu1 %vm11211_vm0, %v10985_v42  ;;  %5514 = vmatmul.msk.f32.gmra.mxu3 %vm11280_vm5, %v10985_v42  ;;  %vm11283_vm0 = vnez %v11121_v30 }
 0x4c2   : > { %v9247_v59 = vadd.f32 %v3794_v7, %v3691_v8  ;;  %4093 = vmatmul.f32.gmra.mxu2 %v11281_v61 }
 0x4c3   : > { %v3800_v14 = vpop.f32.mrf.mxu3 }
 0x4c4   : > { %v3491_v13 = vpop.f32.mrf.mxu0 }
 0x4c5   : > { %v3605_v17 = vpop.f32.mrf.mxu1  ;;  %v3695_v33 = vpop.f32.mrf.mxu2 }
 0x4c6   : > { %v3606_v4 = vadd.f32 %v3605_v17, %v3483_v53  ;;  %v11287_v53 = vld [vmem:[#allocation73_spill] sm:$0xff] }
 0x4c7   : > { %5483 = vmatmul.msk.f32.gmra.mxu0 %vm11282_vm4, %v10985_v42 }
 0x4c8   : > { %v3696_v26 = vadd.f32 %v3695_v33, %v3606_v4  ;;  %5498 = vmatmul.msk.f32.gmra.mxu1 %vm11218_vm9, %v10985_v42  ;;  %5515 = vmatmul.msk.f32.gmra.mxu3 %vm11283_vm0, %v10985_v42  ;;  %vm11288_vm9 = vnez %v11238_v63 }
 0x4ca   : > { %v9259_v18 = vadd.f32 %v3800_v14, %v3696_v26  ;;  %4101 = vmatmul.f32.gmra.mxu2 %v11284_v62 }
 0x4cb   : > { %v3806_v44 = vpop.f32.mrf.mxu3 }
 0x4cc   : > { %v3499_v50 = vpop.f32.mrf.mxu0 }
 0x4cd   : > { %v3609_v56 = vpop.f32.mrf.mxu1  ;;  %v3700_v15 = vpop.f32.mrf.mxu2 }
 0x4ce   : > { %v3610_v55 = vadd.f32 %v3609_v56, %v3491_v13  ;;  %v11290_v13 = vld [vmem:[#allocation129_spill] sm:$0xff] }
 0x4cf   : > { %5484 = vmatmul.msk.f32.gmra.mxu0 %vm11285_vm7, %v10985_v42 }
 0x4d0   : > { %v3701_v7 = vadd.f32 %v3700_v15, %v3610_v55  ;;  %5499 = vmatmul.msk.f32.gmra.mxu1 %vm11282_vm4, %v10985_v42  ;;  %5516 = vmatmul.msk.f32.gmra.mxu3 %vm11286_vm2, %v10985_v42  ;;  %vm11291_vm4 = vnez %v11245_v51 }
 0x4d2   : > { %v9271_v9 = vadd.f32 %v3806_v44, %v3701_v7  ;;  %4109 = vmatmul.f32.gmra.mxu2 %v11287_v53 }
 0x4d3   : > { %v3812_v60 = vpop.f32.mrf.mxu3 }
 0x4d4   : > { %v3507_v49 = vpop.f32.mrf.mxu0 }
 0x4d5   : > { %v3613_v35 = vpop.f32.mrf.mxu1  ;;  %v3705_v61 = vpop.f32.mrf.mxu2 }
 0x4d6   : > { %v3614_v8 = vadd.f32 %v3613_v35, %v3499_v50  ;;  %v11293_v50 = vld [vmem:[#allocation100_spill] sm:$0xff] }
 0x4d7   : > { %5485 = vmatmul.msk.f32.gmra.mxu0 %vm11288_vm9, %v10985_v42 }
 0x4d8   : > { %v3706_v14 = vadd.f32 %v3705_v61, %v3614_v8  ;;  %5500 = vmatmul.msk.f32.gmra.mxu1 %vm11285_vm7, %v10985_v42  ;;  %5517 = vmatmul.msk.f32.gmra.mxu3 %vm11289_vm13, %v10985_v42  ;;  %vm11292_vm7 = vnez %v11087_v19  ;;  %vm11294_vm13 = vnez %v11252_v16 }
 0x4da   : > { %v9283_v10 = vadd.f32 %v3812_v60, %v3706_v14  ;;  %4117 = vmatmul.f32.gmra.mxu2 %v11290_v13 }
 0x4db   : > { %v3818_v17 = vpop.f32.mrf.mxu3 }
 0x4dc   : > { %v3515_v4 = vpop.f32.mrf.mxu0 }
 0x4dd   : > { %v3617_v33 = vpop.f32.mrf.mxu1  ;;  %v3710_v62 = vpop.f32.mrf.mxu2 }
 0x4de   : > { %v3618_v26 = vadd.f32 %v3617_v33, %v3507_v49  ;;  %v11296_v49 = vld [vmem:[#allocation155_spill] sm:$0xff] }
 0x4df   : > { %5486 = vmatmul.msk.f32.gmra.mxu0 %vm11291_vm4, %v10985_v42 }
 0x4e0   : > { %v3711_v44 = vadd.f32 %v3710_v62, %v3618_v26  ;;  %5501 = vmatmul.msk.f32.gmra.mxu1 %vm11288_vm9, %v10985_v42  ;;  %5518 = vmatmul.msk.f32.gmra.mxu3 %vm11292_vm7, %v10985_v42  ;;  %vm11295_vm9 = vnez %v10847_v45 }
 0x4e2   : > { %v9295_v48 = vadd.f32 %v3818_v17, %v3711_v44  ;;  %4125 = vmatmul.f32.gmra.mxu2 %v11293_v50 }
 0x4e3   : > { %v3824_v56 = vpop.f32.mrf.mxu3 }
 0x4e4   : > { %v3523_v55 = vpop.f32.mrf.mxu0 }
 0x4e5   : > { %v3621_v15 = vpop.f32.mrf.mxu1  ;;  %v3715_v53 = vpop.f32.mrf.mxu2 }
 0x4e6   : > { %v3622_v7 = vadd.f32 %v3621_v15, %v3515_v4  ;;  %v11298_v4 = vld [vmem:[#allocation118_spill] sm:$0xff] }
 0x4e7   : > { %5487 = vmatmul.msk.f32.gmra.mxu0 %vm11294_vm13, %v10985_v42 }
 0x4e8   : > { %v3716_v60 = vadd.f32 %v3715_v53, %v3622_v7  ;;  %5502 = vmatmul.msk.f32.gmra.mxu1 %vm11291_vm4, %v10985_v42  ;;  %5519 = vmatmul.msk.f32.gmra.mxu3 %vm11295_vm9, %v10985_v42  ;;  %vm11297_vm4 = vnez %v10850_v37 }
 0x4ea   : > { %v9307_v63 = vadd.f32 %v3824_v56, %v3716_v60  ;;  %4133 = vmatmul.f32.gmra.mxu2 %v11296_v49 }
 0x4eb   : > { %v3830_v35 = vpop.f32.mrf.mxu3 }
 0x4ec   : > { %v3531_v8 = vpop.f32.mrf.mxu0 }
 0x4ed   : > { %v3625_v61 = vpop.f32.mrf.mxu1  ;;  %v3720_v13 = vpop.f32.mrf.mxu2 }
 0x4ee   : > { %v3626_v14 = vadd.f32 %v3625_v61, %v3523_v55  ;;  %v11300_v55 = vld [vmem:[#allocation144_spill] sm:$0xff] }
 0x4ef   : > { %5488 = vmatmul.msk.f32.gmra.mxu0 %vm11260_vm15, %v10985_v42 }
 0x4f0   : > { %v3721_v17 = vadd.f32 %v3720_v13, %v3626_v14  ;;  %5503 = vmatmul.msk.f32.gmra.mxu1 %vm11294_vm13, %v10985_v42  ;;  %5520 = vmatmul.msk.f32.gmra.mxu3 %vm11297_vm4, %v10985_v42  ;;  %vm11299_vm13 = vnez %v11134_v43 }
 0x4f2   : > { %v9319_v51 = vadd.f32 %v3830_v35, %v3721_v17  ;;  %4141 = vmatmul.f32.gmra.mxu2 %v11298_v4 }
 0x4f3   : > { %v3836_v33 = vpop.f32.mrf.mxu3 }
 0x4f4   : > { %v3539_v26 = vpop.f32.mrf.mxu0 }
 0x4f5   : > { %v3629_v62 = vpop.f32.mrf.mxu1  ;;  %v3725_v50 = vpop.f32.mrf.mxu2 }
 0x4f6   : > { %v3630_v44 = vadd.f32 %v3629_v62, %v3531_v8  ;;  %v11302_v8 = vld [vmem:[#allocation145_spill] sm:$0xff] }
 0x4f7   : > { %5489 = vmatmul.msk.f32.gmra.mxu0 %vm11109_vm3, %v10985_v42 }
 0x4f8   : > { %v3726_v56 = vadd.f32 %v3725_v50, %v3630_v44  ;;  %5504 = vmatmul.msk.f32.gmra.mxu1 %vm11260_vm15, %v10985_v42  ;;  %5521 = vmatmul.msk.f32.gmra.mxu3 %vm11299_vm13, %v10985_v42  ;;  %vm11301_vm15 = vnez %v10859_v2 }
 0x4fa   : > { %v9331_v16 = vadd.f32 %v3836_v33, %v3726_v56  ;;  %4149 = vmatmul.f32.gmra.mxu2 %v11300_v55 }
 0x4fb   : > { %v3842_v15 = vpop.f32.mrf.mxu3 }
 0x4fc   : > { %v3547_v7 = vpop.f32.mrf.mxu0 }
 0x4fd   : > { %v3633_v53 = vpop.f32.mrf.mxu1  ;;  %v3730_v49 = vpop.f32.mrf.mxu2 }
 0x4fe   : > { %v3634_v60 = vadd.f32 %v3633_v53, %v3539_v26  ;;  %v11304_v26 = vld [vmem:[#allocation159_spill] sm:$0xff] }
 0x4ff   : > { %5490 = vmatmul.msk.f32.gmra.mxu0 %vm11113_vm11, %v10985_v42 }
 0x500   : > { %v3731_v35 = vadd.f32 %v3730_v49, %v3634_v60  ;;  %5505 = vmatmul.msk.f32.gmra.mxu1 %vm11109_vm3, %v10985_v42  ;;  %5522 = vmatmul.msk.f32.gmra.mxu3 %vm11301_vm15, %v10985_v42  ;;  %vm11303_vm3 = vnez %v10861_v54 }
 0x502   : > { %v9343_v3 = vadd.f32 %v3842_v15, %v3731_v35  ;;  %4157 = vmatmul.f32.gmra.mxu2 %v11302_v8 }
 0x503   : > { %v3848_v61 = vpop.f32.mrf.mxu3 }
 0x504   : > { %v3555_v14 = vpop.f32.mrf.mxu0 }
 0x505   : > { %v3637_v13 = vpop.f32.mrf.mxu1  ;;  %v3735_v4 = vpop.f32.mrf.mxu2 }
 0x506   : > { %v3638_v17 = vadd.f32 %v3637_v13, %v3547_v7 }
 0x507   : > { %5491 = vmatmul.msk.f32.gmra.mxu0 %vm6636_vm1, %v10985_v42 }
 0x508   : > { %v3736_v33 = vadd.f32 %v3735_v4, %v3638_v17  ;;  %5506 = vmatmul.msk.f32.gmra.mxu1 %vm11113_vm11, %v10985_v42  ;;  %5523 = vmatmul.msk.f32.gmra.mxu3 %vm11303_vm3, %v10985_v42  ;;  %vm11306_vm11 = vnez %v11034_v40 }
 0x50a   : > { %v9355_v38 = vadd.f32 %v3848_v61, %v3736_v33  ;;  %4165 = vmatmul.f32.gmra.mxu2 %v11304_v26 }
 0x50b   : > { %v3854_v62 = vpop.f32.mrf.mxu3 }
 0x50c   : > { %v3878_v50 = vpop.f32.mrf.mxu0 }
 0x50d   : > { %v3641_v44 = vpop.f32.mrf.mxu1  ;;  %v3740_v55 = vpop.f32.mrf.mxu2  ;;  %v3879_v53 = vadd.f32 %v3878_v50, %v9187_v27 }
 0x50e   : > { %v3642_v56 = vadd.f32 %v3641_v44, %v3555_v14 }
 0x50f   : > { %4275 = vmatmul.f32.vlgmr.msrb.gmra.mxu0 %v11305_v0 }
 0x510   : > { %v3741_v15 = vadd.f32 %v3740_v55, %v3642_v56  ;;  %5507 = vmatmul.msk.f32.gmra.mxu1 %vm6636_vm1, %v10985_v42  ;;  %5540 = vmatmul.msk.f32.vlgmr.msrb.gmra.mxu3 %vm11306_vm11, %v10985_v42 }
 0x512   : > { %v9365_v7 = vadd.f32 %v3854_v62, %v3741_v15  ;;  %5524 = vmatmul.msk.f32.vlgmr.msrb.gmra.mxu2 %vm11306_vm11, %v10985_v42 }
 0x513   : > { %v4192_v60 = vpop.f32.mrf.mxu3 }
 0x514   : > { %v3882_v49 = vpop.f32.mrf.mxu0 }
 0x515   : > { %v3960_v35 = vpop.f32.mrf.mxu1  ;;  %v4046_v20 = vpop.f32.mrf.mxu2  ;;  %v3883_v40 = vadd.f32 %v3882_v49, %v9199_v22 }
 0x516   : > { %v3961_v8 = vadd.f32 %v3960_v35, %v3879_v53 }
 0x517   : > { %4280 = vmatmul.f32.gmra.mxu0 %v8332_v57 }
 0x518   : > { %v4047_v61 = vadd.f32 %v4046_v20, %v3961_v8  ;;  %4374 = vmatmul.f32.vlgmr.msrb.gmra.mxu1 %v8306_v25  ;;  %5541 = vmatmul.msk.f32.gmra.mxu3 %vm11273_vm12, %v10985_v42  ;;  %v11308_v20 = vld [vmem:[#allocation14_spill] sm:$0xff] }
 0x51a   : > { %v9376_v14 = vadd.f32 %v4192_v60, %v4047_v61  ;;  %5525 = vmatmul.msk.f32.gmra.mxu2 %vm11273_vm12, %v10985_v42  ;;  %v11309_v61 = vld [vmem:[#allocation68_spill] sm:$0xff] }
 0x51b   : > { %v4196_v27 = vpop.f32.mrf.mxu3 }
 0x51c   : > { %v3886_v13 = vpop.f32.mrf.mxu0 }
 0x51d   : > { %v3964_v17 = vpop.f32.mrf.mxu1  ;;  %v4054_v33 = vpop.f32.mrf.mxu2  ;;  %v3887_v29 = vadd.f32 %v3886_v13, %v9211_v6 }
 0x51e   : > { %v3965_v4 = vadd.f32 %v3964_v17, %v3883_v40 }
 0x51f   : > { %4285 = vmatmul.f32.gmra.mxu0 %v8366_v23 }
 0x520   : > { %v4055_v57 = vadd.f32 %v4054_v33, %v3965_v4  ;;  %4380 = vmatmul.f32.gmra.mxu1 %v8341_v12  ;;  %5542 = vmatmul.msk.f32.gmra.mxu3 %vm11275_vm10, %v10985_v42 }
 0x522   : > { %v9387_v25 = vadd.f32 %v4196_v27, %v4055_v57  ;;  %5526 = vmatmul.msk.f32.gmra.mxu2 %vm11275_vm10, %v10985_v42  ;;  %v11310_v57 = vld [vmem:[#allocation80_spill] sm:$0xff] }
 0x523   : > { %v4200_v22 = vpop.f32.mrf.mxu3 }
 0x524   : > { %v3890_v26 = vpop.f32.mrf.mxu0 }
 0x525   : > { %v3968_v62 = vpop.f32.mrf.mxu1  ;;  %v4062_v50 = vpop.f32.mrf.mxu2  ;;  %v3891_v34 = vadd.f32 %v3890_v26, %v9223_v47 }
 0x526   : > { %v3969_v44 = vadd.f32 %v3968_v62, %v3887_v29  ;;  %v11311_v29 = vld [vmem:[#allocation83_spill] sm:$0xff] }
 0x527   : > { %4290 = vmatmul.f32.gmra.mxu0 %v8394_v36 }
 0x528   : > { %v4063_v23 = vadd.f32 %v4062_v50, %v3969_v44  ;;  %4386 = vmatmul.f32.gmra.mxu1 %v8375_v52  ;;  %5543 = vmatmul.msk.f32.gmra.mxu3 %vm11116_vm8, %v10985_v42  ;;  %v11307_v52 = vld [vmem:[#allocation23_spill] sm:$0xff] }
 0x52a   : > { %v9398_v12 = vadd.f32 %v4200_v22, %v4063_v23  ;;  %5527 = vmatmul.msk.f32.gmra.mxu2 %vm11116_vm8, %v10985_v42  ;;  %vm11333_vm8 = vcmask 31744  }
 0x52b   : > { %v4204_v6 = vpop.f32.mrf.mxu3  ;;  %vm11335_vm12 = vmmov %vm11333_vm8 }
 0x52c   : > { %v3894_v56 = vpop.f32.mrf.mxu0  ;;  %vm11337_vm1 = vmmov %vm11333_vm8 }
 0x52d   : > { %v3972_v55 = vpop.f32.mrf.mxu1  ;;  %v4070_v0 = vpop.f32.mrf.mxu2  ;;  %v3895_v5 = vadd.f32 %v3894_v56, %v9235_v24  ;;  %vm11340_vm10 = vmmov %vm11337_vm1 }
 0x52e   : > { %v3973_v15 = vadd.f32 %v3972_v55, %v3891_v34  ;;  %v11312_v34 = vld [vmem:[#allocation66_spill] sm:$0xff] }
 0x52f   : > { %4295 = vmatmul.f32.gmra.mxu0 %v8418_v1 }
 0x530   : > { %v4071_v36 = vadd.f32 %v4070_v0, %v3973_v15  ;;  %4392 = vmatmul.f32.gmra.mxu1 %v11307_v52  ;;  %5544 = vmatmul.msk.f32.gmra.mxu3 %vm11117_vm14, %v10985_v42 }
 0x532   : > { %v9409_v53 = vadd.f32 %v4204_v6, %v4071_v36  ;;  %5528 = vmatmul.msk.f32.gmra.mxu2 %vm11117_vm14, %v10985_v42  ;;  %v11313_v6 = vld [vmem:[#allocation156_spill] sm:$0xff]  ;;  %vm11339_vm14 = vmmov %vm11337_vm1 }
 0x533   : > { %v4208_v47 = vpop.f32.mrf.mxu3 }
 0x534   : > { %v3898_v60 = vpop.f32.mrf.mxu0 }
 0x535   : > { %v3976_v49 = vpop.f32.mrf.mxu1  ;;  %v4078_v8 = vpop.f32.mrf.mxu2  ;;  %v3899_v46 = vadd.f32 %v3898_v60, %v9247_v59  ;;  %v11315_v60 = vld [vmem:[#allocation70_spill] sm:$0xff] }
 0x536   : > { %v3977_v35 = vadd.f32 %v3976_v49, %v3895_v5 }
 0x537   : > { %4300 = vmatmul.f32.gmra.mxu0 %v11308_v20 }
 0x538   : > { %v4079_v1 = vadd.f32 %v4078_v8, %v3977_v35  ;;  %4398 = vmatmul.f32.gmra.mxu1 %v11309_v61  ;;  %5545 = vmatmul.msk.f32.gmra.mxu3 %vm11061_vm6, %v10985_v42  ;;  %v11316_v61 = vld [vmem:[#allocation71_spill] sm:$0xff] }
 0x53a   : > { %v9420_v40 = vadd.f32 %v4208_v47, %v4079_v1  ;;  %5529 = vmatmul.msk.f32.gmra.mxu2 %vm11061_vm6, %v10985_v42  ;;  %v11314_v47 = vld [vmem:[#allocation67_spill] sm:$0xff]  ;;  %vm11318_vm6 = vnez %v11082_v39 }
 0x53b   : > { %v4212_v24 = vpop.f32.mrf.mxu3 }
 0x53c   : > { %v3902_v27 = vpop.f32.mrf.mxu0 }
 0x53d   : > { %v3980_v13 = vpop.f32.mrf.mxu1  ;;  %v4086_v4 = vpop.f32.mrf.mxu2  ;;  %v3903_v28 = vadd.f32 %v3902_v27, %v9259_v18 }
 0x53e   : > { %v3981_v17 = vadd.f32 %v3980_v13, %v3899_v46  ;;  %v11317_v46 = vld [vmem:[#allocation108_spill] sm:$0xff] }
 0x53f   : > { %4305 = vmatmul.f32.gmra.mxu0 %v11310_v57  ;;  %v11319_v57 = vld [vmem:[#allocation82_spill] sm:$0xff] }
 0x540   : > { %v4087_v33 = vadd.f32 %v4086_v4, %v3981_v17  ;;  %4404 = vmatmul.f32.gmra.mxu1 %v11311_v29  ;;  %5546 = vmatmul.msk.f32.gmra.mxu3 %vm11280_vm5, %v10985_v42  ;;  %v11320_v29 = vld [vmem:[#allocation85_spill] sm:$0xff] }
 0x542   : > { %v9431_v22 = vadd.f32 %v4212_v24, %v4087_v33  ;;  %5530 = vmatmul.msk.f32.gmra.mxu2 %vm11280_vm5, %v10985_v42  ;;  %vm11342_vm5 = vmmov %vm11337_vm1 }
 0x543   : > { %v4216_v59 = vpop.f32.mrf.mxu3 }
 0x544   : > { %v3906_v26 = vpop.f32.mrf.mxu0 }
 0x545   : > { %v3984_v62 = vpop.f32.mrf.mxu1  ;;  %v4094_v50 = vpop.f32.mrf.mxu2  ;;  %v3907_v11 = vadd.f32 %v3906_v26, %v9271_v9 }
 0x546   : > { %v3985_v44 = vadd.f32 %v3984_v62, %v3903_v28 }
 0x547   : > { %4310 = vmatmul.f32.gmra.mxu0 %v11312_v34  ;;  %v11322_v34 = vld [vmem:[#allocation126_spill] sm:$0xff] }
 0x548   : > { %v4095_v23 = vadd.f32 %v4094_v50, %v3985_v44  ;;  %4410 = vmatmul.f32.gmra.mxu1 %v11313_v6  ;;  %5547 = vmatmul.msk.f32.gmra.mxu3 %vm11283_vm0, %v10985_v42 }
 0x54a   : > { %v9442_v56 = vadd.f32 %v4216_v59, %v4095_v23  ;;  %5531 = vmatmul.msk.f32.gmra.mxu2 %vm11283_vm0, %v10985_v42  ;;  %v11321_v23 = vld [vmem:[#allocation98_spill] sm:$0xff]  ;;  %vm11344_vm0 = vmmov %vm11337_vm1 }
 0x54b   : > { %v4220_v18 = vpop.f32.mrf.mxu3  ;;  %vm11358_vm11 = vmmov %vm11344_vm0 }
 0x54c   : > { %v3910_v55 = vpop.f32.mrf.mxu0 }
 0x54d   : > { %v3988_v15 = vpop.f32.mrf.mxu1  ;;  %v3911_v0 = vadd.f32 %v3910_v55, %v9283_v10  ;;  %v4102_v52 = vpop.f32.mrf.mxu2 }
 0x54e   : > { %v3989_v36 = vadd.f32 %v3988_v15, %v3907_v11 }
 0x54f   : > { %4315 = vmatmul.f32.gmra.mxu0 %v11314_v47 }
 0x550   : > { %v4103_v5 = vadd.f32 %v4102_v52, %v3989_v36  ;;  %4416 = vmatmul.f32.gmra.mxu1 %v11315_v60  ;;  %5548 = vmatmul.msk.f32.gmra.mxu3 %vm11286_vm2, %v10985_v42  ;;  %v11323_v36 = vld [vmem:[#allocation99_spill] sm:$0xff]  ;;  %v11324_v52 = vld [vmem:[#allocation101_spill] sm:$0xff] }
 0x552   : > { %v9454_v30 = vadd.f32 %v4220_v18, %v4103_v5  ;;  %5532 = vmatmul.msk.f32.gmra.mxu2 %vm11286_vm2, %v10985_v42  ;;  %vm11346_vm2 = vmmov %vm11344_vm0 }
 0x553   : > { %v4224_v9 = vpop.f32.mrf.mxu3 }
 0x554   : > { %v3914_v49 = vpop.f32.mrf.mxu0 }
 0x555   : > { %v3992_v10 = vpop.f32.mrf.mxu1  ;;  %v3915_v35 = vadd.f32 %v3914_v49, %v9295_v48  ;;  %v4110_v1 = vpop.f32.mrf.mxu2 }
 0x556   : > { %v3993_v8 = vadd.f32 %v3992_v10, %v3911_v0 }
 0x557   : > { %4320 = vmatmul.f32.gmra.mxu0 %v11316_v61 }
 0x558   : > { %v4111_v20 = vadd.f32 %v4110_v1, %v3993_v8  ;;  %4422 = vmatmul.f32.gmra.mxu1 %v11317_v46  ;;  %5549 = vmatmul.msk.f32.gmra.mxu3 %vm11318_vm6, %v10985_v42  ;;  %v11326_v8 = vld [vmem:[#allocation152_spill] sm:$0xff] }
 0x55a   : > { %v9465_v24 = vadd.f32 %v4224_v9, %v4111_v20  ;;  %5533 = vmatmul.msk.f32.gmra.mxu2 %vm11318_vm6, %v10985_v42  ;;  %vm11359_vm6 = vmmov %vm11344_vm0 }
 0x55b   : > { %v4228_v31 = vpop.f32.mrf.mxu3 }
 0x55c   : > { %v3918_v27 = vpop.f32.mrf.mxu0 }
 0x55d   : > { %v3996_v48 = vpop.f32.mrf.mxu1  ;;  %v3919_v13 = vadd.f32 %v3918_v27, %v9307_v63  ;;  %v4118_v4 = vpop.f32.mrf.mxu2 }
 0x55e   : > { %v3997_v17 = vadd.f32 %v3996_v48, %v3915_v35  ;;  %v11325_v35 = vld [vmem:[#allocation115_spill] sm:$0xff]  ;;  %v11327_v48 = vld [vmem:[#allocation128_spill] sm:$0xff] }
 0x55f   : > { %4325 = vmatmul.f32.gmra.mxu0 %v11319_v57 }
 0x560   : > { %v4119_v33 = vadd.f32 %v4118_v4, %v3997_v17  ;;  %4428 = vmatmul.f32.gmra.mxu1 %v11320_v29  ;;  %5550 = vmatmul.msk.f32.gmra.mxu3 %vm11292_vm7, %v10985_v42 }
 0x562   : > { %v9476_v28 = vadd.f32 %v4228_v31, %v4119_v33  ;;  %5534 = vmatmul.msk.f32.gmra.mxu2 %vm11292_vm7, %v10985_v42  ;;  %vm11348_vm7 = vmmov %vm11344_vm0 }
 0x563   : > { %v4232_v39 = vpop.f32.mrf.mxu3 }
 0x564   : > { %v3922_v59 = vpop.f32.mrf.mxu0 }
 0x565   : > { %v4000_v63 = vpop.f32.mrf.mxu1  ;;  %v3923_v26 = vadd.f32 %v3922_v59, %v9319_v51  ;;  %v4126_v44 = vpop.f32.mrf.mxu2  ;;  %v11329_v59 = vld [vmem:[#allocation147_spill] sm:$0xff] }
 0x566   : > { %v4001_v62 = vadd.f32 %v4000_v63, %v3919_v13  ;;  %v11328_v13 = vld [vmem:[#allocation131_spill] sm:$0xff]  ;;  %v11330_v63 = vld [vmem:[#allocation146_spill] sm:$0xff] }
 0x567   : > { %4330 = vmatmul.f32.gmra.mxu0 %v11321_v23 }
 0x568   : > { %v4127_v50 = vadd.f32 %v4126_v44, %v4001_v62  ;;  %4434 = vmatmul.f32.gmra.mxu1 %v11322_v34  ;;  %5551 = vmatmul.msk.f32.gmra.mxu3 %vm11295_vm9, %v10985_v42  ;;  %v11331_v34 = vld [vmem:[#allocation158_spill] sm:$0xff] }
 0x56a   : > { %v9487_v6 = vadd.f32 %v4232_v39, %v4127_v50  ;;  %5535 = vmatmul.msk.f32.gmra.mxu2 %vm11295_vm9, %v10985_v42  ;;  %vm11350_vm9 = vmmov %vm11344_vm0 }
 0x56b   : > { %v4236_v19 = vpop.f32.mrf.mxu3 }
 0x56c   : > { %v3926_v11 = vpop.f32.mrf.mxu0 }
 0x56d   : > { %v4004_v51 = vpop.f32.mrf.mxu1  ;;  %v3927_v18 = vadd.f32 %v3926_v11, %v9331_v16  ;;  %v4134_v15 = vpop.f32.mrf.mxu2 }
 0x56e   : > { %v4005_v55 = vadd.f32 %v4004_v51, %v3923_v26 }
 0x56f   : > { %4335 = vmatmul.f32.gmra.mxu0 %v11323_v36  ;;  %v4699_v36 = vld [vmem:[#allocation7] sm:$0xff] }
 0x570   : > { %v4135_v0 = vadd.f32 %v4134_v15, %v4005_v55  ;;  %4440 = vmatmul.f32.gmra.mxu1 %v11324_v52  ;;  %5552 = vmatmul.msk.f32.gmra.mxu3 %vm11297_vm4, %v10985_v42  ;;  %v11332_v52 = vld [vmem:[#allocation16_spill] sm:$0xff] }
 0x572   : > { %v9498_v5 = vadd.f32 %v4236_v19, %v4135_v0  ;;  %5536 = vmatmul.msk.f32.gmra.mxu2 %vm11297_vm4, %v10985_v42  ;;  %vm11352_vm4 = vmmov %vm11344_vm0 }
 0x573   : > { %v4240_v45 = vpop.f32.mrf.mxu3 }
 0x574   : > { %v3930_v47 = vpop.f32.mrf.mxu0 }
 0x575   : > { %v4008_v16 = vpop.f32.mrf.mxu1  ;;  %v3931_v60 = vadd.f32 %v3930_v47, %v9343_v3  ;;  %v4142_v49 = vpop.f32.mrf.mxu2 }
 0x576   : > { %v4009_v9 = vadd.f32 %v4008_v16, %v3927_v18 }
 0x577   : > { %4340 = vmatmul.f32.gmra.mxu0 %v11325_v35  ;;  %v4700_v35 = vld [vmem:[#allocation7 + $0x8] sm:$0xff] }
 0x578   : > { %v4143_v10 = vadd.f32 %v4142_v49, %v4009_v9  ;;  %4446 = vmatmul.f32.gmra.mxu1 %v11326_v8  ;;  %5553 = vmatmul.msk.f32.gmra.mxu3 %vm11299_vm13, %v10985_v42 }
 0x57a   : > { %v9509_v1 = vadd.f32 %v4240_v45, %v4143_v10  ;;  %5537 = vmatmul.msk.f32.gmra.mxu2 %vm11299_vm13, %v10985_v42  ;;  %v4715_v45 = vmul.f32 %v11332_v52, %v4699_v36  ;;  %v4703_v36 = vld [vmem:[#allocation7 + $0x20] sm:$0xff]  ;;  %vm11354_vm13 = vmmov %vm11344_vm0 }
 0x57b   : > { %v4244_v37 = vpop.f32.mrf.mxu3  ;;  %v4719_v52 = vmul.f32 %v9021_v41, %v4703_v36 }
 0x57c   : > { %v3934_v20 = vpop.f32.mrf.mxu0 }
 0x57d   : > { %v4012_v3 = vpop.f32.mrf.mxu1  ;;  %v3935_v61 = vadd.f32 %v3934_v20, %v9355_v38  ;;  %v4150_v31 = vpop.f32.mrf.mxu2  ;;  %v11334_v20 = vld [vmem:[#allocation20_spill] sm:$0xff] }
 0x57e   : > { %v4013_v46 = vadd.f32 %v4012_v3, %v3931_v60  ;;  %v4716_v3 = vmul.f32 %v11334_v20, %v4700_v35 }
 0x57f   : > { %4345 = vmatmul.f32.gmra.mxu0 %v11327_v48 }
 0x580   : > { %v4151_v27 = vadd.f32 %v4150_v31, %v4013_v46  ;;  %4452 = vmatmul.f32.gmra.mxu1 %v11328_v13  ;;  %5554 = vmatmul.msk.f32.gmra.mxu3 %vm11301_vm15, %v10985_v42 }
 0x582   : > { %v9520_v17 = vadd.f32 %v4244_v37, %v4151_v27  ;;  %5538 = vmatmul.msk.f32.gmra.mxu2 %vm11301_vm15, %v10985_v42  ;;  %vm11356_vm15 = vmmov %vm11344_vm0 }
 0x583   : > { %v4248_v43 = vpop.f32.mrf.mxu3 }
 0x584   : > { %v3938_v4 = vpop.f32.mrf.mxu0 }
 0x585   : > { %v4016_v38 = vpop.f32.mrf.mxu1  ;;  %v3939_v33 = vadd.f32 %v3938_v4, %v9365_v7  ;;  %v4158_v29 = vpop.f32.mrf.mxu2 }
 0x586   : > { %v4017_v57 = vadd.f32 %v4016_v38, %v3935_v61 }
 0x587   : > { %4350 = vmatmul.f32.gmra.mxu0 %v11329_v59 }
 0x588   : > { %v4159_v39 = vadd.f32 %v4158_v29, %v4017_v57  ;;  %4458 = vmatmul.f32.gmra.mxu1 %v11330_v63  ;;  %5555 = vmatmul.msk.f32.gmra.mxu3 %vm11303_vm3, %v10985_v42 }
 0x58a   : > { %v9531_v26 = vadd.f32 %v4248_v43, %v4159_v39  ;;  %5539 = vmatmul.msk.f32.gmra.mxu2 %vm11303_vm3, %v10985_v42  ;;  %v4701_v43 = vld [vmem:[#allocation7 + $0x10] sm:$0xff]  ;;  %vm11357_vm3 = vmmov %vm11344_vm0 }
 0x58b   : > { %v4252_v2 = vpop.f32.mrf.mxu3 }
 0x58c   : > { %v4276_v7 = vpop.f32.mrf.mxu0 }
 0x58d   : > { %v4020_v62 = vpop.f32.mrf.mxu1  ;;  %v4166_v50 = vpop.f32.mrf.mxu2  ;;  %v4277_v11 = vadd.f32 %v4276_v7, %v9376_v14  ;;  %v4702_v7 = vld [vmem:[#allocation7 + $0x18] sm:$0xff] }
 0x58e   : > { %v4021_v44 = vadd.f32 %v4020_v62, %v3939_v33  ;;  %v11336_v33 = vld [vmem:[#allocation18_spill] sm:$0xff] }
 0x58f   : > { %v4717_v57 = vmul.f32 %v11336_v33, %v4701_v43 }
 0x590   : > { %v4167_v23 = vadd.f32 %v4166_v50, %v4021_v44  ;;  %4464 = vmatmul.f32.gmra.mxu1 %v11331_v34 }
 0x592   : > { %v9537_v19 = vadd.f32 %v4252_v2, %v4167_v23  ;;  %v11338_v23 = vld [vmem:[#allocation22_spill] sm:$0xff] }
 0x593   : > { %v4571_v51 = vpop.f32.mrf.mxu3  ;;  %v4718_v34 = vmul.f32 %v11338_v23, %v4702_v7 }
 0x594   : > { %v4281_v18 = vpop.f32.mrf.mxu0 }
 0x595   : > { %v4375_v55 = vpop.f32.mrf.mxu1  ;;  %v4489_v0 = vpop.f32.mrf.mxu2  ;;  %v4282_v47 = vadd.f32 %v4281_v18, %v9387_v25 }
 0x596   : > { %v4376_v15 = vadd.f32 %v4375_v55, %v4277_v11 }
 0x598   : > { %v4490_v54 = vadd.f32 %v4489_v0, %v4376_v15 }
 0x59a   : > { %v4572_v42 = vadd.f32 %v4571_v51, %v4490_v54 }
 0x59b   : > { %v4575_v60 = vpop.f32.mrf.mxu3 }
 0x59c   : > { %v4731_v16 = vadd.f32 %v4715_v45, %v4572_v42  ;;  %v4286_v9 = vpop.f32.mrf.mxu0 }
 0x59d   : > { %v4381_v49 = vpop.f32.mrf.mxu1  ;;  %v4493_v14 = vpop.f32.mrf.mxu2  ;;  %v4287_v61 = vadd.f32 %v4286_v9, %v9398_v12 }
 0x59e   : > { %4747 = vst.msk [vmem:[#allocation7] sm:$0xff] %vm11333_vm8, %v4731_v16  ;;  %v4382_v10 = vadd.f32 %v4381_v49, %v4282_v47 }
 0x5a0   : > { %v4494_v8 = vadd.f32 %v4493_v14, %v4382_v10  ;;  %v4704_v10 = vld [vmem:[#allocation7 + $0x28] sm:$0xff] }
 0x5a2   : > { %v4576_v37 = vadd.f32 %v4575_v60, %v4494_v8  ;;  %v11341_v8 = vld [vmem:[#allocation28_spill] sm:$0xff] }
 0x5a3   : > { %v4579_v31 = vpop.f32.mrf.mxu3 }
 0x5a4   : > { %v4732_v46 = vadd.f32 %v4716_v3, %v4576_v37  ;;  %v4291_v27 = vpop.f32.mrf.mxu0  ;;  %v4720_v37 = vmul.f32 %v11341_v8, %v4704_v10 }
 0x5a5   : > { %v4387_v48 = vpop.f32.mrf.mxu1  ;;  %v4497_v13 = vpop.f32.mrf.mxu2  ;;  %v4292_v29 = vadd.f32 %v4291_v27, %v9409_v53  ;;  %v4705_v27 = vld [vmem:[#allocation7 + $0x30] sm:$0xff] }
 0x5a6   : > { %4748 = vst.msk [vmem:[#allocation7 + $0x8] sm:$0xff] %vm11335_vm12, %v4732_v46  ;;  %v4388_v25 = vadd.f32 %v4387_v48, %v4287_v61 }
 0x5a8   : > { %v4498_v4 = vadd.f32 %v4497_v13, %v4388_v25  ;;  %v11343_v13 = vld [vmem:[#allocation26_spill] sm:$0xff] }
 0x5a9   : > { %v4721_v43 = vmul.f32 %v11343_v13, %v4705_v27 }
 0x5aa   : > { %v4580_v38 = vadd.f32 %v4579_v31, %v4498_v4 }
 0x5ab   : > { %v4583_v59 = vpop.f32.mrf.mxu3 }
 0x5ac   : > { %v4733_v39 = vadd.f32 %v4717_v57, %v4580_v38  ;;  %v4296_v63 = vpop.f32.mrf.mxu0 }
 0x5ad   : > { %v4393_v2 = vpop.f32.mrf.mxu1  ;;  %v4501_v62 = vpop.f32.mrf.mxu2  ;;  %v4297_v11 = vadd.f32 %v4296_v63, %v9420_v40 }
 0x5ae   : > { %4749 = vst.msk [vmem:[#allocation7 + $0x10] sm:$0xff] %vm11337_vm1, %v4733_v39  ;;  %v4394_v12 = vadd.f32 %v4393_v2, %v4292_v29 }
 0x5b0   : > { %v4502_v44 = vadd.f32 %v4501_v62, %v4394_v12  ;;  %v11345_v12 = vld [vmem:[#allocation34_spill] sm:$0xff] }
 0x5b2   : > { %v4584_v50 = vadd.f32 %v4583_v59, %v4502_v44  ;;  %v4706_v59 = vld [vmem:[#allocation7 + $0x38] sm:$0xff] }
 0x5b3   : > { %v4587_v18 = vpop.f32.mrf.mxu3  ;;  %v4722_v62 = vmul.f32 %v11345_v12, %v4706_v59  ;;  %v4711_v12 = vld [vmem:[#allocation7 + $0x60] sm:$0xff] }
 0x5b4   : > { %v4734_v51 = vadd.f32 %v4718_v34, %v4584_v50  ;;  %v4301_v55 = vpop.f32.mrf.mxu0 }
 0x5b5   : > { %v4399_v15 = vpop.f32.mrf.mxu1  ;;  %v4505_v0 = vpop.f32.mrf.mxu2  ;;  %v4302_v45 = vadd.f32 %v4301_v55, %v9431_v22 }
 0x5b6   : > { %4750 = vst.msk [vmem:[#allocation7 + $0x18] sm:$0xff] %vm11339_vm14, %v4734_v51  ;;  %v4400_v53 = vadd.f32 %v4399_v15, %v4297_v11  ;;  %v4707_v51 = vld [vmem:[#allocation7 + $0x40] sm:$0xff] }
 0x5b7   : > { %v11347_v15 = vld [vmem:[#allocation36_spill] sm:$0xff] }
 0x5b8   : > { %v4506_v54 = vadd.f32 %v4505_v0, %v4400_v53  ;;  %v4723_v53 = vmul.f32 %v11347_v15, %v4707_v51 }
 0x5ba   : > { %v4588_v42 = vadd.f32 %v4587_v18, %v4506_v54 }
 0x5bb   : > { %v4591_v16 = vpop.f32.mrf.mxu3 }
 0x5bc   : > { %v4735_v47 = vadd.f32 %v4719_v52, %v4588_v42  ;;  %v4306_v60 = vpop.f32.mrf.mxu0 }
 0x5bd   : > { %v4405_v9 = vpop.f32.mrf.mxu1  ;;  %v4509_v49 = vpop.f32.mrf.mxu2  ;;  %v4307_v20 = vadd.f32 %v4306_v60, %v9442_v56 }
 0x5be   : > { %4751 = vst.msk [vmem:[#allocation7 + $0x20] sm:$0xff] %vm11340_vm10, %v4735_v47  ;;  %v4406_v40 = vadd.f32 %v4405_v9, %v4302_v45  ;;  %v4708_v47 = vld [vmem:[#allocation7 + $0x48] sm:$0xff]  ;;  %v11349_v9 = vld [vmem:[#allocation40_spill] sm:$0xff] }
 0x5c0   : > { %v4510_v14 = vadd.f32 %v4509_v49, %v4406_v40  ;;  %v4724_v40 = vmul.f32 %v11349_v9, %v4708_v47 }
 0x5c2   : > { %v4592_v35 = vadd.f32 %v4591_v16, %v4510_v14 }
 0x5c3   : > { %v4595_v61 = vpop.f32.mrf.mxu3 }
 0x5c4   : > { %v4736_v3 = vadd.f32 %v4720_v37, %v4592_v35  ;;  %v4311_v41 = vpop.f32.mrf.mxu0 }
 0x5c5   : > { %v4411_v46 = vpop.f32.mrf.mxu1  ;;  %v4513_v31 = vpop.f32.mrf.mxu2  ;;  %v4312_v4 = vadd.f32 %v4311_v41, %v9454_v30  ;;  %v11351_v41 = vld [vmem:[#allocation30_spill] sm:$0xff] }
 0x5c6   : > { %4752 = vst.msk [vmem:[#allocation7 + $0x28] sm:$0xff] %vm11342_vm5, %v4736_v3  ;;  %v4412_v22 = vadd.f32 %v4411_v46, %v4307_v20  ;;  %v4709_v20 = vld [vmem:[#allocation7 + $0x50] sm:$0xff] }
 0x5c7   : > { %v4725_v46 = vmul.f32 %v11351_v41, %v4709_v20 }
 0x5c8   : > { %v4514_v48 = vadd.f32 %v4513_v31, %v4412_v22 }
 0x5ca   : > { %v4596_v25 = vadd.f32 %v4595_v61, %v4514_v48 }
 0x5cb   : > { %v4599_v33 = vpop.f32.mrf.mxu3 }
 0x5cc   : > { %v4737_v38 = vadd.f32 %v4721_v43, %v4596_v25  ;;  %v4316_v57 = vpop.f32.mrf.mxu0  ;;  %v4710_v43 = vld [vmem:[#allocation7 + $0x58] sm:$0xff] }
 0x5cd   : > { %v4417_v29 = vpop.f32.mrf.mxu1  ;;  %v4517_v39 = vpop.f32.mrf.mxu2  ;;  %v4317_v7 = vadd.f32 %v4316_v57, %v9465_v24 }
 0x5ce   : > { %4753 = vst.msk [vmem:[#allocation7 + $0x30] sm:$0xff] %vm11344_vm0, %v4737_v38  ;;  %v4418_v56 = vadd.f32 %v4417_v29, %v4312_v4 }
 0x5d0   : > { %v4518_v63 = vadd.f32 %v4517_v39, %v4418_v56 }
 0x5d2   : > { %v4600_v2 = vadd.f32 %v4599_v33, %v4518_v63  ;;  %v11353_v33 = vld [vmem:[#allocation32_spill] sm:$0xff] }
 0x5d3   : > { %v4603_v50 = vpop.f32.mrf.mxu3  ;;  %v4726_v57 = vmul.f32 %v11353_v33, %v4710_v43 }
 0x5d4   : > { %v4738_v44 = vadd.f32 %v4722_v62, %v4600_v2  ;;  %v4321_v23 = vpop.f32.mrf.mxu0 }
 0x5d5   : > { %v4423_v34 = vpop.f32.mrf.mxu1  ;;  %v4521_v11 = vpop.f32.mrf.mxu2  ;;  %v4322_v0 = vadd.f32 %v4321_v23, %v9476_v28 }
 0x5d6   : > { %4754 = vst.msk [vmem:[#allocation7 + $0x38] sm:$0xff] %vm11346_vm2, %v4738_v44  ;;  %v4424_v30 = vadd.f32 %v4423_v34, %v4317_v7  ;;  %v11355_v44 = vld [vmem:[#allocation46_spill] sm:$0xff] }
 0x5d8   : > { %v4522_v18 = vadd.f32 %v4521_v11, %v4424_v30 }
 0x5da   : > { %v4604_v55 = vadd.f32 %v4603_v50, %v4522_v18  ;;  %v4727_v50 = vmul.f32 %v11355_v44, %v4711_v12 }
 0x5db   : > { %v4607_v54 = vpop.f32.mrf.mxu3 }
 0x5dc   : > { %v4739_v36 = vadd.f32 %v4723_v53, %v4604_v55  ;;  %v4326_v42 = vpop.f32.mrf.mxu0  ;;  %v4712_v55 = vld [vmem:[#allocation7 + $0x68] sm:$0xff] }
 0x5dd   : > { %v4429_v52 = vpop.f32.mrf.mxu1  ;;  %v4525_v45 = vpop.f32.mrf.mxu2  ;;  %v4327_v49 = vadd.f32 %v4326_v42, %v9487_v6 }
 0x5de   : > { %4755 = vst.msk [vmem:[#allocation7 + $0x40] sm:$0xff] %vm11348_vm7, %v4739_v36  ;;  %v4430_v24 = vadd.f32 %v4429_v52, %v4322_v0  ;;  %v4728_v0 = vmul.f32 %v9140_v21, %v4712_v55 }
 0x5e0   : > { %v4526_v16 = vadd.f32 %v4525_v45, %v4430_v24  ;;  %v4713_v45 = vld [vmem:[#allocation7 + $0x70] sm:$0xff] }
 0x5e1   : > { %v4729_v9 = vmul.f32 %v9153_v32, %v4713_v45 }
 0x5e2   : > { %v4608_v60 = vadd.f32 %v4607_v54, %v4526_v16 }
 0x5e3   : > { %v4611_v14 = vpop.f32.mrf.mxu3 }
 0x5e4   : > { %v4740_v10 = vadd.f32 %v4724_v40, %v4608_v60  ;;  %v4331_v35 = vpop.f32.mrf.mxu0 }
 0x5e5   : > { %v4435_v8 = vpop.f32.mrf.mxu1  ;;  %v4529_v37 = vpop.f32.mrf.mxu2  ;;  %v4332_v22 = vadd.f32 %v4331_v35, %v9498_v5  ;;  %v4714_v35 = vld [vmem:[#allocation7 + $0x78] sm:$0xff] }
 0x5e6   : > { %4756 = vst.msk [vmem:[#allocation7 + $0x48] sm:$0xff] %vm11350_vm9, %v4740_v10  ;;  %v4436_v28 = vadd.f32 %v4435_v8, %v4327_v49 }
 0x5e8   : > { %v4530_v3 = vadd.f32 %v4529_v37, %v4436_v28  ;;  %v4730_v37 = vmul.f32 %v9164_v58, %v4714_v35 }
 0x5ea   : > { %v4612_v61 = vadd.f32 %v4611_v14, %v4530_v3 }
 0x5eb   : > { %v4615_v27 = vpop.f32.mrf.mxu3 }
 0x5ec   : > { %v4741_v31 = vadd.f32 %v4725_v46, %v4612_v61  ;;  %v4336_v48 = vpop.f32.mrf.mxu0 }
 0x5ed   : > { %v4441_v25 = vpop.f32.mrf.mxu1  ;;  %v4533_v13 = vpop.f32.mrf.mxu2  ;;  %v4337_v29 = vadd.f32 %v4336_v48, %v9509_v1 }
 0x5ee   : > { %4757 = vst.msk [vmem:[#allocation7 + $0x50] sm:$0xff] %vm11352_vm4, %v4741_v31  ;;  %v4442_v6 = vadd.f32 %v4441_v25, %v4332_v22 }
 0x5f0   : > { %v4534_v4 = vadd.f32 %v4533_v13, %v4442_v6 }
 0x5f2   : > { %v4616_v38 = vadd.f32 %v4615_v27, %v4534_v4 }
 0x5f3   : > { %v4619_v39 = vpop.f32.mrf.mxu3 }
 0x5f4   : > { %v4742_v56 = vadd.f32 %v4726_v57, %v4616_v38  ;;  %v4341_v59 = vpop.f32.mrf.mxu0 }
 0x5f5   : > { %v4447_v63 = vpop.f32.mrf.mxu1  ;;  %v4537_v2 = vpop.f32.mrf.mxu2  ;;  %v4342_v23 = vadd.f32 %v4341_v59, %v9520_v17 }
 0x5f6   : > { %4758 = vst.msk [vmem:[#allocation7 + $0x58] sm:$0xff] %vm11354_vm13, %v4742_v56  ;;  %v4448_v5 = vadd.f32 %v4447_v63, %v4337_v29 }
 0x5f8   : > { %v4538_v62 = vadd.f32 %v4537_v2, %v4448_v5 }
 0x5fa   : > { %v4620_v7 = vadd.f32 %v4619_v39, %v4538_v62 }
 0x5fb   : > { %v4623_v30 = vpop.f32.mrf.mxu3 }
 0x5fc   : > { %v4743_v34 = vadd.f32 %v4727_v50, %v4620_v7  ;;  %v4346_v18 = vpop.f32.mrf.mxu0 }
 0x5fd   : > { %v4453_v11 = vpop.f32.mrf.mxu1  ;;  %v4541_v51 = vpop.f32.mrf.mxu2  ;;  %v4347_v36 = vadd.f32 %v4346_v18, %v9531_v26 }
 0x5fe   : > { %4759 = vst.msk [vmem:[#allocation7 + $0x60] sm:$0xff] %vm11356_vm15, %v4743_v34  ;;  %v4454_v1 = vadd.f32 %v4453_v11, %v4342_v23 }
 0x600   : > { %v4542_v15 = vadd.f32 %v4541_v51, %v4454_v1 }
 0x602   : > { %v4624_v53 = vadd.f32 %v4623_v30, %v4542_v15 }
 0x603   : > { %v4627_v52 = vpop.f32.mrf.mxu3 }
 0x604   : > { %v4744_v54 = vadd.f32 %v4728_v0, %v4624_v53  ;;  %v4351_v16 = vpop.f32.mrf.mxu0 }
 0x605   : > { %v4459_v42 = vpop.f32.mrf.mxu1  ;;  %v4545_v24 = vpop.f32.mrf.mxu2  ;;  %v4352_v40 = vadd.f32 %v4351_v16, %v9537_v19 }
 0x606   : > { %4760 = vst.msk [vmem:[#allocation7 + $0x68] sm:$0xff] %vm11357_vm3, %v4744_v54  ;;  %v4460_v17 = vadd.f32 %v4459_v42, %v4347_v36 }
 0x608   : > { %v4546_v47 = vadd.f32 %v4545_v24, %v4460_v17 }
 0x60a   : > { %v4628_v60 = vadd.f32 %v4627_v52, %v4546_v47 }
 0x60b   : > { %v4631_v14 = vpop.f32.mrf.mxu3 }
 0x60c   : > { %v4745_v49 = vadd.f32 %v4729_v9, %v4628_v60 }
 0x60d   : > { %v4465_v10 = vpop.f32.mrf.mxu1  ;;  %v4549_v26 = vpop.f32.mrf.mxu2 }
 0x60e   : > { %4761 = vst.msk [vmem:[#allocation7 + $0x70] sm:$0xff] %vm11358_vm11, %v4745_v49  ;;  %v4466_v21 = vadd.f32 %v4465_v10, %v4352_v40 }
 0x610   : > { %v4550_v8 = vadd.f32 %v4549_v26, %v4466_v21 }
 0x612   : > { %v4632_v28 = vadd.f32 %v4631_v14, %v4550_v8  ;;  %4766 = sbr.rel (%p5556_p10) target bundleno = 1806 (0x70e), region = 44 }
 0x614   : > { %v4746_v20 = vadd.f32 %v4730_v37, %v4632_v28 }
 0x616   : > { %4762 = vst.msk [vmem:[#allocation7 + $0x78] sm:$0xff] %vm11359_vm6, %v4746_v20 }
 0x617   : > { %v4771_v32 = vld [vmem:[#allocation6 + $0x20] sm:$0xff]  ;;  %v4769_v19 = vld [vmem:[#allocation6 + $0x10] sm:$0xff]  ;;  %v4772_v46 = vld [vmem:[#allocation6 + $0x28] sm:$0xff]  ;;  %v5739_v22 = vmov 0.0  }
 0x618   : > { %vm4787_vm8 = vcmp.gt.f32.partialorder %v4771_v32, 0.0  ;;  %vm4785_vm12 = vcmp.gt.f32.partialorder %v4769_v19, 0.0  ;;  %v4767_v3 = vld [vmem:[#allocation6] sm:$0xff]  ;;  %v11360_v58 = vld [vmem:[#allocation90_spill] sm:$0xff]  ;;  %v4770_v25 = vld [vmem:[#allocation6 + $0x18] sm:$0xff]  ;;  %vm4788_vm10 = vcmp.gt.f32.partialorder %v4772_v46, 0.0 }
 0x619   : > { %v4803_v61 = vsel %vm4787_vm8, %v4771_v32, 1.0  ;;  %v9588_v41 = vsel %vm4785_vm12, %v4769_v19, 1.0  ;;  %vm4783_vm1 = vcmp.gt.f32.partialorder %v4767_v3, 0.0  ;;  %vm11361_vm14 = vcmp.eq.s32.totalorder %v11360_v58, 1  ;;  %v4768_v38 = vld [vmem:[#allocation6 + $0x8] sm:$0xff]  ;;  %v4775_v36 = vld [vmem:[#allocation6 + $0x40] sm:$0xff] }
 0x61a   : > { %5646 = vrcp.f32 %v4803_v61  ;;  %v5071_v31 = vsel %vm11361_vm14, -1.0, %v5739_v22  ;;  %v4900_v27 = vand.u32 2147483647, %v4803_v61  ;;  %v4902_v48 = vand.u32 2147483648, %v4803_v61  ;;  %v4819_v10 = vld [vmem:[#allocation7 + $0x20] sm:$0xff]  ;;  %v4817_v28 = vld [vmem:[#allocation7 + $0x10] sm:$0xff] }
 0x61b   : > { %5648 = vrcp.f32 %v9588_v41  ;;  %v4870_v6 = vand.u32 2147483647, %v9588_v41  ;;  %v4872_v13 = vand.u32 2147483648, %v9588_v41  ;;  %v9596_v43 = vsel %vm4783_vm1, %v4767_v3, 1.0  ;;  %v4820_v56 = vld [vmem:[#allocation7 + $0x28] sm:$0xff] }
 0x61c   : > { %vm4896_vm5 = vweird.f32 %v4803_v61  ;;  %vm11362_vm0 = vcmp.eq.s32.totalorder %v11360_v58, 0  ;;  %vm4866_vm2 = vweird.f32 %v9588_v41  ;;  %5650 = vrcp.f32 %v9596_v43 }
 0x61d   : > { %v9600_v4 = vsel %vm11362_vm0, 1.0, %v5071_v31  ;;  %v4840_v33 = vand.u32 2147483647, %v9596_v43  ;;  %v4842_v57 = vand.u32 2147483648, %v9596_v43  ;;  %v9606_v29 = vsel %vm4788_vm10, %v4772_v46, 1.0 }
 0x61e   : > { %vm4786_vm7 = vcmp.gt.f32.partialorder %v4770_v25, 0.0  ;;  %vm9608_vm9 = vcmp.eq.f32.partialorder %v4900_v27, 8.507059e+37  ;;  %v4903_v39 = vor.u32 1.1754944e-38, %v4902_v48  ;;  %5652 = vrcp.f32 %v9606_v29  ;;  %v4815_v48 = vld [vmem:[#allocation7] sm:$0xff] }
 0x61f   : > { %v4917_v59 = vand.u32 2147483648, %v9606_v29  ;;  %vm9614_vm4 = vcmp.eq.f32.partialorder %v4870_v6, 8.507059e+37  ;;  %v4873_v2 = vor.u32 1.1754944e-38, %v4872_v13  ;;  %v4915_v12 = vand.u32 2147483647, %v9606_v29 }
 0x620   : > { %v5647_v63 = vpop.eup %5646  ;;  %v9619_v62 = vsel %vm4786_vm7, %v4770_v25, 1.0  ;;  %vm4784_vm13 = vcmp.gt.f32.partialorder %v4768_v38, 0.0  ;;  %vm4836_vm15 = vweird.f32 %v9596_v43  ;;  %v9622_v50 = vor.u32 1.1754944e-38, %v4842_v57 }
 0x621   : > { %v5649_v7 = vpop.eup %5648  ;;  %v4892_v44 = vmul.f32 %v5647_v63, %v4803_v61  ;;  %vm4911_vm3 = vweird.f32 %v9606_v29  ;;  %vm4897_vm11 = vweird.f32 %v5647_v63  ;;  %vm9626_vm6 = vcmp.eq.f32.partialorder %v4840_v33, 8.507059e+37 }
 0x622   : > { %v4862_v23 = vmul.f32 %v5649_v7, %v9588_v41  ;;  %v9630_v30 = vor.u32 1.1754944e-38, %v4917_v59  ;;  %5654 = vrcp.f32 %v9619_v62  ;;  %v5651_v11 = vpop.eup %5650  ;;  %v4885_v51 = vand.u32 2147483647, %v9619_v62  ;;  %vm9648_vm10 = vmor %vm4896_vm5, %vm4897_vm11 }
 0x623   : > { %v4893_v1 = vsub.f32 1.0, %v4892_v44  ;;  %v4887_v18 = vand.u32 2147483648, %v9619_v62  ;;  %v9635_v55 = vsel %vm4784_vm13, %v4768_v38, 1.0  ;;  %vm4867_vm8 = vweird.f32 %v5649_v7 }
 0x624   : > { %v4863_v15 = vsub.f32 1.0, %v4862_v23  ;;  %v4832_v53 = vmul.f32 %v5651_v11, %v9596_v43  ;;  %vm9638_vm12 = vcmp.eq.f32.partialorder %v4915_v12, 8.507059e+37  ;;  %5656 = vrcp.f32 %v9635_v55  ;;  %v5653_v54 = vpop.eup %5652  ;;  %vm9657_vm7 = vmor %vm4866_vm2, %vm4867_vm8 }
 0x625   : > { %v4894_v42 = vmul.f32 %v5647_v63, %v4893_v1  ;;  %vm4837_vm1 = vweird.f32 %v5651_v11  ;;  %v9644_v52 = vor.u32 1.1754944e-38, %v4887_v18  ;;  %v4907_v47 = vmul.f32 %v5653_v54, %v9606_v29 }
 0x626   : > { %v4864_v24 = vmul.f32 %v5649_v7, %v4863_v15  ;;  %v4833_v45 = vsub.f32 1.0, %v4832_v53  ;;  %vm4851_vm0 = vweird.f32 %v9635_v55  ;;  %vm4912_vm13 = vweird.f32 %v5653_v54  ;;  %vm9672_vm2 = vmor %vm4836_vm15, %vm4837_vm1 }
 0x627   : > { %v4895_v16 = vadd.f32 %v5647_v63, %v4894_v42  ;;  %vm9661_vm14 = vcmp.eq.f32.partialorder %v4885_v51, 8.507059e+37  ;;  %v4855_v40 = vand.u32 2147483647, %v9635_v55  ;;  %vm4791_vm5 = vcmp.gt.f32.partialorder %v4775_v36, 0.0  ;;  %vm9690_vm15 = vmor %vm4911_vm3, %vm4912_vm13  ;;  %v4818_v51 = vld [vmem:[#allocation7 + $0x18] sm:$0xff] }
 0x628   : > { %v5655_v49 = vpop.eup %5654  ;;  %v4865_v21 = vadd.f32 %v5649_v7, %v4864_v24  ;;  %v4834_v26 = vmul.f32 %v5651_v11, %v4833_v45  ;;  %v4908_v14 = vsub.f32 1.0, %v4907_v47  ;;  %v4857_v35 = vand.u32 2147483648, %v9635_v55  ;;  %v4773_v45 = vld [vmem:[#allocation6 + $0x30] sm:$0xff]  ;;  %v4778_v47 = vld [vmem:[#allocation6 + $0x58] sm:$0xff] }
 0x629   : > { %v4899_v8 = vsel %vm9648_vm10, %v5647_v63, %v4895_v16  ;;  %v4877_v20 = vmul.f32 %v5655_v49, %v9619_v62  ;;  %vm4882_vm11 = vweird.f32 %v5655_v49  ;;  %v9677_v32 = vsel %vm4791_vm5, %v4775_v36, 1.0 }
 0x62a   : > { %v5657_v19 = vpop.eup %5656  ;;  %v4904_v3 = vsel %vm9608_vm9, %v4903_v39, %v4899_v8  ;;  %v4869_v61 = vsel %vm9657_vm7, %v5649_v7, %v4865_v21  ;;  %v4835_v41 = vadd.f32 %v5651_v11, %v4834_v26  ;;  %v4909_v46 = vmul.f32 %v5653_v54, %v4908_v14 }
 0x62b   : > { %v9683_v31 = vmul.f32 %v4904_v3, %v4819_v10  ;;  %v4874_v27 = vsel %vm9614_vm4, %v4873_v2, %v4869_v61  ;;  %v4878_v6 = vsub.f32 1.0, %v4877_v20  ;;  %v4847_v13 = vmul.f32 %v5657_v19, %v9635_v55 }
 0x62c   : > { %v9695_v43 = vmul.f32 %v4874_v27, %v4817_v28  ;;  %v4839_v38 = vsel %vm9672_vm2, %v5651_v11, %v4835_v41  ;;  %v4910_v33 = vadd.f32 %v5653_v54, %v4909_v46  ;;  %vm4852_vm9 = vweird.f32 %v5657_v19 }
 0x62d   : > { %v5080_v57 = vmul.f32 %v9600_v4, %v9683_v31  ;;  %v4844_v29 = vsel %vm9626_vm6, %v9622_v50, %v4839_v38  ;;  %v4879_v39 = vmul.f32 %v5655_v49, %v4878_v6  ;;  %v4848_v59 = vsub.f32 1.0, %v4847_v13  ;;  %vm9729_vm1 = vmor %vm4851_vm0, %vm4852_vm9 }
 0x62e   : > { %v5078_v63 = vmul.f32 %v9600_v4, %v9695_v43  ;;  %v9706_v5 = vmul.f32 %v4844_v29, %v4815_v48  ;;  %v4914_v2 = vsel %vm9690_vm15, %v5653_v54, %v4910_v33  ;;  %vm11381_vm4 = vweird.f32 %v9619_v62  ;;  %v4816_v54 = vld [vmem:[#allocation7 + $0x8] sm:$0xff] }
 0x62f   : > { %vm9713_vm3 = vmor %vm11381_vm4, %vm4882_vm11  ;;  %v4858_v7 = vor.u32 1.1754944e-38, %v4857_v35  ;;  %vm11384_vm6 = vcmask 31744   ;;  %v4919_v50 = vsel %vm9638_vm12, %v9630_v30, %v4914_v2  ;;  %v4880_v23 = vadd.f32 %v5655_v49, %v4879_v39  ;;  %v4774_v30 = vld [vmem:[#allocation6 + $0x38] sm:$0xff] }
 0x630   : > { %v5104_v44 = vsel %vm11384_vm6, %v5080_v57, 0.0  ;;  %v4849_v34 = vmul.f32 %v5657_v19, %v4848_v59  ;;  %vm11385_vm8 = vmmov %vm11384_vm6  ;;  %v5076_v1 = vmul.f32 %v9600_v4, %v9706_v5  ;;  %v9724_v62 = vmul.f32 %v4919_v50, %v4820_v56  ;;  %v4776_v56 = vld [vmem:[#allocation6 + $0x48] sm:$0xff]  ;;  %v4825_v50 = vld [vmem:[#allocation7 + $0x50] sm:$0xff] }
 0x631   : > { %5105 = vadd.xlane.f32.xlu2 %v5104_v44  ;;  %v5098_v11 = vsel %vm11385_vm8, %v5078_v63, 0.0  ;;  %5658 = vrcp.f32 %v9677_v32  ;;  %v4884_v15 = vsel %vm9713_vm3, %v5655_v49, %v4880_v23  ;;  %vm4856_vm12 = vcmp.eq.f32.partialorder %v4855_v40, 8.507059e+37  ;;  %vm11388_vm10 = vmmov %vm11384_vm6 }
 0x632   : > { %5099 = vadd.xlane.f32.xlu1 %v5098_v11  ;;  %v4850_v53 = vadd.f32 %v5657_v19, %v4849_v34  ;;  %v5092_v0 = vsel %vm11388_vm10, %v5076_v1, 0.0  ;;  %v5081_v36 = vmul.f32 %v9600_v4, %v9724_v62  ;;  %v4889_v55 = vsel %vm9661_vm14, %v9644_v52, %v4884_v15  ;;  %vm11389_vm7 = vmmov %vm11384_vm6 }
 0x633   : > { %5093 = vadd.xlane.f32.xlu0 %v5092_v0  ;;  %v9742_v42 = vmul.f32 %v4889_v55, %v4818_v51  ;;  %v4960_v24 = vand.u32 2147483647, %v9677_v32  ;;  %vm4790_vm0 = vcmp.gt.f32.partialorder %v4774_v30, 0.0  ;;  %vm4956_vm14 = vweird.f32 %v9677_v32  ;;  %vm11390_vm2 = vmmov %vm11384_vm6  ;;  %v4781_v0 = vld [vmem:[#allocation6 + $0x70] sm:$0xff] }
 0x634   : > { %v4854_v17 = vsel %vm9729_vm1, %v5657_v19, %v4850_v53  ;;  %v4806_v60 = vsel %vm4790_vm0, %v4774_v30, 1.0  ;;  %v5107_v40 = vsel %vm11389_vm7, %v5081_v36, 0.0  ;;  %v4962_v10 = vand.u32 2147483648, %v9677_v32  ;;  %v4777_v19 = vld [vmem:[#allocation6 + $0x50] sm:$0xff]  ;;  %vm11393_vm15 = vmmov %vm11390_vm2 }
 0x635   : > { %v4859_v16 = vsel %vm4856_vm12, %v4858_v7, %v4854_v17  ;;  %v5079_v9 = vmul.f32 %v9600_v4, %v9742_v42  ;;  %5660 = vrcp.f32 %v4806_v60  ;;  %vm4789_vm13 = vcmp.gt.f32.partialorder %v4773_v45, 0.0 }
 0x636   : > { %v9750_v52 = vmul.f32 %v4859_v16, %v4816_v54  ;;  %vm4794_vm5 = vcmp.gt.f32.partialorder %v4778_v47, 0.0  ;;  %vm9758_vm11 = vcmp.eq.f32.partialorder %v4960_v24, 8.507059e+37  ;;  %v4945_v8 = vand.u32 2147483647, %v4806_v60  ;;  %v4822_v24 = vld [vmem:[#allocation7 + $0x38] sm:$0xff] }
 0x637   : > { %v5659_v49 = vpop.eup %5658  ;;  %v5101_v21 = vsel %vm11390_vm2, %v5079_v9, 0.0  ;;  %v4947_v28 = vand.u32 2147483648, %v4806_v60  ;;  %v9762_v37 = vsel %vm4789_vm13, %v4773_v45, 1.0  ;;  %v9764_v20 = vsel %vm4794_vm5, %v4778_v47, 1.0 }
 0x638   : > { %v5077_v26 = vmul.f32 %v9600_v4, %v9750_v52  ;;  %v4952_v14 = vmul.f32 %v5659_v49, %v9677_v32  ;;  %vm4957_vm9 = vweird.f32 %v5659_v49  ;;  %5662 = vrcp.f32 %v9762_v37  ;;  %v4823_v32 = vld [vmem:[#allocation7 + $0x40] sm:$0xff] }
 0x639   : > { %5108 = vadd.xlane.f32.xlu2 %v5107_v40  ;;  %v4963_v41 = vor.u32 1.1754944e-38, %v4962_v10  ;;  %vm4941_vm4 = vweird.f32 %v4806_v60  ;;  %v4930_v46 = vand.u32 2147483647, %v9762_v37  ;;  %5664 = vrcp.f32 %v9764_v20  ;;  %vm9774_vm6 = vmor %vm4956_vm14, %vm4957_vm9  ;;  %v4782_v10 = vld [vmem:[#allocation6 + $0x78] sm:$0xff] }
 0x63a   : > { %5102 = vadd.xlane.f32.xlu1 %v5101_v21  ;;  %v5095_v3 = vsel %vm11393_vm15, %v5077_v26, 0.0  ;;  %v4953_v61 = vsub.f32 1.0, %v4952_v14  ;;  %v4932_v25 = vand.u32 2147483648, %v9762_v37  ;;  %v5005_v6 = vand.u32 2147483647, %v9764_v20 }
 0x63b   : > { %v5661_v27 = vpop.eup %5660  ;;  %5096 = vadd.xlane.f32.xlu0 %v5095_v3  ;;  %vm4793_vm3 = vcmp.gt.f32.partialorder %v4777_v19, 0.0  ;;  %vm9778_vm8 = vcmp.eq.f32.partialorder %v4945_v8, 8.507059e+37  ;;  %v4948_v57 = vor.u32 1.1754944e-38, %v4947_v28  ;;  %v5007_v29 = vand.u32 2147483648, %v9764_v20 }
 0x63c   : > { %v4954_v48 = vmul.f32 %v5659_v49, %v4953_v61  ;;  %v4937_v38 = vmul.f32 %v5661_v27, %v4806_v60  ;;  %vm4926_vm1 = vweird.f32 %v9762_v37  ;;  %vm5001_vm12 = vweird.f32 %v9764_v20 }
 0x63d   : > { %v9785_v59 = vsel %vm4793_vm3, %v4777_v19, 1.0  ;;  %vm4942_vm10 = vweird.f32 %v5661_v27  ;;  %vm9787_vm0 = vcmp.eq.f32.partialorder %v4930_v46, 8.507059e+37  ;;  %v4933_v44 = vor.u32 1.1754944e-38, %v4932_v25  ;;  %v4821_v19 = vld [vmem:[#allocation7 + $0x30] sm:$0xff] }
 0x63e   : > { %v4955_v39 = vadd.f32 %v5659_v49, %v4954_v48  ;;  %v4938_v63 = vsub.f32 1.0, %v4937_v38  ;;  %5666 = vrcp.f32 %v9785_v59  ;;  %v5663_v12 = vpop.eup %5662  ;;  %vm9794_vm7 = vcmp.eq.f32.partialorder %v5005_v6, 8.507059e+37  ;;  %vm9804_vm13 = vmor %vm4941_vm4, %vm4942_vm10 }
 0x63f   : > { %vm4792_vm14 = vcmp.gt.f32.partialorder %v4776_v56, 0.0  ;;  %v5665_v23 = vpop.eup %5664  ;;  %v4922_v1 = vmul.f32 %v5663_v12, %v9762_v37  ;;  %v5008_v51 = vor.u32 1.1754944e-38, %v5007_v29  ;;  %vm4986_vm5 = vweird.f32 %v9785_v59 }
 0x640   : > { %v4959_v7 = vsel %vm9774_vm6, %v5659_v49, %v4955_v39  ;;  %v4939_v11 = vmul.f32 %v5661_v27, %v4938_v63  ;;  %v4997_v15 = vmul.f32 %v5665_v23, %v9764_v20  ;;  %v4990_v53 = vand.u32 2147483647, %v9785_v59 }
 0x641   : > { %v4964_v34 = vsel %vm9758_vm11, %v4963_v41, %v4959_v7  ;;  %v4923_v55 = vsub.f32 1.0, %v4922_v1  ;;  %vm4927_vm2 = vweird.f32 %v5663_v12  ;;  %v9811_v54 = vsel %vm4792_vm14, %v4776_v56, 1.0 }
 0x642   : > { %v9801_v18 = vmul.f32 %v4964_v34, %v4823_v32  ;;  %v4940_v36 = vadd.f32 %v5661_v27, %v4939_v11  ;;  %v4998_v45 = vsub.f32 1.0, %v4997_v15  ;;  %vm5002_vm11 = vweird.f32 %v5665_v23  ;;  %vm9824_vm4 = vmor %vm4926_vm1, %vm4927_vm2 }
 0x643   : > { %5668 = vrcp.f32 %v9811_v54  ;;  %v4924_v60 = vmul.f32 %v5663_v12, %v4923_v55  ;;  %v4992_v40 = vand.u32 2147483648, %v9785_v59  ;;  %vm4797_vm15 = vcmp.gt.f32.partialorder %v4781_v0, 0.0  ;;  %vm9834_vm3 = vmor %vm5001_vm12, %vm5002_vm11 }
 0x644   : > { %v5084_v17 = vmul.f32 %v9600_v4, %v9801_v18  ;;  %v5667_v47 = vpop.eup %5666  ;;  %v4944_v16 = vsel %vm9804_vm13, %v5661_v27, %v4940_v36  ;;  %vm11404_vm9 = vcmask 31744   ;;  %v4999_v21 = vmul.f32 %v5665_v23, %v4998_v45  ;;  %v4826_v27 = vld [vmem:[#allocation7 + $0x58] sm:$0xff] }
 0x645   : > { %v4949_v49 = vsel %vm9778_vm8, %v4948_v57, %v4944_v16  ;;  %v4982_v26 = vmul.f32 %v5667_v47, %v9785_v59  ;;  %v4925_v35 = vadd.f32 %v5663_v12, %v4924_v60  ;;  %vm9838_vm6 = vcmp.eq.f32.partialorder %v4990_v53, 8.507059e+37  ;;  %v4780_v57 = vld [vmem:[#allocation6 + $0x68] sm:$0xff]  ;;  %vm11411_vm1 = vmmov %vm11404_vm9 }
 0x646   : > { %v5116_v9 = vsel %vm11404_vm9, %v5084_v17, 0.0  ;;  %v9829_v14 = vmul.f32 %v4949_v49, %v4822_v24  ;;  %v4975_v37 = vand.u32 2147483647, %v9811_v54  ;;  %v5000_v3 = vadd.f32 %v5665_v23, %v4999_v21  ;;  %vm11416_vm13 = vmmov %vm11411_vm1  ;;  %v4827_v17 = vld [vmem:[#allocation7 + $0x60] sm:$0xff] }
 0x647   : > { %5117 = vadd.xlane.f32.xlu2 %v5116_v9  ;;  %v4983_v61 = vsub.f32 1.0, %v4982_v26  ;;  %vm4987_vm8 = vweird.f32 %v5667_v47  ;;  %v9844_v41 = vsel %vm4797_vm15, %v4781_v0, 1.0  ;;  %v4929_v46 = vsel %vm9824_vm4, %v5663_v12, %v4925_v35  ;;  %vm11417_vm2 = vmmov %vm11411_vm1 }
 0x648   : > { %v5083_v20 = vmul.f32 %v9600_v4, %v9829_v14  ;;  %v4993_v48 = vor.u32 1.1754944e-38, %v4992_v40  ;;  %5670 = vrcp.f32 %v9844_v41  ;;  %v4934_v6 = vsel %vm9787_vm0, %v4933_v44, %v4929_v46  ;;  %vm9864_vm12 = vmor %vm4986_vm5, %vm4987_vm8  ;;  %v4779_v44 = vld [vmem:[#allocation6 + $0x60] sm:$0xff] }
 0x649   : > { %v5669_v25 = vpop.eup %5668  ;;  %v5004_v13 = vsel %vm9834_vm3, %v5665_v23, %v5000_v3  ;;  %v4984_v38 = vmul.f32 %v5667_v47, %v4983_v61  ;;  %v4977_v33 = vand.u32 2147483648, %v9811_v54  ;;  %v9857_v56 = vmul.f32 %v4934_v6, %v4821_v19  ;;  %vm11420_vm4 = vmmov %vm11411_vm1 }
 0x64a   : > { %v5113_v29 = vsel %vm11411_vm1, %v5083_v20, 0.0  ;;  %v5009_v39 = vsel %vm9794_vm7, %v5008_v51, %v5004_v13  ;;  %v4967_v63 = vmul.f32 %v5669_v25, %v9811_v54  ;;  %vm4971_vm10 = vweird.f32 %v9811_v54  ;;  %v4824_v54 = vld [vmem:[#allocation7 + $0x48] sm:$0xff]  ;;  %v4829_v20 = vld [vmem:[#allocation7 + $0x70] sm:$0xff] }
 0x64b   : > { %5114 = vadd.xlane.f32.xlu1 %v5113_v29  ;;  %v9869_v2 = vmul.f32 %v5009_v39, %v4826_v27  ;;  %v4985_v12 = vadd.f32 %v5667_v47, %v4984_v38  ;;  %vm9872_vm0 = vcmp.eq.f32.partialorder %v4975_v37, 8.507059e+37  ;;  %v5082_v59 = vmul.f32 %v9600_v4, %v9857_v56 }
 0x64c   : > { %v4968_v23 = vsub.f32 1.0, %v4967_v63  ;;  %vm4972_vm7 = vweird.f32 %v5669_v25  ;;  %vm4796_vm14 = vcmp.gt.f32.partialorder %v4780_v57, 0.0  ;;  %v4978_v1 = vor.u32 1.1754944e-38, %v4977_v33 }
 0x64d   : > { %v5087_v34 = vmul.f32 %v9600_v4, %v9869_v2  ;;  %v4989_v11 = vsel %vm9864_vm12, %v5667_v47, %v4985_v12  ;;  %v9882_v51 = vsel %vm4796_vm14, %v4780_v57, 1.0  ;;  %v5110_v15 = vsel %vm11416_vm13, %v5082_v59, 0.0  ;;  %vm9892_vm11 = vmor %vm4971_vm10, %vm4972_vm7 }
 0x64e   : > { %v5671_v30 = vpop.eup %5670  ;;  %v4994_v53 = vsel %vm9838_vm6, %v4993_v48, %v4989_v11  ;;  %v4969_v0 = vmul.f32 %v5669_v25, %v4968_v23  ;;  %vm4795_vm5 = vcmp.gt.f32.partialorder %v4779_v44, 0.0  ;;  %5111 = vadd.xlane.f32.xlu0 %v5110_v15  ;;  %vm5046_vm15 = vweird.f32 %v9844_v41  ;;  %vm11423_vm10 = vmmov %vm11417_vm2 }
 0x64f   : > { %v5125_v36 = vsel %vm11417_vm2, %v5087_v34, 0.0  ;;  %v9888_v55 = vmul.f32 %v4994_v53, %v4825_v50  ;;  %v5042_v24 = vmul.f32 %v5671_v30, %v9844_v41  ;;  %v5050_v47 = vand.u32 2147483647, %v9844_v41 }
 0x650   : > { %5126 = vadd.xlane.f32.xlu2 %v5125_v36  ;;  %v4970_v45 = vadd.f32 %v5669_v25, %v4969_v0  ;;  %v5052_v16 = vand.u32 2147483648, %v9844_v41  ;;  %5672 = vrcp.f32 %v9882_v51  ;;  %vm5047_vm9 = vweird.f32 %v5671_v30 }
 0x651   : > { %v5086_v60 = vmul.f32 %v9600_v4, %v9888_v55  ;;  %v5043_v40 = vsub.f32 1.0, %v5042_v24  ;;  %v4811_v9 = vsel %vm4795_vm5, %v4779_v44, 1.0  ;;  %vm9913_vm3 = vmor %vm5046_vm15, %vm5047_vm9  ;;  %vm5073_vm6 = vcmp.eq.s32.totalorder %v11360_v58, 3 }
 0x652   : > { %v4974_v49 = vsel %vm9892_vm11, %v5669_v25, %v4970_v45  ;;  %5674 = vrcp.f32 %v4811_v9  ;;  %v5053_v37 = vor.u32 1.1754944e-38, %v5052_v16  ;;  %vm5051_vm8 = vcmp.eq.f32.partialorder %v5050_v47, 8.507059e+37  ;;  %vm11427_vm11 = vmmov %vm11420_vm4 }
 0x653   : > { %v5122_v21 = vsel %vm11420_vm4, %v5086_v60, 0.0  ;;  %v4979_v26 = vsel %vm9872_vm0, %v4978_v1, %v4974_v49  ;;  %v5044_v35 = vmul.f32 %v5671_v30, %v5043_v40  ;;  %vm4798_vm1 = vcmp.gt.f32.partialorder %v4782_v10, 0.0 }
 0x654   : > { %5123 = vadd.xlane.f32.xlu1 %v5122_v21  ;;  %v9909_v8 = vmul.f32 %v4979_v26, %v4824_v54  ;;  %vm5031_vm12 = vweird.f32 %v9882_v51  ;;  %v5035_v46 = vand.u32 2147483647, %v9882_v51  ;;  %v5037_v48 = vand.u32 2147483648, %v9882_v51 }
 0x655   : > { %v5045_v19 = vadd.f32 %v5671_v30, %v5044_v35  ;;  %v5074_v25 = vsel %vm5073_vm6, -1.0, %v5739_v22  ;;  %vm5016_vm0 = vweird.f32 %v4811_v9  ;;  %v4814_v33 = vsel %vm4798_vm1, %v4782_v10, 1.0 }
 0x656   : > { %v5673_v3 = vpop.eup %5672  ;;  %v5085_v61 = vmul.f32 %v9600_v4, %v9909_v8  ;;  %v5020_v32 = vand.u32 2147483647, %v4811_v9  ;;  %v5022_v63 = vand.u32 2147483648, %v4811_v9  ;;  %vm11424_vm14 = vcmp.eq.s32.totalorder %v11360_v58, 2 }
 0x657   : > { %v5049_v41 = vsel %vm9913_vm3, %v5671_v30, %v5045_v19  ;;  %v5027_v27 = vmul.f32 %v5673_v3, %v9882_v51  ;;  %vm5032_vm7 = vweird.f32 %v5673_v3  ;;  %v9932_v12 = vsel %vm11424_vm14, 1.0, %v5074_v25  ;;  %v4828_v30 = vld [vmem:[#allocation7 + $0x68] sm:$0xff] }
 0x658   : > { %v5675_v6 = vpop.eup %5674  ;;  %v5119_v13 = vsel %vm11423_vm10, %v5085_v61, 0.0  ;;  %v5054_v38 = vsel %vm5051_vm8, %v5053_v37, %v5049_v41  ;;  %5676 = vrcp.f32 %v4814_v33  ;;  %vm9938_vm5 = vmor %vm5031_vm12, %vm5032_vm7  ;;  %vm5036_vm2 = vcmp.eq.f32.partialorder %v5035_v46, 8.507059e+37  ;;  %v4830_v61 = vld [vmem:[#allocation7 + $0x78] sm:$0xff] }
 0x659   : > { %5120 = vadd.xlane.f32.xlu0 %v5119_v13  ;;  %v9928_v57 = vmul.f32 %v5054_v38, %v4829_v20  ;;  %v5028_v29 = vsub.f32 1.0, %v5027_v27  ;;  %v5012_v39 = vmul.f32 %v5675_v6, %v4811_v9  ;;  %vm5017_vm13 = vweird.f32 %v5675_v6  ;;  %vm11428_vm8 = vmmov %vm11420_vm4 }
 0x65a   : > { %v5038_v50 = vor.u32 1.1754944e-38, %v5037_v48  ;;  %v5141_v1 = vmul.f32 %v9932_v12, %v9750_v52  ;;  %vm5018_vm15 = vmor %vm5016_vm0, %vm5017_vm13  ;;  %v5023_v15 = vor.u32 1.1754944e-38, %v5022_v63  ;;  %vm5021_vm9 = vcmp.eq.f32.partialorder %v5020_v32, 8.507059e+37 }
 0x65b   : > { %v5090_v22 = vmul.f32 %v9600_v4, %v9928_v57  ;;  %v5029_v7 = vmul.f32 %v5673_v3, %v5028_v29  ;;  %v5013_v44 = vsub.f32 1.0, %v5012_v39  ;;  %vm5061_vm3 = vweird.f32 %v4814_v33  ;;  %vm11429_vm12 = vmmov %vm11420_vm4 }
 0x65c   : > { %v5159_v47 = vsel %vm11420_vm4, %v5141_v1, 0.0  ;;  %v5065_v52 = vand.u32 2147483647, %v4814_v33  ;;  %v5067_v54 = vand.u32 2147483648, %v4814_v33  ;;  %v5140_v35 = vmul.f32 %v9932_v12, %v9706_v5  ;;  %vm11430_vm0 = vmmov %vm11420_vm4 }
 0x65d   : > { %v5134_v23 = vsel %vm11427_vm11, %v5090_v22, 0.0  ;;  %v5030_v34 = vadd.f32 %v5673_v3, %v5029_v7  ;;  %v5014_v11 = vmul.f32 %v5675_v6, %v5013_v44  ;;  %vm11431_vm7 = vmmov %vm11430_vm0  ;;  %v5142_v13 = vmul.f32 %v9932_v12, %v9695_v43 }
 0x65e   : > { %5135 = vadd.xlane.f32.xlu2 %v5134_v23  ;;  %v5677_v0 = vpop.eup %5676  ;;  %v5068_v28 = vor.u32 1.1754944e-38, %v5067_v54  ;;  %vm5066_vm10 = vcmp.eq.f32.partialorder %v5065_v52, 8.507059e+37  ;;  %v5156_v41 = vsel %vm11430_vm0, %v5140_v35, 0.0  ;;  %vm11432_vm14 = vmmov %vm11430_vm0  ;;  %v5146_v29 = vmul.f32 %v9932_v12, %v9857_v56 }
 0x65f   : > { %v5034_v51 = vsel %vm9938_vm5, %v5673_v3, %v5030_v34  ;;  %v5015_v53 = vadd.f32 %v5675_v6, %v5014_v11  ;;  %v5057_v16 = vmul.f32 %v5677_v0, %v4814_v33  ;;  %vm5062_vm6 = vweird.f32 %v5677_v0  ;;  %vm11433_vm13 = vmmov %vm11430_vm0 }
 0x660   : > { %v5039_v36 = vsel %vm5036_vm2, %v5038_v50, %v5034_v51  ;;  %vm5063_vm1 = vmor %vm5061_vm3, %vm5062_vm6  ;;  %v5144_v3 = vmul.f32 %v9932_v12, %v9683_v31  ;;  %v5147_v31 = vmul.f32 %v9932_v12, %v9829_v14  ;;  %v5145_v14 = vmul.f32 %v9932_v12, %v9724_v62 }
 0x661   : > { %v5040_v24 = vmul.f32 %v5039_v36, %v4828_v30  ;;  %v5019_v45 = vsel %vm5018_vm15, %v5675_v6, %v5015_v53  ;;  %v5058_v49 = vsub.f32 1.0, %v5057_v16  ;;  %v5143_v6 = vmul.f32 %v9932_v12, %v9742_v42  ;;  %vm11434_vm5 = vmmov %vm11430_vm0 }
 0x662   : > { %v5024_v60 = vsel %vm5021_vm9, %v5023_v15, %v5019_v45  ;;  %v5168_v48 = vsel %vm11431_vm7, %v5144_v3, 0.0  ;;  %v5177_v33 = vsel %vm11434_vm5, %v5147_v31, 0.0  ;;  %vm11435_vm2 = vmmov %vm11430_vm0  ;;  %v5150_v42 = vmul.f32 %v9932_v12, %v9888_v55 }
 0x663   : > { %v5089_v40 = vmul.f32 %v9600_v4, %v5040_v24  ;;  %v5025_v9 = vmul.f32 %v5024_v60, %v4827_v17  ;;  %v5059_v26 = vmul.f32 %v5677_v0, %v5058_v49  ;;  %v5165_v38 = vsel %vm11433_vm13, %v5143_v6, 0.0  ;;  %vm11436_vm11 = vmmov %vm11430_vm0 }
 0x664   : > { %v5174_v43 = vsel %vm11436_vm11, %v5146_v29, 0.0  ;;  %vm11437_vm15 = vmmov %vm11430_vm0  ;;  %v5149_v63 = vmul.f32 %v9932_v12, %v9909_v8  ;;  %v5153_v56 = vmul.f32 %v9932_v12, %v5040_v24  ;;  %v5148_v55 = vmul.f32 %v9932_v12, %v9801_v18 }
 0x665   : > { %v5131_v10 = vsel %vm11428_vm8, %v5089_v40, 0.0  ;;  %v5088_v21 = vmul.f32 %v9600_v4, %v5025_v9  ;;  %v5060_v19 = vadd.f32 %v5677_v0, %v5059_v26  ;;  %v5186_v39 = vsel %vm11437_vm15, %v5150_v42, 0.0  ;;  %vm11438_vm9 = vmmov %vm11430_vm0 }
 0x666   : > { %5132 = vadd.xlane.f32.xlu1 %v5131_v10  ;;  %5160 = vadd.xlane.f32.xlu2 %v5159_v47  ;;  %v5171_v32 = vsel %vm11438_vm9, %v5145_v14, 0.0  ;;  %vm11439_vm4 = vmmov %vm11430_vm0  ;;  %v5152_v44 = vmul.f32 %v9932_v12, %v5025_v9  ;;  %v5151_v8 = vmul.f32 %v9932_v12, %v9869_v2  ;;  %v5154_v23 = vmul.f32 %v9932_v12, %v9928_v57 }
 0x667   : > { %v5128_v37 = vsel %vm11429_vm12, %v5088_v21, 0.0  ;;  %v5064_v20 = vsel %vm5063_vm1, %v5677_v0, %v5060_v19  ;;  %v5183_v22 = vsel %vm11439_vm4, %v5149_v63, 0.0  ;;  %vm11440_vm3 = vmmov %vm11430_vm0  ;;  %vm11446_vm7 = vcmp.eq.s32.totalorder %v11360_v58, 0 }
 0x668   : > { %5129 = vadd.xlane.f32.xlu0 %v5128_v37  ;;  %v5069_v46 = vsel %vm5066_vm10, %v5068_v28, %v5064_v20  ;;  %v5195_v62 = vsel %vm11440_vm3, %v5153_v56, 0.0  ;;  %vm11441_vm6 = vmmov %vm11430_vm0 }
 0x669   : > { %v5070_v27 = vmul.f32 %v5069_v46, %v4830_v61  ;;  %v5180_v7 = vsel %vm11441_vm6, %v5148_v55, 0.0  ;;  %vm11442_vm8 = vmmov %vm11430_vm0 }
 0x66a   : > { %v5192_v59 = vsel %vm11442_vm8, %v5152_v44, 0.0  ;;  %vm11443_vm1 = vmmov %vm11430_vm0 }
 0x66b   : > { %v5091_v5 = vmul.f32 %v9600_v4, %v5070_v27  ;;  %v5162_v4 = vsel %vm11435_vm2, %v5142_v13, 0.0  ;;  %v5189_v50 = vsel %vm11443_vm1, %v5151_v8, 0.0  ;;  %v5155_v18 = vmul.f32 %v9932_v12, %v5070_v27  ;;  %vm11444_vm12 = vmmov %vm11430_vm0 }
 0x66c   : > { %vm11445_vm10 = vmmov %vm11430_vm0  ;;  %vm5220_vm0 = vcmask 15360  }
 0x66d   : > { %v5137_v25 = vsel %vm11432_vm14, %v5091_v5, 0.0  ;;  %v5201_v34 = vsel %vm11444_vm12, %v5155_v18, 0.0  ;;  %v5198_v11 = vsel %vm11445_vm10, %v5154_v23, 0.0  ;;  %vm11447_vm14 = vmmov %vm11446_vm7 }
 0x66e   : > { %5157 = vadd.xlane.f32.xlu1 %v5156_v41  ;;  %5169 = vadd.xlane.f32.xlu2 %v5168_v48  ;;  %vm11448_vm13 = vmmov %vm11446_vm7 }
 0x66f   : > { %vm11449_vm5 = vmmov %vm11446_vm7 }
 0x670   : > { %5138 = vadd.xlane.f32.xlu0 %v5137_v25  ;;  %vm11450_vm2 = vmmov %vm11449_vm5 }
 0x671   : > { %vm11451_vm11 = vmmov %vm11450_vm2 }
 0x672   : > { %vm11452_vm15 = vmmov %vm11450_vm2 }
 0x673   : > { %vm11453_vm9 = vmmov %vm11450_vm2 }
 0x674   : > { %vm11454_vm4 = vmmov %vm11450_vm2 }
 0x675   : > { %vm11455_vm3 = vmmov %vm11450_vm2 }
 0x676   : > { %5166 = vadd.xlane.f32.xlu1 %v5165_v38  ;;  %5178 = vadd.xlane.f32.xlu2 %v5177_v33  ;;  %vm11456_vm6 = vmmov %vm11450_vm2 }
 0x677   : > { %vm11457_vm8 = vmmov %vm11450_vm2 }
 0x678   : > { %5163 = vadd.xlane.f32.xlu0 %v5162_v4  ;;  %vm11458_vm1 = vmmov %vm11450_vm2 }
 0x679   : > { %vm11459_vm12 = vmmov %vm11458_vm1 }
 0x67a   : > { %vm11460_vm10 = vmmov %vm11458_vm1 }
 0x67e   : > { %5175 = vadd.xlane.f32.xlu1 %v5174_v43  ;;  %5187 = vadd.xlane.f32.xlu2 %v5186_v39 }
 0x680   : > { %5172 = vadd.xlane.f32.xlu0 %v5171_v32 }
 0x686   : > { %5184 = vadd.xlane.f32.xlu1 %v5183_v22  ;;  %5196 = vadd.xlane.f32.xlu2 %v5195_v62 }
 0x688   : > { %5181 = vadd.xlane.f32.xlu0 %v5180_v7 }
 0x68e   : > { %5193 = vadd.xlane.f32.xlu1 %v5192_v59 }
 0x690   : > { %5190 = vadd.xlane.f32.xlu0 %v5189_v50 }
 0x696   : > { %5202 = vadd.xlane.f32.xlu1 %v5201_v34 }
 0x698   : > { %5199 = vadd.xlane.f32.xlu0 %v5198_v11 }
 0x6a4   : > { %v5106_v1 = vpop.xlane.xlu2 %5105 }
 0x6a5   : > { %v5100_v30 = vpop.xlane.xlu1 %5099 }
 0x6a6   : > { %v5094_v2 = vpop.xlane.xlu0 %5093 }
 0x6ac   : > { %v5109_v15 = vpop.xlane.xlu2 %5108 }
 0x6ad   : > { %v5103_v51 = vpop.xlane.xlu1 %5102 }
 0x6ae   : > { %v5097_v53 = vpop.xlane.xlu0 %5096 }
 0x6ba   : > { %v5118_v0 = vpop.xlane.xlu2 %5117 }
 0x6be   : > { %v5115_v36 = vpop.xlane.xlu1 %5114 }
 0x6c1   : > { %v5112_v17 = vpop.xlane.xlu0 %5111 }
 0x6c3   : > { %v5127_v24 = vpop.xlane.xlu2 %5126 }
 0x6c7   : > { %v5124_v57 = vpop.xlane.xlu1 %5123 }
 0x6cc   : > { %v5121_v12 = vpop.xlane.xlu0 %5120 }
 0x6d1   : > { %v5136_v45 = vpop.xlane.xlu2 %5135 }
 0x6d9   : > { %v5133_v47 = vpop.xlane.xlu1 %5132  ;;  %v5161_v16 = vpop.xlane.xlu2 %5160 }
 0x6da   : > { %v5205_v60 = vsel %vm11446_vm7, %v5097_v53, %v5161_v16  ;;  %vm11461_vm7 = vmmov %vm11458_vm1 }
 0x6db   : > { %v5130_v52 = vpop.xlane.xlu0 %5129  ;;  %5222 = vst.msk [vmem:[%s5819_s13 + $0x8] sm:$0xff] %vm5220_vm0, %v5205_v60 }
 0x6e1   : > { %v5158_v54 = vpop.xlane.xlu1 %5157  ;;  %v5170_v40 = vpop.xlane.xlu2 %5169 }
 0x6e2   : > { %v5204_v9 = vsel %vm11447_vm14, %v5094_v2, %v5158_v54  ;;  %v5208_v49 = vsel %vm11448_vm13, %v5106_v1, %v5170_v40 }
 0x6e3   : > { %5221 = vst.msk [vmem:[%s5819_s13] sm:$0xff] %vm5220_vm0, %v5204_v9  ;;  %v5139_v10 = vpop.xlane.xlu0 %5138 }
 0x6e4   : > { %5225 = vst.msk [vmem:[%s5819_s13 + $0x20] sm:$0xff] %vm5220_vm0, %v5208_v49 }
 0x6e9   : > { %v5167_v21 = vpop.xlane.xlu1 %5166  ;;  %v5179_v26 = vpop.xlane.xlu2 %5178 }
 0x6ea   : > { %v5207_v35 = vsel %vm11449_vm5, %v5103_v51, %v5167_v21  ;;  %v5211_v28 = vsel %vm11450_vm2, %v5115_v36, %v5179_v26 }
 0x6eb   : > { %5224 = vst.msk [vmem:[%s5819_s13 + $0x18] sm:$0xff] %vm5220_vm0, %v5207_v35  ;;  %v5164_v37 = vpop.xlane.xlu0 %5163 }
 0x6ec   : > { %v5206_v19 = vsel %vm11451_vm11, %v5100_v30, %v5164_v37  ;;  %5228 = vst.msk [vmem:[%s5819_s13 + $0x38] sm:$0xff] %vm5220_vm0, %v5211_v28 }
 0x6ed   : > { %5223 = vst.msk [vmem:[%s5819_s13 + $0x10] sm:$0xff] %vm5220_vm0, %v5206_v19 }
 0x6f1   : > { %v5176_v3 = vpop.xlane.xlu1 %5175  ;;  %v5188_v61 = vpop.xlane.xlu2 %5187 }
 0x6f2   : > { %v5210_v20 = vsel %vm11452_vm15, %v5112_v17, %v5176_v3  ;;  %v5214_v46 = vsel %vm11453_vm9, %v5124_v57, %v5188_v61 }
 0x6f3   : > { %5227 = vst.msk [vmem:[%s5819_s13 + $0x30] sm:$0xff] %vm5220_vm0, %v5210_v20  ;;  %v5173_v41 = vpop.xlane.xlu0 %5172 }
 0x6f4   : > { %v5209_v27 = vsel %vm11454_vm4, %v5109_v15, %v5173_v41  ;;  %5231 = vst.msk [vmem:[%s5819_s13 + $0x50] sm:$0xff] %vm5220_vm0, %v5214_v46 }
 0x6f5   : > { %5226 = vst.msk [vmem:[%s5819_s13 + $0x28] sm:$0xff] %vm5220_vm0, %v5209_v27 }
 0x6f9   : > { %v5185_v48 = vpop.xlane.xlu1 %5184  ;;  %v5197_v5 = vpop.xlane.xlu2 %5196 }
 0x6fa   : > { %v5213_v25 = vsel %vm11455_vm3, %v5121_v12, %v5185_v48  ;;  %v5217_v6 = vsel %vm11456_vm6, %v5133_v47, %v5197_v5 }
 0x6fb   : > { %5230 = vst.msk [vmem:[%s5819_s13 + $0x48] sm:$0xff] %vm5220_vm0, %v5213_v25  ;;  %v5182_v31 = vpop.xlane.xlu0 %5181 }
 0x6fc   : > { %v5212_v13 = vsel %vm11457_vm8, %v5118_v0, %v5182_v31  ;;  %5234 = vst.msk [vmem:[%s5819_s13 + $0x68] sm:$0xff] %vm5220_vm0, %v5217_v6 }
 0x6fd   : > { %5229 = vst.msk [vmem:[%s5819_s13 + $0x40] sm:$0xff] %vm5220_vm0, %v5212_v13 }
 0x701   : > { %v5194_v38 = vpop.xlane.xlu1 %5193 }
 0x702   : > { %v5216_v33 = vsel %vm11458_vm1, %v5130_v52, %v5194_v38 }
 0x703   : > { %5233 = vst.msk [vmem:[%s5819_s13 + $0x60] sm:$0xff] %vm5220_vm0, %v5216_v33  ;;  %v5191_v4 = vpop.xlane.xlu0 %5190 }
 0x704   : > { %v5215_v29 = vsel %vm11459_vm12, %v5127_v24, %v5191_v4 }
 0x705   : > { %5232 = vst.msk [vmem:[%s5819_s13 + $0x58] sm:$0xff] %vm5220_vm0, %v5215_v29 }
 0x709   : > { %v5203_v42 = vpop.xlane.xlu1 %5202 }
 0x70a   : > { %v5219_v14 = vsel %vm11460_vm10, %v5139_v10, %v5203_v42 }
 0x70b   : > { %5236 = vst.msk [vmem:[%s5819_s13 + $0x78] sm:$0xff] %vm5220_vm0, %v5219_v14  ;;  %v5200_v43 = vpop.xlane.xlu0 %5199 }
 0x70c   : > { %v5218_v39 = vsel %vm11461_vm7, %v5136_v45, %v5200_v43 }
 0x70d   : > { %5235 = vst.msk [vmem:[%s5819_s13 + $0x70] sm:$0xff] %vm5220_vm0, %v5218_v39 }
 0x70e PF: > { %s24_s28 = sadd.s32 1, %s5730_s28   ;;  %s11462_s24 = smov %s5722_s26 }
 0x70f   : > { %p21_p11 = scmp.ge.s32.totalorder %s24_s28, 8   ;;  %s11463_s25 = smov %s5726_s27 }
 0x710   : > { %s11464_s26 = smov %s11467_s0  ;;  %s11465_s27 = smov %s11471_s1 }
 0x711   :  { %23 = sbr.rel (!%p21_p11) target bundleno = 9 (0x9), region = 80 }

</bundles_post_ra>
